<compile_context>
chip_gen: v6e
topology: v6e:2x2x1
jax: 0.10.0
libtpu: 0.0.40
codegen_flags: <defaults>
</compile_context>

<pallas_src>
import functools

import numpy as np
import jax
import jax.numpy as jnp
from jax.experimental import pallas as pl
from jax.experimental.pallas import tpu as pltpu


# ------------------------------ in-kernel pieces ------------------------------ #

def _conv_relu_pool(xpad_ref, w_ref, b_ref, *, n, hp, wp):
    """Fused Conv3x3(stride=1, pad=1) + ReLU + MaxPool2x2 on a batch-folded flat activation.

    xpad_ref : (n*hp*wp, cin) ref; image i occupies rows [i*hp*wp, (i+1)*hp*wp) with a
               zero border of width 1 around each (hp, wp) image (row-flat NHWC).
    w_ref    : (9, cin, cout) bf16 ref, k = dh*3 + dw, w_ref[k][ci, co] == W_torch[co, ci, dh, dw].
    b_ref    : (1, cout) f32 ref.
    returns  : (L - wp - 1, cout) f32 value; the pooled output of image i at (ho, wo) sits at
               row i*hp*wp + 2*ho*wp + 2*wo (all other rows are don't-care junk).
    """
    h, w = hp - 2, wp - 2
    L = (n - 1) * hp * wp + (h - 1) * wp + w          # conv-output rows (flat, width stride wp)
    cout = w_ref.shape[-1]
    acc = jnp.zeros((L, cout), jnp.float32)
    for dh in range(3):
        for dw in range(3):
            off = dh * wp + dw
            win = xpad_ref[off:off + L, :].astype(jnp.bfloat16)   # shifted contiguous window
            acc = acc + jnp.dot(win, w_ref[dh * 3 + dw],
                                preferred_element_type=jnp.float32)
    a = jnp.maximum(acc + b_ref[...], 0.0)            # bias + ReLU
    hmax = jnp.maximum(a[:L - wp, :], a[wp:, :])      # pool over H (rows wp apart)
    return jnp.maximum(hmax[:-1, :], hmax[1:, :])     # pool over W (adjacent rows)


def _baseline_cnn_kernel(x_ref, w1_ref, b1_ref, s1_ref, w2_ref, b2_ref, s2_ref,
                         w3_ref, b3_ref, sel_ref, w1h_ref, fb1_ref, w2f_ref, fb2_ref,
                         o_ref, x2_ref, x3_ref, *, n, h, w):
    hp1, wp1 = h + 2, w + 2
    hp2, wp2 = h // 2 + 2, w // 2 + 2
    hp3, wp3 = h // 4 + 2, w // 4 + 2

    # layer 1: conv(cin->32) + relu + pool, scatter into layer-2 padded-flat layout (borders = 0)
    p1 = _conv_relu_pool(x_ref, w1_ref, b1_ref, n=n, hp=hp1, wp=wp1)
    x2_ref[...] = jnp.dot(s1_ref[...], p1, preferred_element_type=jnp.float32)

    # layer 2: conv(32->64) + relu + pool
    p2 = _conv_relu_pool(x2_ref, w2_ref, b2_ref, n=n, hp=hp2, wp=wp2)
    x3_ref[...] = jnp.dot(s2_ref[...], p2, preferred_element_type=jnp.float32)

    # layer 3: conv(64->128) + relu + pool
    p3 = _conv_relu_pool(x3_ref, w3_ref, b3_ref, n=n, hp=hp3, wp=wp3)

    # FC head: Flatten (order folded into sel/w1h) -> Linear -> ReLU -> Dropout(id) -> Linear -> Sigmoid
    npos = (h // 8) * (w // 8)
    hidden = w1h_ref.shape[-1]
    hacc = jnp.zeros((n, hidden), jnp.float32)
    for p in range(npos):
        feat = jnp.dot(sel_ref[p], p3, preferred_element_type=jnp.float32)      # (n, 128)
        hacc = hacc + jnp.dot(feat.astype(jnp.bfloat16), w1h_ref[p],
                              preferred_element_type=jnp.float32)
    hact = jnp.maximum(hacc + fb1_ref[...], 0.0)
    # TODO(synk): nn.Dropout(0.5) is the identity at inference; train-mode dropout not implemented.
    z = jnp.dot(hact.astype(jnp.bfloat16), w2f_ref[...],
                preferred_element_type=jnp.float32) + fb2_ref[...]
    o_ref[...] = pl.reciprocal(1.0 + jnp.exp(-z))     # sigmoid (exact reciprocal)


# ------------------------------ host-side glue ------------------------------ #

def _flat_len(n, hin, win):
    hp, wp = hin + 2, win + 2
    L = (n - 1) * hp * wp + (hin - 1) * wp + win
    return L - wp - 1                       # rows of the pooled (flat) activation


def _pool_scatter_matrix(n, hin, win):
    """0/1 matrix scattering the 2x2-pooled rows of one stage into the next stage's
    zero-padded row-flat input (border rows stay zero)."""
    hp_in, wp_in = hin + 2, win + 2
    ho_n, wo_n = hin // 2, win // 2
    hp_out, wp_out = ho_n + 2, wo_n + 2
    lp = _flat_len(n, hin, win)
    s = np.zeros((n * hp_out * wp_out, lp), np.float32)
    for i in range(n):
        for ho in range(ho_n):
            for wo in range(wo_n):
                src = i * hp_in * wp_in + 2 * ho * wp_in + 2 * wo
                dst = i * hp_out * wp_out + (ho + 1) * wp_out + (wo + 1)
                s[dst, src] = 1.0
    return s


def _flatten_select_matrix(n, hin, win):
    """(npos, n, Lp) 0/1 selectors: entry p picks, for every image, the pooled value at
    spatial position p = ho*Wo + wo (PyTorch flatten ordering within a channel)."""
    hp_in, wp_in = hin + 2, win + 2
    ho_n, wo_n = hin // 2, win // 2
    lp = _flat_len(n, hin, win)
    sel = np.zeros((ho_n * wo_n, n, lp), np.float32)
    for p in range(ho_n * wo_n):
        ho, wo = p // wo_n, p % wo_n
        for i in range(n):
            sel[p, i, i * hp_in * wp_in + 2 * ho * wp_in + 2 * wo] = 1.0
    return sel


def _conv_w_flat(w_oihw, cin_pad=None):
    """PyTorch (Cout, Cin, 3, 3) -> (9, Cin[_pad], Cout) bf16 with k = dh*3 + dw."""
    cout, cin = w_oihw.shape[0], w_oihw.shape[1]
    wk = jnp.transpose(w_oihw, (2, 3, 1, 0)).reshape(9, cin, cout)
    if cin_pad is not None and cin_pad > cin:
        wk = jnp.pad(wk, ((0, 0), (0, cin_pad - cin), (0, 0)))
    return wk.astype(jnp.bfloat16)


def baseline_cnn_forward(params, x_nchw):
    n, cin, h, w = x_nchw.shape
    assert h % 8 == 0 and w % 8 == 0, "spatial dims must be divisible by 8 (three 2x2 pools)"
    cin_pad = ((cin + 7) // 8) * 8                         # sublane-align conv1 reduction dim
    num_classes = params["fc2_w"].shape[1]
    hidden = params["fc1_w"].shape[1]
    npos = (h // 8) * (w // 8)
    c3 = params["w3"].shape[0]

    # input: NCHW -> zero-padded, channel-padded, batch-folded row-flat NHWC
    xp = jnp.transpose(x_nchw.astype(jnp.float32), (0, 2, 3, 1))
    xp = jnp.pad(xp, ((0, 0), (1, 1), (1, 1), (0, cin_pad - cin)))
    xflat = xp.reshape(n * (h + 2) * (w + 2), cin_pad)

    # conv weights as (9, Cin, Cout) bf16; biases as (1, Cout) f32
    w1 = _conv_w_flat(params["w1"], cin_pad)
    w2 = _conv_w_flat(params["w2"])
    w3 = _conv_w_flat(params["w3"])
    b1 = params["b1"].reshape(1, -1).astype(jnp.float32)
    b2 = params["b2"].reshape(1, -1).astype(jnp.float32)
    b3 = params["b3"].reshape(1, -1).astype(jnp.float32)

    # constant pooled->next-layer scatter matrices and final flatten selectors
    s1 = jnp.asarray(_pool_scatter_matrix(n, h, w))
    s2 = jnp.asarray(_pool_scatter_matrix(n, h // 2, w // 2))
    sel = jnp.asarray(_flatten_select_matrix(n, h // 4, w // 4))

    # fc1 weight (in_features = c3*npos, hidden) with PyTorch NCHW-flatten row order c*npos + p,
    # regrouped to (npos, c3, hidden) so each spatial position contracts against its features.
    w1h = jnp.transpose(params["fc1_w"].reshape(c3, npos, hidden), (1, 0, 2)).astype(jnp.bfloat16)
    fb1 = params["fc1_b"].reshape(1, -1).astype(jnp.float32)
    w2f = params["fc2_w"].astype(jnp.bfloat16)
    fb2 = params["fc2_b"].reshape(1, -1).astype(jnp.float32)

    kernel = functools.partial(_baseline_cnn_kernel, n=n, h=h, w=w)
    return pl.pallas_call(
        kernel,
        out_shape=jax.ShapeDtypeStruct((n, num_classes), jnp.float32),
        scratch_shapes=[
            pltpu.VMEM((n * (h // 2 + 2) * (w // 2 + 2), params["w1"].shape[0]), jnp.float32),
            pltpu.VMEM((n * (h // 4 + 2) * (w // 4 + 2), params["w2"].shape[0]), jnp.float32),
        ],
    )(xflat, w1, b1, s1, w2, b2, s2, w3, b3, sel, w1h, fb1, w2f, fb2)


# --------------------------- deterministic params --------------------------- #

def init_params(key, input_shape=(3, 16, 16), num_classes=1):
    c_in, H, W = input_shape

    def uniform(k, shape, fan_in):
        bound = 1.0 / jnp.sqrt(jnp.float32(fan_in))
        return jax.random.uniform(k, shape, jnp.float32, -bound, bound)

    ks = jax.random.split(key, 10)
    params = {
        "w1": uniform(ks[0], (32, c_in, 3, 3), c_in * 9),
        "b1": uniform(ks[1], (32,), c_in * 9),
        "w2": uniform(ks[2], (64, 32, 3, 3), 32 * 9),
        "b2": uniform(ks[3], (64,), 32 * 9),
        "w3": uniform(ks[4], (128, 64, 3, 3), 64 * 9),
        "b3": uniform(ks[5], (128,), 64 * 9),
    }
    conv_output_size = 128 * (H // 8) * (W // 8)
    # stored as (in_features, out_features) == transpose of PyTorch's nn.Linear weight
    params["fc1_w"] = uniform(ks[6], (conv_output_size, 128), conv_output_size)
    params["fc1_b"] = uniform(ks[7], (128,), conv_output_size)
    params["fc2_w"] = uniform(ks[8], (128, num_classes), 128)
    params["fc2_b"] = uniform(ks[9], (num_classes,), 128)
    return params


if __name__ == "__main__":
    key = jax.random.PRNGKey(0)
    pkey, xkey = jax.random.split(key)

    input_shape = (3, 16, 16)          # small spatial size (divisible by 8), batch=2
    params = init_params(pkey, input_shape=input_shape, num_classes=1)
    x = jax.random.normal(xkey, (2,) + input_shape, dtype=jnp.float32)

    out = jax.jit(baseline_cnn_forward)(params, x)
    out = jax.block_until_ready(out)

    assert out.shape == (2, 1), out.shape
    assert bool(jnp.all((out >= 0.0) & (out <= 1.0))), out
    print("KERNEL_OK")
</pallas_src>

<mosaic_0001>
module attributes {stable_mosaic.version = 11 : i64} {
  func.func @_baseline_cnn_kernel(%arg0: memref<648x8xf32, #tpu.memory_space<vmem>>, %arg1: memref<9x8x32xbf16, #tpu.memory_space<vmem>>, %arg2: memref<1x32xf32, #tpu.memory_space<vmem>>, %arg3: memref<200x591xf32, #tpu.memory_space<vmem>>, %arg4: memref<9x32x64xbf16, #tpu.memory_space<vmem>>, %arg5: memref<1x64xf32, #tpu.memory_space<vmem>>, %arg6: memref<72x167xf32, #tpu.memory_space<vmem>>, %arg7: memref<9x64x128xbf16, #tpu.memory_space<vmem>>, %arg8: memref<1x128xf32, #tpu.memory_space<vmem>>, %arg9: memref<4x2x51xf32, #tpu.memory_space<vmem>>, %arg10: memref<4x128x128xbf16, #tpu.memory_space<vmem>>, %arg11: memref<1x128xf32, #tpu.memory_space<vmem>>, %arg12: memref<128x1xbf16, #tpu.memory_space<vmem>>, %arg13: memref<1x1xf32, #tpu.memory_space<vmem>>, %arg14: memref<2x1xf32, #tpu.memory_space<vmem>>, %arg15: memref<200x32xf32, #tpu.memory_space<vmem>>, %arg16: memref<72x64xf32, #tpu.memory_space<vmem>>) attributes {dimension_semantics = [], scalar_prefetch = 0 : i64, scratch_operands = 2 : i64, tpu.core_type = #tpu.core_type<tc>} {
    %cst = arith.constant 0.000000e+00 : f32
    %0 = vector.broadcast %cst : f32 to vector<610x32xf32>
    %c0 = arith.constant 0 : index
    %c0_0 = arith.constant 0 : index
    %1 = vector.load %arg0[%c0, %c0_0] : memref<648x8xf32, #tpu.memory_space<vmem>>, vector<610x8xf32>
    %2 = arith.truncf %1 : vector<610x8xf32> to vector<610x8xbf16>
    %c0_1 = arith.constant 0 : index
    %c0_2 = arith.constant 0 : index
    %c0_3 = arith.constant 0 : index
    %3 = vector.load %arg1[%c0_1, %c0_2, %c0_3] : memref<9x8x32xbf16, #tpu.memory_space<vmem>>, vector<1x8x32xbf16>
    %4 = vector.shape_cast %3 : vector<1x8x32xbf16> to vector<8x32xbf16>
    %cst_4 = arith.constant dense<0.000000e+00> : vector<610x32xf32>
    %5 = tpu.matmul %2, %4, %cst_4 {dimension_numbers = #tpu.dot_dimension_numbers<[1], [0], [0], [1], [0, 0, 1, 1], [], []>} : vector<610x8xbf16>, vector<8x32xbf16>, vector<610x32xf32> -> vector<610x32xf32>
    %6 = arith.addf %0, %5 : vector<610x32xf32>
    %c1 = arith.constant 1 : index
    %c0_5 = arith.constant 0 : index
    %7 = vector.load %arg0[%c1, %c0_5] : memref<648x8xf32, #tpu.memory_space<vmem>>, vector<610x8xf32>
    %8 = arith.truncf %7 : vector<610x8xf32> to vector<610x8xbf16>
    %c1_6 = arith.constant 1 : index
    %c0_7 = arith.constant 0 : index
    %c0_8 = arith.constant 0 : index
    %9 = vector.load %arg1[%c1_6, %c0_7, %c0_8] : memref<9x8x32xbf16, #tpu.memory_space<vmem>>, vector<1x8x32xbf16>
    %10 = vector.shape_cast %9 : vector<1x8x32xbf16> to vector<8x32xbf16>
    %cst_9 = arith.constant dense<0.000000e+00> : vector<610x32xf32>
    %11 = tpu.matmul %8, %10, %cst_9 {dimension_numbers = #tpu.dot_dimension_numbers<[1], [0], [0], [1], [0, 0, 1, 1], [], []>} : vector<610x8xbf16>, vector<8x32xbf16>, vector<610x32xf32> -> vector<610x32xf32>
    %12 = arith.addf %6, %11 : vector<610x32xf32>
    %c2 = arith.constant 2 : index
    %c0_10 = arith.constant 0 : index
    %13 = vector.load %arg0[%c2, %c0_10] : memref<648x8xf32, #tpu.memory_space<vmem>>, vector<610x8xf32>
    %14 = arith.truncf %13 : vector<610x8xf32> to vector<610x8xbf16>
    %c2_11 = arith.constant 2 : index
    %c0_12 = arith.constant 0 : index
    %c0_13 = arith.constant 0 : index
    %15 = vector.load %arg1[%c2_11, %c0_12, %c0_13] : memref<9x8x32xbf16, #tpu.memory_space<vmem>>, vector<1x8x32xbf16>
    %16 = vector.shape_cast %15 : vector<1x8x32xbf16> to vector<8x32xbf16>
    %cst_14 = arith.constant dense<0.000000e+00> : vector<610x32xf32>
    %17 = tpu.matmul %14, %16, %cst_14 {dimension_numbers = #tpu.dot_dimension_numbers<[1], [0], [0], [1], [0, 0, 1, 1], [], []>} : vector<610x8xbf16>, vector<8x32xbf16>, vector<610x32xf32> -> vector<610x32xf32>
    %18 = arith.addf %12, %17 : vector<610x32xf32>
    %c18 = arith.constant 18 : index
    %c0_15 = arith.constant 0 : index
    %19 = vector.load %arg0[%c18, %c0_15] : memref<648x8xf32, #tpu.memory_space<vmem>>, vector<610x8xf32>
    %20 = arith.truncf %19 : vector<610x8xf32> to vector<610x8xbf16>
    %c3 = arith.constant 3 : index
    %c0_16 = arith.constant 0 : index
    %c0_17 = arith.constant 0 : index
    %21 = vector.load %arg1[%c3, %c0_16, %c0_17] : memref<9x8x32xbf16, #tpu.memory_space<vmem>>, vector<1x8x32xbf16>
    %22 = vector.shape_cast %21 : vector<1x8x32xbf16> to vector<8x32xbf16>
    %cst_18 = arith.constant dense<0.000000e+00> : vector<610x32xf32>
    %23 = tpu.matmul %20, %22, %cst_18 {dimension_numbers = #tpu.dot_dimension_numbers<[1], [0], [0], [1], [0, 0, 1, 1], [], []>} : vector<610x8xbf16>, vector<8x32xbf16>, vector<610x32xf32> -> vector<610x32xf32>
    %24 = arith.addf %18, %23 : vector<610x32xf32>
    %c19 = arith.constant 19 : index
    %c0_19 = arith.constant 0 : index
    %25 = vector.load %arg0[%c19, %c0_19] : memref<648x8xf32, #tpu.memory_space<vmem>>, vector<610x8xf32>
    %26 = arith.truncf %25 : vector<610x8xf32> to vector<610x8xbf16>
    %c4 = arith.constant 4 : index
    %c0_20 = arith.constant 0 : index
    %c0_21 = arith.constant 0 : index
    %27 = vector.load %arg1[%c4, %c0_20, %c0_21] : memref<9x8x32xbf16, #tpu.memory_space<vmem>>, vector<1x8x32xbf16>
    %28 = vector.shape_cast %27 : vector<1x8x32xbf16> to vector<8x32xbf16>
    %cst_22 = arith.constant dense<0.000000e+00> : vector<610x32xf32>
    %29 = tpu.matmul %26, %28, %cst_22 {dimension_numbers = #tpu.dot_dimension_numbers<[1], [0], [0], [1], [0, 0, 1, 1], [], []>} : vector<610x8xbf16>, vector<8x32xbf16>, vector<610x32xf32> -> vector<610x32xf32>
    %30 = arith.addf %24, %29 : vector<610x32xf32>
    %c20 = arith.constant 20 : index
    %c0_23 = arith.constant 0 : index
    %31 = vector.load %arg0[%c20, %c0_23] : memref<648x8xf32, #tpu.memory_space<vmem>>, vector<610x8xf32>
    %32 = arith.truncf %31 : vector<610x8xf32> to vector<610x8xbf16>
    %c5 = arith.constant 5 : index
    %c0_24 = arith.constant 0 : index
    %c0_25 = arith.constant 0 : index
    %33 = vector.load %arg1[%c5, %c0_24, %c0_25] : memref<9x8x32xbf16, #tpu.memory_space<vmem>>, vector<1x8x32xbf16>
    %34 = vector.shape_cast %33 : vector<1x8x32xbf16> to vector<8x32xbf16>
    %cst_26 = arith.constant dense<0.000000e+00> : vector<610x32xf32>
    %35 = tpu.matmul %32, %34, %cst_26 {dimension_numbers = #tpu.dot_dimension_numbers<[1], [0], [0], [1], [0, 0, 1, 1], [], []>} : vector<610x8xbf16>, vector<8x32xbf16>, vector<610x32xf32> -> vector<610x32xf32>
    %36 = arith.addf %30, %35 : vector<610x32xf32>
    %c36 = arith.constant 36 : index
    %c0_27 = arith.constant 0 : index
    %37 = vector.load %arg0[%c36, %c0_27] : memref<648x8xf32, #tpu.memory_space<vmem>>, vector<610x8xf32>
    %38 = arith.truncf %37 : vector<610x8xf32> to vector<610x8xbf16>
    %c6 = arith.constant 6 : index
    %c0_28 = arith.constant 0 : index
    %c0_29 = arith.constant 0 : index
    %39 = vector.load %arg1[%c6, %c0_28, %c0_29] : memref<9x8x32xbf16, #tpu.memory_space<vmem>>, vector<1x8x32xbf16>
    %40 = vector.shape_cast %39 : vector<1x8x32xbf16> to vector<8x32xbf16>
    %cst_30 = arith.constant dense<0.000000e+00> : vector<610x32xf32>
    %41 = tpu.matmul %38, %40, %cst_30 {dimension_numbers = #tpu.dot_dimension_numbers<[1], [0], [0], [1], [0, 0, 1, 1], [], []>} : vector<610x8xbf16>, vector<8x32xbf16>, vector<610x32xf32> -> vector<610x32xf32>
    %42 = arith.addf %36, %41 : vector<610x32xf32>
    %c37 = arith.constant 37 : index
    %c0_31 = arith.constant 0 : index
    %43 = vector.load %arg0[%c37, %c0_31] : memref<648x8xf32, #tpu.memory_space<vmem>>, vector<610x8xf32>
    %44 = arith.truncf %43 : vector<610x8xf32> to vector<610x8xbf16>
    %c7 = arith.constant 7 : index
    %c0_32 = arith.constant 0 : index
    %c0_33 = arith.constant 0 : index
    %45 = vector.load %arg1[%c7, %c0_32, %c0_33] : memref<9x8x32xbf16, #tpu.memory_space<vmem>>, vector<1x8x32xbf16>
    %46 = vector.shape_cast %45 : vector<1x8x32xbf16> to vector<8x32xbf16>
    %cst_34 = arith.constant dense<0.000000e+00> : vector<610x32xf32>
    %47 = tpu.matmul %44, %46, %cst_34 {dimension_numbers = #tpu.dot_dimension_numbers<[1], [0], [0], [1], [0, 0, 1, 1], [], []>} : vector<610x8xbf16>, vector<8x32xbf16>, vector<610x32xf32> -> vector<610x32xf32>
    %48 = arith.addf %42, %47 : vector<610x32xf32>
    %c38 = arith.constant 38 : index
    %c0_35 = arith.constant 0 : index
    %49 = vector.load %arg0[%c38, %c0_35] : memref<648x8xf32, #tpu.memory_space<vmem>>, vector<610x8xf32>
    %50 = arith.truncf %49 : vector<610x8xf32> to vector<610x8xbf16>
    %c8 = arith.constant 8 : index
    %c0_36 = arith.constant 0 : index
    %c0_37 = arith.constant 0 : index
    %51 = vector.load %arg1[%c8, %c0_36, %c0_37] : memref<9x8x32xbf16, #tpu.memory_space<vmem>>, vector<1x8x32xbf16>
    %52 = vector.shape_cast %51 : vector<1x8x32xbf16> to vector<8x32xbf16>
    %cst_38 = arith.constant dense<0.000000e+00> : vector<610x32xf32>
    %53 = tpu.matmul %50, %52, %cst_38 {dimension_numbers = #tpu.dot_dimension_numbers<[1], [0], [0], [1], [0, 0, 1, 1], [], []>} : vector<610x8xbf16>, vector<8x32xbf16>, vector<610x32xf32> -> vector<610x32xf32>
    %54 = arith.addf %48, %53 : vector<610x32xf32>
    %c0_39 = arith.constant 0 : index
    %c0_40 = arith.constant 0 : index
    %55 = vector.load %arg2[%c0_39, %c0_40] : memref<1x32xf32, #tpu.memory_space<vmem>>, vector<1x32xf32>
    %56 = vector.broadcast %55 : vector<1x32xf32> to vector<610x32xf32>
    %57 = arith.addf %54, %56 : vector<610x32xf32>
    %cst_41 = arith.constant 0.000000e+00 : f32
    %58 = vector.broadcast %cst_41 : f32 to vector<610x32xf32>
    %59 = arith.maximumf %57, %58 : vector<610x32xf32>
    %60 = vector.extract_strided_slice %59 {offsets = [0, 0], sizes = [592, 32], strides = [1, 1]} : vector<610x32xf32> to vector<592x32xf32>
    %61 = vector.extract_strided_slice %59 {offsets = [18, 0], sizes = [592, 32], strides = [1, 1]} : vector<610x32xf32> to vector<592x32xf32>
    %62 = arith.maximumf %60, %61 : vector<592x32xf32>
    %63 = vector.extract_strided_slice %62 {offsets = [0, 0], sizes = [591, 32], strides = [1, 1]} : vector<592x32xf32> to vector<591x32xf32>
    %64 = vector.extract_strided_slice %62 {offsets = [1, 0], sizes = [591, 32], strides = [1, 1]} : vector<592x32xf32> to vector<591x32xf32>
    %65 = arith.maximumf %63, %64 : vector<591x32xf32>
    %c0_42 = arith.constant 0 : index
    %c0_43 = arith.constant 0 : index
    %66 = vector.load %arg3[%c0_42, %c0_43] : memref<200x591xf32, #tpu.memory_space<vmem>>, vector<200x591xf32>
    %cst_44 = arith.constant dense<0.000000e+00> : vector<200x32xf32>
    %67 = tpu.matmul %66, %65, %cst_44 {dimension_numbers = #tpu.dot_dimension_numbers<[1], [0], [0], [1], [0, 0, 1, 1], [], []>} : vector<200x591xf32>, vector<591x32xf32>, vector<200x32xf32> -> vector<200x32xf32>
    %c0_45 = arith.constant 0 : index
    %c0_46 = arith.constant 0 : index
    %68 = vector.load %arg15[%c0_45, %c0_46] : memref<200x32xf32, #tpu.memory_space<vmem>>, vector<200x32xf32>
    tpu.vector_store %arg15[%c0_45, %c0_46], %67 {strides = array<i32>} : memref<200x32xf32, #tpu.memory_space<vmem>>, vector<200x32xf32>,
    %cst_47 = arith.constant 0.000000e+00 : f32
    %69 = vector.broadcast %cst_47 : f32 to vector<178x64xf32>
    %c0_48 = arith.constant 0 : index
    %c0_49 = arith.constant 0 : index
    %70 = vector.load %arg15[%c0_48, %c0_49] : memref<200x32xf32, #tpu.memory_space<vmem>>, vector<178x32xf32>
    %71 = arith.truncf %70 : vector<178x32xf32> to vector<178x32xbf16>
    %c0_50 = arith.constant 0 : index
    %c0_51 = arith.constant 0 : index
    %c0_52 = arith.constant 0 : index
    %72 = vector.load %arg4[%c0_50, %c0_51, %c0_52] : memref<9x32x64xbf16, #tpu.memory_space<vmem>>, vector<1x32x64xbf16>
    %73 = vector.shape_cast %72 : vector<1x32x64xbf16> to vector<32x64xbf16>
    %cst_53 = arith.constant dense<0.000000e+00> : vector<178x64xf32>
    %74 = tpu.matmul %71, %73, %cst_53 {dimension_numbers = #tpu.dot_dimension_numbers<[1], [0], [0], [1], [0, 0, 1, 1], [], []>} : vector<178x32xbf16>, vector<32x64xbf16>, vector<178x64xf32> -> vector<178x64xf32>
    %75 = arith.addf %69, %74 : vector<178x64xf32>
    %c1_54 = arith.constant 1 : index
    %c0_55 = arith.constant 0 : index
    %76 = vector.load %arg15[%c1_54, %c0_55] : memref<200x32xf32, #tpu.memory_space<vmem>>, vector<178x32xf32>
    %77 = arith.truncf %76 : vector<178x32xf32> to vector<178x32xbf16>
    %c1_56 = arith.constant 1 : index
    %c0_57 = arith.constant 0 : index
    %c0_58 = arith.constant 0 : index
    %78 = vector.load %arg4[%c1_56, %c0_57, %c0_58] : memref<9x32x64xbf16, #tpu.memory_space<vmem>>, vector<1x32x64xbf16>
    %79 = vector.shape_cast %78 : vector<1x32x64xbf16> to vector<32x64xbf16>
    %cst_59 = arith.constant dense<0.000000e+00> : vector<178x64xf32>
    %80 = tpu.matmul %77, %79, %cst_59 {dimension_numbers = #tpu.dot_dimension_numbers<[1], [0], [0], [1], [0, 0, 1, 1], [], []>} : vector<178x32xbf16>, vector<32x64xbf16>, vector<178x64xf32> -> vector<178x64xf32>
    %81 = arith.addf %75, %80 : vector<178x64xf32>
    %c2_60 = arith.constant 2 : index
    %c0_61 = arith.constant 0 : index
    %82 = vector.load %arg15[%c2_60, %c0_61] : memref<200x32xf32, #tpu.memory_space<vmem>>, vector<178x32xf32>
    %83 = arith.truncf %82 : vector<178x32xf32> to vector<178x32xbf16>
    %c2_62 = arith.constant 2 : index
    %c0_63 = arith.constant 0 : index
    %c0_64 = arith.constant 0 : index
    %84 = vector.load %arg4[%c2_62, %c0_63, %c0_64] : memref<9x32x64xbf16, #tpu.memory_space<vmem>>, vector<1x32x64xbf16>
    %85 = vector.shape_cast %84 : vector<1x32x64xbf16> to vector<32x64xbf16>
    %cst_65 = arith.constant dense<0.000000e+00> : vector<178x64xf32>
    %86 = tpu.matmul %83, %85, %cst_65 {dimension_numbers = #tpu.dot_dimension_numbers<[1], [0], [0], [1], [0, 0, 1, 1], [], []>} : vector<178x32xbf16>, vector<32x64xbf16>, vector<178x64xf32> -> vector<178x64xf32>
    %87 = arith.addf %81, %86 : vector<178x64xf32>
    %c10 = arith.constant 10 : index
    %c0_66 = arith.constant 0 : index
    %88 = vector.load %arg15[%c10, %c0_66] : memref<200x32xf32, #tpu.memory_space<vmem>>, vector<178x32xf32>
    %89 = arith.truncf %88 : vector<178x32xf32> to vector<178x32xbf16>
    %c3_67 = arith.constant 3 : index
    %c0_68 = arith.constant 0 : index
    %c0_69 = arith.constant 0 : index
    %90 = vector.load %arg4[%c3_67, %c0_68, %c0_69] : memref<9x32x64xbf16, #tpu.memory_space<vmem>>, vector<1x32x64xbf16>
    %91 = vector.shape_cast %90 : vector<1x32x64xbf16> to vector<32x64xbf16>
    %cst_70 = arith.constant dense<0.000000e+00> : vector<178x64xf32>
    %92 = tpu.matmul %89, %91, %cst_70 {dimension_numbers = #tpu.dot_dimension_numbers<[1], [0], [0], [1], [0, 0, 1, 1], [], []>} : vector<178x32xbf16>, vector<32x64xbf16>, vector<178x64xf32> -> vector<178x64xf32>
    %93 = arith.addf %87, %92 : vector<178x64xf32>
    %c11 = arith.constant 11 : index
    %c0_71 = arith.constant 0 : index
    %94 = vector.load %arg15[%c11, %c0_71] : memref<200x32xf32, #tpu.memory_space<vmem>>, vector<178x32xf32>
    %95 = arith.truncf %94 : vector<178x32xf32> to vector<178x32xbf16>
    %c4_72 = arith.constant 4 : index
    %c0_73 = arith.constant 0 : index
    %c0_74 = arith.constant 0 : index
    %96 = vector.load %arg4[%c4_72, %c0_73, %c0_74] : memref<9x32x64xbf16, #tpu.memory_space<vmem>>, vector<1x32x64xbf16>
    %97 = vector.shape_cast %96 : vector<1x32x64xbf16> to vector<32x64xbf16>
    %cst_75 = arith.constant dense<0.000000e+00> : vector<178x64xf32>
    %98 = tpu.matmul %95, %97, %cst_75 {dimension_numbers = #tpu.dot_dimension_numbers<[1], [0], [0], [1], [0, 0, 1, 1], [], []>} : vector<178x32xbf16>, vector<32x64xbf16>, vector<178x64xf32> -> vector<178x64xf32>
    %99 = arith.addf %93, %98 : vector<178x64xf32>
    %c12 = arith.constant 12 : index
    %c0_76 = arith.constant 0 : index
    %100 = vector.load %arg15[%c12, %c0_76] : memref<200x32xf32, #tpu.memory_space<vmem>>, vector<178x32xf32>
    %101 = arith.truncf %100 : vector<178x32xf32> to vector<178x32xbf16>
    %c5_77 = arith.constant 5 : index
    %c0_78 = arith.constant 0 : index
    %c0_79 = arith.constant 0 : index
    %102 = vector.load %arg4[%c5_77, %c0_78, %c0_79] : memref<9x32x64xbf16, #tpu.memory_space<vmem>>, vector<1x32x64xbf16>
    %103 = vector.shape_cast %102 : vector<1x32x64xbf16> to vector<32x64xbf16>
    %cst_80 = arith.constant dense<0.000000e+00> : vector<178x64xf32>
    %104 = tpu.matmul %101, %103, %cst_80 {dimension_numbers = #tpu.dot_dimension_numbers<[1], [0], [0], [1], [0, 0, 1, 1], [], []>} : vector<178x32xbf16>, vector<32x64xbf16>, vector<178x64xf32> -> vector<178x64xf32>
    %105 = arith.addf %99, %104 : vector<178x64xf32>
    %c20_81 = arith.constant 20 : index
    %c0_82 = arith.constant 0 : index
    %106 = vector.load %arg15[%c20_81, %c0_82] : memref<200x32xf32, #tpu.memory_space<vmem>>, vector<178x32xf32>
    %107 = arith.truncf %106 : vector<178x32xf32> to vector<178x32xbf16>
    %c6_83 = arith.constant 6 : index
    %c0_84 = arith.constant 0 : index
    %c0_85 = arith.constant 0 : index
    %108 = vector.load %arg4[%c6_83, %c0_84, %c0_85] : memref<9x32x64xbf16, #tpu.memory_space<vmem>>, vector<1x32x64xbf16>
    %109 = vector.shape_cast %108 : vector<1x32x64xbf16> to vector<32x64xbf16>
    %cst_86 = arith.constant dense<0.000000e+00> : vector<178x64xf32>
    %110 = tpu.matmul %107, %109, %cst_86 {dimension_numbers = #tpu.dot_dimension_numbers<[1], [0], [0], [1], [0, 0, 1, 1], [], []>} : vector<178x32xbf16>, vector<32x64xbf16>, vector<178x64xf32> -> vector<178x64xf32>
    %111 = arith.addf %105, %110 : vector<178x64xf32>
    %c21 = arith.constant 21 : index
    %c0_87 = arith.constant 0 : index
    %112 = vector.load %arg15[%c21, %c0_87] : memref<200x32xf32, #tpu.memory_space<vmem>>, vector<178x32xf32>
    %113 = arith.truncf %112 : vector<178x32xf32> to vector<178x32xbf16>
    %c7_88 = arith.constant 7 : index
    %c0_89 = arith.constant 0 : index
    %c0_90 = arith.constant 0 : index
    %114 = vector.load %arg4[%c7_88, %c0_89, %c0_90] : memref<9x32x64xbf16, #tpu.memory_space<vmem>>, vector<1x32x64xbf16>
    %115 = vector.shape_cast %114 : vector<1x32x64xbf16> to vector<32x64xbf16>
    %cst_91 = arith.constant dense<0.000000e+00> : vector<178x64xf32>
    %116 = tpu.matmul %113, %115, %cst_91 {dimension_numbers = #tpu.dot_dimension_numbers<[1], [0], [0], [1], [0, 0, 1, 1], [], []>} : vector<178x32xbf16>, vector<32x64xbf16>, vector<178x64xf32> -> vector<178x64xf32>
    %117 = arith.addf %111, %116 : vector<178x64xf32>
    %c22 = arith.constant 22 : index
    %c0_92 = arith.constant 0 : index
    %118 = vector.load %arg15[%c22, %c0_92] : memref<200x32xf32, #tpu.memory_space<vmem>>, vector<178x32xf32>
    %119 = arith.truncf %118 : vector<178x32xf32> to vector<178x32xbf16>
    %c8_93 = arith.constant 8 : index
    %c0_94 = arith.constant 0 : index
    %c0_95 = arith.constant 0 : index
    %120 = vector.load %arg4[%c8_93, %c0_94, %c0_95] : memref<9x32x64xbf16, #tpu.memory_space<vmem>>, vector<1x32x64xbf16>
    %121 = vector.shape_cast %120 : vector<1x32x64xbf16> to vector<32x64xbf16>
    %cst_96 = arith.constant dense<0.000000e+00> : vector<178x64xf32>
    %122 = tpu.matmul %119, %121, %cst_96 {dimension_numbers = #tpu.dot_dimension_numbers<[1], [0], [0], [1], [0, 0, 1, 1], [], []>} : vector<178x32xbf16>, vector<32x64xbf16>, vector<178x64xf32> -> vector<178x64xf32>
    %123 = arith.addf %117, %122 : vector<178x64xf32>
    %c0_97 = arith.constant 0 : index
    %c0_98 = arith.constant 0 : index
    %124 = vector.load %arg5[%c0_97, %c0_98] : memref<1x64xf32, #tpu.memory_space<vmem>>, vector<1x64xf32>
    %125 = vector.broadcast %124 : vector<1x64xf32> to vector<178x64xf32>
    %126 = arith.addf %123, %125 : vector<178x64xf32>
    %cst_99 = arith.constant 0.000000e+00 : f32
    %127 = vector.broadcast %cst_99 : f32 to vector<178x64xf32>
    %128 = arith.maximumf %126, %127 : vector<178x64xf32>
    %129 = vector.extract_strided_slice %128 {offsets = [0, 0], sizes = [168, 64], strides = [1, 1]} : vector<178x64xf32> to vector<168x64xf32>
    %130 = vector.extract_strided_slice %128 {offsets = [10, 0], sizes = [168, 64], strides = [1, 1]} : vector<178x64xf32> to vector<168x64xf32>
    %131 = arith.maximumf %129, %130 : vector<168x64xf32>
    %132 = vector.extract_strided_slice %131 {offsets = [0, 0], sizes = [167, 64], strides = [1, 1]} : vector<168x64xf32> to vector<167x64xf32>
    %133 = vector.extract_strided_slice %131 {offsets = [1, 0], sizes = [167, 64], strides = [1, 1]} : vector<168x64xf32> to vector<167x64xf32>
    %134 = arith.maximumf %132, %133 : vector<167x64xf32>
    %c0_100 = arith.constant 0 : index
    %c0_101 = arith.constant 0 : index
    %135 = vector.load %arg6[%c0_100, %c0_101] : memref<72x167xf32, #tpu.memory_space<vmem>>, vector<72x167xf32>
    %cst_102 = arith.constant dense<0.000000e+00> : vector<72x64xf32>
    %136 = tpu.matmul %135, %134, %cst_102 {dimension_numbers = #tpu.dot_dimension_numbers<[1], [0], [0], [1], [0, 0, 1, 1], [], []>} : vector<72x167xf32>, vector<167x64xf32>, vector<72x64xf32> -> vector<72x64xf32>
    %c0_103 = arith.constant 0 : index
    %c0_104 = arith.constant 0 : index
    %137 = vector.load %arg16[%c0_103, %c0_104] : memref<72x64xf32, #tpu.memory_space<vmem>>, vector<72x64xf32>
    tpu.vector_store %arg16[%c0_103, %c0_104], %136 {strides = array<i32>} : memref<72x64xf32, #tpu.memory_space<vmem>>, vector<72x64xf32>,
    %cst_105 = arith.constant 0.000000e+00 : f32
    %138 = vector.broadcast %cst_105 : f32 to vector<58x128xf32>
    %c0_106 = arith.constant 0 : index
    %c0_107 = arith.constant 0 : index
    %139 = vector.load %arg16[%c0_106, %c0_107] : memref<72x64xf32, #tpu.memory_space<vmem>>, vector<58x64xf32>
    %140 = arith.truncf %139 : vector<58x64xf32> to vector<58x64xbf16>
    %c0_108 = arith.constant 0 : index
    %c0_109 = arith.constant 0 : index
    %c0_110 = arith.constant 0 : index
    %141 = vector.load %arg7[%c0_108, %c0_109, %c0_110] : memref<9x64x128xbf16, #tpu.memory_space<vmem>>, vector<1x64x128xbf16>
    %142 = vector.shape_cast %141 : vector<1x64x128xbf16> to vector<64x128xbf16>
    %cst_111 = arith.constant dense<0.000000e+00> : vector<58x128xf32>
    %143 = tpu.matmul %140, %142, %cst_111 {dimension_numbers = #tpu.dot_dimension_numbers<[1], [0], [0], [1], [0, 0, 1, 1], [], []>} : vector<58x64xbf16>, vector<64x128xbf16>, vector<58x128xf32> -> vector<58x128xf32>
    %144 = arith.addf %138, %143 : vector<58x128xf32>
    %c1_112 = arith.constant 1 : index
    %c0_113 = arith.constant 0 : index
    %145 = vector.load %arg16[%c1_112, %c0_113] : memref<72x64xf32, #tpu.memory_space<vmem>>, vector<58x64xf32>
    %146 = arith.truncf %145 : vector<58x64xf32> to vector<58x64xbf16>
    %c1_114 = arith.constant 1 : index
    %c0_115 = arith.constant 0 : index
    %c0_116 = arith.constant 0 : index
    %147 = vector.load %arg7[%c1_114, %c0_115, %c0_116] : memref<9x64x128xbf16, #tpu.memory_space<vmem>>, vector<1x64x128xbf16>
    %148 = vector.shape_cast %147 : vector<1x64x128xbf16> to vector<64x128xbf16>
    %cst_117 = arith.constant dense<0.000000e+00> : vector<58x128xf32>
    %149 = tpu.matmul %146, %148, %cst_117 {dimension_numbers = #tpu.dot_dimension_numbers<[1], [0], [0], [1], [0, 0, 1, 1], [], []>} : vector<58x64xbf16>, vector<64x128xbf16>, vector<58x128xf32> -> vector<58x128xf32>
    %150 = arith.addf %144, %149 : vector<58x128xf32>
    %c2_118 = arith.constant 2 : index
    %c0_119 = arith.constant 0 : index
    %151 = vector.load %arg16[%c2_118, %c0_119] : memref<72x64xf32, #tpu.memory_space<vmem>>, vector<58x64xf32>
    %152 = arith.truncf %151 : vector<58x64xf32> to vector<58x64xbf16>
    %c2_120 = arith.constant 2 : index
    %c0_121 = arith.constant 0 : index
    %c0_122 = arith.constant 0 : index
    %153 = vector.load %arg7[%c2_120, %c0_121, %c0_122] : memref<9x64x128xbf16, #tpu.memory_space<vmem>>, vector<1x64x128xbf16>
    %154 = vector.shape_cast %153 : vector<1x64x128xbf16> to vector<64x128xbf16>
    %cst_123 = arith.constant dense<0.000000e+00> : vector<58x128xf32>
    %155 = tpu.matmul %152, %154, %cst_123 {dimension_numbers = #tpu.dot_dimension_numbers<[1], [0], [0], [1], [0, 0, 1, 1], [], []>} : vector<58x64xbf16>, vector<64x128xbf16>, vector<58x128xf32> -> vector<58x128xf32>
    %156 = arith.addf %150, %155 : vector<58x128xf32>
    %c6_124 = arith.constant 6 : index
    %c0_125 = arith.constant 0 : index
    %157 = vector.load %arg16[%c6_124, %c0_125] : memref<72x64xf32, #tpu.memory_space<vmem>>, vector<58x64xf32>
    %158 = arith.truncf %157 : vector<58x64xf32> to vector<58x64xbf16>
    %c3_126 = arith.constant 3 : index
    %c0_127 = arith.constant 0 : index
    %c0_128 = arith.constant 0 : index
    %159 = vector.load %arg7[%c3_126, %c0_127, %c0_128] : memref<9x64x128xbf16, #tpu.memory_space<vmem>>, vector<1x64x128xbf16>
    %160 = vector.shape_cast %159 : vector<1x64x128xbf16> to vector<64x128xbf16>
    %cst_129 = arith.constant dense<0.000000e+00> : vector<58x128xf32>
    %161 = tpu.matmul %158, %160, %cst_129 {dimension_numbers = #tpu.dot_dimension_numbers<[1], [0], [0], [1], [0, 0, 1, 1], [], []>} : vector<58x64xbf16>, vector<64x128xbf16>, vector<58x128xf32> -> vector<58x128xf32>
    %162 = arith.addf %156, %161 : vector<58x128xf32>
    %c7_130 = arith.constant 7 : index
    %c0_131 = arith.constant 0 : index
    %163 = vector.load %arg16[%c7_130, %c0_131] : memref<72x64xf32, #tpu.memory_space<vmem>>, vector<58x64xf32>
    %164 = arith.truncf %163 : vector<58x64xf32> to vector<58x64xbf16>
    %c4_132 = arith.constant 4 : index
    %c0_133 = arith.constant 0 : index
    %c0_134 = arith.constant 0 : index
    %165 = vector.load %arg7[%c4_132, %c0_133, %c0_134] : memref<9x64x128xbf16, #tpu.memory_space<vmem>>, vector<1x64x128xbf16>
    %166 = vector.shape_cast %165 : vector<1x64x128xbf16> to vector<64x128xbf16>
    %cst_135 = arith.constant dense<0.000000e+00> : vector<58x128xf32>
    %167 = tpu.matmul %164, %166, %cst_135 {dimension_numbers = #tpu.dot_dimension_numbers<[1], [0], [0], [1], [0, 0, 1, 1], [], []>} : vector<58x64xbf16>, vector<64x128xbf16>, vector<58x128xf32> -> vector<58x128xf32>
    %168 = arith.addf %162, %167 : vector<58x128xf32>
    %c8_136 = arith.constant 8 : index
    %c0_137 = arith.constant 0 : index
    %169 = vector.load %arg16[%c8_136, %c0_137] : memref<72x64xf32, #tpu.memory_space<vmem>>, vector<58x64xf32>
    %170 = arith.truncf %169 : vector<58x64xf32> to vector<58x64xbf16>
    %c5_138 = arith.constant 5 : index
    %c0_139 = arith.constant 0 : index
    %c0_140 = arith.constant 0 : index
    %171 = vector.load %arg7[%c5_138, %c0_139, %c0_140] : memref<9x64x128xbf16, #tpu.memory_space<vmem>>, vector<1x64x128xbf16>
    %172 = vector.shape_cast %171 : vector<1x64x128xbf16> to vector<64x128xbf16>
    %cst_141 = arith.constant dense<0.000000e+00> : vector<58x128xf32>
    %173 = tpu.matmul %170, %172, %cst_141 {dimension_numbers = #tpu.dot_dimension_numbers<[1], [0], [0], [1], [0, 0, 1, 1], [], []>} : vector<58x64xbf16>, vector<64x128xbf16>, vector<58x128xf32> -> vector<58x128xf32>
    %174 = arith.addf %168, %173 : vector<58x128xf32>
    %c12_142 = arith.constant 12 : index
    %c0_143 = arith.constant 0 : index
    %175 = vector.load %arg16[%c12_142, %c0_143] : memref<72x64xf32, #tpu.memory_space<vmem>>, vector<58x64xf32>
    %176 = arith.truncf %175 : vector<58x64xf32> to vector<58x64xbf16>
    %c6_144 = arith.constant 6 : index
    %c0_145 = arith.constant 0 : index
    %c0_146 = arith.constant 0 : index
    %177 = vector.load %arg7[%c6_144, %c0_145, %c0_146] : memref<9x64x128xbf16, #tpu.memory_space<vmem>>, vector<1x64x128xbf16>
    %178 = vector.shape_cast %177 : vector<1x64x128xbf16> to vector<64x128xbf16>
    %cst_147 = arith.constant dense<0.000000e+00> : vector<58x128xf32>
    %179 = tpu.matmul %176, %178, %cst_147 {dimension_numbers = #tpu.dot_dimension_numbers<[1], [0], [0], [1], [0, 0, 1, 1], [], []>} : vector<58x64xbf16>, vector<64x128xbf16>, vector<58x128xf32> -> vector<58x128xf32>
    %180 = arith.addf %174, %179 : vector<58x128xf32>
    %c13 = arith.constant 13 : index
    %c0_148 = arith.constant 0 : index
    %181 = vector.load %arg16[%c13, %c0_148] : memref<72x64xf32, #tpu.memory_space<vmem>>, vector<58x64xf32>
    %182 = arith.truncf %181 : vector<58x64xf32> to vector<58x64xbf16>
    %c7_149 = arith.constant 7 : index
    %c0_150 = arith.constant 0 : index
    %c0_151 = arith.constant 0 : index
    %183 = vector.load %arg7[%c7_149, %c0_150, %c0_151] : memref<9x64x128xbf16, #tpu.memory_space<vmem>>, vector<1x64x128xbf16>
    %184 = vector.shape_cast %183 : vector<1x64x128xbf16> to vector<64x128xbf16>
    %cst_152 = arith.constant dense<0.000000e+00> : vector<58x128xf32>
    %185 = tpu.matmul %182, %184, %cst_152 {dimension_numbers = #tpu.dot_dimension_numbers<[1], [0], [0], [1], [0, 0, 1, 1], [], []>} : vector<58x64xbf16>, vector<64x128xbf16>, vector<58x128xf32> -> vector<58x128xf32>
    %186 = arith.addf %180, %185 : vector<58x128xf32>
    %c14 = arith.constant 14 : index
    %c0_153 = arith.constant 0 : index
    %187 = vector.load %arg16[%c14, %c0_153] : memref<72x64xf32, #tpu.memory_space<vmem>>, vector<58x64xf32>
    %188 = arith.truncf %187 : vector<58x64xf32> to vector<58x64xbf16>
    %c8_154 = arith.constant 8 : index
    %c0_155 = arith.constant 0 : index
    %c0_156 = arith.constant 0 : index
    %189 = vector.load %arg7[%c8_154, %c0_155, %c0_156] : memref<9x64x128xbf16, #tpu.memory_space<vmem>>, vector<1x64x128xbf16>
    %190 = vector.shape_cast %189 : vector<1x64x128xbf16> to vector<64x128xbf16>
    %cst_157 = arith.constant dense<0.000000e+00> : vector<58x128xf32>
    %191 = tpu.matmul %188, %190, %cst_157 {dimension_numbers = #tpu.dot_dimension_numbers<[1], [0], [0], [1], [0, 0, 1, 1], [], []>} : vector<58x64xbf16>, vector<64x128xbf16>, vector<58x128xf32> -> vector<58x128xf32>
    %192 = arith.addf %186, %191 : vector<58x128xf32>
    %c0_158 = arith.constant 0 : index
    %c0_159 = arith.constant 0 : index
    %193 = vector.load %arg8[%c0_158, %c0_159] : memref<1x128xf32, #tpu.memory_space<vmem>>, vector<1x128xf32>
    %194 = vector.broadcast %193 : vector<1x128xf32> to vector<58x128xf32>
    %195 = arith.addf %192, %194 : vector<58x128xf32>
    %cst_160 = arith.constant 0.000000e+00 : f32
    %196 = vector.broadcast %cst_160 : f32 to vector<58x128xf32>
    %197 = arith.maximumf %195, %196 : vector<58x128xf32>
    %198 = vector.extract_strided_slice %197 {offsets = [0, 0], sizes = [52, 128], strides = [1, 1]} : vector<58x128xf32> to vector<52x128xf32>
    %199 = vector.extract_strided_slice %197 {offsets = [6, 0], sizes = [52, 128], strides = [1, 1]} : vector<58x128xf32> to vector<52x128xf32>
    %200 = arith.maximumf %198, %199 : vector<52x128xf32>
    %201 = vector.extract_strided_slice %200 {offsets = [0, 0], sizes = [51, 128], strides = [1, 1]} : vector<52x128xf32> to vector<51x128xf32>
    %202 = vector.extract_strided_slice %200 {offsets = [1, 0], sizes = [51, 128], strides = [1, 1]} : vector<52x128xf32> to vector<51x128xf32>
    %203 = arith.maximumf %201, %202 : vector<51x128xf32>
    %cst_161 = arith.constant 0.000000e+00 : f32
    %204 = vector.broadcast %cst_161 : f32 to vector<2x128xf32>
    %c0_162 = arith.constant 0 : index
    %c0_163 = arith.constant 0 : index
    %c0_164 = arith.constant 0 : index
    %205 = vector.load %arg9[%c0_162, %c0_163, %c0_164] : memref<4x2x51xf32, #tpu.memory_space<vmem>>, vector<1x2x51xf32>
    %206 = vector.shape_cast %205 : vector<1x2x51xf32> to vector<2x51xf32>
    %cst_165 = arith.constant dense<0.000000e+00> : vector<2x128xf32>
    %207 = tpu.matmul %206, %203, %cst_165 {dimension_numbers = #tpu.dot_dimension_numbers<[1], [0], [0], [1], [0, 0, 1, 1], [], []>} : vector<2x51xf32>, vector<51x128xf32>, vector<2x128xf32> -> vector<2x128xf32>
    %208 = arith.truncf %207 : vector<2x128xf32> to vector<2x128xbf16>
    %c0_166 = arith.constant 0 : index
    %c0_167 = arith.constant 0 : index
    %c0_168 = arith.constant 0 : index
    %209 = vector.load %arg10[%c0_166, %c0_167, %c0_168] : memref<4x128x128xbf16, #tpu.memory_space<vmem>>, vector<1x128x128xbf16>
    %210 = vector.shape_cast %209 : vector<1x128x128xbf16> to vector<128x128xbf16>
    %cst_169 = arith.constant dense<0.000000e+00> : vector<2x128xf32>
    %211 = tpu.matmul %208, %210, %cst_169 {dimension_numbers = #tpu.dot_dimension_numbers<[1], [0], [0], [1], [0, 0, 1, 1], [], []>} : vector<2x128xbf16>, vector<128x128xbf16>, vector<2x128xf32> -> vector<2x128xf32>
    %212 = arith.addf %204, %211 : vector<2x128xf32>
    %c1_170 = arith.constant 1 : index
    %c0_171 = arith.constant 0 : index
    %c0_172 = arith.constant 0 : index
    %213 = vector.load %arg9[%c1_170, %c0_171, %c0_172] : memref<4x2x51xf32, #tpu.memory_space<vmem>>, vector<1x2x51xf32>
    %214 = vector.shape_cast %213 : vector<1x2x51xf32> to vector<2x51xf32>
    %cst_173 = arith.constant dense<0.000000e+00> : vector<2x128xf32>
    %215 = tpu.matmul %214, %203, %cst_173 {dimension_numbers = #tpu.dot_dimension_numbers<[1], [0], [0], [1], [0, 0, 1, 1], [], []>} : vector<2x51xf32>, vector<51x128xf32>, vector<2x128xf32> -> vector<2x128xf32>
    %216 = arith.truncf %215 : vector<2x128xf32> to vector<2x128xbf16>
    %c1_174 = arith.constant 1 : index
    %c0_175 = arith.constant 0 : index
    %c0_176 = arith.constant 0 : index
    %217 = vector.load %arg10[%c1_174, %c0_175, %c0_176] : memref<4x128x128xbf16, #tpu.memory_space<vmem>>, vector<1x128x128xbf16>
    %218 = vector.shape_cast %217 : vector<1x128x128xbf16> to vector<128x128xbf16>
    %cst_177 = arith.constant dense<0.000000e+00> : vector<2x128xf32>
    %219 = tpu.matmul %216, %218, %cst_177 {dimension_numbers = #tpu.dot_dimension_numbers<[1], [0], [0], [1], [0, 0, 1, 1], [], []>} : vector<2x128xbf16>, vector<128x128xbf16>, vector<2x128xf32> -> vector<2x128xf32>
    %220 = arith.addf %212, %219 : vector<2x128xf32>
    %c2_178 = arith.constant 2 : index
    %c0_179 = arith.constant 0 : index
    %c0_180 = arith.constant 0 : index
    %221 = vector.load %arg9[%c2_178, %c0_179, %c0_180] : memref<4x2x51xf32, #tpu.memory_space<vmem>>, vector<1x2x51xf32>
    %222 = vector.shape_cast %221 : vector<1x2x51xf32> to vector<2x51xf32>
    %cst_181 = arith.constant dense<0.000000e+00> : vector<2x128xf32>
    %223 = tpu.matmul %222, %203, %cst_181 {dimension_numbers = #tpu.dot_dimension_numbers<[1], [0], [0], [1], [0, 0, 1, 1], [], []>} : vector<2x51xf32>, vector<51x128xf32>, vector<2x128xf32> -> vector<2x128xf32>
    %224 = arith.truncf %223 : vector<2x128xf32> to vector<2x128xbf16>
    %c2_182 = arith.constant 2 : index
    %c0_183 = arith.constant 0 : index
    %c0_184 = arith.constant 0 : index
    %225 = vector.load %arg10[%c2_182, %c0_183, %c0_184] : memref<4x128x128xbf16, #tpu.memory_space<vmem>>, vector<1x128x128xbf16>
    %226 = vector.shape_cast %225 : vector<1x128x128xbf16> to vector<128x128xbf16>
    %cst_185 = arith.constant dense<0.000000e+00> : vector<2x128xf32>
    %227 = tpu.matmul %224, %226, %cst_185 {dimension_numbers = #tpu.dot_dimension_numbers<[1], [0], [0], [1], [0, 0, 1, 1], [], []>} : vector<2x128xbf16>, vector<128x128xbf16>, vector<2x128xf32> -> vector<2x128xf32>
    %228 = arith.addf %220, %227 : vector<2x128xf32>
    %c3_186 = arith.constant 3 : index
    %c0_187 = arith.constant 0 : index
    %c0_188 = arith.constant 0 : index
    %229 = vector.load %arg9[%c3_186, %c0_187, %c0_188] : memref<4x2x51xf32, #tpu.memory_space<vmem>>, vector<1x2x51xf32>
    %230 = vector.shape_cast %229 : vector<1x2x51xf32> to vector<2x51xf32>
    %cst_189 = arith.constant dense<0.000000e+00> : vector<2x128xf32>
    %231 = tpu.matmul %230, %203, %cst_189 {dimension_numbers = #tpu.dot_dimension_numbers<[1], [0], [0], [1], [0, 0, 1, 1], [], []>} : vector<2x51xf32>, vector<51x128xf32>, vector<2x128xf32> -> vector<2x128xf32>
    %232 = arith.truncf %231 : vector<2x128xf32> to vector<2x128xbf16>
    %c3_190 = arith.constant 3 : index
    %c0_191 = arith.constant 0 : index
    %c0_192 = arith.constant 0 : index
    %233 = vector.load %arg10[%c3_190, %c0_191, %c0_192] : memref<4x128x128xbf16, #tpu.memory_space<vmem>>, vector<1x128x128xbf16>
    %234 = vector.shape_cast %233 : vector<1x128x128xbf16> to vector<128x128xbf16>
    %cst_193 = arith.constant dense<0.000000e+00> : vector<2x128xf32>
    %235 = tpu.matmul %232, %234, %cst_193 {dimension_numbers = #tpu.dot_dimension_numbers<[1], [0], [0], [1], [0, 0, 1, 1], [], []>} : vector<2x128xbf16>, vector<128x128xbf16>, vector<2x128xf32> -> vector<2x128xf32>
    %236 = arith.addf %228, %235 : vector<2x128xf32>
    %c0_194 = arith.constant 0 : index
    %c0_195 = arith.constant 0 : index
    %237 = vector.load %arg11[%c0_194, %c0_195] : memref<1x128xf32, #tpu.memory_space<vmem>>, vector<1x128xf32>
    %238 = vector.broadcast %237 : vector<1x128xf32> to vector<2x128xf32>
    %239 = arith.addf %236, %238 : vector<2x128xf32>
    %cst_196 = arith.constant 0.000000e+00 : f32
    %240 = vector.broadcast %cst_196 : f32 to vector<2x128xf32>
    %241 = arith.maximumf %239, %240 : vector<2x128xf32>
    %242 = arith.truncf %241 : vector<2x128xf32> to vector<2x128xbf16>
    %c0_197 = arith.constant 0 : index
    %c0_198 = arith.constant 0 : index
    %243 = vector.load %arg12[%c0_197, %c0_198] : memref<128x1xbf16, #tpu.memory_space<vmem>>, vector<128x1xbf16>
    %cst_199 = arith.constant dense<0.000000e+00> : vector<2x1xf32>
    %244 = tpu.matmul %242, %243, %cst_199 {dimension_numbers = #tpu.dot_dimension_numbers<[1], [0], [0], [1], [0, 0, 1, 1], [], []>} : vector<2x128xbf16>, vector<128x1xbf16>, vector<2x1xf32> -> vector<2x1xf32>
    %c0_200 = arith.constant 0 : index
    %c0_201 = arith.constant 0 : index
    %245 = vector.load %arg13[%c0_200, %c0_201] : memref<1x1xf32, #tpu.memory_space<vmem>>, vector<1x1xf32>
    %246 = vector.broadcast %245 : vector<1x1xf32> to vector<2x1xf32>
    %247 = arith.addf %244, %246 : vector<2x1xf32>
    %cst_202 = arith.constant 0.000000e+00 : f32
    %248 = vector.broadcast %cst_202 : f32 to vector<2x1xf32>
    %249 = arith.subf %248, %247 : vector<2x1xf32>
    %250 = math.exp %249 : vector<2x1xf32>
    %cst_203 = arith.constant 1.000000e+00 : f32
    %251 = vector.broadcast %cst_203 : f32 to vector<2x1xf32>
    %252 = arith.addf %251, %250 : vector<2x1xf32>
    %253 = tpu.reciprocal %252 : vector<2x1xf32> -> vector<2x1xf32>
    %c0_204 = arith.constant 0 : index
    %c0_205 = arith.constant 0 : index
    %254 = vector.load %arg14[%c0_204, %c0_205] : memref<2x1xf32, #tpu.memory_space<vmem>>, vector<2x1xf32>
    tpu.vector_store %arg14[%c0_204, %c0_205], %253 {strides = array<i32>} : memref<2x1xf32, #tpu.memory_space<vmem>>, vector<2x1xf32>,
    return
  }
}

</mosaic_0001>

<bundles_post_ra>
// kernel: baseline_cnn_forward.1
= control target key start
LH: loop header
LB: loop body
LE: loop exit
PB: predicated region body
PF: predicated region fallthrough
CT: control target
= control target key end

     0   :  { %vm403_vm0 = vcmask 1043456   ;;  %v23192_v0 = vmov 0.0   ;;  %vm15827_vm1 = vmmov 0   ;;  %vm285_vm2 = vcmask 64512   ;;  %s23177_s1 = inlined_call_operand.vmem [shape: bf16[9,8,32], index: 1, kind: input, shape index: {}]   ;;  %s23178_s0 = inlined_call_operand.vmem [shape: f32[648,8], index: 0, kind: input, shape index: {}]   ;;  %s23179_s2 = inlined_call_operand.vmem [shape: f32[1,32], index: 2, kind: input, shape index: {}]   ;;  %s23180_s3 = inlined_call_operand.vmem [shape: f32[200,591], index: 3, kind: input, shape index: {}]   ;;  %s23181_s4 = inlined_call_operand.vmem [shape: bf16[9,32,64], index: 4, kind: input, shape index: {}]   ;;  %s23182_s6 = inlined_call_operand.vmem [shape: f32[72,167], index: 6, kind: input, shape index: {}]   ;;  %s23183_s5 = inlined_call_operand.vmem [shape: f32[1,64], index: 5, kind: input, shape index: {}]   ;;  %s23184_s7 = inlined_call_operand.vmem [shape: bf16[9,64,128], index: 7, kind: input, shape index: {}]   ;;  %s23185_s10 = inlined_call_operand.vmem [shape: bf16[4,128,128], index: 10, kind: input, shape index: {}]   ;;  %s23186_s8 = inlined_call_operand.vmem [shape: f32[1,128], index: 8, kind: input, shape index: {}]   ;;  %s23187_s9 = inlined_call_operand.vmem [shape: f32[4,2,51], index: 9, kind: input, shape index: {}]   ;;  %s23188_s12 = inlined_call_operand.vmem [shape: bf16[128,1], index: 12, kind: input, shape index: {}]   ;;  %s23189_s13 = inlined_call_operand.<no memory space> [shape: f32[1,1], index: 13, kind: input, shape index: {}]   ;;  %s23190_s11 = inlined_call_operand.vmem [shape: f32[1,128], index: 11, kind: input, shape index: {}]   ;;  %s23191_s14 = inlined_call_operand.vmem [shape: f32[2,1], index: 14, kind: output, shape index: {}]  }
   0x1   :  { %13641 = vmatprep.subr.bf16.mxu0 %v23192_v0  ;;  %15722 = vmatprep.subr.bf16.mxu1 %v23192_v0  ;;  %v12178_v1 = vld [vmem:[%s23177_s1 + $0x4] sm:$0xf]  ;;  %v168_v3 = vld [vmem:[%s23178_s0 + $0x9] sm:$0xff]  ;;  %v243_v6 = vld [vmem:[%s23178_s0 + $0x261] sm:$0x3]  ;;  %vm6064_vm3 = vcmask 1045504  }
   0x2   :  { %v167_v2 = vld [vmem:[%s23178_s0 + $0x1] sm:$0xff]  ;;  %v405_v4 = vsel %vm403_vm0, %v12178_v1, 0  ;;  %13643 = vmatprep.mubr.msk.bf16.mxu0 %vm15827_vm1, %v23192_v0  ;;  %13795 = vmatprep.mubr.msk.bf16.mxu1 %vm15827_vm1, %v23192_v0  ;;  %v282_v8 = vpack.c.bf16 %v243_v6, %v243_v6  ;;  %v169_v10 = vld [vmem:[%s23178_s0 + $0x11] sm:$0xff]  ;;  %v170_v11 = vld [vmem:[%s23178_s0 + $0x19] sm:$0xff]  ;;  %vm6436_vm4 = vcmask 1046528   ;;  %vm6857_vm5 = vcmask 646144  }
   0x3   :  { %v244_v5 = vpack.c.bf16 %v168_v3, %v167_v2  ;;  %v166_v7 = vld [vmem:[%s23177_s1] sm:$0xf]  ;;  %13642 = vmatpush3.bf16.msra.mxu0 %v405_v4  ;;  %15723 = vmatpush3.bf16.msra.mxu1 %v405_v4  ;;  %v51_v13 = vld [vmem:[%s23178_s0 + $0x8] sm:$0xff]  ;;  %v245_v14 = vpack.c.bf16 %v170_v11, %v169_v10  ;;  %v52_v18 = vld [vmem:[%s23178_s0 + $0x10] sm:$0xff]  ;;  %vm7506_vm6 = vcmask 261120   ;;  %vm9918_vm7 = vcmask 318464  }
   0x4   :  { %13799 = vmatprep.subr.bf16.mxu1 %v23192_v0  ;;  %v869_v9 = vsel %vm403_vm0, %v166_v7, 0  ;;  %13957 = vmatprep.subr.bf16.mxu0 %v23192_v0  ;;  %v50_v12 = vld [vmem:[%s23178_s0] sm:$0xff]  ;;  %v172_v17 = vld [vmem:[%s23178_s0 + $0x29] sm:$0xff]  ;;  %v53_v19 = vld [vmem:[%s23178_s0 + $0x18] sm:$0xff]  ;;  %vm10059_vm8 = vcmask 523264   ;;  %vm11253_vm9 = vcmask 1041408  }
   0x5   :  { %v127_v15 = vpack.c.bf16 %v51_v13, %v50_v12  ;;  %v171_v16 = vld [vmem:[%s23178_s0 + $0x21] sm:$0xff]  ;;  %v128_v21 = vpack.c.bf16 %v53_v19, %v52_v18  ;;  %v173_v22 = vld [vmem:[%s23178_s0 + $0x31] sm:$0xff]  ;;  %v174_v23 = vld [vmem:[%s23178_s0 + $0x39] sm:$0xff]  ;;  %vm11322_vm10 = vcmask 1042432   ;;  %vm11318_vm11 = vcmask 416768  }
   0x6   :  { %13644 = vmatmul.mubr.msk.bf16.vlgmr.msra.gmra.mxu0 %vm285_vm2, %v244_v5  ;;  %13796 = vmatmul.mubr.msk.bf16.vlgmr.msra.gmra.mxu1 %vm285_vm2, %v282_v8  ;;  %v246_v20 = vpack.c.bf16 %v172_v17, %v171_v16  ;;  %v54_v24 = vld [vmem:[%s23178_s0 + $0x20] sm:$0xff]  ;;  %v55_v25 = vld [vmem:[%s23178_s0 + $0x28] sm:$0xff]  ;;  %v247_v26 = vpack.c.bf16 %v174_v23, %v173_v22  ;;  %v56_v30 = vld [vmem:[%s23178_s0 + $0x30] sm:$0xff]  ;;  %vm12172_vm12 = vcmask 1024  }
   0x7   :  { %13800 = vmatpush3.bf16.msra.mxu1 %v869_v9  ;;  %13647 = vmatprep.mubr.msk.bf16.mxu0 %vm15827_vm1, %v23192_v0  ;;  %v129_v27 = vpack.c.bf16 %v55_v25, %v54_v24  ;;  %v175_v28 = vld [vmem:[%s23178_s0 + $0x41] sm:$0xff]  ;;  %v176_v29 = vld [vmem:[%s23178_s0 + $0x49] sm:$0xff]  ;;  %v57_v31 = vld [vmem:[%s23178_s0 + $0x38] sm:$0xff] }
   0x8   :  { %13801 = vmatprep.mubr.msk.bf16.mxu1 %vm15827_vm1, %v23192_v0  ;;  %14115 = vmatprep.subr.bf16.mxu1 %v23192_v0  ;;  %v248_v32 = vpack.c.bf16 %v176_v29, %v175_v28  ;;  %v130_v33 = vpack.c.bf16 %v57_v31, %v56_v30  ;;  %v177_v34 = vld [vmem:[%s23178_s0 + $0x51] sm:$0xff]  ;;  %v178_v35 = vld [vmem:[%s23178_s0 + $0x59] sm:$0xff]  ;;  %v59_v37 = vld [vmem:[%s23178_s0 + $0x48] sm:$0xff] }
   0x9   :  { %v58_v36 = vld [vmem:[%s23178_s0 + $0x40] sm:$0xff]  ;;  %v249_v38 = vpack.c.bf16 %v178_v35, %v177_v34  ;;  %v180_v41 = vld [vmem:[%s23178_s0 + $0x69] sm:$0xff]  ;;  %v61_v43 = vld [vmem:[%s23178_s0 + $0x58] sm:$0xff] }
   0xa   :  { %v131_v39 = vpack.c.bf16 %v59_v37, %v58_v36  ;;  %v179_v40 = vld [vmem:[%s23178_s0 + $0x61] sm:$0xff]  ;;  %v60_v42 = vld [vmem:[%s23178_s0 + $0x50] sm:$0xff]  ;;  %v182_v47 = vld [vmem:[%s23178_s0 + $0x79] sm:$0xff] }
   0xb   :  { %v250_v44 = vpack.c.bf16 %v180_v41, %v179_v40  ;;  %v132_v45 = vpack.c.bf16 %v61_v43, %v60_v42  ;;  %v181_v46 = vld [vmem:[%s23178_s0 + $0x71] sm:$0xff]  ;;  %v62_v48 = vld [vmem:[%s23178_s0 + $0x60] sm:$0xff]  ;;  %v63_v49 = vld [vmem:[%s23178_s0 + $0x68] sm:$0xff] }
   0xc   :  { %v251_v50 = vpack.c.bf16 %v182_v47, %v181_v46  ;;  %v133_v51 = vpack.c.bf16 %v63_v49, %v62_v48  ;;  %v183_v52 = vld [vmem:[%s23178_s0 + $0x81] sm:$0xff]  ;;  %v184_v54 = vld [vmem:[%s23178_s0 + $0x89] sm:$0xff]  ;;  %v65_v56 = vld [vmem:[%s23178_s0 + $0x78] sm:$0xff] }
   0xd   :  { %v12257_v53 = vld [vmem:[%s23177_s1 + $0x8] sm:$0xf]  ;;  %v64_v55 = vld [vmem:[%s23178_s0 + $0x70] sm:$0xff]  ;;  %v252_v58 = vpack.c.bf16 %v184_v54, %v183_v52  ;;  %v186_v61 = vld [vmem:[%s23178_s0 + $0x99] sm:$0xff] }
   0xe   :  { %13648 = vmatmul.mubr.msk.bf16.gmra.mxu0 %vm285_vm2, %v245_v14  ;;  %13802 = vmatmul.mubr.msk.bf16.vlgmr.msra.gmra.mxu1 %vm285_vm2, %v127_v15  ;;  %v1451_v57 = vsel %vm403_vm0, %v12257_v53, 0  ;;  %v134_v59 = vpack.c.bf16 %v65_v56, %v64_v55  ;;  %v185_v60 = vld [vmem:[%s23178_s0 + $0x91] sm:$0xff]  ;;  %v66_v62 = vld [vmem:[%s23178_s0 + $0x80] sm:$0xff]  ;;  %v67_v63 = vld [vmem:[%s23178_s0 + $0x88] sm:$0xff] }
   0xf   :  { %13651 = vmatprep.mubr.msk.bf16.mxu0 %vm15827_vm1, %v23192_v0  ;;  %13805 = vmatprep.mubr.msk.bf16.mxu1 %vm15827_vm1, %v23192_v0  ;;  %v253_v1 = vpack.c.bf16 %v186_v61, %v185_v60  ;;  %v135_v2 = vpack.c.bf16 %v67_v63, %v66_v62  ;;  %v187_v3 = vld [vmem:[%s23178_s0 + $0xa1] sm:$0xff]  ;;  %v188_v4 = vld [vmem:[%s23178_s0 + $0xa9] sm:$0xff]  ;;  %v69_v6 = vld [vmem:[%s23178_s0 + $0x98] sm:$0xff] }
  0x10   :  { %13958 = vmatpush3.bf16.msra.mxu0 %v1451_v57  ;;  %v68_v5 = vld [vmem:[%s23178_s0 + $0x90] sm:$0xff]  ;;  %v254_v7 = vpack.c.bf16 %v188_v4, %v187_v3  ;;  %v190_v10 = vld [vmem:[%s23178_s0 + $0xb9] sm:$0xff]  ;;  %v71_v12 = vld [vmem:[%s23178_s0 + $0xa8] sm:$0xff] }
  0x11   :  { %14273 = vmatprep.subr.bf16.mxu0 %v23192_v0  ;;  %v136_v8 = vpack.c.bf16 %v69_v6, %v68_v5  ;;  %v189_v9 = vld [vmem:[%s23178_s0 + $0xb1] sm:$0xff]  ;;  %v70_v11 = vld [vmem:[%s23178_s0 + $0xa0] sm:$0xff]  ;;  %v192_v16 = vld [vmem:[%s23178_s0 + $0xc9] sm:$0xff] }
  0x12   :  { %v255_v13 = vpack.c.bf16 %v190_v10, %v189_v9  ;;  %v137_v14 = vpack.c.bf16 %v71_v12, %v70_v11  ;;  %v191_v15 = vld [vmem:[%s23178_s0 + $0xc1] sm:$0xff]  ;;  %v72_v17 = vld [vmem:[%s23178_s0 + $0xb0] sm:$0xff]  ;;  %v73_v18 = vld [vmem:[%s23178_s0 + $0xb8] sm:$0xff] }
  0x13   :  { %v256_v19 = vpack.c.bf16 %v192_v16, %v191_v15  ;;  %v194_v22 = vld [vmem:[%s23178_s0 + $0xd9] sm:$0xff]  ;;  %v75_v24 = vld [vmem:[%s23178_s0 + $0xc8] sm:$0xff]  ;;  %v76_v29 = vld [vmem:[%s23178_s0 + $0xd0] sm:$0xff] }
  0x14   :  { %v74_v23 = vld [vmem:[%s23178_s0 + $0xc0] sm:$0xff]  ;;  %v196_v28 = vld [vmem:[%s23178_s0 + $0xe9] sm:$0xff]  ;;  %v77_v30 = vld [vmem:[%s23178_s0 + $0xd8] sm:$0xff] }
  0x15   :  { %v198_v34 = vld [vmem:[%s23178_s0 + $0xf9] sm:$0xff]  ;;  %v79_v36 = vld [vmem:[%s23178_s0 + $0xe8] sm:$0xff]  ;;  %v80_v41 = vld [vmem:[%s23178_s0 + $0xf0] sm:$0xff] }
  0x16   :  { %13652 = vmatmul.mubr.msk.bf16.gmra.mxu0 %vm285_vm2, %v246_v20  ;;  %13806 = vmatmul.mubr.msk.bf16.gmra.mxu1 %vm285_vm2, %v128_v21  ;;  %v138_v20 = vpack.c.bf16 %v73_v18, %v72_v17  ;;  %v193_v21 = vld [vmem:[%s23178_s0 + $0xd1] sm:$0xff]  ;;  %v78_v35 = vld [vmem:[%s23178_s0 + $0xe0] sm:$0xff]  ;;  %v200_v40 = vld [vmem:[%s23178_s0 + $0x109] sm:$0xff] }
  0x17   :  { %13655 = vmatprep.mubr.msk.bf16.mxu0 %vm15827_vm1, %v23192_v0  ;;  %13809 = vmatprep.mubr.msk.bf16.mxu1 %vm15827_vm1, %v23192_v0  ;;  %v257_v25 = vpack.c.bf16 %v194_v22, %v193_v21  ;;  %v81_v42 = vld [vmem:[%s23178_s0 + $0xf8] sm:$0xff]  ;;  %v82_v47 = vld [vmem:[%s23178_s0 + $0x100] sm:$0xff]  ;;  %v83_v48 = vld [vmem:[%s23178_s0 + $0x108] sm:$0xff] }
  0x18   :  { %v202_v46 = vld [vmem:[%s23178_s0 + $0x119] sm:$0xff]  ;;  %v204_v52 = vld [vmem:[%s23178_s0 + $0x129] sm:$0xff]  ;;  %v205_v57 = vld [vmem:[%s23178_s0 + $0x131] sm:$0xff] }
  0x19   :  { %v84_v53 = vld [vmem:[%s23178_s0 + $0x110] sm:$0xff]  ;;  %v85_v54 = vld [vmem:[%s23178_s0 + $0x118] sm:$0xff]  ;;  %v87_v60 = vld [vmem:[%s23178_s0 + $0x128] sm:$0xff] }
  0x1a   :  { %v144_v56 = vpack.c.bf16 %v85_v54, %v84_v53  ;;  %v207_v63 = vld [vmem:[%s23178_s0 + $0x141] sm:$0xff]  ;;  %v89_v3 = vld [vmem:[%s23178_s0 + $0x138] sm:$0xff] }
  0x1b   :  { %v209_v6 = vld [vmem:[%s23178_s0 + $0x151] sm:$0xff]  ;;  %v91_v9 = vld [vmem:[%s23178_s0 + $0x148] sm:$0xff] }
  0x1c   :  { %v211_v12 = vld [vmem:[%s23178_s0 + $0x161] sm:$0xff]  ;;  %v93_v15 = vld [vmem:[%s23178_s0 + $0x158] sm:$0xff] }
  0x1d   :  { %v213_v18 = vld [vmem:[%s23178_s0 + $0x171] sm:$0xff]  ;;  %v95_v21 = vld [vmem:[%s23178_s0 + $0x168] sm:$0xff] }
  0x1e   :  { %13656 = vmatmul.mubr.msk.bf16.gmra.mxu0 %vm285_vm2, %v247_v26  ;;  %13810 = vmatmul.mubr.msk.bf16.gmra.mxu1 %vm285_vm2, %v129_v27  ;;  %v139_v26 = vpack.c.bf16 %v75_v24, %v74_v23  ;;  %v195_v27 = vld [vmem:[%s23178_s0 + $0xe1] sm:$0xff] }
  0x1f   :  { %13659 = vmatprep.mubr.msk.bf16.mxu0 %vm15827_vm1, %v23192_v0  ;;  %13813 = vmatprep.mubr.msk.bf16.mxu1 %vm15827_vm1, %v23192_v0  ;;  %v258_v31 = vpack.c.bf16 %v196_v28, %v195_v27  ;;  %v215_v24 = vld [vmem:[%s23178_s0 + $0x181] sm:$0xff]  ;;  %v97_v27 = vld [vmem:[%s23178_s0 + $0x178] sm:$0xff]  ;;  %v12297_v28 = vld [vmem:[%s23177_s1 + $0xc] sm:$0xf] }
  0x26   :  { %13660 = vmatmul.mubr.msk.bf16.gmra.mxu0 %vm285_vm2, %v248_v32  ;;  %13814 = vmatmul.mubr.msk.bf16.gmra.mxu1 %vm285_vm2, %v130_v33  ;;  %v140_v32 = vpack.c.bf16 %v77_v30, %v76_v29  ;;  %v197_v33 = vld [vmem:[%s23178_s0 + $0xf1] sm:$0xff] }
  0x27   :  { %13663 = vmatprep.mubr.msk.bf16.mxu0 %vm15827_vm1, %v23192_v0  ;;  %13817 = vmatprep.mubr.msk.bf16.mxu1 %vm15827_vm1, %v23192_v0  ;;  %v259_v37 = vpack.c.bf16 %v198_v34, %v197_v33  ;;  %v217_v34 = vld [vmem:[%s23178_s0 + $0x191] sm:$0xff] }
  0x2e   :  { %13664 = vmatmul.mubr.msk.bf16.gmra.mxu0 %vm285_vm2, %v249_v38  ;;  %13818 = vmatmul.mubr.msk.bf16.gmra.mxu1 %vm285_vm2, %v131_v39  ;;  %v141_v38 = vpack.c.bf16 %v79_v36, %v78_v35  ;;  %v199_v39 = vld [vmem:[%s23178_s0 + $0x101] sm:$0xff]  ;;  %v218_v35 = vld [vmem:[%s23178_s0 + $0x199] sm:$0xff] }
  0x2f   :  { %13667 = vmatprep.mubr.msk.bf16.mxu0 %vm15827_vm1, %v23192_v0  ;;  %13821 = vmatprep.mubr.msk.bf16.mxu1 %vm15827_vm1, %v23192_v0  ;;  %v260_v43 = vpack.c.bf16 %v200_v40, %v199_v39  ;;  %v98_v36 = vld [vmem:[%s23178_s0 + $0x180] sm:$0xff] }
  0x36   :  { %13668 = vmatmul.mubr.msk.bf16.gmra.mxu0 %vm285_vm2, %v250_v44  ;;  %13822 = vmatmul.mubr.msk.bf16.gmra.mxu1 %vm285_vm2, %v132_v45  ;;  %v142_v44 = vpack.c.bf16 %v81_v42, %v80_v41  ;;  %v201_v45 = vld [vmem:[%s23178_s0 + $0x111] sm:$0xff]  ;;  %v269_v42 = vpack.c.bf16 %v218_v35, %v217_v34 }
  0x37   :  { %13671 = vmatprep.mubr.msk.bf16.mxu0 %vm15827_vm1, %v23192_v0  ;;  %13825 = vmatprep.mubr.msk.bf16.mxu1 %vm15827_vm1, %v23192_v0  ;;  %v261_v49 = vpack.c.bf16 %v202_v46, %v201_v45  ;;  %v225_v34 = vld [vmem:[%s23178_s0 + $0x1d1] sm:$0xff] }
  0x3e   :  { %13672 = vmatmul.mubr.msk.bf16.gmra.mxu0 %vm285_vm2, %v251_v50  ;;  %13826 = vmatmul.mubr.msk.bf16.gmra.mxu1 %vm285_vm2, %v133_v51  ;;  %v143_v50 = vpack.c.bf16 %v83_v48, %v82_v47  ;;  %v203_v51 = vld [vmem:[%s23178_s0 + $0x121] sm:$0xff] }
  0x3f   :  { %13675 = vmatprep.mubr.msk.bf16.mxu0 %vm15827_vm1, %v23192_v0  ;;  %13829 = vmatprep.mubr.msk.bf16.mxu1 %vm15827_vm1, %v23192_v0  ;;  %v262_v55 = vpack.c.bf16 %v204_v52, %v203_v51  ;;  %v219_v48 = vld [vmem:[%s23178_s0 + $0x1a1] sm:$0xff]  ;;  %v100_v51 = vld [vmem:[%s23178_s0 + $0x190] sm:$0xff]  ;;  %v101_v52 = vld [vmem:[%s23178_s0 + $0x198] sm:$0xff] }
  0x46   :  { %13676 = vmatmul.mubr.msk.bf16.gmra.mxu0 %vm285_vm2, %v252_v58  ;;  %13830 = vmatmul.mubr.msk.bf16.gmra.mxu1 %vm285_vm2, %v134_v59  ;;  %v206_v58 = vld [vmem:[%s23178_s0 + $0x139] sm:$0xff] }
  0x47   :  { %13679 = vmatprep.mubr.msk.bf16.mxu0 %vm15827_vm1, %v23192_v0  ;;  %13833 = vmatprep.mubr.msk.bf16.mxu1 %vm15827_vm1, %v23192_v0  ;;  %v86_v59 = vld [vmem:[%s23178_s0 + $0x120] sm:$0xff]  ;;  %v263_v61 = vpack.c.bf16 %v206_v58, %v205_v57  ;;  %v152_v58 = vpack.c.bf16 %v101_v52, %v100_v51 }
  0x48   :  { %v145_v62 = vpack.c.bf16 %v87_v60, %v86_v59  ;;  %v227_v51 = vld [vmem:[%s23178_s0 + $0x1e1] sm:$0xff] }
  0x4e   :  { %13680 = vmatmul.mubr.msk.bf16.gmra.mxu0 %vm285_vm2, %v253_v1  ;;  %13834 = vmatmul.mubr.msk.bf16.gmra.mxu1 %vm285_vm2, %v135_v2  ;;  %v208_v1 = vld [vmem:[%s23178_s0 + $0x149] sm:$0xff] }
  0x4f   :  { %13683 = vmatprep.mubr.msk.bf16.mxu0 %vm15827_vm1, %v23192_v0  ;;  %13837 = vmatprep.mubr.msk.bf16.mxu1 %vm15827_vm1, %v23192_v0  ;;  %v88_v2 = vld [vmem:[%s23178_s0 + $0x130] sm:$0xff]  ;;  %v264_v4 = vpack.c.bf16 %v208_v1, %v207_v63 }
  0x50   :  { %v146_v5 = vpack.c.bf16 %v89_v3, %v88_v2  ;;  %v221_v1 = vld [vmem:[%s23178_s0 + $0x1b1] sm:$0xff]  ;;  %v222_v3 = vld [vmem:[%s23178_s0 + $0x1b9] sm:$0xff] }
  0x56   :  { %13684 = vmatmul.mubr.msk.bf16.gmra.mxu0 %vm285_vm2, %v254_v7  ;;  %13838 = vmatmul.mubr.msk.bf16.gmra.mxu1 %vm285_vm2, %v136_v8  ;;  %v210_v7 = vld [vmem:[%s23178_s0 + $0x159] sm:$0xff] }
  0x57   :  { %13687 = vmatprep.mubr.msk.bf16.mxu0 %vm15827_vm1, %v23192_v0  ;;  %13841 = vmatprep.mubr.msk.bf16.mxu1 %vm15827_vm1, %v23192_v0  ;;  %v90_v8 = vld [vmem:[%s23178_s0 + $0x140] sm:$0xff]  ;;  %v265_v10 = vpack.c.bf16 %v210_v7, %v209_v6 }
  0x58   :  { %v147_v11 = vpack.c.bf16 %v91_v9, %v90_v8 }
  0x5e   :  { %13688 = vmatmul.mubr.msk.bf16.gmra.mxu0 %vm285_vm2, %v255_v13  ;;  %13842 = vmatmul.mubr.msk.bf16.gmra.mxu1 %vm285_vm2, %v137_v14  ;;  %v212_v13 = vld [vmem:[%s23178_s0 + $0x169] sm:$0xff] }
  0x5f   :  { %13691 = vmatprep.mubr.msk.bf16.mxu0 %vm15827_vm1, %v23192_v0  ;;  %13845 = vmatprep.mubr.msk.bf16.mxu1 %vm15827_vm1, %v23192_v0  ;;  %v92_v14 = vld [vmem:[%s23178_s0 + $0x150] sm:$0xff]  ;;  %v266_v16 = vpack.c.bf16 %v212_v13, %v211_v12 }
  0x60   :  { %v148_v17 = vpack.c.bf16 %v93_v15, %v92_v14 }
  0x66   :  { %13692 = vmatmul.mubr.msk.bf16.gmra.mxu0 %vm285_vm2, %v256_v19  ;;  %13846 = vmatmul.mubr.msk.bf16.gmra.mxu1 %vm285_vm2, %v138_v20  ;;  %v214_v19 = vld [vmem:[%s23178_s0 + $0x179] sm:$0xff] }
  0x67   :  { %13695 = vmatprep.mubr.msk.bf16.mxu0 %vm15827_vm1, %v23192_v0  ;;  %13849 = vmatprep.mubr.msk.bf16.mxu1 %vm15827_vm1, %v23192_v0  ;;  %v94_v20 = vld [vmem:[%s23178_s0 + $0x160] sm:$0xff]  ;;  %v267_v22 = vpack.c.bf16 %v214_v19, %v213_v18  ;;  %v224_v19 = vld [vmem:[%s23178_s0 + $0x1c9] sm:$0xff] }
  0x68   :  { %v149_v23 = vpack.c.bf16 %v95_v21, %v94_v20  ;;  %v104_v20 = vld [vmem:[%s23178_s0 + $0x1b0] sm:$0xff]  ;;  %v105_v21 = vld [vmem:[%s23178_s0 + $0x1b8] sm:$0xff] }
  0x6e   :  { %13696 = vmatmul.mubr.msk.bf16.gmra.mxu0 %vm285_vm2, %v257_v25  ;;  %13850 = vmatmul.mubr.msk.bf16.gmra.mxu1 %vm285_vm2, %v139_v26  ;;  %v216_v25 = vld [vmem:[%s23178_s0 + $0x189] sm:$0xff] }
  0x6f   :  { %13699 = vmatprep.mubr.msk.bf16.mxu0 %vm15827_vm1, %v23192_v0  ;;  %13853 = vmatprep.mubr.msk.bf16.mxu1 %vm15827_vm1, %v23192_v0  ;;  %v96_v26 = vld [vmem:[%s23178_s0 + $0x170] sm:$0xff]  ;;  %v268_v29 = vpack.c.bf16 %v216_v25, %v215_v24 }
  0x70   :  { %v150_v30 = vpack.c.bf16 %v97_v27, %v96_v26  ;;  %v154_v27 = vpack.c.bf16 %v105_v21, %v104_v20 }
  0x76   :  { %13700 = vmatmul.mubr.msk.bf16.gmra.mxu0 %vm285_vm2, %v258_v31  ;;  %13854 = vmatmul.mubr.msk.bf16.gmra.mxu1 %vm285_vm2, %v140_v32  ;;  %v2110_v31 = vsel %vm403_vm0, %v12297_v28, 0 }
  0x77   :  { %13703 = vmatprep.mubr.msk.bf16.mxu0 %vm15827_vm1, %v23192_v0  ;;  %13857 = vmatprep.mubr.msk.bf16.mxu1 %vm15827_vm1, %v23192_v0 }
  0x78   :  { %14116 = vmatpush3.bf16.msra.mxu1 %v2110_v31 }
  0x79   :  { %14431 = vmatprep.subr.bf16.mxu1 %v23192_v0 }
  0x7e   :  { %13704 = vmatmul.mubr.msk.bf16.gmra.mxu0 %vm285_vm2, %v259_v37  ;;  %13858 = vmatmul.mubr.msk.bf16.gmra.mxu1 %vm285_vm2, %v141_v38  ;;  %v99_v37 = vld [vmem:[%s23178_s0 + $0x188] sm:$0xff] }
  0x7f   :  { %13707 = vmatprep.mubr.msk.bf16.mxu0 %vm15827_vm1, %v23192_v0  ;;  %13861 = vmatprep.mubr.msk.bf16.mxu1 %vm15827_vm1, %v23192_v0 }
  0x86   :  { %13708 = vmatmul.mubr.msk.bf16.gmra.mxu0 %vm285_vm2, %v260_v43  ;;  %13862 = vmatmul.mubr.msk.bf16.gmra.mxu1 %vm285_vm2, %v142_v44  ;;  %v151_v43 = vpack.c.bf16 %v99_v37, %v98_v36  ;;  %v226_v36 = vld [vmem:[%s23178_s0 + $0x1d9] sm:$0xff] }
  0x87   :  { %13711 = vmatprep.mubr.msk.bf16.mxu0 %vm15827_vm1, %v23192_v0  ;;  %13865 = vmatprep.mubr.msk.bf16.mxu1 %vm15827_vm1, %v23192_v0  ;;  %v106_v37 = vld [vmem:[%s23178_s0 + $0x1c0] sm:$0xff] }
  0x8e   :  { %13712 = vmatmul.mubr.msk.bf16.gmra.mxu0 %vm285_vm2, %v261_v49  ;;  %13866 = vmatmul.mubr.msk.bf16.gmra.mxu1 %vm285_vm2, %v143_v50  ;;  %v220_v50 = vld [vmem:[%s23178_s0 + $0x1a9] sm:$0xff] }
  0x8f   :  { %13715 = vmatprep.mubr.msk.bf16.mxu0 %vm15827_vm1, %v23192_v0  ;;  %13869 = vmatprep.mubr.msk.bf16.mxu1 %vm15827_vm1, %v23192_v0  ;;  %v270_v57 = vpack.c.bf16 %v220_v50, %v219_v48 }
  0x96   :  { %13716 = vmatmul.mubr.msk.bf16.gmra.mxu0 %vm285_vm2, %v262_v55  ;;  %13870 = vmatmul.mubr.msk.bf16.gmra.mxu1 %vm285_vm2, %v144_v56 }
  0x97   :  { %13719 = vmatprep.mubr.msk.bf16.mxu0 %vm15827_vm1, %v23192_v0  ;;  %13873 = vmatprep.mubr.msk.bf16.mxu1 %vm15827_vm1, %v23192_v0 }
  0x9e   :  { %13720 = vmatmul.mubr.msk.bf16.gmra.mxu0 %vm285_vm2, %v263_v61  ;;  %13874 = vmatmul.mubr.msk.bf16.gmra.mxu1 %vm285_vm2, %v145_v62 }
  0x9f   :  { %13723 = vmatprep.mubr.msk.bf16.mxu0 %vm15827_vm1, %v23192_v0  ;;  %13877 = vmatprep.mubr.msk.bf16.mxu1 %vm15827_vm1, %v23192_v0 }
  0xa6   :  { %13724 = vmatmul.mubr.msk.bf16.gmra.mxu0 %vm285_vm2, %v264_v4  ;;  %13878 = vmatmul.mubr.msk.bf16.gmra.mxu1 %vm285_vm2, %v146_v5  ;;  %v102_v4 = vld [vmem:[%s23178_s0 + $0x1a0] sm:$0xff]  ;;  %v103_v5 = vld [vmem:[%s23178_s0 + $0x1a8] sm:$0xff] }
  0xa7   :  { %13727 = vmatprep.mubr.msk.bf16.mxu0 %vm15827_vm1, %v23192_v0  ;;  %13881 = vmatprep.mubr.msk.bf16.mxu1 %vm15827_vm1, %v23192_v0 }
  0xae   :  { %13728 = vmatmul.mubr.msk.bf16.gmra.mxu0 %vm285_vm2, %v265_v10  ;;  %13882 = vmatmul.mubr.msk.bf16.gmra.mxu1 %vm285_vm2, %v147_v11  ;;  %v271_v10 = vpack.c.bf16 %v222_v3, %v221_v1  ;;  %v153_v11 = vpack.c.bf16 %v103_v5, %v102_v4 }
  0xaf   :  { %13731 = vmatprep.mubr.msk.bf16.mxu0 %vm15827_vm1, %v23192_v0  ;;  %13885 = vmatprep.mubr.msk.bf16.mxu1 %vm15827_vm1, %v23192_v0 }
  0xb6   :  { %13732 = vmatmul.mubr.msk.bf16.gmra.mxu0 %vm285_vm2, %v266_v16  ;;  %13886 = vmatmul.mubr.msk.bf16.gmra.mxu1 %vm285_vm2, %v148_v17  ;;  %v223_v17 = vld [vmem:[%s23178_s0 + $0x1c1] sm:$0xff] }
  0xb7   :  { %13735 = vmatprep.mubr.msk.bf16.mxu0 %vm15827_vm1, %v23192_v0  ;;  %13889 = vmatprep.mubr.msk.bf16.mxu1 %vm15827_vm1, %v23192_v0  ;;  %v272_v26 = vpack.c.bf16 %v224_v19, %v223_v17 }
  0xbe   :  { %13736 = vmatmul.mubr.msk.bf16.gmra.mxu0 %vm285_vm2, %v267_v22  ;;  %13890 = vmatmul.mubr.msk.bf16.gmra.mxu1 %vm285_vm2, %v149_v23 }
  0xbf   :  { %13739 = vmatprep.mubr.msk.bf16.mxu0 %vm15827_vm1, %v23192_v0  ;;  %13893 = vmatprep.mubr.msk.bf16.mxu1 %vm15827_vm1, %v23192_v0 }
  0xc6   :  { %v441_v32 = vpop.f32.mrf.mxu0  ;;  %13740 = vmatmul.mubr.msk.bf16.gmra.mxu0 %vm285_vm2, %v268_v29  ;;  %v16372_v33 = vpop.f32.mrf.mxu1  ;;  %13894 = vmatmul.mubr.msk.bf16.gmra.mxu1 %vm285_vm2, %v150_v30 }
  0xc7   :  { %23198 = vst [vmem:[#allocation5_spill] sm:$0xff] %v16372_v33  ;;  %13743 = vmatprep.mubr.msk.bf16.mxu0 %vm15827_vm1, %v23192_v0  ;;  %13897 = vmatprep.mubr.msk.bf16.mxu1 %vm15827_vm1, %v23192_v0  ;;  %v23202_v33 = vmov 0.0  }
  0xc8   :  { %v13645_v38 = vpop.f32.mrf.mxu0  ;;  %v13797_v39 = vpop.f32.mrf.mxu1 }
  0xc9   :  { %v107_v38 = vld [vmem:[%s23178_s0 + $0x1c8] sm:$0xff] }
  0xca   :  { %v444_v40 = vpop.f32.mrf.mxu0  ;;  %v748_v41 = vpop.f32.mrf.mxu1 }
  0xcc   :  { %v13646_v44 = vpop.f32.mrf.mxu0  ;;  %v13798_v45 = vpop.f32.mrf.mxu1 }
  0xcd   :  { %v155_v44 = vpack.c.bf16 %v107_v38, %v106_v37 }
  0xce   :  { %v449_v46 = vpop.f32.mrf.mxu0  ;;  %13744 = vmatmul.mubr.msk.bf16.gmra.mxu0 %vm285_vm2, %v269_v42  ;;  %v905_v47 = vpop.f32.mrf.mxu1  ;;  %13898 = vmatmul.mubr.msk.bf16.gmra.mxu1 %vm285_vm2, %v151_v43  ;;  %v273_v43 = vpack.c.bf16 %v226_v36, %v225_v34 }
  0xcf   :  { %v16396_v49 = vadd.f32 %v905_v47, %v441_v32  ;;  %13747 = vmatprep.mubr.msk.bf16.mxu0 %vm15827_vm1, %v23192_v0  ;;  %13901 = vmatprep.mubr.msk.bf16.mxu1 %vm15827_vm1, %v23192_v0 }
  0xd0   :  { %v13649_v53 = vpop.f32.mrf.mxu0  ;;  %v13803_v54 = vpop.f32.mrf.mxu1 }
  0xd1   :  { %v228_v53 = vld [vmem:[%s23178_s0 + $0x1e9] sm:$0xff] }
  0xd2   :  { %v452_v55 = vpop.f32.mrf.mxu0  ;;  %v908_v56 = vpop.f32.mrf.mxu1  ;;  %v108_v54 = vld [vmem:[%s23178_s0 + $0x1d0] sm:$0xff] }
  0xd3   :  { %v16411_v59 = vadd.f32 %v908_v56, %v444_v40 }
  0xd4   :  { %v13650_v60 = vpop.f32.mrf.mxu0  ;;  %v13804_v61 = vpop.f32.mrf.mxu1 }
  0xd5   :  { %v274_v61 = vpack.c.bf16 %v228_v53, %v227_v51 }
  0xd6   :  { %v457_v62 = vpop.f32.mrf.mxu0  ;;  %13748 = vmatmul.mubr.msk.bf16.gmra.mxu0 %vm285_vm2, %v270_v57  ;;  %v913_v63 = vpop.f32.mrf.mxu1  ;;  %13902 = vmatmul.mubr.msk.bf16.gmra.mxu1 %vm285_vm2, %v152_v58 }
  0xd7   :  { %v16418_v2 = vadd.f32 %v913_v63, %v449_v46  ;;  %13751 = vmatprep.mubr.msk.bf16.mxu0 %vm15827_vm1, %v23192_v0  ;;  %13905 = vmatprep.mubr.msk.bf16.mxu1 %vm15827_vm1, %v23192_v0 }
  0xd8   :  { %v13653_v6 = vpop.f32.mrf.mxu0  ;;  %v13807_v7 = vpop.f32.mrf.mxu1 }
  0xd9   :  { %v229_v6 = vld [vmem:[%s23178_s0 + $0x1f1] sm:$0xff] }
  0xda   :  { %v460_v8 = vpop.f32.mrf.mxu0  ;;  %v916_v9 = vpop.f32.mrf.mxu1 }
  0xdb   :  { %v16433_v12 = vadd.f32 %v916_v9, %v452_v55  ;;  %v109_v55 = vld [vmem:[%s23178_s0 + $0x1d8] sm:$0xff]  ;;  %v110_v9 = vld [vmem:[%s23178_s0 + $0x1e0] sm:$0xff] }
  0xdc   :  { %v13654_v13 = vpop.f32.mrf.mxu0  ;;  %v13808_v14 = vpop.f32.mrf.mxu1 }
  0xde   :  { %v465_v15 = vpop.f32.mrf.mxu0  ;;  %13752 = vmatmul.mubr.msk.bf16.gmra.mxu0 %vm285_vm2, %v271_v10  ;;  %v921_v16 = vpop.f32.mrf.mxu1  ;;  %13906 = vmatmul.mubr.msk.bf16.gmra.mxu1 %vm285_vm2, %v153_v11  ;;  %v111_v10 = vld [vmem:[%s23178_s0 + $0x1e8] sm:$0xff] }
  0xdf   :  { %v16440_v18 = vadd.f32 %v921_v16, %v457_v62  ;;  %13755 = vmatprep.mubr.msk.bf16.mxu0 %vm15827_vm1, %v23192_v0  ;;  %13909 = vmatprep.mubr.msk.bf16.mxu1 %vm15827_vm1, %v23192_v0  ;;  %v156_v62 = vpack.c.bf16 %v109_v55, %v108_v54  ;;  %v157_v17 = vpack.c.bf16 %v111_v10, %v110_v9 }
  0xe0   :  { %v13657_v22 = vpop.f32.mrf.mxu0  ;;  %v13811_v23 = vpop.f32.mrf.mxu1 }
  0xe2   :  { %v468_v24 = vpop.f32.mrf.mxu0  ;;  %v924_v25 = vpop.f32.mrf.mxu1 }
  0xe3   :  { %v16455_v28 = vadd.f32 %v924_v25, %v460_v8  ;;  %v230_v8 = vld [vmem:[%s23178_s0 + $0x1f9] sm:$0xff] }
  0xe4   :  { %v13658_v29 = vpop.f32.mrf.mxu0  ;;  %v13812_v30 = vpop.f32.mrf.mxu1  ;;  %v275_v16 = vpack.c.bf16 %v230_v8, %v229_v6  ;;  %v117_v6 = vld [vmem:[%s23178_s0 + $0x218] sm:$0xff] }
  0xe5   :  { %v113_v29 = vld [vmem:[%s23178_s0 + $0x1f8] sm:$0xff] }
  0xe6   :  { %v473_v31 = vpop.f32.mrf.mxu0  ;;  %13756 = vmatmul.mubr.msk.bf16.gmra.mxu0 %vm285_vm2, %v272_v26  ;;  %v929_v32 = vpop.f32.mrf.mxu1  ;;  %13910 = vmatmul.mubr.msk.bf16.gmra.mxu1 %vm285_vm2, %v154_v27  ;;  %v232_v26 = vld [vmem:[%s23178_s0 + $0x209] sm:$0xff] }
  0xe7   :  { %v16462_v35 = vadd.f32 %v929_v32, %v465_v15  ;;  %13759 = vmatprep.mubr.msk.bf16.mxu0 %vm15827_vm1, %v23192_v0  ;;  %13913 = vmatprep.mubr.msk.bf16.mxu1 %vm15827_vm1, %v23192_v0  ;;  %v112_v27 = vld [vmem:[%s23178_s0 + $0x1f0] sm:$0xff] }
  0xe8   :  { %v13661_v39 = vpop.f32.mrf.mxu0  ;;  %v13815_v40 = vpop.f32.mrf.mxu1  ;;  %v158_v37 = vpack.c.bf16 %v113_v29, %v112_v27  ;;  %v119_v27 = vld [vmem:[%s23178_s0 + $0x228] sm:$0xff] }
  0xea   :  { %v476_v41 = vpop.f32.mrf.mxu0  ;;  %v932_v42 = vpop.f32.mrf.mxu1 }
  0xeb   :  { %v16477_v45 = vadd.f32 %v932_v42, %v468_v24  ;;  %v231_v24 = vld [vmem:[%s23178_s0 + $0x201] sm:$0xff] }
  0xec   :  { %v13662_v46 = vpop.f32.mrf.mxu0  ;;  %v13816_v47 = vpop.f32.mrf.mxu1  ;;  %v276_v36 = vpack.c.bf16 %v232_v26, %v231_v24  ;;  %v238_v24 = vld [vmem:[%s23178_s0 + $0x239] sm:$0xff] }
  0xed   :  { %v234_v46 = vld [vmem:[%s23178_s0 + $0x219] sm:$0xff] }
  0xee   :  { %v481_v48 = vpop.f32.mrf.mxu0  ;;  %13760 = vmatmul.mubr.msk.bf16.gmra.mxu0 %vm285_vm2, %v273_v43  ;;  %v937_v50 = vpop.f32.mrf.mxu1  ;;  %13914 = vmatmul.mubr.msk.bf16.gmra.mxu1 %vm285_vm2, %v155_v44  ;;  %v233_v43 = vld [vmem:[%s23178_s0 + $0x211] sm:$0xff]  ;;  %v114_v47 = vld [vmem:[%s23178_s0 + $0x200] sm:$0xff] }
  0xef   :  { %v16484_v52 = vadd.f32 %v937_v50, %v473_v31  ;;  %13763 = vmatprep.mubr.msk.bf16.mxu0 %vm15827_vm1, %v23192_v0  ;;  %13917 = vmatprep.mubr.msk.bf16.mxu1 %vm15827_vm1, %v23192_v0  ;;  %v277_v55 = vpack.c.bf16 %v234_v46, %v233_v43  ;;  %v118_v26 = vld [vmem:[%s23178_s0 + $0x220] sm:$0xff] }
  0xf0   :  { %v13665_v56 = vpop.f32.mrf.mxu0  ;;  %v13819_v57 = vpop.f32.mrf.mxu1  ;;  %v239_v43 = vld [vmem:[%s23178_s0 + $0x241] sm:$0xff] }
  0xf2   :  { %v484_v58 = vpop.f32.mrf.mxu0  ;;  %v940_v60 = vpop.f32.mrf.mxu1 }
  0xf3   :  { %v16499_v63 = vadd.f32 %v940_v60, %v476_v41 }
  0xf4   :  { %v13666_v1 = vpop.f32.mrf.mxu0  ;;  %v13820_v3 = vpop.f32.mrf.mxu1 }
  0xf5   :  { %v235_v1 = vld [vmem:[%s23178_s0 + $0x221] sm:$0xff] }
  0xf6   :  { %v489_v4 = vpop.f32.mrf.mxu0  ;;  %13764 = vmatmul.mubr.msk.bf16.gmra.mxu0 %vm285_vm2, %v274_v61  ;;  %v945_v5 = vpop.f32.mrf.mxu1  ;;  %13918 = vmatmul.mubr.msk.bf16.gmra.mxu1 %vm285_vm2, %v156_v62 }
  0xf7   :  { %v16506_v7 = vadd.f32 %v945_v5, %v481_v48  ;;  %13767 = vmatprep.mubr.msk.bf16.mxu0 %vm15827_vm1, %v23192_v0  ;;  %13921 = vmatprep.mubr.msk.bf16.mxu1 %vm15827_vm1, %v23192_v0  ;;  %v115_v48 = vld [vmem:[%s23178_s0 + $0x208] sm:$0xff]  ;;  %v116_v5 = vld [vmem:[%s23178_s0 + $0x210] sm:$0xff] }
  0xf8   :  { %v13669_v11 = vpop.f32.mrf.mxu0  ;;  %v13823_v13 = vpop.f32.mrf.mxu1  ;;  %v159_v56 = vpack.c.bf16 %v115_v48, %v114_v47  ;;  %v240_v47 = vld [vmem:[%s23178_s0 + $0x249] sm:$0xff] }
  0xf9   :  { %v120_v48 = vld [vmem:[%s23178_s0 + $0x230] sm:$0xff] }
  0xfa   :  { %v492_v14 = vpop.f32.mrf.mxu0  ;;  %v948_v15 = vpop.f32.mrf.mxu1 }
  0xfb   :  { %v16521_v19 = vadd.f32 %v948_v15, %v484_v58 }
  0xfc   :  { %v13670_v20 = vpop.f32.mrf.mxu0  ;;  %v13824_v21 = vpop.f32.mrf.mxu1 }
  0xfe   :  { %v497_v22 = vpop.f32.mrf.mxu0  ;;  %13768 = vmatmul.mubr.msk.bf16.gmra.mxu0 %vm285_vm2, %v275_v16  ;;  %v953_v23 = vpop.f32.mrf.mxu1  ;;  %13922 = vmatmul.mubr.msk.bf16.gmra.mxu1 %vm285_vm2, %v157_v17 }
  0xff   :  { %v16528_v25 = vadd.f32 %v953_v23, %v489_v4  ;;  %13771 = vmatprep.mubr.msk.bf16.mxu0 %vm15827_vm1, %v23192_v0  ;;  %13925 = vmatprep.mubr.msk.bf16.mxu1 %vm15827_vm1, %v23192_v0  ;;  %v236_v4 = vld [vmem:[%s23178_s0 + $0x229] sm:$0xff] }
 0x100   :  { %v13673_v30 = vpop.f32.mrf.mxu0  ;;  %v13827_v31 = vpop.f32.mrf.mxu1  ;;  %v278_v13 = vpack.c.bf16 %v236_v4, %v235_v1 }
 0x102   :  { %v500_v32 = vpop.f32.mrf.mxu0  ;;  %v956_v34 = vpop.f32.mrf.mxu1 }
 0x103   :  { %v16543_v38 = vadd.f32 %v956_v34, %v492_v14  ;;  %v160_v14 = vpack.c.bf16 %v117_v6, %v116_v5  ;;  %v241_v5 = vld [vmem:[%s23178_s0 + $0x251] sm:$0xff] }
 0x104   :  { %v13674_v39 = vpop.f32.mrf.mxu0  ;;  %v13828_v40 = vpop.f32.mrf.mxu1 }
 0x106   :  { %v505_v41 = vpop.f32.mrf.mxu0  ;;  %13772 = vmatmul.mubr.msk.bf16.gmra.mxu0 %vm285_vm2, %v276_v36  ;;  %v961_v42 = vpop.f32.mrf.mxu1  ;;  %13926 = vmatmul.mubr.msk.bf16.gmra.mxu1 %vm285_vm2, %v158_v37  ;;  %v161_v36 = vpack.c.bf16 %v119_v27, %v118_v26 }
 0x107   :  { %v16550_v44 = vadd.f32 %v961_v42, %v497_v22  ;;  %13775 = vmatprep.mubr.msk.bf16.mxu0 %vm15827_vm1, %v23192_v0  ;;  %13929 = vmatprep.mubr.msk.bf16.mxu1 %vm15827_vm1, %v23192_v0  ;;  %v237_v22 = vld [vmem:[%s23178_s0 + $0x231] sm:$0xff] }
 0x108   :  { %v13677_v50 = vpop.f32.mrf.mxu0  ;;  %v13831_v51 = vpop.f32.mrf.mxu1  ;;  %v279_v34 = vpack.c.bf16 %v238_v24, %v237_v22 }
 0x109   :  { %v121_v50 = vld [vmem:[%s23178_s0 + $0x238] sm:$0xff] }
 0x10a   :  { %v508_v53 = vpop.f32.mrf.mxu0  ;;  %v964_v54 = vpop.f32.mrf.mxu1 }
 0x10b   :  { %v16565_v57 = vadd.f32 %v964_v54, %v500_v32 }
 0x10c   :  { %v13678_v58 = vpop.f32.mrf.mxu0  ;;  %v13832_v60 = vpop.f32.mrf.mxu1 }
 0x10d   :  { %v162_v58 = vpack.c.bf16 %v121_v50, %v120_v48 }
 0x10e   :  { %v513_v61 = vpop.f32.mrf.mxu0  ;;  %13776 = vmatmul.mubr.msk.bf16.gmra.mxu0 %vm285_vm2, %v277_v55  ;;  %v969_v62 = vpop.f32.mrf.mxu1  ;;  %13930 = vmatmul.mubr.msk.bf16.gmra.mxu1 %vm285_vm2, %v159_v56  ;;  %v280_v56 = vpack.c.bf16 %v240_v47, %v239_v43 }
 0x10f   :  { %v16572_v3 = vadd.f32 %v969_v62, %v505_v41  ;;  %13779 = vmatprep.mubr.msk.bf16.mxu0 %vm15827_vm1, %v23192_v0  ;;  %13933 = vmatprep.mubr.msk.bf16.mxu1 %vm15827_vm1, %v23192_v0 }
 0x110   :  { %v13681_v8 = vpop.f32.mrf.mxu0  ;;  %v13835_v9 = vpop.f32.mrf.mxu1 }
 0x111   :  { %v242_v8 = vld [vmem:[%s23178_s0 + $0x259] sm:$0xff] }
 0x112   :  { %v516_v10 = vpop.f32.mrf.mxu0  ;;  %v972_v11 = vpop.f32.mrf.mxu1  ;;  %v122_v9 = vld [vmem:[%s23178_s0 + $0x240] sm:$0xff] }
 0x113   :  { %v16587_v15 = vadd.f32 %v972_v11, %v508_v53 }
 0x114   :  { %v13682_v16 = vpop.f32.mrf.mxu0  ;;  %v13836_v17 = vpop.f32.mrf.mxu1 }
 0x115   :  { %v281_v17 = vpack.c.bf16 %v242_v8, %v241_v5 }
 0x116   :  { %v521_v20 = vpop.f32.mrf.mxu0  ;;  %13780 = vmatmul.mubr.msk.bf16.gmra.mxu0 %vm285_vm2, %v278_v13  ;;  %v977_v21 = vpop.f32.mrf.mxu1  ;;  %13934 = vmatmul.mubr.msk.bf16.gmra.mxu1 %vm285_vm2, %v160_v14 }
 0x117   :  { %v16594_v23 = vadd.f32 %v977_v21, %v513_v61  ;;  %13783 = vmatprep.mubr.msk.bf16.mxu0 %vm15827_vm1, %v23192_v0  ;;  %13937 = vmatprep.mubr.msk.bf16.mxu1 %vm15827_vm1, %v23192_v0 }
 0x118   :  { %v13685_v29 = vpop.f32.mrf.mxu0  ;;  %v13839_v30 = vpop.f32.mrf.mxu1 }
 0x119   :  { %v124_v29 = vld [vmem:[%s23178_s0 + $0x250] sm:$0xff] }
 0x11a   :  { %v524_v31 = vpop.f32.mrf.mxu0  ;;  %v980_v32 = vpop.f32.mrf.mxu1 }
 0x11b   :  { %v16609_v37 = vadd.f32 %v980_v32, %v516_v10  ;;  %v123_v10 = vld [vmem:[%s23178_s0 + $0x248] sm:$0xff] }
 0x11c   :  { %v13686_v39 = vpop.f32.mrf.mxu0  ;;  %v13840_v40 = vpop.f32.mrf.mxu1  ;;  %v1215_v32 = vld [vmem:[%s23178_s0 + $0x2] sm:$0xff] }
 0x11e   :  { %v529_v41 = vpop.f32.mrf.mxu0  ;;  %13784 = vmatmul.mubr.msk.bf16.gmra.mxu0 %vm285_vm2, %v279_v34  ;;  %v985_v42 = vpop.f32.mrf.mxu1  ;;  %13938 = vmatmul.mubr.msk.bf16.gmra.mxu1 %vm285_vm2, %v161_v36  ;;  %v1216_v34 = vld [vmem:[%s23178_s0 + $0xa] sm:$0xff] }
 0x11f   :  { %v16616_v46 = vadd.f32 %v985_v42, %v521_v20  ;;  %13787 = vmatprep.mubr.msk.bf16.mxu0 %vm15827_vm1, %v23192_v0  ;;  %13941 = vmatprep.mubr.msk.bf16.mxu1 %vm15827_vm1, %v23192_v0  ;;  %v163_v20 = vpack.c.bf16 %v123_v10, %v122_v9  ;;  %v1292_v43 = vpack.c.bf16 %v1216_v34, %v1215_v32 }
 0x120   :  { %v13689_v51 = vpop.f32.mrf.mxu0  ;;  %v13843_v53 = vpop.f32.mrf.mxu1 }
 0x122   :  { %v532_v54 = vpop.f32.mrf.mxu0  ;;  %v988_v55 = vpop.f32.mrf.mxu1 }
 0x123   :  { %v16631_v60 = vadd.f32 %v988_v55, %v524_v31  ;;  %v125_v31 = vld [vmem:[%s23178_s0 + $0x258] sm:$0xff]  ;;  %v126_v55 = vld [vmem:[%s23178_s0 + $0x260] sm:$0x3] }
 0x124   :  { %v13690_v61 = vpop.f32.mrf.mxu0  ;;  %v13844_v62 = vpop.f32.mrf.mxu1  ;;  %v164_v42 = vpack.c.bf16 %v125_v31, %v124_v29  ;;  %v165_v5 = vpack.c.bf16 %v126_v55, %v126_v55 }
 0x126   :  { %v537_v1 = vpop.f32.mrf.mxu0  ;;  %13788 = vmatmul.mubr.msk.bf16.gmra.mxu0 %vm285_vm2, %v280_v56  ;;  %v993_v4 = vpop.f32.mrf.mxu1  ;;  %13942 = vmatmul.mubr.msk.bf16.gmra.mxu1 %vm285_vm2, %v162_v58  ;;  %v1217_v56 = vld [vmem:[%s23178_s0 + $0x12] sm:$0xff]  ;;  %v1218_v58 = vld [vmem:[%s23178_s0 + $0x1a] sm:$0xff] }
 0x127   :  { %v16638_v6 = vadd.f32 %v993_v4, %v529_v41  ;;  %13791 = vmatprep.mubr.msk.bf16.mxu0 %vm15827_vm1, %v23192_v0  ;;  %13945 = vmatprep.mubr.msk.bf16.mxu1 %vm15827_vm1, %v23192_v0  ;;  %v1293_v8 = vpack.c.bf16 %v1218_v58, %v1217_v56 }
 0x128   :  { %v13693_v11 = vpop.f32.mrf.mxu0  ;;  %v13847_v13 = vpop.f32.mrf.mxu1 }
 0x12a   :  { %v540_v14 = vpop.f32.mrf.mxu0  ;;  %v996_v16 = vpop.f32.mrf.mxu1 }
 0x12b   :  { %v16653_v21 = vadd.f32 %v996_v16, %v532_v54 }
 0x12c   :  { %v13694_v22 = vpop.f32.mrf.mxu0  ;;  %v13848_v24 = vpop.f32.mrf.mxu1 }
 0x12e   :  { %v545_v26 = vpop.f32.mrf.mxu0  ;;  %13792 = vmatmul.mubr.msk.bf16.gmra.mxu0 %vm285_vm2, %v281_v17  ;;  %v1001_v27 = vpop.f32.mrf.mxu1  ;;  %13946 = vmatmul.mubr.msk.bf16.gmra.mxu1 %vm285_vm2, %v163_v20  ;;  %v1219_v17 = vld [vmem:[%s23178_s0 + $0x22] sm:$0xff]  ;;  %v1220_v20 = vld [vmem:[%s23178_s0 + $0x2a] sm:$0xff] }
 0x12f   :  { %v16660_v30 = vadd.f32 %v1001_v27, %v537_v1  ;;  %13949 = vmatprep.mubr.msk.bf16.mxu1 %vm15827_vm1, %v23192_v0  ;;  %13959 = vmatprep.mubr.msk.bf16.mxu0 %vm15827_vm1, %v23192_v0  ;;  %v1294_v29 = vpack.c.bf16 %v1220_v20, %v1219_v17 }
 0x130   :  { %v13697_v36 = vpop.f32.mrf.mxu0  ;;  %v13851_v39 = vpop.f32.mrf.mxu1 }
 0x132   :  { %v548_v40 = vpop.f32.mrf.mxu0  ;;  %v1004_v41 = vpop.f32.mrf.mxu1 }
 0x133   :  { %v16675_v47 = vadd.f32 %v1004_v41, %v540_v14  ;;  %v1221_v41 = vld [vmem:[%s23178_s0 + $0x32] sm:$0xff] }
 0x134   :  { %v13698_v48 = vpop.f32.mrf.mxu0  ;;  %v13852_v50 = vpop.f32.mrf.mxu1 }
 0x136   :  { %v553_v51 = vpop.f32.mrf.mxu0  ;;  %v1009_v53 = vpop.f32.mrf.mxu1  ;;  %13950 = vmatmul.mubr.msk.bf16.gmra.mxu1 %vm285_vm2, %v164_v42  ;;  %13960 = vmatmul.mubr.msk.bf16.vlgmr.msra.gmra.mxu0 %vm285_vm2, %v1292_v43  ;;  %v1222_v42 = vld [vmem:[%s23178_s0 + $0x3a] sm:$0xff] }
 0x137   :  { %v16679_v54 = vadd.f32 %v1009_v53, %v545_v26  ;;  %13953 = vmatprep.mubr.msk.bf16.mxu1 %vm15827_vm1, %v23192_v0  ;;  %13963 = vmatprep.mubr.msk.bf16.mxu0 %vm15827_vm1, %v23192_v0  ;;  %v1295_v53 = vpack.c.bf16 %v1222_v42, %v1221_v41 }
 0x138   :  { %v13701_v61 = vpop.f32.mrf.mxu0  ;;  %v13855_v62 = vpop.f32.mrf.mxu1 }
 0x13a   :  { %v556_v1 = vpop.f32.mrf.mxu0  ;;  %v1012_v4 = vpop.f32.mrf.mxu1 }
 0x13b   :  { %v16694_v9 = vadd.f32 %v1012_v4, %v548_v40  ;;  %v1223_v4 = vld [vmem:[%s23178_s0 + $0x42] sm:$0xff] }
 0x13c   :  { %v13702_v10 = vpop.f32.mrf.mxu0  ;;  %v13856_v11 = vpop.f32.mrf.mxu1 }
 0x13e   :  { %v561_v13 = vpop.f32.mrf.mxu0  ;;  %v1017_v14 = vpop.f32.mrf.mxu1  ;;  %13954 = vmatmul.mubr.msk.bf16.gmra.mxu1 %vm285_vm2, %v165_v5  ;;  %13964 = vmatmul.mubr.msk.bf16.gmra.mxu0 %vm285_vm2, %v1293_v8  ;;  %v1224_v5 = vld [vmem:[%s23178_s0 + $0x4a] sm:$0xff] }
 0x13f   :  { %v16698_v16 = vadd.f32 %v1017_v14, %v553_v51  ;;  %13967 = vmatprep.mubr.msk.bf16.mxu0 %vm15827_vm1, %v23192_v0  ;;  %14117 = vmatprep.mubr.msk.bf16.mxu1 %vm15827_vm1, %v23192_v0  ;;  %v1296_v14 = vpack.c.bf16 %v1224_v5, %v1223_v4 }
 0x140   :  { %v13705_v22 = vpop.f32.mrf.mxu0  ;;  %v13859_v24 = vpop.f32.mrf.mxu1 }
 0x142   :  { %v564_v26 = vpop.f32.mrf.mxu0  ;;  %v1020_v27 = vpop.f32.mrf.mxu1 }
 0x143   :  { %v16710_v31 = vadd.f32 %v1020_v27, %v556_v1 }
 0x144   :  { %v13706_v32 = vpop.f32.mrf.mxu0  ;;  %v13860_v34 = vpop.f32.mrf.mxu1 }
 0x145   :  { %v1226_v32 = vld [vmem:[%s23178_s0 + $0x5a] sm:$0xff] }
 0x146   :  { %v569_v36 = vpop.f32.mrf.mxu0  ;;  %v1025_v39 = vpop.f32.mrf.mxu1  ;;  %13968 = vmatmul.mubr.msk.bf16.gmra.mxu0 %vm285_vm2, %v1294_v29  ;;  %14118 = vmatmul.mubr.msk.bf16.vlgmr.msra.gmra.mxu1 %vm285_vm2, %v1293_v8 }
 0x147   :  { %v16714_v40 = vadd.f32 %v1025_v39, %v561_v13  ;;  %13971 = vmatprep.mubr.msk.bf16.mxu0 %vm15827_vm1, %v23192_v0  ;;  %14121 = vmatprep.mubr.msk.bf16.mxu1 %vm15827_vm1, %v23192_v0 }
 0x148   :  { %v13709_v43 = vpop.f32.mrf.mxu0  ;;  %v13863_v48 = vpop.f32.mrf.mxu1 }
 0x14a   :  { %v572_v50 = vpop.f32.mrf.mxu0  ;;  %v1028_v51 = vpop.f32.mrf.mxu1 }
 0x14b   :  { %v16726_v55 = vadd.f32 %v1028_v51, %v564_v26 }
 0x14c   :  { %v13710_v56 = vpop.f32.mrf.mxu0  ;;  %v13864_v58 = vpop.f32.mrf.mxu1 }
 0x14d   :  { %v1227_v58 = vld [vmem:[%s23178_s0 + $0x62] sm:$0xff] }
 0x14e   :  { %v577_v61 = vpop.f32.mrf.mxu0  ;;  %v1033_v62 = vpop.f32.mrf.mxu1  ;;  %13972 = vmatmul.mubr.msk.bf16.gmra.mxu0 %vm285_vm2, %v1295_v53  ;;  %14122 = vmatmul.mubr.msk.bf16.gmra.mxu1 %vm285_vm2, %v1294_v29  ;;  %v1225_v29 = vld [vmem:[%s23178_s0 + $0x52] sm:$0xff] }
 0x14f   :  { %v16730_v1 = vadd.f32 %v1033_v62, %v569_v36  ;;  %13975 = vmatprep.mubr.msk.bf16.mxu0 %vm15827_vm1, %v23192_v0  ;;  %14125 = vmatprep.mubr.msk.bf16.mxu1 %vm15827_vm1, %v23192_v0  ;;  %v1297_v42 = vpack.c.bf16 %v1226_v32, %v1225_v29  ;;  %v1230_v29 = vld [vmem:[%s23178_s0 + $0x7a] sm:$0xff] }
 0x150   :  { %v13713_v8 = vpop.f32.mrf.mxu0  ;;  %v13867_v10 = vpop.f32.mrf.mxu1 }
 0x152   :  { %v580_v11 = vpop.f32.mrf.mxu0  ;;  %v1036_v13 = vpop.f32.mrf.mxu1 }
 0x153   :  { %v16742_v17 = vadd.f32 %v1036_v13, %v572_v50 }
 0x154   :  { %v13714_v20 = vpop.f32.mrf.mxu0  ;;  %v13868_v22 = vpop.f32.mrf.mxu1 }
 0x156   :  { %v585_v24 = vpop.f32.mrf.mxu0  ;;  %v1041_v26 = vpop.f32.mrf.mxu1  ;;  %13976 = vmatmul.mubr.msk.bf16.gmra.mxu0 %vm285_vm2, %v1296_v14  ;;  %14126 = vmatmul.mubr.msk.bf16.gmra.mxu1 %vm285_vm2, %v1295_v53 }
 0x157   :  { %v16746_v27 = vadd.f32 %v1041_v26, %v577_v61  ;;  %13979 = vmatprep.mubr.msk.bf16.mxu0 %vm15827_vm1, %v23192_v0  ;;  %14129 = vmatprep.mubr.msk.bf16.mxu1 %vm15827_vm1, %v23192_v0  ;;  %v1228_v61 = vld [vmem:[%s23178_s0 + $0x6a] sm:$0xff]  ;;  %v1229_v26 = vld [vmem:[%s23178_s0 + $0x72] sm:$0xff] }
 0x158   :  { %v13717_v34 = vpop.f32.mrf.mxu0  ;;  %v13871_v36 = vpop.f32.mrf.mxu1  ;;  %v1298_v10 = vpack.c.bf16 %v1228_v61, %v1227_v58  ;;  %v1231_v61 = vld [vmem:[%s23178_s0 + $0x82] sm:$0xff] }
 0x15a   :  { %v588_v39 = vpop.f32.mrf.mxu0  ;;  %v1044_v41 = vpop.f32.mrf.mxu1 }
 0x15b   :  { %v16758_v43 = vadd.f32 %v1044_v41, %v580_v11  ;;  %v1299_v41 = vpack.c.bf16 %v1230_v29, %v1229_v26 }
 0x15c   :  { %v13718_v48 = vpop.f32.mrf.mxu0  ;;  %v13872_v50 = vpop.f32.mrf.mxu1 }
 0x15e   :  { %v593_v51 = vpop.f32.mrf.mxu0  ;;  %v1049_v53 = vpop.f32.mrf.mxu1  ;;  %13980 = vmatmul.mubr.msk.bf16.gmra.mxu0 %vm285_vm2, %v1297_v42  ;;  %14130 = vmatmul.mubr.msk.bf16.gmra.mxu1 %vm285_vm2, %v1296_v14 }
 0x15f   :  { %v16762_v56 = vadd.f32 %v1049_v53, %v585_v24  ;;  %13983 = vmatprep.mubr.msk.bf16.mxu0 %vm15827_vm1, %v23192_v0  ;;  %14133 = vmatprep.mubr.msk.bf16.mxu1 %vm15827_vm1, %v23192_v0 }
 0x160   :  { %v13721_v62 = vpop.f32.mrf.mxu0  ;;  %v13875_v4 = vpop.f32.mrf.mxu1 }
 0x161   :  { %v1232_v62 = vld [vmem:[%s23178_s0 + $0x8a] sm:$0xff] }
 0x162   :  { %v596_v5 = vpop.f32.mrf.mxu0  ;;  %v1052_v8 = vpop.f32.mrf.mxu1 }
 0x163   :  { %v16774_v11 = vadd.f32 %v1052_v8, %v588_v39 }
 0x164   :  { %v13722_v13 = vpop.f32.mrf.mxu0  ;;  %v13876_v14 = vpop.f32.mrf.mxu1 }
 0x165   :  { %v1300_v13 = vpack.c.bf16 %v1232_v62, %v1231_v61 }
 0x166   :  { %v601_v20 = vpop.f32.mrf.mxu0  ;;  %v1057_v22 = vpop.f32.mrf.mxu1  ;;  %13984 = vmatmul.mubr.msk.bf16.gmra.mxu0 %vm285_vm2, %v1298_v10  ;;  %14134 = vmatmul.mubr.msk.bf16.gmra.mxu1 %vm285_vm2, %v1297_v42 }
 0x167   :  { %v16778_v24 = vadd.f32 %v1057_v22, %v593_v51  ;;  %13987 = vmatprep.mubr.msk.bf16.mxu0 %vm15827_vm1, %v23192_v0  ;;  %14137 = vmatprep.mubr.msk.bf16.mxu1 %vm15827_vm1, %v23192_v0 }
 0x168   :  { %v13725_v32 = vpop.f32.mrf.mxu0  ;;  %v13879_v34 = vpop.f32.mrf.mxu1 }
 0x16a   :  { %v604_v36 = vpop.f32.mrf.mxu0  ;;  %v1060_v39 = vpop.f32.mrf.mxu1 }
 0x16b   :  { %v16790_v42 = vadd.f32 %v1060_v39, %v596_v5 }
 0x16c   :  { %v13726_v48 = vpop.f32.mrf.mxu0  ;;  %v13880_v50 = vpop.f32.mrf.mxu1 }
 0x16d   :  { %v1234_v48 = vld [vmem:[%s23178_s0 + $0x9a] sm:$0xff] }
 0x16e   :  { %v609_v51 = vpop.f32.mrf.mxu0  ;;  %v1065_v53 = vpop.f32.mrf.mxu1  ;;  %13988 = vmatmul.mubr.msk.bf16.gmra.mxu0 %vm285_vm2, %v1299_v41  ;;  %14138 = vmatmul.mubr.msk.bf16.gmra.mxu1 %vm285_vm2, %v1298_v10 }
 0x16f   :  { %v16794_v58 = vadd.f32 %v1065_v53, %v601_v20  ;;  %13991 = vmatprep.mubr.msk.bf16.mxu0 %vm15827_vm1, %v23192_v0  ;;  %14141 = vmatprep.mubr.msk.bf16.mxu1 %vm15827_vm1, %v23192_v0  ;;  %v12337_v20 = vld [vmem:[%s23177_s1 + $0x10] sm:$0xf] }
 0x170   :  { %v13729_v4 = vpop.f32.mrf.mxu0  ;;  %v13883_v5 = vpop.f32.mrf.mxu1  ;;  %v2769_v29 = vsel %vm403_vm0, %v12337_v20, 0 }
 0x171   :  { %14274 = vmatpush3.bf16.msra.mxu0 %v2769_v29 }
 0x172   :  { %v612_v8 = vpop.f32.mrf.mxu0  ;;  %v1068_v10 = vpop.f32.mrf.mxu1  ;;  %14589 = vmatprep.subr.bf16.mxu0 %v23192_v0 }
 0x173   :  { %v16806_v14 = vadd.f32 %v1068_v10, %v604_v36  ;;  %v1233_v36 = vld [vmem:[%s23178_s0 + $0x92] sm:$0xff] }
 0x174   :  { %v13730_v22 = vpop.f32.mrf.mxu0  ;;  %v13884_v26 = vpop.f32.mrf.mxu1  ;;  %v1301_v61 = vpack.c.bf16 %v1234_v48, %v1233_v36 }
 0x175   :  { %v1236_v26 = vld [vmem:[%s23178_s0 + $0xaa] sm:$0xff] }
 0x176   :  { %v617_v32 = vpop.f32.mrf.mxu0  ;;  %v1073_v34 = vpop.f32.mrf.mxu1  ;;  %13992 = vmatmul.mubr.msk.bf16.gmra.mxu0 %vm285_vm2, %v1300_v13  ;;  %14142 = vmatmul.mubr.msk.bf16.gmra.mxu1 %vm285_vm2, %v1299_v41 }
 0x177   :  { %v16814_v39 = vadd.f32 %v1073_v34, %v609_v51  ;;  %13995 = vmatprep.mubr.msk.bf16.mxu0 %vm15827_vm1, %v23192_v0  ;;  %14145 = vmatprep.mubr.msk.bf16.mxu1 %vm15827_vm1, %v23192_v0 }
 0x178   :  { %v13733_v50 = vpop.f32.mrf.mxu0  ;;  %v13887_v53 = vpop.f32.mrf.mxu1 }
 0x17a   :  { %v620_v41 = vpop.f32.mrf.mxu0  ;;  %v1076_v51 = vpop.f32.mrf.mxu1 }
 0x17b   :  { %v16827_v62 = vadd.f32 %v1076_v51, %v612_v8  ;;  %v1235_v8 = vld [vmem:[%s23178_s0 + $0xa2] sm:$0xff] }
 0x17c   :  { %v13734_v4 = vpop.f32.mrf.mxu0  ;;  %v13888_v5 = vpop.f32.mrf.mxu1 }
 0x17e   :  { %v625_v10 = vpop.f32.mrf.mxu0  ;;  %v1081_v20 = vpop.f32.mrf.mxu1  ;;  %13996 = vmatmul.mubr.msk.bf16.gmra.mxu0 %vm285_vm2, %v1301_v61  ;;  %14146 = vmatmul.mubr.msk.bf16.gmra.mxu1 %vm285_vm2, %v1300_v13 }
 0x17f   :  { %v16831_v22 = vadd.f32 %v1081_v20, %v617_v32  ;;  %13999 = vmatprep.mubr.msk.bf16.mxu0 %vm15827_vm1, %v23192_v0  ;;  %14149 = vmatprep.mubr.msk.bf16.mxu1 %vm15827_vm1, %v23192_v0  ;;  %v1302_v32 = vpack.c.bf16 %v1236_v26, %v1235_v8  ;;  %v1238_v20 = vld [vmem:[%s23178_s0 + $0xba] sm:$0xff] }
 0x180   :  { %v13737_v29 = vpop.f32.mrf.mxu0  ;;  %v13891_v34 = vpop.f32.mrf.mxu1 }
 0x182   :  { %v628_v36 = vpop.f32.mrf.mxu0  ;;  %v1084_v13 = vpop.f32.mrf.mxu1 }
 0x183   :  { %v16843_v48 = vadd.f32 %v1084_v13, %v620_v41  ;;  %v1237_v41 = vld [vmem:[%s23178_s0 + $0xb2] sm:$0xff] }
 0x184   :  { %v13738_v50 = vpop.f32.mrf.mxu0  ;;  %v13892_v53 = vpop.f32.mrf.mxu1 }
 0x186   :  { %v633_v51 = vpop.f32.mrf.mxu0  ;;  %v1089_v4 = vpop.f32.mrf.mxu1  ;;  %14000 = vmatmul.mubr.msk.bf16.gmra.mxu0 %vm285_vm2, %v1302_v32  ;;  %14150 = vmatmul.mubr.msk.bf16.gmra.mxu1 %vm285_vm2, %v1301_v61 }
 0x187   :  { %v16847_v5 = vadd.f32 %v1089_v4, %v625_v10  ;;  %14003 = vmatprep.mubr.msk.bf16.mxu0 %vm15827_vm1, %v23192_v0  ;;  %14153 = vmatprep.mubr.msk.bf16.mxu1 %vm15827_vm1, %v23192_v0  ;;  %v1303_v10 = vpack.c.bf16 %v1238_v20, %v1237_v41  ;;  %v1240_v41 = vld [vmem:[%s23178_s0 + $0xca] sm:$0xff] }
 0x188   :  { %v13741_v8 = vpop.f32.mrf.mxu0  ;;  %v13895_v26 = vpop.f32.mrf.mxu1 }
 0x189   :  { %23199 = vst [vmem:[#allocation6_spill] sm:$0xff] %v16847_v5 }
 0x18a   :  { %v636_v29 = vpop.f32.mrf.mxu0  ;;  %v1092_v61 = vpop.f32.mrf.mxu1 }
 0x18b   :  { %v16859_v34 = vadd.f32 %v1092_v61, %v628_v36  ;;  %v1239_v36 = vld [vmem:[%s23178_s0 + $0xc2] sm:$0xff] }
 0x18c   :  { %v13742_v13 = vpop.f32.mrf.mxu0  ;;  %v13896_v50 = vpop.f32.mrf.mxu1 }
 0x18d   :  { %23200 = vst [vmem:[#allocation7_spill] sm:$0xff] %v16859_v34 }
 0x18e   :  { %v641_v53 = vpop.f32.mrf.mxu0  ;;  %v1097_v4 = vpop.f32.mrf.mxu1  ;;  %14004 = vmatmul.mubr.msk.bf16.gmra.mxu0 %vm285_vm2, %v1303_v10  ;;  %14154 = vmatmul.mubr.msk.bf16.gmra.mxu1 %vm285_vm2, %v1302_v32 }
 0x18f   :  { %v16863_v0 = vadd.f32 %v1097_v4, %v633_v51  ;;  %14007 = vmatprep.mubr.msk.bf16.mxu0 %vm15827_vm1, %v23202_v33  ;;  %14157 = vmatprep.mubr.msk.bf16.mxu1 %vm15827_vm1, %v23202_v33  ;;  %v1304_v51 = vpack.c.bf16 %v1240_v41, %v1239_v36  ;;  %v1242_v36 = vld [vmem:[%s23178_s0 + $0xda] sm:$0xff] }
 0x190   :  { %v13745_v20 = vpop.f32.mrf.mxu0  ;;  %v13899_v8 = vpop.f32.mrf.mxu1 }
 0x191   :  { %23201 = vst [vmem:[#allocation8_spill] sm:$0xff] %v16863_v0 }
 0x192   :  { %v644_v26 = vpop.f32.mrf.mxu0  ;;  %v1100_v32 = vpop.f32.mrf.mxu1 }
 0x193   :  { %v16875_v61 = vadd.f32 %v1100_v32, %v636_v29  ;;  %v1241_v29 = vld [vmem:[%s23178_s0 + $0xd2] sm:$0xff] }
 0x194   :  { %v13746_v13 = vpop.f32.mrf.mxu0  ;;  %v13900_v50 = vpop.f32.mrf.mxu1 }
 0x195   :  { %23203 = vst [vmem:[#allocation9_spill] sm:$0xff] %v16875_v61 }
 0x196   :  { %v649_v4 = vpop.f32.mrf.mxu0  ;;  %v1105_v0 = vpop.f32.mrf.mxu1  ;;  %14008 = vmatmul.mubr.msk.bf16.gmra.mxu0 %vm285_vm2, %v1304_v51  ;;  %14158 = vmatmul.mubr.msk.bf16.gmra.mxu1 %vm285_vm2, %v1303_v10 }
 0x197   :  { %v16879_v34 = vadd.f32 %v1105_v0, %v641_v53  ;;  %14011 = vmatprep.mubr.msk.bf16.mxu0 %vm15827_vm1, %v23202_v33  ;;  %14161 = vmatprep.mubr.msk.bf16.mxu1 %vm15827_vm1, %v23202_v33  ;;  %v1305_v0 = vpack.c.bf16 %v1242_v36, %v1241_v29  ;;  %v1244_v29 = vld [vmem:[%s23178_s0 + $0xea] sm:$0xff] }
 0x198   :  { %v13749_v41 = vpop.f32.mrf.mxu0  ;;  %v13903_v20 = vpop.f32.mrf.mxu1 }
 0x199   :  { %23204 = vst [vmem:[#allocation10_spill] sm:$0xff] %v16879_v34 }
 0x19a   :  { %v652_v8 = vpop.f32.mrf.mxu0  ;;  %v1108_v10 = vpop.f32.mrf.mxu1 }
 0x19b   :  { %v16891_v53 = vadd.f32 %v1108_v10, %v644_v26  ;;  %v1243_v26 = vld [vmem:[%s23178_s0 + $0xe2] sm:$0xff] }
 0x19c   :  { %v13750_v32 = vpop.f32.mrf.mxu0  ;;  %v13904_v13 = vpop.f32.mrf.mxu1 }
 0x19d   :  { %23205 = vst [vmem:[#allocation11_spill] sm:$0xff] %v16891_v53 }
 0x19e   :  { %v657_v50 = vpop.f32.mrf.mxu0  ;;  %v1113_v34 = vpop.f32.mrf.mxu1  ;;  %14012 = vmatmul.mubr.msk.bf16.gmra.mxu0 %vm285_vm2, %v1305_v0  ;;  %14162 = vmatmul.mubr.msk.bf16.gmra.mxu1 %vm285_vm2, %v1304_v51 }
 0x19f   :  { %v16895_v61 = vadd.f32 %v1113_v34, %v649_v4  ;;  %14015 = vmatprep.mubr.msk.bf16.mxu0 %vm15827_vm1, %v23202_v33  ;;  %14165 = vmatprep.mubr.msk.bf16.mxu1 %vm15827_vm1, %v23202_v33  ;;  %v1306_v34 = vpack.c.bf16 %v1244_v29, %v1243_v26  ;;  %v1246_v26 = vld [vmem:[%s23178_s0 + $0xfa] sm:$0xff] }
 0x1a0   :  { %v13753_v36 = vpop.f32.mrf.mxu0  ;;  %v13907_v41 = vpop.f32.mrf.mxu1 }
 0x1a1   :  { %23206 = vst [vmem:[#allocation12_spill] sm:$0xff] %v16895_v61 }
 0x1a2   :  { %v660_v20 = vpop.f32.mrf.mxu0  ;;  %v1116_v51 = vpop.f32.mrf.mxu1 }
 0x1a3   :  { %v16907_v4 = vadd.f32 %v1116_v51, %v652_v8  ;;  %v1245_v8 = vld [vmem:[%s23178_s0 + $0xf2] sm:$0xff] }
 0x1a4   :  { %v13754_v10 = vpop.f32.mrf.mxu0  ;;  %v13908_v32 = vpop.f32.mrf.mxu1 }
 0x1a5   :  { %23207 = vst [vmem:[#allocation13_spill] sm:$0xff] %v16907_v4 }
 0x1a6   :  { %v665_v13 = vpop.f32.mrf.mxu0  ;;  %v1121_v61 = vpop.f32.mrf.mxu1  ;;  %14016 = vmatmul.mubr.msk.bf16.gmra.mxu0 %vm285_vm2, %v1306_v34  ;;  %14166 = vmatmul.mubr.msk.bf16.gmra.mxu1 %vm285_vm2, %v1305_v0 }
 0x1a7   :  { %v16911_v53 = vadd.f32 %v1121_v61, %v657_v50  ;;  %14019 = vmatprep.mubr.msk.bf16.mxu0 %vm15827_vm1, %v23202_v33  ;;  %14169 = vmatprep.mubr.msk.bf16.mxu1 %vm15827_vm1, %v23202_v33  ;;  %v1307_v61 = vpack.c.bf16 %v1246_v26, %v1245_v8  ;;  %v1248_v8 = vld [vmem:[%s23178_s0 + $0x10a] sm:$0xff] }
 0x1a8   :  { %v13757_v29 = vpop.f32.mrf.mxu0  ;;  %v13911_v36 = vpop.f32.mrf.mxu1 }
 0x1a9   :  { %23208 = vst [vmem:[#allocation14_spill] sm:$0xff] %v16911_v53 }
 0x1aa   :  { %v668_v41 = vpop.f32.mrf.mxu0  ;;  %v1124_v0 = vpop.f32.mrf.mxu1 }
 0x1ab   :  { %v16923_v50 = vadd.f32 %v1124_v0, %v660_v20  ;;  %v1247_v20 = vld [vmem:[%s23178_s0 + $0x102] sm:$0xff] }
 0x1ac   :  { %v13758_v51 = vpop.f32.mrf.mxu0  ;;  %v13912_v10 = vpop.f32.mrf.mxu1 }
 0x1ad   :  { %23209 = vst [vmem:[#allocation15_spill] sm:$0xff] %v16923_v50 }
 0x1ae   :  { %v673_v32 = vpop.f32.mrf.mxu0  ;;  %v1129_v53 = vpop.f32.mrf.mxu1  ;;  %14020 = vmatmul.mubr.msk.bf16.gmra.mxu0 %vm285_vm2, %v1307_v61  ;;  %14170 = vmatmul.mubr.msk.bf16.gmra.mxu1 %vm285_vm2, %v1306_v34 }
 0x1af   :  { %v16927_v4 = vadd.f32 %v1129_v53, %v665_v13  ;;  %14023 = vmatprep.mubr.msk.bf16.mxu0 %vm15827_vm1, %v23202_v33  ;;  %14173 = vmatprep.mubr.msk.bf16.mxu1 %vm15827_vm1, %v23202_v33  ;;  %v1308_v53 = vpack.c.bf16 %v1248_v8, %v1247_v20  ;;  %v1250_v20 = vld [vmem:[%s23178_s0 + $0x11a] sm:$0xff] }
 0x1b0   :  { %v13761_v26 = vpop.f32.mrf.mxu0  ;;  %v13915_v29 = vpop.f32.mrf.mxu1 }
 0x1b1   :  { %23210 = vst [vmem:[#allocation16_spill] sm:$0xff] %v16927_v4 }
 0x1b2   :  { %v676_v36 = vpop.f32.mrf.mxu0  ;;  %v1132_v34 = vpop.f32.mrf.mxu1 }
 0x1b3   :  { %v16939_v13 = vadd.f32 %v1132_v34, %v668_v41  ;;  %v1249_v41 = vld [vmem:[%s23178_s0 + $0x112] sm:$0xff] }
 0x1b4   :  { %v13762_v0 = vpop.f32.mrf.mxu0  ;;  %v13916_v51 = vpop.f32.mrf.mxu1 }
 0x1b5   :  { %23211 = vst [vmem:[#allocation17_spill] sm:$0xff] %v16939_v13 }
 0x1b6   :  { %v681_v10 = vpop.f32.mrf.mxu0  ;;  %v1137_v4 = vpop.f32.mrf.mxu1  ;;  %14024 = vmatmul.mubr.msk.bf16.gmra.mxu0 %vm285_vm2, %v1308_v53  ;;  %14174 = vmatmul.mubr.msk.bf16.gmra.mxu1 %vm285_vm2, %v1307_v61 }
 0x1b7   :  { %v16943_v50 = vadd.f32 %v1137_v4, %v673_v32  ;;  %14027 = vmatprep.mubr.msk.bf16.mxu0 %vm15827_vm1, %v23202_v33  ;;  %14177 = vmatprep.mubr.msk.bf16.mxu1 %vm15827_vm1, %v23202_v33  ;;  %v1309_v4 = vpack.c.bf16 %v1250_v20, %v1249_v41  ;;  %v1252_v41 = vld [vmem:[%s23178_s0 + $0x12a] sm:$0xff] }
 0x1b8   :  { %v13765_v8 = vpop.f32.mrf.mxu0  ;;  %v13919_v26 = vpop.f32.mrf.mxu1 }
 0x1b9   :  { %23212 = vst [vmem:[#allocation18_spill] sm:$0xff] %v16943_v50 }
 0x1ba   :  { %v684_v29 = vpop.f32.mrf.mxu0  ;;  %v1140_v61 = vpop.f32.mrf.mxu1 }
 0x1bb   :  { %v16955_v32 = vadd.f32 %v1140_v61, %v676_v36  ;;  %v1251_v36 = vld [vmem:[%s23178_s0 + $0x122] sm:$0xff] }
 0x1bc   :  { %v13766_v34 = vpop.f32.mrf.mxu0  ;;  %v13920_v0 = vpop.f32.mrf.mxu1 }
 0x1bd   :  { %23213 = vst [vmem:[#allocation19_spill] sm:$0xff] %v16955_v32 }
 0x1be   :  { %v689_v51 = vpop.f32.mrf.mxu0  ;;  %v1145_v50 = vpop.f32.mrf.mxu1  ;;  %14028 = vmatmul.mubr.msk.bf16.gmra.mxu0 %vm285_vm2, %v1309_v4  ;;  %14178 = vmatmul.mubr.msk.bf16.gmra.mxu1 %vm285_vm2, %v1308_v53 }
 0x1bf   :  { %v16959_v13 = vadd.f32 %v1145_v50, %v681_v10  ;;  %14031 = vmatprep.mubr.msk.bf16.mxu0 %vm15827_vm1, %v23202_v33  ;;  %14181 = vmatprep.mubr.msk.bf16.mxu1 %vm15827_vm1, %v23202_v33  ;;  %v1310_v50 = vpack.c.bf16 %v1252_v41, %v1251_v36  ;;  %v1254_v36 = vld [vmem:[%s23178_s0 + $0x13a] sm:$0xff] }
 0x1c0   :  { %v13769_v20 = vpop.f32.mrf.mxu0  ;;  %v13923_v8 = vpop.f32.mrf.mxu1 }
 0x1c1   :  { %23214 = vst [vmem:[#allocation20_spill] sm:$0xff] %v16959_v13 }
 0x1c2   :  { %v692_v26 = vpop.f32.mrf.mxu0  ;;  %v1148_v53 = vpop.f32.mrf.mxu1 }
 0x1c3   :  { %v16971_v10 = vadd.f32 %v1148_v53, %v684_v29  ;;  %v1253_v29 = vld [vmem:[%s23178_s0 + $0x132] sm:$0xff] }
 0x1c4   :  { %v13770_v61 = vpop.f32.mrf.mxu0  ;;  %v13924_v34 = vpop.f32.mrf.mxu1 }
 0x1c5   :  { %23215 = vst [vmem:[#allocation21_spill] sm:$0xff] %v16971_v10 }
 0x1c6   :  { %v697_v0 = vpop.f32.mrf.mxu0  ;;  %v1153_v13 = vpop.f32.mrf.mxu1  ;;  %14032 = vmatmul.mubr.msk.bf16.gmra.mxu0 %vm285_vm2, %v1310_v50  ;;  %14182 = vmatmul.mubr.msk.bf16.gmra.mxu1 %vm285_vm2, %v1309_v4 }
 0x1c7   :  { %v16975_v32 = vadd.f32 %v1153_v13, %v689_v51  ;;  %14035 = vmatprep.mubr.msk.bf16.mxu0 %vm15827_vm1, %v23202_v33  ;;  %14185 = vmatprep.mubr.msk.bf16.mxu1 %vm15827_vm1, %v23202_v33  ;;  %v1311_v13 = vpack.c.bf16 %v1254_v36, %v1253_v29  ;;  %v1256_v29 = vld [vmem:[%s23178_s0 + $0x14a] sm:$0xff] }
 0x1c8   :  { %v13773_v41 = vpop.f32.mrf.mxu0  ;;  %v13927_v20 = vpop.f32.mrf.mxu1 }
 0x1c9   :  { %23216 = vst [vmem:[#allocation22_spill] sm:$0xff] %v16975_v32 }
 0x1ca   :  { %v700_v8 = vpop.f32.mrf.mxu0  ;;  %v1156_v4 = vpop.f32.mrf.mxu1 }
 0x1cb   :  { %v16987_v51 = vadd.f32 %v1156_v4, %v692_v26  ;;  %v1255_v26 = vld [vmem:[%s23178_s0 + $0x142] sm:$0xff] }
 0x1cc   :  { %v13774_v53 = vpop.f32.mrf.mxu0  ;;  %v13928_v61 = vpop.f32.mrf.mxu1 }
 0x1cd   :  { %23217 = vst [vmem:[#allocation23_spill] sm:$0xff] %v16987_v51 }
 0x1ce   :  { %v705_v34 = vpop.f32.mrf.mxu0  ;;  %v1161_v32 = vpop.f32.mrf.mxu1  ;;  %14036 = vmatmul.mubr.msk.bf16.gmra.mxu0 %vm285_vm2, %v1311_v13  ;;  %14186 = vmatmul.mubr.msk.bf16.gmra.mxu1 %vm285_vm2, %v1310_v50 }
 0x1cf   :  { %v16991_v10 = vadd.f32 %v1161_v32, %v697_v0  ;;  %14039 = vmatprep.mubr.msk.bf16.mxu0 %vm15827_vm1, %v23202_v33  ;;  %14189 = vmatprep.mubr.msk.bf16.mxu1 %vm15827_vm1, %v23202_v33  ;;  %v1312_v32 = vpack.c.bf16 %v1256_v29, %v1255_v26  ;;  %v1258_v26 = vld [vmem:[%s23178_s0 + $0x15a] sm:$0xff] }
 0x1d0   :  { %v13777_v36 = vpop.f32.mrf.mxu0  ;;  %v13931_v41 = vpop.f32.mrf.mxu1 }
 0x1d1   :  { %23218 = vst [vmem:[#allocation24_spill] sm:$0xff] %v16991_v10 }
 0x1d2   :  { %v708_v20 = vpop.f32.mrf.mxu0  ;;  %v1164_v50 = vpop.f32.mrf.mxu1 }
 0x1d3   :  { %v17003_v0 = vadd.f32 %v1164_v50, %v700_v8  ;;  %v1257_v8 = vld [vmem:[%s23178_s0 + $0x152] sm:$0xff] }
 0x1d4   :  { %v13778_v4 = vpop.f32.mrf.mxu0  ;;  %v13932_v53 = vpop.f32.mrf.mxu1 }
 0x1d5   :  { %23219 = vst [vmem:[#allocation25_spill] sm:$0xff] %v17003_v0 }
 0x1d6   :  { %v713_v61 = vpop.f32.mrf.mxu0  ;;  %v1169_v10 = vpop.f32.mrf.mxu1  ;;  %14040 = vmatmul.mubr.msk.bf16.gmra.mxu0 %vm285_vm2, %v1312_v32  ;;  %14190 = vmatmul.mubr.msk.bf16.gmra.mxu1 %vm285_vm2, %v1311_v13 }
 0x1d7   :  { %v17007_v51 = vadd.f32 %v1169_v10, %v705_v34  ;;  %14043 = vmatprep.mubr.msk.bf16.mxu0 %vm15827_vm1, %v23202_v33  ;;  %14193 = vmatprep.mubr.msk.bf16.mxu1 %vm15827_vm1, %v23202_v33  ;;  %v1313_v10 = vpack.c.bf16 %v1258_v26, %v1257_v8  ;;  %v1260_v8 = vld [vmem:[%s23178_s0 + $0x16a] sm:$0xff] }
 0x1d8   :  { %v13781_v29 = vpop.f32.mrf.mxu0  ;;  %v13935_v36 = vpop.f32.mrf.mxu1 }
 0x1d9   :  { %23220 = vst [vmem:[#allocation26_spill] sm:$0xff] %v17007_v51 }
 0x1da   :  { %v716_v41 = vpop.f32.mrf.mxu0  ;;  %v1172_v13 = vpop.f32.mrf.mxu1 }
 0x1db   :  { %v17019_v34 = vadd.f32 %v1172_v13, %v708_v20  ;;  %v1259_v20 = vld [vmem:[%s23178_s0 + $0x162] sm:$0xff] }
 0x1dc   :  { %v13782_v50 = vpop.f32.mrf.mxu0  ;;  %v13936_v4 = vpop.f32.mrf.mxu1 }
 0x1dd   :  { %23221 = vst [vmem:[#allocation27_spill] sm:$0xff] %v17019_v34 }
 0x1de   :  { %v721_v53 = vpop.f32.mrf.mxu0  ;;  %v1177_v51 = vpop.f32.mrf.mxu1  ;;  %14044 = vmatmul.mubr.msk.bf16.gmra.mxu0 %vm285_vm2, %v1313_v10  ;;  %14194 = vmatmul.mubr.msk.bf16.gmra.mxu1 %vm285_vm2, %v1312_v32 }
 0x1df   :  { %v17023_v0 = vadd.f32 %v1177_v51, %v713_v61  ;;  %14047 = vmatprep.mubr.msk.bf16.mxu0 %vm15827_vm1, %v23202_v33  ;;  %14197 = vmatprep.mubr.msk.bf16.mxu1 %vm15827_vm1, %v23202_v33  ;;  %v1314_v51 = vpack.c.bf16 %v1260_v8, %v1259_v20  ;;  %v1262_v20 = vld [vmem:[%s23178_s0 + $0x17a] sm:$0xff] }
 0x1e0   :  { %v13785_v26 = vpop.f32.mrf.mxu0  ;;  %v13939_v29 = vpop.f32.mrf.mxu1 }
 0x1e1   :  { %23222 = vst [vmem:[#allocation28_spill] sm:$0xff] %v17023_v0 }
 0x1e2   :  { %v724_v36 = vpop.f32.mrf.mxu0  ;;  %v1180_v32 = vpop.f32.mrf.mxu1 }
 0x1e3   :  { %v17035_v61 = vadd.f32 %v1180_v32, %v716_v41  ;;  %v1261_v41 = vld [vmem:[%s23178_s0 + $0x172] sm:$0xff] }
 0x1e4   :  { %v13786_v13 = vpop.f32.mrf.mxu0  ;;  %v13940_v50 = vpop.f32.mrf.mxu1 }
 0x1e5   :  { %23223 = vst [vmem:[#allocation29_spill] sm:$0xff] %v17035_v61 }
 0x1e6   :  { %v729_v4 = vpop.f32.mrf.mxu0  ;;  %v1185_v0 = vpop.f32.mrf.mxu1  ;;  %14048 = vmatmul.mubr.msk.bf16.gmra.mxu0 %vm285_vm2, %v1314_v51  ;;  %14198 = vmatmul.mubr.msk.bf16.gmra.mxu1 %vm285_vm2, %v1313_v10 }
 0x1e7   :  { %v17039_v34 = vadd.f32 %v1185_v0, %v721_v53  ;;  %14051 = vmatprep.mubr.msk.bf16.mxu0 %vm15827_vm1, %v23202_v33  ;;  %14201 = vmatprep.mubr.msk.bf16.mxu1 %vm15827_vm1, %v23202_v33  ;;  %v1315_v0 = vpack.c.bf16 %v1262_v20, %v1261_v41  ;;  %v1264_v41 = vld [vmem:[%s23178_s0 + $0x18a] sm:$0xff] }
 0x1e8   :  { %v13789_v8 = vpop.f32.mrf.mxu0  ;;  %v13943_v26 = vpop.f32.mrf.mxu1 }
 0x1e9   :  { %23224 = vst [vmem:[#allocation30_spill] sm:$0xff] %v17039_v34 }
 0x1ea   :  { %v732_v29 = vpop.f32.mrf.mxu0  ;;  %v1188_v10 = vpop.f32.mrf.mxu1 }
 0x1eb   :  { %v17051_v53 = vadd.f32 %v1188_v10, %v724_v36  ;;  %v1263_v36 = vld [vmem:[%s23178_s0 + $0x182] sm:$0xff] }
 0x1ec   :  { %v13790_v32 = vpop.f32.mrf.mxu0  ;;  %v13944_v13 = vpop.f32.mrf.mxu1 }
 0x1ed   :  { %23225 = vst [vmem:[#allocation31_spill] sm:$0xff] %v17051_v53 }
 0x1ee   :  { %v737_v50 = vpop.f32.mrf.mxu0  ;;  %v1193_v34 = vpop.f32.mrf.mxu1  ;;  %14052 = vmatmul.mubr.msk.bf16.gmra.mxu0 %vm285_vm2, %v1315_v0  ;;  %14202 = vmatmul.mubr.msk.bf16.gmra.mxu1 %vm285_vm2, %v1314_v51 }
 0x1ef   :  { %v17055_v61 = vadd.f32 %v1193_v34, %v729_v4  ;;  %14055 = vmatprep.mubr.msk.bf16.mxu0 %vm15827_vm1, %v23202_v33  ;;  %14205 = vmatprep.mubr.msk.bf16.mxu1 %vm15827_vm1, %v23202_v33  ;;  %v1316_v34 = vpack.c.bf16 %v1264_v41, %v1263_v36  ;;  %v1266_v36 = vld [vmem:[%s23178_s0 + $0x19a] sm:$0xff] }
 0x1f0   :  { %v13793_v20 = vpop.f32.mrf.mxu0  ;;  %v13947_v8 = vpop.f32.mrf.mxu1 }
 0x1f1   :  { %23226 = vst [vmem:[#allocation32_spill] sm:$0xff] %v17055_v61 }
 0x1f2   :  { %v740_v26 = vpop.f32.mrf.mxu0  ;;  %v1196_v51 = vpop.f32.mrf.mxu1 }
 0x1f3   :  { %v17067_v4 = vadd.f32 %v1196_v51, %v732_v29  ;;  %v1265_v29 = vld [vmem:[%s23178_s0 + $0x192] sm:$0xff] }
 0x1f4   :  { %v13794_v10 = vpop.f32.mrf.mxu0  ;;  %v13948_v32 = vpop.f32.mrf.mxu1  ;;  %v1317_v20 = vpack.c.bf16 %v1266_v36, %v1265_v29 }
 0x1f6   :  { %v1201_v13 = vpop.f32.mrf.mxu1  ;;  %v1487_v61 = vpop.f32.mrf.mxu0  ;;  %14056 = vmatmul.mubr.msk.bf16.gmra.mxu0 %vm285_vm2, %v1316_v34  ;;  %14206 = vmatmul.mubr.msk.bf16.gmra.mxu1 %vm285_vm2, %v1315_v0 }
 0x1f7   :  { %v17071_v53 = vadd.f32 %v1201_v13, %v737_v50  ;;  %v1797_v5 = vadd.f32 %v1487_v61, %v16396_v49  ;;  %14059 = vmatprep.mubr.msk.bf16.mxu0 %vm15827_vm1, %v23202_v33  ;;  %14209 = vmatprep.mubr.msk.bf16.mxu1 %vm15827_vm1, %v23202_v33  ;;  %v12377_v49 = vld [vmem:[%s23177_s1 + $0x14] sm:$0xf] }
 0x1f8   :  { %v13951_v41 = vpop.f32.mrf.mxu1  ;;  %v13961_v0 = vpop.f32.mrf.mxu0  ;;  %v3428_v8 = vsel %vm403_vm0, %v12377_v49, 0 }
 0x1f9   :  { %14432 = vmatpush3.bf16.msra.mxu1 %v3428_v8 }
 0x1fa   :  { %v1204_v61 = vpop.f32.mrf.mxu1  ;;  %v1490_v50 = vpop.f32.mrf.mxu0  ;;  %14747 = vmatprep.subr.bf16.mxu1 %v23202_v33 }
 0x1fb   :  { %v17088_v51 = vadd.f32 %v1204_v61, %v740_v26  ;;  %v1798_v10 = vadd.f32 %v1490_v50, %v16411_v59  ;;  %v1267_v59 = vld [vmem:[%s23178_s0 + $0x1a2] sm:$0xff]  ;;  %v1268_v26 = vld [vmem:[%s23178_s0 + $0x1aa] sm:$0xff] }
 0x1fc   :  { %v13952_v32 = vpop.f32.mrf.mxu1  ;;  %v13962_v13 = vpop.f32.mrf.mxu0  ;;  %v1318_v50 = vpack.c.bf16 %v1268_v26, %v1267_v59  ;;  %v1270_v59 = vld [vmem:[%s23178_s0 + $0x1ba] sm:$0xff] }
 0x1fd   :  { %23227 = vst [vmem:[#allocation33_spill] sm:$0xff] %v17088_v51 }
 0x1fe   :  { %v17092_v41 = vpop.f32.mrf.mxu1  ;;  %v1495_v0 = vpop.f32.mrf.mxu0  ;;  %14060 = vmatmul.mubr.msk.bf16.gmra.mxu0 %vm285_vm2, %v1317_v20  ;;  %14210 = vmatmul.mubr.msk.bf16.gmra.mxu1 %vm285_vm2, %v1316_v34 }
 0x1ff   :  { %23228 = vst [vmem:[#allocation34_spill] sm:$0xff] %v17092_v41  ;;  %v1799_v29 = vadd.f32 %v1495_v0, %v16418_v2  ;;  %14063 = vmatprep.mubr.msk.bf16.mxu0 %vm15827_vm1, %v23202_v33  ;;  %14213 = vmatprep.mubr.msk.bf16.mxu1 %vm15827_vm1, %v23202_v33 }
 0x200   :  { %v13955_v36 = vpop.f32.mrf.mxu1  ;;  %v13965_v49 = vpop.f32.mrf.mxu0 }
 0x202   :  { %v1212_v61 = vpop.f32.mrf.mxu1  ;;  %v1498_v34 = vpop.f32.mrf.mxu0 }
 0x203   :  { %v1800_v2 = vadd.f32 %v1498_v34, %v16433_v12  ;;  %v1269_v12 = vld [vmem:[%s23178_s0 + $0x1b2] sm:$0xff] }
 0x204   :  { %v13956_v8 = vpop.f32.mrf.mxu1  ;;  %v13966_v32 = vpop.f32.mrf.mxu0 }
 0x206   :  { %v1503_v13 = vpop.f32.mrf.mxu0  ;;  %14064 = vmatmul.mubr.msk.bf16.gmra.mxu0 %vm285_vm2, %v1318_v50  ;;  %v2146_v0 = vpop.f32.mrf.mxu1  ;;  %14214 = vmatmul.mubr.msk.bf16.gmra.mxu1 %vm285_vm2, %v1317_v20 }
 0x207   :  { %v1801_v41 = vadd.f32 %v1503_v13, %v16440_v18  ;;  %v17111_v51 = vadd.f32 %v2146_v0, %v1797_v5  ;;  %14067 = vmatprep.mubr.msk.bf16.mxu0 %vm15827_vm1, %v23202_v33  ;;  %14217 = vmatprep.mubr.msk.bf16.mxu1 %vm15827_vm1, %v23202_v33  ;;  %v1319_v5 = vpack.c.bf16 %v1270_v59, %v1269_v12 }
 0x208   :  { %v13969_v26 = vpop.f32.mrf.mxu0  ;;  %v14119_v20 = vpop.f32.mrf.mxu1 }
 0x209   :  { %23229 = vst [vmem:[#allocation35_spill] sm:$0xff] %v17111_v51 }
 0x20a   :  { %v1506_v36 = vpop.f32.mrf.mxu0  ;;  %v2149_v18 = vpop.f32.mrf.mxu1 }
 0x20b   :  { %v1802_v49 = vadd.f32 %v1506_v36, %v16455_v28  ;;  %v17124_v61 = vadd.f32 %v2149_v18, %v1798_v10  ;;  %v1271_v28 = vld [vmem:[%s23178_s0 + $0x1c2] sm:$0xff]  ;;  %v1272_v10 = vld [vmem:[%s23178_s0 + $0x1ca] sm:$0xff] }
 0x20c   :  { %v13970_v34 = vpop.f32.mrf.mxu0  ;;  %v14120_v8 = vpop.f32.mrf.mxu1 }
 0x20e   :  { %v1511_v32 = vpop.f32.mrf.mxu0  ;;  %14068 = vmatmul.mubr.msk.bf16.gmra.mxu0 %vm285_vm2, %v1319_v5  ;;  %v2154_v13 = vpop.f32.mrf.mxu1  ;;  %14218 = vmatmul.mubr.msk.bf16.gmra.mxu1 %vm285_vm2, %v1318_v50 }
 0x20f   :  { %v1803_v0 = vadd.f32 %v1511_v32, %v16462_v35  ;;  %v17129_v51 = vadd.f32 %v2154_v13, %v1799_v29  ;;  %14071 = vmatprep.mubr.msk.bf16.mxu0 %vm15827_vm1, %v23202_v33  ;;  %14221 = vmatprep.mubr.msk.bf16.mxu1 %vm15827_vm1, %v23202_v33  ;;  %v1320_v29 = vpack.c.bf16 %v1272_v10, %v1271_v28 }
 0x210   :  { %v13973_v12 = vpop.f32.mrf.mxu0  ;;  %v14123_v50 = vpop.f32.mrf.mxu1 }
 0x212   :  { %v1514_v59 = vpop.f32.mrf.mxu0  ;;  %v2157_v35 = vpop.f32.mrf.mxu1 }
 0x213   :  { %v1804_v26 = vadd.f32 %v1514_v59, %v16477_v45  ;;  %v17142_v20 = vadd.f32 %v2157_v35, %v1800_v2  ;;  %v1273_v45 = vld [vmem:[%s23178_s0 + $0x1d2] sm:$0xff]  ;;  %v1274_v2 = vld [vmem:[%s23178_s0 + $0x1da] sm:$0xff] }
 0x214   :  { %v13974_v36 = vpop.f32.mrf.mxu0  ;;  %v14124_v18 = vpop.f32.mrf.mxu1 }
 0x216   :  { %v1519_v34 = vpop.f32.mrf.mxu0  ;;  %14072 = vmatmul.mubr.msk.bf16.gmra.mxu0 %vm285_vm2, %v1320_v29  ;;  %v2162_v8 = vpop.f32.mrf.mxu1  ;;  %14222 = vmatmul.mubr.msk.bf16.gmra.mxu1 %vm285_vm2, %v1319_v5 }
 0x217   :  { %v1805_v32 = vadd.f32 %v1519_v34, %v16484_v52  ;;  %v17147_v13 = vadd.f32 %v2162_v8, %v1801_v41  ;;  %14075 = vmatprep.mubr.msk.bf16.mxu0 %vm15827_vm1, %v23202_v33  ;;  %14225 = vmatprep.mubr.msk.bf16.mxu1 %vm15827_vm1, %v23202_v33  ;;  %v1321_v41 = vpack.c.bf16 %v1274_v2, %v1273_v45 }
 0x218   :  { %v13977_v28 = vpop.f32.mrf.mxu0  ;;  %v14127_v5 = vpop.f32.mrf.mxu1 }
 0x21a   :  { %v1522_v10 = vpop.f32.mrf.mxu0  ;;  %v2165_v52 = vpop.f32.mrf.mxu1 }
 0x21b   :  { %v1806_v12 = vadd.f32 %v1522_v10, %v16499_v63  ;;  %v17160_v50 = vadd.f32 %v2165_v52, %v1802_v49  ;;  %v1275_v63 = vld [vmem:[%s23178_s0 + $0x1e2] sm:$0xff]  ;;  %v1276_v49 = vld [vmem:[%s23178_s0 + $0x1ea] sm:$0xff] }
 0x21c   :  { %v13978_v59 = vpop.f32.mrf.mxu0  ;;  %v14128_v35 = vpop.f32.mrf.mxu1 }
 0x21e   :  { %v1527_v36 = vpop.f32.mrf.mxu0  ;;  %14076 = vmatmul.mubr.msk.bf16.gmra.mxu0 %vm285_vm2, %v1321_v41  ;;  %v2170_v18 = vpop.f32.mrf.mxu1  ;;  %14226 = vmatmul.mubr.msk.bf16.gmra.mxu1 %vm285_vm2, %v1320_v29 }
 0x21f   :  { %v1807_v34 = vadd.f32 %v1527_v36, %v16506_v7  ;;  %v17165_v8 = vadd.f32 %v2170_v18, %v1803_v0  ;;  %14079 = vmatprep.mubr.msk.bf16.mxu0 %vm15827_vm1, %v23202_v33  ;;  %14229 = vmatprep.mubr.msk.bf16.mxu1 %vm15827_vm1, %v23202_v33  ;;  %v1322_v0 = vpack.c.bf16 %v1276_v49, %v1275_v63 }
 0x220   :  { %v13981_v45 = vpop.f32.mrf.mxu0  ;;  %v14131_v29 = vpop.f32.mrf.mxu1 }
 0x222   :  { %v1530_v2 = vpop.f32.mrf.mxu0  ;;  %v2173_v7 = vpop.f32.mrf.mxu1 }
 0x223   :  { %v1808_v28 = vadd.f32 %v1530_v2, %v16521_v19  ;;  %v17178_v5 = vadd.f32 %v2173_v7, %v1804_v26  ;;  %v1277_v19 = vld [vmem:[%s23178_s0 + $0x1f2] sm:$0xff]  ;;  %v1278_v26 = vld [vmem:[%s23178_s0 + $0x1fa] sm:$0xff] }
 0x224   :  { %v13982_v10 = vpop.f32.mrf.mxu0  ;;  %v14132_v52 = vpop.f32.mrf.mxu1 }
 0x226   :  { %v1535_v59 = vpop.f32.mrf.mxu0  ;;  %14080 = vmatmul.mubr.msk.bf16.gmra.mxu0 %vm285_vm2, %v1322_v0  ;;  %v2178_v35 = vpop.f32.mrf.mxu1  ;;  %14230 = vmatmul.mubr.msk.bf16.gmra.mxu1 %vm285_vm2, %v1321_v41 }
 0x227   :  { %v1809_v36 = vadd.f32 %v1535_v59, %v16528_v25  ;;  %v17183_v18 = vadd.f32 %v2178_v35, %v1805_v32  ;;  %14083 = vmatprep.mubr.msk.bf16.mxu0 %vm15827_vm1, %v23202_v33  ;;  %14233 = vmatprep.mubr.msk.bf16.mxu1 %vm15827_vm1, %v23202_v33  ;;  %v1323_v32 = vpack.c.bf16 %v1278_v26, %v1277_v19 }
 0x228   :  { %v13985_v63 = vpop.f32.mrf.mxu0  ;;  %v14135_v41 = vpop.f32.mrf.mxu1 }
 0x22a   :  { %v1538_v49 = vpop.f32.mrf.mxu0  ;;  %v2181_v25 = vpop.f32.mrf.mxu1 }
 0x22b   :  { %v1810_v45 = vadd.f32 %v1538_v49, %v16543_v38  ;;  %v17196_v29 = vadd.f32 %v2181_v25, %v1806_v12  ;;  %v1279_v38 = vld [vmem:[%s23178_s0 + $0x202] sm:$0xff]  ;;  %v1280_v12 = vld [vmem:[%s23178_s0 + $0x20a] sm:$0xff] }
 0x22c   :  { %v13986_v2 = vpop.f32.mrf.mxu0  ;;  %v14136_v7 = vpop.f32.mrf.mxu1 }
 0x22e   :  { %v1543_v10 = vpop.f32.mrf.mxu0  ;;  %14084 = vmatmul.mubr.msk.bf16.gmra.mxu0 %vm285_vm2, %v1323_v32  ;;  %v2186_v52 = vpop.f32.mrf.mxu1  ;;  %14234 = vmatmul.mubr.msk.bf16.gmra.mxu1 %vm285_vm2, %v1322_v0 }
 0x22f   :  { %v1811_v59 = vadd.f32 %v1543_v10, %v16550_v44  ;;  %v17201_v35 = vadd.f32 %v2186_v52, %v1807_v34  ;;  %14087 = vmatprep.mubr.msk.bf16.mxu0 %vm15827_vm1, %v23202_v33  ;;  %14237 = vmatprep.mubr.msk.bf16.mxu1 %vm15827_vm1, %v23202_v33  ;;  %v1324_v34 = vpack.c.bf16 %v1280_v12, %v1279_v38 }
 0x230   :  { %v13989_v19 = vpop.f32.mrf.mxu0  ;;  %v14139_v0 = vpop.f32.mrf.mxu1 }
 0x232   :  { %v1546_v26 = vpop.f32.mrf.mxu0  ;;  %v2189_v44 = vpop.f32.mrf.mxu1 }
 0x233   :  { %v1812_v63 = vadd.f32 %v1546_v26, %v16565_v57  ;;  %v17214_v41 = vadd.f32 %v2189_v44, %v1808_v28  ;;  %v1281_v57 = vld [vmem:[%s23178_s0 + $0x212] sm:$0xff]  ;;  %v1282_v28 = vld [vmem:[%s23178_s0 + $0x21a] sm:$0xff] }
 0x234   :  { %v13990_v49 = vpop.f32.mrf.mxu0  ;;  %v14140_v25 = vpop.f32.mrf.mxu1 }
 0x236   :  { %v1551_v2 = vpop.f32.mrf.mxu0  ;;  %14088 = vmatmul.mubr.msk.bf16.gmra.mxu0 %vm285_vm2, %v1324_v34  ;;  %v2194_v7 = vpop.f32.mrf.mxu1  ;;  %14238 = vmatmul.mubr.msk.bf16.gmra.mxu1 %vm285_vm2, %v1323_v32 }
 0x237   :  { %v1813_v10 = vadd.f32 %v1551_v2, %v16572_v3  ;;  %v17219_v52 = vadd.f32 %v2194_v7, %v1809_v36  ;;  %14091 = vmatprep.mubr.msk.bf16.mxu0 %vm15827_vm1, %v23202_v33  ;;  %14241 = vmatprep.mubr.msk.bf16.mxu1 %vm15827_vm1, %v23202_v33  ;;  %v1325_v36 = vpack.c.bf16 %v1282_v28, %v1281_v57 }
 0x238   :  { %v13993_v38 = vpop.f32.mrf.mxu0  ;;  %v14143_v32 = vpop.f32.mrf.mxu1 }
 0x23a   :  { %v1554_v12 = vpop.f32.mrf.mxu0  ;;  %v2197_v3 = vpop.f32.mrf.mxu1 }
 0x23b   :  { %v1814_v19 = vadd.f32 %v1554_v12, %v16587_v15  ;;  %v17232_v0 = vadd.f32 %v2197_v3, %v1810_v45  ;;  %v1283_v15 = vld [vmem:[%s23178_s0 + $0x222] sm:$0xff]  ;;  %v1284_v45 = vld [vmem:[%s23178_s0 + $0x22a] sm:$0xff] }
 0x23c   :  { %v13994_v26 = vpop.f32.mrf.mxu0  ;;  %v14144_v44 = vpop.f32.mrf.mxu1 }
 0x23e   :  { %v1559_v49 = vpop.f32.mrf.mxu0  ;;  %14092 = vmatmul.mubr.msk.bf16.gmra.mxu0 %vm285_vm2, %v1325_v36  ;;  %v2202_v25 = vpop.f32.mrf.mxu1  ;;  %14242 = vmatmul.mubr.msk.bf16.gmra.mxu1 %vm285_vm2, %v1324_v34 }
 0x23f   :  { %v1815_v2 = vadd.f32 %v1559_v49, %v16594_v23  ;;  %v17237_v7 = vadd.f32 %v2202_v25, %v1811_v59  ;;  %14095 = vmatprep.mubr.msk.bf16.mxu0 %vm15827_vm1, %v23202_v33  ;;  %14245 = vmatprep.mubr.msk.bf16.mxu1 %vm15827_vm1, %v23202_v33  ;;  %v1326_v59 = vpack.c.bf16 %v1284_v45, %v1283_v15 }
 0x240   :  { %v13997_v57 = vpop.f32.mrf.mxu0  ;;  %v14147_v34 = vpop.f32.mrf.mxu1 }
 0x242   :  { %v1562_v28 = vpop.f32.mrf.mxu0  ;;  %v2205_v23 = vpop.f32.mrf.mxu1 }
 0x243   :  { %v1816_v38 = vadd.f32 %v1562_v28, %v16609_v37  ;;  %v17250_v32 = vadd.f32 %v2205_v23, %v1812_v63  ;;  %v1285_v37 = vld [vmem:[%s23178_s0 + $0x232] sm:$0xff]  ;;  %v1286_v63 = vld [vmem:[%s23178_s0 + $0x23a] sm:$0xff] }
 0x244   :  { %v13998_v12 = vpop.f32.mrf.mxu0  ;;  %v14148_v3 = vpop.f32.mrf.mxu1 }
 0x246   :  { %v1567_v26 = vpop.f32.mrf.mxu0  ;;  %14096 = vmatmul.mubr.msk.bf16.gmra.mxu0 %vm285_vm2, %v1326_v59  ;;  %v2210_v44 = vpop.f32.mrf.mxu1  ;;  %14246 = vmatmul.mubr.msk.bf16.gmra.mxu1 %vm285_vm2, %v1325_v36 }
 0x247   :  { %v1817_v49 = vadd.f32 %v1567_v26, %v16616_v46  ;;  %v17255_v25 = vadd.f32 %v2210_v44, %v1813_v10  ;;  %14099 = vmatprep.mubr.msk.bf16.mxu0 %vm15827_vm1, %v23202_v33  ;;  %14249 = vmatprep.mubr.msk.bf16.mxu1 %vm15827_vm1, %v23202_v33  ;;  %v1327_v10 = vpack.c.bf16 %v1286_v63, %v1285_v37 }
 0x248   :  { %v14001_v15 = vpop.f32.mrf.mxu0  ;;  %v14151_v36 = vpop.f32.mrf.mxu1 }
 0x24a   :  { %v1570_v45 = vpop.f32.mrf.mxu0  ;;  %v2213_v46 = vpop.f32.mrf.mxu1 }
 0x24b   :  { %v1818_v57 = vadd.f32 %v1570_v45, %v16631_v60  ;;  %v17268_v34 = vadd.f32 %v2213_v46, %v1814_v19  ;;  %v1287_v60 = vld [vmem:[%s23178_s0 + $0x242] sm:$0xff]  ;;  %v1288_v19 = vld [vmem:[%s23178_s0 + $0x24a] sm:$0xff] }
 0x24c   :  { %v14002_v28 = vpop.f32.mrf.mxu0  ;;  %v14152_v23 = vpop.f32.mrf.mxu1 }
 0x24e   :  { %v1575_v12 = vpop.f32.mrf.mxu0  ;;  %14100 = vmatmul.mubr.msk.bf16.gmra.mxu0 %vm285_vm2, %v1327_v10  ;;  %v2218_v3 = vpop.f32.mrf.mxu1  ;;  %14250 = vmatmul.mubr.msk.bf16.gmra.mxu1 %vm285_vm2, %v1326_v59 }
 0x24f   :  { %v1819_v26 = vadd.f32 %v1575_v12, %v16638_v6  ;;  %v17273_v44 = vadd.f32 %v2218_v3, %v1815_v2  ;;  %14103 = vmatprep.mubr.msk.bf16.mxu0 %vm15827_vm1, %v23202_v33  ;;  %14253 = vmatprep.mubr.msk.bf16.mxu1 %vm15827_vm1, %v23202_v33  ;;  %v1328_v2 = vpack.c.bf16 %v1288_v19, %v1287_v60 }
 0x250   :  { %v14005_v37 = vpop.f32.mrf.mxu0  ;;  %v14155_v59 = vpop.f32.mrf.mxu1 }
 0x252   :  { %v1578_v63 = vpop.f32.mrf.mxu0  ;;  %v2221_v6 = vpop.f32.mrf.mxu1 }
 0x253   :  { %v1820_v15 = vadd.f32 %v1578_v63, %v16653_v21  ;;  %v17286_v36 = vadd.f32 %v2221_v6, %v1816_v38  ;;  %v1289_v21 = vld [vmem:[%s23178_s0 + $0x252] sm:$0xff]  ;;  %v1290_v38 = vld [vmem:[%s23178_s0 + $0x25a] sm:$0xff] }
 0x254   :  { %v14006_v45 = vpop.f32.mrf.mxu0  ;;  %v14156_v46 = vpop.f32.mrf.mxu1 }
 0x256   :  { %v1583_v28 = vpop.f32.mrf.mxu0  ;;  %14104 = vmatmul.mubr.msk.bf16.gmra.mxu0 %vm285_vm2, %v1328_v2  ;;  %v2226_v23 = vpop.f32.mrf.mxu1  ;;  %14254 = vmatmul.mubr.msk.bf16.gmra.mxu1 %vm285_vm2, %v1327_v10 }
 0x257   :  { %v1821_v12 = vadd.f32 %v1583_v28, %v16660_v30  ;;  %v17291_v3 = vadd.f32 %v2226_v23, %v1817_v49  ;;  %14107 = vmatprep.mubr.msk.bf16.mxu0 %vm15827_vm1, %v23202_v33  ;;  %14257 = vmatprep.mubr.msk.bf16.mxu1 %vm15827_vm1, %v23202_v33  ;;  %v1329_v49 = vpack.c.bf16 %v1290_v38, %v1289_v21 }
 0x258   :  { %v14009_v60 = vpop.f32.mrf.mxu0  ;;  %v14159_v10 = vpop.f32.mrf.mxu1 }
 0x25a   :  { %v1586_v19 = vpop.f32.mrf.mxu0  ;;  %v2229_v30 = vpop.f32.mrf.mxu1 }
 0x25b   :  { %v1822_v37 = vadd.f32 %v1586_v19, %v16675_v47  ;;  %v17304_v59 = vadd.f32 %v2229_v30, %v1818_v57  ;;  %v1291_v47 = vld [vmem:[%s23178_s0 + $0x262] sm:$0x3] }
 0x25c   :  { %v14010_v63 = vpop.f32.mrf.mxu0  ;;  %v14160_v6 = vpop.f32.mrf.mxu1  ;;  %v1330_v10 = vpack.c.bf16 %v1291_v47, %v1291_v47 }
 0x25d   :  { %v1948_v6 = vld [vmem:[%s23178_s0 + $0x262] sm:$0xff] }
 0x25e   :  { %v1591_v45 = vpop.f32.mrf.mxu0  ;;  %14108 = vmatmul.mubr.msk.bf16.gmra.mxu0 %vm285_vm2, %v1329_v49  ;;  %v2234_v46 = vpop.f32.mrf.mxu1  ;;  %14258 = vmatmul.mubr.msk.bf16.gmra.mxu1 %vm285_vm2, %v1328_v2 }
 0x25f   :  { %v1823_v28 = vadd.f32 %v1591_v45, %v16679_v54  ;;  %v17309_v23 = vadd.f32 %v2234_v46, %v1819_v26  ;;  %14111 = vmatprep.mubr.msk.bf16.mxu0 %vm15827_vm1, %v23202_v33  ;;  %14261 = vmatprep.mubr.msk.bf16.mxu1 %vm15827_vm1, %v23202_v33 }
 0x260   :  { %v14013_v57 = vpop.f32.mrf.mxu0  ;;  %v14163_v21 = vpop.f32.mrf.mxu1 }
 0x262   :  { %v1594_v38 = vpop.f32.mrf.mxu0  ;;  %v2237_v60 = vpop.f32.mrf.mxu1 }
 0x263   :  { %v1824_v2 = vadd.f32 %v1594_v38, %v16694_v9  ;;  %v17319_v54 = vadd.f32 %v2237_v60, %v1820_v15  ;;  %v1949_v9 = vld [vmem:[%s23178_s0 + $0x26a] sm:$0xff]  ;;  %v2533_v15 = vld [vmem:[%s23178_s0 + $0x13] sm:$0xff] }
 0x264   :  { %v14014_v26 = vpop.f32.mrf.mxu0  ;;  %v14164_v19 = vpop.f32.mrf.mxu1  ;;  %v1988_v21 = vpack.c.bf16 %v1949_v9, %v1948_v6 }
 0x266   :  { %v1599_v30 = vpop.f32.mrf.mxu0  ;;  %14112 = vmatmul.mubr.msk.bf16.gmra.mxu0 %vm285_vm2, %v1330_v10  ;;  %v2242_v63 = vpop.f32.mrf.mxu1  ;;  %14262 = vmatmul.mubr.msk.bf16.gmra.mxu1 %vm285_vm2, %v1329_v49 }
 0x267   :  { %v1825_v45 = vadd.f32 %v1599_v30, %v16698_v16  ;;  %v17327_v46 = vadd.f32 %v2242_v63, %v1821_v12  ;;  %14265 = vmatprep.mubr.msk.bf16.mxu1 %vm15827_vm1, %v23202_v33  ;;  %14275 = vmatprep.mubr.msk.bf16.mxu0 %vm15827_vm1, %v23202_v33  ;;  %v2534_v16 = vld [vmem:[%s23178_s0 + $0x1b] sm:$0xff] }
 0x268   :  { %v14017_v12 = vpop.f32.mrf.mxu0  ;;  %v14167_v49 = vpop.f32.mrf.mxu1  ;;  %v2610_v38 = vpack.c.bf16 %v2534_v16, %v2533_v15 }
 0x269   :  { %23230 = vst [vmem:[#allocation36_spill] sm:$0xff] %v17327_v46 }
 0x26a   :  { %v1602_v47 = vpop.f32.mrf.mxu0  ;;  %v2245_v57 = vpop.f32.mrf.mxu1 }
 0x26b   :  { %v1826_v60 = vadd.f32 %v1602_v47, %v16710_v31  ;;  %v17343_v10 = vadd.f32 %v2245_v57, %v1822_v37  ;;  %v1950_v31 = vld [vmem:[%s23178_s0 + $0x272] sm:$0x3]  ;;  %v2535_v37 = vld [vmem:[%s23178_s0 + $0x23] sm:$0xff] }
 0x26c   :  { %v14018_v26 = vpop.f32.mrf.mxu0  ;;  %v14168_v19 = vpop.f32.mrf.mxu1  ;;  %v1989_v16 = vpack.c.bf16 %v1950_v31, %v1950_v31 }
 0x26e   :  { %v1607_v30 = vpop.f32.mrf.mxu0  ;;  %v2250_v63 = vpop.f32.mrf.mxu1  ;;  %14266 = vmatmul.mubr.msk.bf16.gmra.mxu1 %vm285_vm2, %v1988_v21  ;;  %14276 = vmatmul.mubr.msk.bf16.vlgmr.msra.gmra.mxu0 %vm285_vm2, %v2610_v38 }
 0x26f   :  { %v1827_v46 = vadd.f32 %v1607_v30, %v16714_v40  ;;  %v17348_v12 = vadd.f32 %v2250_v63, %v1823_v28  ;;  %14269 = vmatprep.mubr.msk.bf16.mxu1 %vm15827_vm1, %v23202_v33  ;;  %14279 = vmatprep.mubr.msk.bf16.mxu0 %vm15827_vm1, %v23202_v33  ;;  %v2536_v40 = vld [vmem:[%s23178_s0 + $0x2b] sm:$0xff]  ;;  %v2537_v30 = vld [vmem:[%s23178_s0 + $0x33] sm:$0xff] }
 0x270   :  { %v14021_v28 = vpop.f32.mrf.mxu0  ;;  %v14171_v6 = vpop.f32.mrf.mxu1  ;;  %v2611_v49 = vpack.c.bf16 %v2536_v40, %v2535_v37 }
 0x272   :  { %v1610_v9 = vpop.f32.mrf.mxu0  ;;  %v2253_v15 = vpop.f32.mrf.mxu1 }
 0x273   :  { %v1828_v47 = vadd.f32 %v1610_v9, %v16726_v55  ;;  %v17364_v57 = vadd.f32 %v2253_v15, %v1824_v2  ;;  %v2538_v55 = vld [vmem:[%s23178_s0 + $0x3b] sm:$0xff] }
 0x274   :  { %v14022_v21 = vpop.f32.mrf.mxu0  ;;  %v14172_v38 = vpop.f32.mrf.mxu1  ;;  %v3192_v2 = vld [vmem:[%s23178_s0 + $0x14] sm:$0xff]  ;;  %v2612_v6 = vpack.c.bf16 %v2538_v55, %v2537_v30 }
 0x276   :  { %v1615_v26 = vpop.f32.mrf.mxu0  ;;  %v2258_v19 = vpop.f32.mrf.mxu1  ;;  %14270 = vmatmul.mubr.msk.bf16.gmra.mxu1 %vm285_vm2, %v1989_v16  ;;  %14280 = vmatmul.mubr.msk.bf16.gmra.mxu0 %vm285_vm2, %v2611_v49 }
 0x277   :  { %v1829_v63 = vadd.f32 %v1615_v26, %v16730_v1  ;;  %v17372_v31 = vadd.f32 %v2258_v19, %v1825_v45  ;;  %14283 = vmatprep.mubr.msk.bf16.mxu0 %vm15827_vm1, %v23202_v33  ;;  %14433 = vmatprep.mubr.msk.bf16.mxu1 %vm15827_vm1, %v23202_v33  ;;  %v3193_v1 = vld [vmem:[%s23178_s0 + $0x1c] sm:$0xff] }
 0x278   :  { %v14025_v45 = vpop.f32.mrf.mxu0  ;;  %v14175_v37 = vpop.f32.mrf.mxu1  ;;  %v3269_v9 = vpack.c.bf16 %v3193_v1, %v3192_v2  ;;  %v2539_v19 = vld [vmem:[%s23178_s0 + $0x43] sm:$0xff] }
 0x27a   :  { %v1618_v40 = vpop.f32.mrf.mxu0  ;;  %v2261_v28 = vpop.f32.mrf.mxu1 }
 0x27b   :  { %v1830_v15 = vadd.f32 %v1618_v40, %v16742_v17  ;;  %v17388_v16 = vadd.f32 %v2261_v28, %v1826_v60  ;;  %v2540_v17 = vld [vmem:[%s23178_s0 + $0x4b] sm:$0xff] }
 0x27c   :  { %v14026_v49 = vpop.f32.mrf.mxu0  ;;  %v14176_v21 = vpop.f32.mrf.mxu1  ;;  %v3194_v60 = vld [vmem:[%s23178_s0 + $0x24] sm:$0xff]  ;;  %v2613_v37 = vpack.c.bf16 %v2540_v17, %v2539_v19 }
 0x27e   :  { %v1623_v38 = vpop.f32.mrf.mxu0  ;;  %v2266_v26 = vpop.f32.mrf.mxu1  ;;  %14284 = vmatmul.mubr.msk.bf16.gmra.mxu0 %vm285_vm2, %v2612_v6  ;;  %14434 = vmatmul.mubr.msk.bf16.vlgmr.msra.gmra.mxu1 %vm285_vm2, %v3269_v9 }
 0x27f   :  { %v1831_v45 = vadd.f32 %v1623_v38, %v16746_v27  ;;  %v17396_v30 = vadd.f32 %v2266_v26, %v1827_v46  ;;  %14287 = vmatprep.mubr.msk.bf16.mxu0 %vm15827_vm1, %v23202_v33  ;;  %14437 = vmatprep.mubr.msk.bf16.mxu1 %vm15827_vm1, %v23202_v33  ;;  %v3195_v27 = vld [vmem:[%s23178_s0 + $0x2c] sm:$0xff] }
 0x280   :  { %v14029_v46 = vpop.f32.mrf.mxu0  ;;  %v14179_v55 = vpop.f32.mrf.mxu1  ;;  %v3270_v40 = vpack.c.bf16 %v3195_v27, %v3194_v60  ;;  %v2541_v26 = vld [vmem:[%s23178_s0 + $0x53] sm:$0xff] }
 0x282   :  { %v1626_v2 = vpop.f32.mrf.mxu0  ;;  %v2269_v1 = vpop.f32.mrf.mxu1 }
 0x283   :  { %v1832_v28 = vadd.f32 %v1626_v2, %v16758_v43  ;;  %v17412_v6 = vadd.f32 %v2269_v1, %v1828_v47  ;;  %v2542_v43 = vld [vmem:[%s23178_s0 + $0x5b] sm:$0xff] }
 0x284   :  { %v14030_v9 = vpop.f32.mrf.mxu0  ;;  %v14180_v49 = vpop.f32.mrf.mxu1  ;;  %v3196_v47 = vld [vmem:[%s23178_s0 + $0x34] sm:$0xff]  ;;  %v2614_v55 = vpack.c.bf16 %v2542_v43, %v2541_v26 }
 0x286   :  { %v1631_v21 = vpop.f32.mrf.mxu0  ;;  %v2274_v38 = vpop.f32.mrf.mxu1  ;;  %14288 = vmatmul.mubr.msk.bf16.gmra.mxu0 %vm285_vm2, %v2613_v37  ;;  %14438 = vmatmul.mubr.msk.bf16.gmra.mxu1 %vm285_vm2, %v3270_v40 }
 0x287   :  { %v1833_v46 = vadd.f32 %v1631_v21, %v16762_v56  ;;  %v17420_v19 = vadd.f32 %v2274_v38, %v1829_v63  ;;  %14291 = vmatprep.mubr.msk.bf16.mxu0 %vm15827_vm1, %v23202_v33  ;;  %14441 = vmatprep.mubr.msk.bf16.mxu1 %vm15827_vm1, %v23202_v33  ;;  %v3197_v56 = vld [vmem:[%s23178_s0 + $0x3c] sm:$0xff] }
 0x288   :  { %v14033_v63 = vpop.f32.mrf.mxu0  ;;  %v14183_v17 = vpop.f32.mrf.mxu1  ;;  %v3271_v2 = vpack.c.bf16 %v3197_v56, %v3196_v47  ;;  %v2543_v38 = vld [vmem:[%s23178_s0 + $0x63] sm:$0xff] }
 0x28a   :  { %v1634_v60 = vpop.f32.mrf.mxu0  ;;  %v2277_v27 = vpop.f32.mrf.mxu1 }
 0x28b   :  { %v1834_v1 = vadd.f32 %v1634_v60, %v16774_v11  ;;  %v17436_v37 = vadd.f32 %v2277_v27, %v1830_v15  ;;  %v2544_v11 = vld [vmem:[%s23178_s0 + $0x6b] sm:$0xff] }
 0x28c   :  { %v14034_v40 = vpop.f32.mrf.mxu0  ;;  %v14184_v9 = vpop.f32.mrf.mxu1  ;;  %v3198_v15 = vld [vmem:[%s23178_s0 + $0x44] sm:$0xff]  ;;  %v2615_v17 = vpack.c.bf16 %v2544_v11, %v2543_v38 }
 0x28e   :  { %v1639_v49 = vpop.f32.mrf.mxu0  ;;  %v2282_v21 = vpop.f32.mrf.mxu1  ;;  %14292 = vmatmul.mubr.msk.bf16.gmra.mxu0 %vm285_vm2, %v2614_v55  ;;  %14442 = vmatmul.mubr.msk.bf16.gmra.mxu1 %vm285_vm2, %v3271_v2 }
 0x28f   :  { %v1835_v63 = vadd.f32 %v1639_v49, %v16778_v24  ;;  %v17444_v26 = vadd.f32 %v2282_v21, %v1831_v45  ;;  %14295 = vmatprep.mubr.msk.bf16.mxu0 %vm15827_vm1, %v23202_v33  ;;  %14445 = vmatprep.mubr.msk.bf16.mxu1 %vm15827_vm1, %v23202_v33  ;;  %v3199_v24 = vld [vmem:[%s23178_s0 + $0x4c] sm:$0xff] }
 0x290   :  { %v14037_v45 = vpop.f32.mrf.mxu0  ;;  %v14187_v43 = vpop.f32.mrf.mxu1  ;;  %v3272_v60 = vpack.c.bf16 %v3199_v24, %v3198_v15  ;;  %v2545_v21 = vld [vmem:[%s23178_s0 + $0x73] sm:$0xff] }
 0x292   :  { %v1642_v47 = vpop.f32.mrf.mxu0  ;;  %v2285_v56 = vpop.f32.mrf.mxu1 }
 0x293   :  { %v1836_v27 = vadd.f32 %v1642_v47, %v16790_v42  ;;  %v17460_v55 = vadd.f32 %v2285_v56, %v1832_v28  ;;  %v2546_v42 = vld [vmem:[%s23178_s0 + $0x7b] sm:$0xff] }
 0x294   :  { %v14038_v2 = vpop.f32.mrf.mxu0  ;;  %v14188_v40 = vpop.f32.mrf.mxu1  ;;  %v3200_v28 = vld [vmem:[%s23178_s0 + $0x54] sm:$0xff]  ;;  %v2616_v43 = vpack.c.bf16 %v2546_v42, %v2545_v21 }
 0x296   :  { %v1647_v9 = vpop.f32.mrf.mxu0  ;;  %v2290_v49 = vpop.f32.mrf.mxu1  ;;  %14296 = vmatmul.mubr.msk.bf16.gmra.mxu0 %vm285_vm2, %v2615_v17  ;;  %14446 = vmatmul.mubr.msk.bf16.gmra.mxu1 %vm285_vm2, %v3272_v60 }
 0x297   :  { %v1837_v45 = vadd.f32 %v1647_v9, %v16794_v58  ;;  %v17468_v38 = vadd.f32 %v2290_v49, %v1833_v46  ;;  %14299 = vmatprep.mubr.msk.bf16.mxu0 %vm15827_vm1, %v23202_v33  ;;  %14449 = vmatprep.mubr.msk.bf16.mxu1 %vm15827_vm1, %v23202_v33  ;;  %v3201_v58 = vld [vmem:[%s23178_s0 + $0x5c] sm:$0xff] }
 0x298   :  { %v14041_v46 = vpop.f32.mrf.mxu0  ;;  %v14191_v11 = vpop.f32.mrf.mxu1  ;;  %v3273_v47 = vpack.c.bf16 %v3201_v58, %v3200_v28  ;;  %v2547_v49 = vld [vmem:[%s23178_s0 + $0x83] sm:$0xff] }
 0x29a   :  { %v1650_v15 = vpop.f32.mrf.mxu0  ;;  %v2293_v24 = vpop.f32.mrf.mxu1 }
 0x29b   :  { %v1838_v56 = vadd.f32 %v1650_v15, %v16806_v14  ;;  %v17484_v17 = vadd.f32 %v2293_v24, %v1834_v1  ;;  %v2548_v14 = vld [vmem:[%s23178_s0 + $0x8b] sm:$0xff] }
 0x29c   :  { %v14042_v60 = vpop.f32.mrf.mxu0  ;;  %v14192_v2 = vpop.f32.mrf.mxu1  ;;  %v3202_v1 = vld [vmem:[%s23178_s0 + $0x64] sm:$0xff]  ;;  %v2617_v11 = vpack.c.bf16 %v2548_v14, %v2547_v49 }
 0x29e   :  { %v1655_v40 = vpop.f32.mrf.mxu0  ;;  %v2298_v9 = vpop.f32.mrf.mxu1  ;;  %14300 = vmatmul.mubr.msk.bf16.gmra.mxu0 %vm285_vm2, %v2616_v43  ;;  %14450 = vmatmul.mubr.msk.bf16.gmra.mxu1 %vm285_vm2, %v3273_v47 }
 0x29f   :  { %v1839_v46 = vadd.f32 %v1655_v40, %v16814_v39  ;;  %v17492_v21 = vadd.f32 %v2298_v9, %v1835_v63  ;;  %14303 = vmatprep.mubr.msk.bf16.mxu0 %vm15827_vm1, %v23202_v33  ;;  %14453 = vmatprep.mubr.msk.bf16.mxu1 %vm15827_vm1, %v23202_v33  ;;  %v3203_v39 = vld [vmem:[%s23178_s0 + $0x6c] sm:$0xff] }
 0x2a0   :  { %v14045_v63 = vpop.f32.mrf.mxu0  ;;  %v14195_v42 = vpop.f32.mrf.mxu1  ;;  %v3274_v15 = vpack.c.bf16 %v3203_v39, %v3202_v1  ;;  %v2549_v9 = vld [vmem:[%s23178_s0 + $0x93] sm:$0xff] }
 0x2a2   :  { %v1658_v28 = vpop.f32.mrf.mxu0  ;;  %v2301_v58 = vpop.f32.mrf.mxu1 }
 0x2a3   :  { %v1840_v24 = vadd.f32 %v1658_v28, %v16827_v62  ;;  %v17508_v43 = vadd.f32 %v2301_v58, %v1836_v27  ;;  %v2550_v62 = vld [vmem:[%s23178_s0 + $0x9b] sm:$0xff] }
 0x2a4   :  { %v14046_v47 = vpop.f32.mrf.mxu0  ;;  %v14196_v60 = vpop.f32.mrf.mxu1  ;;  %v3204_v27 = vld [vmem:[%s23178_s0 + $0x74] sm:$0xff]  ;;  %v2618_v42 = vpack.c.bf16 %v2550_v62, %v2549_v9 }
 0x2a6   :  { %v1663_v2 = vpop.f32.mrf.mxu0  ;;  %v2306_v40 = vpop.f32.mrf.mxu1  ;;  %14304 = vmatmul.mubr.msk.bf16.gmra.mxu0 %vm285_vm2, %v2617_v11  ;;  %14454 = vmatmul.mubr.msk.bf16.gmra.mxu1 %vm285_vm2, %v3274_v15  ;;  %v12417_v15 = vld [vmem:[%s23177_s1 + $0x18] sm:$0xf] }
 0x2a7   :  { %v1841_v63 = vadd.f32 %v1663_v2, %v16831_v22  ;;  %v17516_v49 = vadd.f32 %v2306_v40, %v1837_v45  ;;  %14307 = vmatprep.mubr.msk.bf16.mxu0 %vm15827_vm1, %v23202_v33  ;;  %14457 = vmatprep.mubr.msk.bf16.mxu1 %vm15827_vm1, %v23202_v33  ;;  %v3205_v22 = vld [vmem:[%s23178_s0 + $0x7c] sm:$0xff]  ;;  %v4087_v2 = vsel %vm403_vm0, %v12417_v15, 0 }
 0x2a8   :  { %v14049_v45 = vpop.f32.mrf.mxu0  ;;  %v14199_v14 = vpop.f32.mrf.mxu1  ;;  %v3275_v28 = vpack.c.bf16 %v3205_v22, %v3204_v27  ;;  %14590 = vmatpush3.bf16.msra.mxu0 %v4087_v2  ;;  %v2552_v27 = vld [vmem:[%s23178_s0 + $0xab] sm:$0xff] }
 0x2a9   :  { %v3206_v22 = vld [vmem:[%s23178_s0 + $0x84] sm:$0xff]  ;;  %v3207_v14 = vld [vmem:[%s23178_s0 + $0x8c] sm:$0xff]  ;;  %14905 = vmatprep.subr.bf16.mxu0 %v23202_v33 }
 0x2aa   :  { %v1666_v1 = vpop.f32.mrf.mxu0  ;;  %v2309_v39 = vpop.f32.mrf.mxu1  ;;  %v3276_v15 = vpack.c.bf16 %v3207_v14, %v3206_v22  ;;  %v3209_v22 = vld [vmem:[%s23178_s0 + $0x9c] sm:$0xff] }
 0x2ab   :  { %v1842_v58 = vadd.f32 %v1666_v1, %v16843_v48  ;;  %v17532_v11 = vadd.f32 %v2309_v39, %v1838_v56  ;;  %v2551_v48 = vld [vmem:[%s23178_s0 + $0xa3] sm:$0xff]  ;;  %v23232_v56 = vld [vmem:[#allocation6_spill] sm:$0xff] }
 0x2ac   :  { %v14050_v47 = vpop.f32.mrf.mxu0  ;;  %v14200_v60 = vpop.f32.mrf.mxu1 }
 0x2ad   :  { %23231 = vst [vmem:[#allocation37_spill] sm:$0xff] %v17532_v11  ;;  %v23234_v47 = vld [vmem:[#allocation7_spill] sm:$0xff] }
 0x2ae   :  { %v1671_v40 = vpop.f32.mrf.mxu0  ;;  %v2314_v45 = vpop.f32.mrf.mxu1  ;;  %14308 = vmatmul.mubr.msk.bf16.gmra.mxu0 %vm285_vm2, %v2618_v42  ;;  %14458 = vmatmul.mubr.msk.bf16.gmra.mxu1 %vm285_vm2, %v3275_v28  ;;  %v2619_v28 = vpack.c.bf16 %v2552_v27, %v2551_v48  ;;  %v3208_v27 = vld [vmem:[%s23178_s0 + $0x94] sm:$0xff] }
 0x2af   :  { %v1843_v9 = vadd.f32 %v1671_v40, %v23232_v56  ;;  %v17544_v62 = vadd.f32 %v2314_v45, %v1839_v46  ;;  %14311 = vmatprep.mubr.msk.bf16.mxu0 %vm15827_vm1, %v23202_v33  ;;  %14461 = vmatprep.mubr.msk.bf16.mxu1 %vm15827_vm1, %v23202_v33 }
 0x2b0   :  { %v14053_v46 = vpop.f32.mrf.mxu0  ;;  %v14203_v1 = vpop.f32.mrf.mxu1 }
 0x2b1   :  { %23233 = vst [vmem:[#allocation6_spill] sm:$0xff] %v17544_v62  ;;  %v2553_v46 = vld [vmem:[%s23178_s0 + $0xb3] sm:$0xff]  ;;  %v23236_v1 = vld [vmem:[#allocation8_spill] sm:$0xff] }
 0x2b2   :  { %v1674_v39 = vpop.f32.mrf.mxu0  ;;  %v2317_v42 = vpop.f32.mrf.mxu1 }
 0x2b3   :  { %v1844_v60 = vadd.f32 %v1674_v39, %v23234_v47  ;;  %v17561_v2 = vadd.f32 %v2317_v42, %v1840_v24  ;;  %v2554_v24 = vld [vmem:[%s23178_s0 + $0xbb] sm:$0xff] }
 0x2b4   :  { %v14054_v40 = vpop.f32.mrf.mxu0  ;;  %v14204_v45 = vpop.f32.mrf.mxu1  ;;  %v2620_v42 = vpack.c.bf16 %v2554_v24, %v2553_v46  ;;  %v3210_v24 = vld [vmem:[%s23178_s0 + $0xa4] sm:$0xff] }
 0x2b5   :  { %23235 = vst [vmem:[#allocation7_spill] sm:$0xff] %v17561_v2 }
 0x2b6   :  { %v1679_v56 = vpop.f32.mrf.mxu0  ;;  %v2322_v62 = vpop.f32.mrf.mxu1  ;;  %14312 = vmatmul.mubr.msk.bf16.gmra.mxu0 %vm285_vm2, %v2619_v28  ;;  %14462 = vmatmul.mubr.msk.bf16.gmra.mxu1 %vm285_vm2, %v3276_v15  ;;  %v3277_v28 = vpack.c.bf16 %v3209_v22, %v3208_v27  ;;  %v23238_v15 = vld [vmem:[#allocation9_spill] sm:$0xff] }
 0x2b7   :  { %v1845_v11 = vadd.f32 %v1679_v56, %v23236_v1  ;;  %v17569_v48 = vadd.f32 %v2322_v62, %v1841_v63  ;;  %14315 = vmatprep.mubr.msk.bf16.mxu0 %vm15827_vm1, %v23202_v33  ;;  %14465 = vmatprep.mubr.msk.bf16.mxu1 %vm15827_vm1, %v23202_v33  ;;  %v3211_v27 = vld [vmem:[%s23178_s0 + $0xac] sm:$0xff] }
 0x2b8   :  { %v14057_v63 = vpop.f32.mrf.mxu0  ;;  %v14207_v62 = vpop.f32.mrf.mxu1 }
 0x2b9   :  { %23237 = vst [vmem:[#allocation8_spill] sm:$0xff] %v17569_v48  ;;  %v2555_v63 = vld [vmem:[%s23178_s0 + $0xc3] sm:$0xff]  ;;  %v23240_v62 = vld [vmem:[#allocation10_spill] sm:$0xff] }
 0x2ba   :  { %v1682_v14 = vpop.f32.mrf.mxu0  ;;  %v2325_v39 = vpop.f32.mrf.mxu1 }
 0x2bb   :  { %v1846_v47 = vadd.f32 %v1682_v14, %v23238_v15  ;;  %v17585_v40 = vadd.f32 %v2325_v39, %v1842_v58  ;;  %v2556_v58 = vld [vmem:[%s23178_s0 + $0xcb] sm:$0xff] }
 0x2bc   :  { %v14058_v45 = vpop.f32.mrf.mxu0  ;;  %v14208_v56 = vpop.f32.mrf.mxu1  ;;  %v2621_v39 = vpack.c.bf16 %v2556_v58, %v2555_v63  ;;  %v3212_v58 = vld [vmem:[%s23178_s0 + $0xb4] sm:$0xff] }
 0x2bd   :  { %23239 = vst [vmem:[#allocation9_spill] sm:$0xff] %v17585_v40 }
 0x2be   :  { %v1687_v1 = vpop.f32.mrf.mxu0  ;;  %v2330_v48 = vpop.f32.mrf.mxu1  ;;  %14316 = vmatmul.mubr.msk.bf16.gmra.mxu0 %vm285_vm2, %v2620_v42  ;;  %14466 = vmatmul.mubr.msk.bf16.gmra.mxu1 %vm285_vm2, %v3277_v28  ;;  %v3278_v42 = vpack.c.bf16 %v3211_v27, %v3210_v24  ;;  %v23242_v28 = vld [vmem:[#allocation11_spill] sm:$0xff] }
 0x2bf   :  { %v1847_v2 = vadd.f32 %v1687_v1, %v23240_v62  ;;  %v17593_v46 = vadd.f32 %v2330_v48, %v1843_v9  ;;  %14319 = vmatprep.mubr.msk.bf16.mxu0 %vm15827_vm1, %v23202_v33  ;;  %14469 = vmatprep.mubr.msk.bf16.mxu1 %vm15827_vm1, %v23202_v33  ;;  %v3213_v24 = vld [vmem:[%s23178_s0 + $0xbc] sm:$0xff] }
 0x2c0   :  { %v14061_v9 = vpop.f32.mrf.mxu0  ;;  %v14211_v48 = vpop.f32.mrf.mxu1 }
 0x2c1   :  { %23241 = vst [vmem:[#allocation10_spill] sm:$0xff] %v17593_v46  ;;  %v2557_v9 = vld [vmem:[%s23178_s0 + $0xd3] sm:$0xff]  ;;  %v23244_v48 = vld [vmem:[#allocation12_spill] sm:$0xff] }
 0x2c2   :  { %v1690_v22 = vpop.f32.mrf.mxu0  ;;  %v2333_v14 = vpop.f32.mrf.mxu1 }
 0x2c3   :  { %v1848_v15 = vadd.f32 %v1690_v22, %v23242_v28  ;;  %v17609_v45 = vadd.f32 %v2333_v14, %v1844_v60  ;;  %v2558_v60 = vld [vmem:[%s23178_s0 + $0xdb] sm:$0xff] }
 0x2c4   :  { %v14062_v56 = vpop.f32.mrf.mxu0  ;;  %v14212_v1 = vpop.f32.mrf.mxu1  ;;  %v2622_v14 = vpack.c.bf16 %v2558_v60, %v2557_v9  ;;  %v3214_v60 = vld [vmem:[%s23178_s0 + $0xc4] sm:$0xff] }
 0x2c5   :  { %23243 = vst [vmem:[#allocation11_spill] sm:$0xff] %v17609_v45 }
 0x2c6   :  { %v1695_v62 = vpop.f32.mrf.mxu0  ;;  %v2338_v46 = vpop.f32.mrf.mxu1  ;;  %14320 = vmatmul.mubr.msk.bf16.gmra.mxu0 %vm285_vm2, %v2621_v39  ;;  %14470 = vmatmul.mubr.msk.bf16.gmra.mxu1 %vm285_vm2, %v3278_v42  ;;  %v3279_v39 = vpack.c.bf16 %v3213_v24, %v3212_v58  ;;  %v23246_v42 = vld [vmem:[#allocation13_spill] sm:$0xff] }
 0x2c7   :  { %v1849_v40 = vadd.f32 %v1695_v62, %v23244_v48  ;;  %v17617_v63 = vadd.f32 %v2338_v46, %v1845_v11  ;;  %14323 = vmatprep.mubr.msk.bf16.mxu0 %vm15827_vm1, %v23202_v33  ;;  %14473 = vmatprep.mubr.msk.bf16.mxu1 %vm15827_vm1, %v23202_v33  ;;  %v3215_v58 = vld [vmem:[%s23178_s0 + $0xcc] sm:$0xff] }
 0x2c8   :  { %v14065_v11 = vpop.f32.mrf.mxu0  ;;  %v14215_v46 = vpop.f32.mrf.mxu1 }
 0x2c9   :  { %23245 = vst [vmem:[#allocation12_spill] sm:$0xff] %v17617_v63  ;;  %v2559_v11 = vld [vmem:[%s23178_s0 + $0xe3] sm:$0xff]  ;;  %v23248_v46 = vld [vmem:[#allocation14_spill] sm:$0xff] }
 0x2ca   :  { %v1698_v27 = vpop.f32.mrf.mxu0  ;;  %v2341_v22 = vpop.f32.mrf.mxu1 }
 0x2cb   :  { %v1850_v28 = vadd.f32 %v1698_v27, %v23246_v42  ;;  %v17633_v56 = vadd.f32 %v2341_v22, %v1846_v47  ;;  %v2560_v47 = vld [vmem:[%s23178_s0 + $0xeb] sm:$0xff] }
 0x2cc   :  { %v14066_v1 = vpop.f32.mrf.mxu0  ;;  %v14216_v62 = vpop.f32.mrf.mxu1  ;;  %v2623_v22 = vpack.c.bf16 %v2560_v47, %v2559_v11  ;;  %v3216_v47 = vld [vmem:[%s23178_s0 + $0xd4] sm:$0xff] }
 0x2cd   :  { %23247 = vst [vmem:[#allocation13_spill] sm:$0xff] %v17633_v56 }
 0x2ce   :  { %v1703_v48 = vpop.f32.mrf.mxu0  ;;  %v2346_v63 = vpop.f32.mrf.mxu1  ;;  %14324 = vmatmul.mubr.msk.bf16.gmra.mxu0 %vm285_vm2, %v2622_v14  ;;  %14474 = vmatmul.mubr.msk.bf16.gmra.mxu1 %vm285_vm2, %v3279_v39  ;;  %v3280_v14 = vpack.c.bf16 %v3215_v58, %v3214_v60  ;;  %v23250_v39 = vld [vmem:[#allocation15_spill] sm:$0xff] }
 0x2cf   :  { %v1851_v45 = vadd.f32 %v1703_v48, %v23248_v46  ;;  %v17641_v9 = vadd.f32 %v2346_v63, %v1847_v2  ;;  %14327 = vmatprep.mubr.msk.bf16.mxu0 %vm15827_vm1, %v23202_v33  ;;  %14477 = vmatprep.mubr.msk.bf16.mxu1 %vm15827_vm1, %v23202_v33  ;;  %v3217_v60 = vld [vmem:[%s23178_s0 + $0xdc] sm:$0xff] }
 0x2d0   :  { %v14069_v2 = vpop.f32.mrf.mxu0  ;;  %v14219_v63 = vpop.f32.mrf.mxu1 }
 0x2d1   :  { %23249 = vst [vmem:[#allocation14_spill] sm:$0xff] %v17641_v9  ;;  %v2561_v2 = vld [vmem:[%s23178_s0 + $0xf3] sm:$0xff]  ;;  %v23252_v63 = vld [vmem:[#allocation16_spill] sm:$0xff] }
 0x2d2   :  { %v1706_v24 = vpop.f32.mrf.mxu0  ;;  %v2349_v27 = vpop.f32.mrf.mxu1 }
 0x2d3   :  { %v1852_v42 = vadd.f32 %v1706_v24, %v23250_v39  ;;  %v17657_v1 = vadd.f32 %v2349_v27, %v1848_v15  ;;  %v2562_v15 = vld [vmem:[%s23178_s0 + $0xfb] sm:$0xff] }
 0x2d4   :  { %v14070_v62 = vpop.f32.mrf.mxu0  ;;  %v14220_v48 = vpop.f32.mrf.mxu1  ;;  %v2624_v27 = vpack.c.bf16 %v2562_v15, %v2561_v2  ;;  %v3218_v15 = vld [vmem:[%s23178_s0 + $0xe4] sm:$0xff] }
 0x2d5   :  { %23251 = vst [vmem:[#allocation15_spill] sm:$0xff] %v17657_v1 }
 0x2d6   :  { %v1711_v46 = vpop.f32.mrf.mxu0  ;;  %v2354_v9 = vpop.f32.mrf.mxu1  ;;  %14328 = vmatmul.mubr.msk.bf16.gmra.mxu0 %vm285_vm2, %v2623_v22  ;;  %14478 = vmatmul.mubr.msk.bf16.gmra.mxu1 %vm285_vm2, %v3280_v14  ;;  %v3281_v22 = vpack.c.bf16 %v3217_v60, %v3216_v47  ;;  %v23254_v14 = vld [vmem:[#allocation17_spill] sm:$0xff] }
 0x2d7   :  { %v1853_v56 = vadd.f32 %v1711_v46, %v23252_v63  ;;  %v17665_v11 = vadd.f32 %v2354_v9, %v1849_v40  ;;  %14331 = vmatprep.mubr.msk.bf16.mxu0 %vm15827_vm1, %v23202_v33  ;;  %14481 = vmatprep.mubr.msk.bf16.mxu1 %vm15827_vm1, %v23202_v33  ;;  %v3219_v47 = vld [vmem:[%s23178_s0 + $0xec] sm:$0xff] }
 0x2d8   :  { %v14073_v40 = vpop.f32.mrf.mxu0  ;;  %v14223_v9 = vpop.f32.mrf.mxu1 }
 0x2d9   :  { %23253 = vst [vmem:[#allocation16_spill] sm:$0xff] %v17665_v11  ;;  %v2563_v40 = vld [vmem:[%s23178_s0 + $0x103] sm:$0xff]  ;;  %v23256_v9 = vld [vmem:[#allocation18_spill] sm:$0xff] }
 0x2da   :  { %v1714_v58 = vpop.f32.mrf.mxu0  ;;  %v2357_v24 = vpop.f32.mrf.mxu1 }
 0x2db   :  { %v1854_v39 = vadd.f32 %v1714_v58, %v23254_v14  ;;  %v17681_v62 = vadd.f32 %v2357_v24, %v1850_v28  ;;  %v2564_v28 = vld [vmem:[%s23178_s0 + $0x10b] sm:$0xff] }
 0x2dc   :  { %v14074_v48 = vpop.f32.mrf.mxu0  ;;  %v14224_v46 = vpop.f32.mrf.mxu1  ;;  %v2625_v24 = vpack.c.bf16 %v2564_v28, %v2563_v40  ;;  %v3220_v28 = vld [vmem:[%s23178_s0 + $0xf4] sm:$0xff] }
 0x2dd   :  { %23255 = vst [vmem:[#allocation17_spill] sm:$0xff] %v17681_v62 }
 0x2de   :  { %v1719_v63 = vpop.f32.mrf.mxu0  ;;  %v2362_v11 = vpop.f32.mrf.mxu1  ;;  %14332 = vmatmul.mubr.msk.bf16.gmra.mxu0 %vm285_vm2, %v2624_v27  ;;  %14482 = vmatmul.mubr.msk.bf16.gmra.mxu1 %vm285_vm2, %v3281_v22  ;;  %v3282_v27 = vpack.c.bf16 %v3219_v47, %v3218_v15  ;;  %v23258_v22 = vld [vmem:[#allocation19_spill] sm:$0xff] }
 0x2df   :  { %v1855_v1 = vadd.f32 %v1719_v63, %v23256_v9  ;;  %v17689_v2 = vadd.f32 %v2362_v11, %v1851_v45  ;;  %14335 = vmatprep.mubr.msk.bf16.mxu0 %vm15827_vm1, %v23202_v33  ;;  %14485 = vmatprep.mubr.msk.bf16.mxu1 %vm15827_vm1, %v23202_v33  ;;  %v3221_v15 = vld [vmem:[%s23178_s0 + $0xfc] sm:$0xff] }
 0x2e0   :  { %v14077_v45 = vpop.f32.mrf.mxu0  ;;  %v14227_v11 = vpop.f32.mrf.mxu1 }
 0x2e1   :  { %23257 = vst [vmem:[#allocation18_spill] sm:$0xff] %v17689_v2  ;;  %v2565_v45 = vld [vmem:[%s23178_s0 + $0x113] sm:$0xff]  ;;  %v23260_v11 = vld [vmem:[#allocation20_spill] sm:$0xff] }
 0x2e2   :  { %v1722_v60 = vpop.f32.mrf.mxu0  ;;  %v2365_v58 = vpop.f32.mrf.mxu1 }
 0x2e3   :  { %v1856_v14 = vadd.f32 %v1722_v60, %v23258_v22  ;;  %v17705_v48 = vadd.f32 %v2365_v58, %v1852_v42  ;;  %v2566_v42 = vld [vmem:[%s23178_s0 + $0x11b] sm:$0xff] }
 0x2e4   :  { %v14078_v46 = vpop.f32.mrf.mxu0  ;;  %v14228_v63 = vpop.f32.mrf.mxu1  ;;  %v2626_v58 = vpack.c.bf16 %v2566_v42, %v2565_v45  ;;  %v3222_v42 = vld [vmem:[%s23178_s0 + $0x104] sm:$0xff] }
 0x2e5   :  { %23259 = vst [vmem:[#allocation19_spill] sm:$0xff] %v17705_v48 }
 0x2e6   :  { %v1727_v9 = vpop.f32.mrf.mxu0  ;;  %v2370_v2 = vpop.f32.mrf.mxu1  ;;  %14336 = vmatmul.mubr.msk.bf16.gmra.mxu0 %vm285_vm2, %v2625_v24  ;;  %14486 = vmatmul.mubr.msk.bf16.gmra.mxu1 %vm285_vm2, %v3282_v27  ;;  %v3283_v24 = vpack.c.bf16 %v3221_v15, %v3220_v28  ;;  %v23262_v27 = vld [vmem:[#allocation21_spill] sm:$0xff] }
 0x2e7   :  { %v1857_v62 = vadd.f32 %v1727_v9, %v23260_v11  ;;  %v17713_v40 = vadd.f32 %v2370_v2, %v1853_v56  ;;  %14339 = vmatprep.mubr.msk.bf16.mxu0 %vm15827_vm1, %v23202_v33  ;;  %14489 = vmatprep.mubr.msk.bf16.mxu1 %vm15827_vm1, %v23202_v33  ;;  %v3223_v28 = vld [vmem:[%s23178_s0 + $0x10c] sm:$0xff] }
 0x2e8   :  { %v14081_v56 = vpop.f32.mrf.mxu0  ;;  %v14231_v2 = vpop.f32.mrf.mxu1 }
 0x2e9   :  { %23261 = vst [vmem:[#allocation20_spill] sm:$0xff] %v17713_v40  ;;  %v2567_v56 = vld [vmem:[%s23178_s0 + $0x123] sm:$0xff]  ;;  %v23264_v2 = vld [vmem:[#allocation22_spill] sm:$0xff] }
 0x2ea   :  { %v1730_v47 = vpop.f32.mrf.mxu0  ;;  %v2373_v60 = vpop.f32.mrf.mxu1 }
 0x2eb   :  { %v1858_v22 = vadd.f32 %v1730_v47, %v23262_v27  ;;  %v17729_v46 = vadd.f32 %v2373_v60, %v1854_v39  ;;  %v2568_v39 = vld [vmem:[%s23178_s0 + $0x12b] sm:$0xff] }
 0x2ec   :  { %v14082_v63 = vpop.f32.mrf.mxu0  ;;  %v14232_v9 = vpop.f32.mrf.mxu1  ;;  %v2627_v60 = vpack.c.bf16 %v2568_v39, %v2567_v56  ;;  %v3224_v39 = vld [vmem:[%s23178_s0 + $0x114] sm:$0xff] }
 0x2ed   :  { %23263 = vst [vmem:[#allocation21_spill] sm:$0xff] %v17729_v46 }
 0x2ee   :  { %v1735_v11 = vpop.f32.mrf.mxu0  ;;  %v2378_v40 = vpop.f32.mrf.mxu1  ;;  %14340 = vmatmul.mubr.msk.bf16.gmra.mxu0 %vm285_vm2, %v2626_v58  ;;  %14490 = vmatmul.mubr.msk.bf16.gmra.mxu1 %vm285_vm2, %v3283_v24  ;;  %v3284_v58 = vpack.c.bf16 %v3223_v28, %v3222_v42  ;;  %v23266_v24 = vld [vmem:[#allocation23_spill] sm:$0xff] }
 0x2ef   :  { %v1859_v48 = vadd.f32 %v1735_v11, %v23264_v2  ;;  %v17737_v45 = vadd.f32 %v2378_v40, %v1855_v1  ;;  %14343 = vmatprep.mubr.msk.bf16.mxu0 %vm15827_vm1, %v23202_v33  ;;  %14493 = vmatprep.mubr.msk.bf16.mxu1 %vm15827_vm1, %v23202_v33  ;;  %v3225_v42 = vld [vmem:[%s23178_s0 + $0x11c] sm:$0xff] }
 0x2f0   :  { %v14085_v1 = vpop.f32.mrf.mxu0  ;;  %v14235_v40 = vpop.f32.mrf.mxu1 }
 0x2f1   :  { %23265 = vst [vmem:[#allocation22_spill] sm:$0xff] %v17737_v45  ;;  %v2569_v1 = vld [vmem:[%s23178_s0 + $0x133] sm:$0xff]  ;;  %v23268_v40 = vld [vmem:[#allocation24_spill] sm:$0xff] }
 0x2f2   :  { %v1738_v15 = vpop.f32.mrf.mxu0  ;;  %v2381_v47 = vpop.f32.mrf.mxu1 }
 0x2f3   :  { %v1860_v27 = vadd.f32 %v1738_v15, %v23266_v24  ;;  %v17753_v63 = vadd.f32 %v2381_v47, %v1856_v14  ;;  %v2570_v14 = vld [vmem:[%s23178_s0 + $0x13b] sm:$0xff] }
 0x2f4   :  { %v14086_v9 = vpop.f32.mrf.mxu0  ;;  %v14236_v11 = vpop.f32.mrf.mxu1  ;;  %v2628_v47 = vpack.c.bf16 %v2570_v14, %v2569_v1  ;;  %v3226_v14 = vld [vmem:[%s23178_s0 + $0x124] sm:$0xff] }
 0x2f5   :  { %23267 = vst [vmem:[#allocation23_spill] sm:$0xff] %v17753_v63 }
 0x2f6   :  { %v1743_v2 = vpop.f32.mrf.mxu0  ;;  %v2386_v45 = vpop.f32.mrf.mxu1  ;;  %14344 = vmatmul.mubr.msk.bf16.gmra.mxu0 %vm285_vm2, %v2627_v60  ;;  %14494 = vmatmul.mubr.msk.bf16.gmra.mxu1 %vm285_vm2, %v3284_v58  ;;  %v3285_v60 = vpack.c.bf16 %v3225_v42, %v3224_v39  ;;  %v23270_v58 = vld [vmem:[#allocation25_spill] sm:$0xff] }
 0x2f7   :  { %v1861_v46 = vadd.f32 %v1743_v2, %v23268_v40  ;;  %v17761_v56 = vadd.f32 %v2386_v45, %v1857_v62  ;;  %14347 = vmatprep.mubr.msk.bf16.mxu0 %vm15827_vm1, %v23202_v33  ;;  %14497 = vmatprep.mubr.msk.bf16.mxu1 %vm15827_vm1, %v23202_v33  ;;  %v3227_v39 = vld [vmem:[%s23178_s0 + $0x12c] sm:$0xff] }
 0x2f8   :  { %v14089_v62 = vpop.f32.mrf.mxu0  ;;  %v14239_v45 = vpop.f32.mrf.mxu1 }
 0x2f9   :  { %23269 = vst [vmem:[#allocation24_spill] sm:$0xff] %v17761_v56  ;;  %v2571_v62 = vld [vmem:[%s23178_s0 + $0x143] sm:$0xff]  ;;  %v23272_v45 = vld [vmem:[#allocation26_spill] sm:$0xff] }
 0x2fa   :  { %v1746_v28 = vpop.f32.mrf.mxu0  ;;  %v2389_v15 = vpop.f32.mrf.mxu1 }
 0x2fb   :  { %v1862_v24 = vadd.f32 %v1746_v28, %v23270_v58  ;;  %v17777_v9 = vadd.f32 %v2389_v15, %v1858_v22  ;;  %v2572_v22 = vld [vmem:[%s23178_s0 + $0x14b] sm:$0xff] }
 0x2fc   :  { %v14090_v11 = vpop.f32.mrf.mxu0  ;;  %v14240_v2 = vpop.f32.mrf.mxu1  ;;  %v2629_v15 = vpack.c.bf16 %v2572_v22, %v2571_v62  ;;  %v3228_v22 = vld [vmem:[%s23178_s0 + $0x134] sm:$0xff] }
 0x2fd   :  { %23271 = vst [vmem:[#allocation25_spill] sm:$0xff] %v17777_v9 }
 0x2fe   :  { %v1751_v40 = vpop.f32.mrf.mxu0  ;;  %v2394_v56 = vpop.f32.mrf.mxu1  ;;  %14348 = vmatmul.mubr.msk.bf16.gmra.mxu0 %vm285_vm2, %v2628_v47  ;;  %14498 = vmatmul.mubr.msk.bf16.gmra.mxu1 %vm285_vm2, %v3285_v60  ;;  %v3286_v47 = vpack.c.bf16 %v3227_v39, %v3226_v14  ;;  %v23274_v60 = vld [vmem:[#allocation27_spill] sm:$0xff] }
 0x2ff   :  { %v1863_v63 = vadd.f32 %v1751_v40, %v23272_v45  ;;  %v17785_v1 = vadd.f32 %v2394_v56, %v1859_v48  ;;  %14351 = vmatprep.mubr.msk.bf16.mxu0 %vm15827_vm1, %v23202_v33  ;;  %14501 = vmatprep.mubr.msk.bf16.mxu1 %vm15827_vm1, %v23202_v33  ;;  %v3229_v14 = vld [vmem:[%s23178_s0 + $0x13c] sm:$0xff] }
 0x300   :  { %v14093_v48 = vpop.f32.mrf.mxu0  ;;  %v14243_v56 = vpop.f32.mrf.mxu1 }
 0x301   :  { %23273 = vst [vmem:[#allocation26_spill] sm:$0xff] %v17785_v1  ;;  %v2573_v48 = vld [vmem:[%s23178_s0 + $0x153] sm:$0xff]  ;;  %v23276_v56 = vld [vmem:[#allocation28_spill] sm:$0xff] }
 0x302   :  { %v1754_v42 = vpop.f32.mrf.mxu0  ;;  %v2397_v28 = vpop.f32.mrf.mxu1 }
 0x303   :  { %v1864_v58 = vadd.f32 %v1754_v42, %v23274_v60  ;;  %v17801_v11 = vadd.f32 %v2397_v28, %v1860_v27  ;;  %v2574_v27 = vld [vmem:[%s23178_s0 + $0x15b] sm:$0xff] }
 0x304   :  { %v14094_v2 = vpop.f32.mrf.mxu0  ;;  %v14244_v40 = vpop.f32.mrf.mxu1  ;;  %v2630_v28 = vpack.c.bf16 %v2574_v27, %v2573_v48  ;;  %v3230_v27 = vld [vmem:[%s23178_s0 + $0x144] sm:$0xff] }
 0x305   :  { %23275 = vst [vmem:[#allocation27_spill] sm:$0xff] %v17801_v11 }
 0x306   :  { %v1759_v45 = vpop.f32.mrf.mxu0  ;;  %v2402_v1 = vpop.f32.mrf.mxu1  ;;  %14352 = vmatmul.mubr.msk.bf16.gmra.mxu0 %vm285_vm2, %v2629_v15  ;;  %14502 = vmatmul.mubr.msk.bf16.gmra.mxu1 %vm285_vm2, %v3286_v47  ;;  %v3287_v15 = vpack.c.bf16 %v3229_v14, %v3228_v22  ;;  %v23278_v47 = vld [vmem:[#allocation29_spill] sm:$0xff] }
 0x307   :  { %v1865_v9 = vadd.f32 %v1759_v45, %v23276_v56  ;;  %v17809_v62 = vadd.f32 %v2402_v1, %v1861_v46  ;;  %14355 = vmatprep.mubr.msk.bf16.mxu0 %vm15827_vm1, %v23202_v33  ;;  %14505 = vmatprep.mubr.msk.bf16.mxu1 %vm15827_vm1, %v23202_v33  ;;  %v3231_v22 = vld [vmem:[%s23178_s0 + $0x14c] sm:$0xff] }
 0x308   :  { %v14097_v46 = vpop.f32.mrf.mxu0  ;;  %v14247_v1 = vpop.f32.mrf.mxu1 }
 0x309   :  { %23277 = vst [vmem:[#allocation28_spill] sm:$0xff] %v17809_v62  ;;  %v2575_v46 = vld [vmem:[%s23178_s0 + $0x163] sm:$0xff]  ;;  %v23280_v1 = vld [vmem:[#allocation30_spill] sm:$0xff] }
 0x30a   :  { %v1762_v39 = vpop.f32.mrf.mxu0  ;;  %v2405_v42 = vpop.f32.mrf.mxu1 }
 0x30b   :  { %v1866_v60 = vadd.f32 %v1762_v39, %v23278_v47  ;;  %v17825_v2 = vadd.f32 %v2405_v42, %v1862_v24  ;;  %v2576_v24 = vld [vmem:[%s23178_s0 + $0x16b] sm:$0xff] }
 0x30c   :  { %v14098_v40 = vpop.f32.mrf.mxu0  ;;  %v14248_v45 = vpop.f32.mrf.mxu1  ;;  %v2631_v42 = vpack.c.bf16 %v2576_v24, %v2575_v46  ;;  %v3232_v24 = vld [vmem:[%s23178_s0 + $0x154] sm:$0xff] }
 0x30d   :  { %23279 = vst [vmem:[#allocation29_spill] sm:$0xff] %v17825_v2 }
 0x30e   :  { %v1767_v56 = vpop.f32.mrf.mxu0  ;;  %v2410_v62 = vpop.f32.mrf.mxu1  ;;  %14356 = vmatmul.mubr.msk.bf16.gmra.mxu0 %vm285_vm2, %v2630_v28  ;;  %14506 = vmatmul.mubr.msk.bf16.gmra.mxu1 %vm285_vm2, %v3287_v15  ;;  %v3288_v28 = vpack.c.bf16 %v3231_v22, %v3230_v27  ;;  %v23282_v15 = vld [vmem:[#allocation31_spill] sm:$0xff] }
 0x30f   :  { %v1867_v11 = vadd.f32 %v1767_v56, %v23280_v1  ;;  %v17833_v48 = vadd.f32 %v2410_v62, %v1863_v63  ;;  %14359 = vmatprep.mubr.msk.bf16.mxu0 %vm15827_vm1, %v23202_v33  ;;  %14509 = vmatprep.mubr.msk.bf16.mxu1 %vm15827_vm1, %v23202_v33  ;;  %v3233_v27 = vld [vmem:[%s23178_s0 + $0x15c] sm:$0xff] }
 0x310   :  { %v14101_v63 = vpop.f32.mrf.mxu0  ;;  %v14251_v62 = vpop.f32.mrf.mxu1 }
 0x311   :  { %23281 = vst [vmem:[#allocation30_spill] sm:$0xff] %v17833_v48  ;;  %v2577_v63 = vld [vmem:[%s23178_s0 + $0x173] sm:$0xff]  ;;  %v23284_v62 = vld [vmem:[#allocation32_spill] sm:$0xff] }
 0x312   :  { %v1770_v14 = vpop.f32.mrf.mxu0  ;;  %v2413_v39 = vpop.f32.mrf.mxu1 }
 0x313   :  { %v1868_v47 = vadd.f32 %v1770_v14, %v23282_v15  ;;  %v17849_v40 = vadd.f32 %v2413_v39, %v1864_v58  ;;  %v2578_v58 = vld [vmem:[%s23178_s0 + $0x17b] sm:$0xff] }
 0x314   :  { %v14102_v45 = vpop.f32.mrf.mxu0  ;;  %v14252_v56 = vpop.f32.mrf.mxu1  ;;  %v2632_v39 = vpack.c.bf16 %v2578_v58, %v2577_v63 }
 0x315   :  { %23283 = vst [vmem:[#allocation31_spill] sm:$0xff] %v17849_v40 }
 0x316   :  { %v1775_v1 = vpop.f32.mrf.mxu0  ;;  %v2418_v48 = vpop.f32.mrf.mxu1  ;;  %14360 = vmatmul.mubr.msk.bf16.gmra.mxu0 %vm285_vm2, %v2631_v42  ;;  %14510 = vmatmul.mubr.msk.bf16.gmra.mxu1 %vm285_vm2, %v3288_v28  ;;  %v3289_v42 = vpack.c.bf16 %v3233_v27, %v3232_v24 }
 0x317   :  { %v1869_v2 = vadd.f32 %v1775_v1, %v23284_v62  ;;  %v17857_v46 = vadd.f32 %v2418_v48, %v1865_v9  ;;  %14363 = vmatprep.mubr.msk.bf16.mxu0 %vm15827_vm1, %v23202_v33  ;;  %14513 = vmatprep.mubr.msk.bf16.mxu1 %vm15827_vm1, %v23202_v33 }
 0x318   :  { %v14105_v9 = vpop.f32.mrf.mxu0  ;;  %v14255_v48 = vpop.f32.mrf.mxu1 }
 0x319   :  { %23285 = vst [vmem:[#allocation32_spill] sm:$0xff] %v17857_v46  ;;  %v2579_v9 = vld [vmem:[%s23178_s0 + $0x183] sm:$0xff] }
 0x31a   :  { %v1778_v22 = vpop.f32.mrf.mxu0  ;;  %v2421_v14 = vpop.f32.mrf.mxu1 }
 0x31b   :  { %v1870_v28 = vadd.f32 %v1778_v22, %v17067_v4  ;;  %v17873_v15 = vadd.f32 %v2421_v14, %v1866_v60  ;;  %v2580_v4 = vld [vmem:[%s23178_s0 + $0x18b] sm:$0xff] }
 0x31c   :  { %v14106_v45 = vpop.f32.mrf.mxu0  ;;  %v14256_v56 = vpop.f32.mrf.mxu1  ;;  %v3234_v60 = vld [vmem:[%s23178_s0 + $0x164] sm:$0xff]  ;;  %v2633_v22 = vpack.c.bf16 %v2580_v4, %v2579_v9  ;;  %v2581_v9 = vld [vmem:[%s23178_s0 + $0x193] sm:$0xff] }
 0x31d   :  { %23286 = vst [vmem:[#allocation38_spill] sm:$0xff] %v17873_v15 }
 0x31e   :  { %v1783_v1 = vpop.f32.mrf.mxu0  ;;  %v2426_v62 = vpop.f32.mrf.mxu1  ;;  %14364 = vmatmul.mubr.msk.bf16.gmra.mxu0 %vm285_vm2, %v2632_v39  ;;  %14514 = vmatmul.mubr.msk.bf16.gmra.mxu1 %vm285_vm2, %v3289_v42  ;;  %v23288_v39 = vld [vmem:[#allocation33_spill] sm:$0xff] }
 0x31f   :  { %v1871_v48 = vadd.f32 %v1783_v1, %v17071_v53  ;;  %v17881_v63 = vadd.f32 %v2426_v62, %v1867_v11  ;;  %14367 = vmatprep.mubr.msk.bf16.mxu0 %vm15827_vm1, %v23202_v33  ;;  %14517 = vmatprep.mubr.msk.bf16.mxu1 %vm15827_vm1, %v23202_v33  ;;  %v3235_v53 = vld [vmem:[%s23178_s0 + $0x16c] sm:$0xff] }
 0x320   :  { %v14109_v11 = vpop.f32.mrf.mxu0  ;;  %v14259_v58 = vpop.f32.mrf.mxu1  ;;  %v3290_v14 = vpack.c.bf16 %v3235_v53, %v3234_v60  ;;  %v23289_v62 = vld [vmem:[#allocation5_spill] sm:$0xff] }
 0x321   :  { %23287 = vst [vmem:[#allocation39_spill] sm:$0xff] %v17881_v63  ;;  %v23290_v63 = vld [vmem:[#allocation34_spill] sm:$0xff] }
 0x322   :  { %v1786_v24 = vpop.f32.mrf.mxu0  ;;  %v2429_v27 = vpop.f32.mrf.mxu1  ;;  %v1210_v15 = vadd.f32 %v23290_v63, %v23289_v62  ;;  %v3236_v63 = vld [vmem:[%s23178_s0 + $0x174] sm:$0xff]  ;;  %v23291_v62 = vld [vmem:[#allocation35_spill] sm:$0xff] }
 0x323   :  { %v1872_v42 = vadd.f32 %v1786_v24, %v23288_v39  ;;  %v17897_v45 = vadd.f32 %v2429_v27, %v1868_v47  ;;  %v2582_v47 = vld [vmem:[%s23178_s0 + $0x19b] sm:$0xff] }
 0x324   :  { %v14110_v56 = vpop.f32.mrf.mxu0  ;;  %v14260_v1 = vpop.f32.mrf.mxu1  ;;  %v2634_v11 = vpack.c.bf16 %v2582_v47, %v2581_v9  ;;  %v3238_v9 = vld [vmem:[%s23178_s0 + $0x184] sm:$0xff] }
 0x325   :  { %v2583_v56 = vld [vmem:[%s23178_s0 + $0x1a3] sm:$0xff] }
 0x326   :  { %v1791_v46 = vpop.f32.mrf.mxu0  ;;  %v2434_v40 = vpop.f32.mrf.mxu1  ;;  %14368 = vmatmul.mubr.msk.bf16.gmra.mxu0 %vm285_vm2, %v2633_v22  ;;  %14518 = vmatmul.mubr.msk.bf16.gmra.mxu1 %vm285_vm2, %v3290_v14 }
 0x327   :  { %v1873_v4 = vadd.f32 %v1791_v46, %v1210_v15  ;;  %v17906_v60 = vadd.f32 %v2434_v40, %v1869_v2  ;;  %14371 = vmatprep.mubr.msk.bf16.mxu0 %vm15827_vm1, %v23202_v33  ;;  %14521 = vmatprep.mubr.msk.bf16.mxu1 %vm15827_vm1, %v23202_v33  ;;  %v3237_v46 = vld [vmem:[%s23178_s0 + $0x17c] sm:$0xff] }
 0x328   :  { %v14113_v2 = vpop.f32.mrf.mxu0  ;;  %v14263_v40 = vpop.f32.mrf.mxu1  ;;  %v3291_v58 = vpack.c.bf16 %v3237_v46, %v3236_v63  ;;  %v12457_v46 = vld [vmem:[%s23177_s1 + $0x1c] sm:$0xf] }
 0x32a   :  { %v1794_v15 = vpop.f32.mrf.mxu0  ;;  %v2437_v53 = vpop.f32.mrf.mxu1 }
 0x32b   :  { %v17921_v24 = vadd.f32 %v2437_v53, %v1870_v28  ;;  %v2584_v28 = vld [vmem:[%s23178_s0 + $0x1ab] sm:$0xff] }
 0x32c   :  { %v14114_v27 = vpop.f32.mrf.mxu0  ;;  %v14264_v22 = vpop.f32.mrf.mxu1  ;;  %v2635_v53 = vpack.c.bf16 %v2584_v28, %v2583_v56  ;;  %v2585_v56 = vld [vmem:[%s23178_s0 + $0x1b3] sm:$0xff] }
 0x32e   :  { %v2442_v14 = vpop.f32.mrf.mxu1  ;;  %v2805_v39 = vpop.f32.mrf.mxu0  ;;  %14372 = vmatmul.mubr.msk.bf16.gmra.mxu0 %vm285_vm2, %v2634_v11  ;;  %14522 = vmatmul.mubr.msk.bf16.gmra.mxu1 %vm285_vm2, %v3291_v58  ;;  %v4746_v58 = vsel %vm403_vm0, %v12457_v46, 0 }
 0x32f   :  { %v17928_v1 = vadd.f32 %v2442_v14, %v1871_v48  ;;  %v3115_v2 = vadd.f32 %v2805_v39, %v23291_v62  ;;  %14375 = vmatprep.mubr.msk.bf16.mxu0 %vm15827_vm1, %v23202_v33  ;;  %14525 = vmatprep.mubr.msk.bf16.mxu1 %vm15827_vm1, %v23202_v33  ;;  %v3239_v48 = vld [vmem:[%s23178_s0 + $0x18c] sm:$0xff] }
 0x330   :  { %v14267_v47 = vpop.f32.mrf.mxu1  ;;  %v14277_v63 = vpop.f32.mrf.mxu0  ;;  %v3292_v11 = vpack.c.bf16 %v3239_v48, %v3238_v9  ;;  %14748 = vmatpush3.bf16.msra.mxu1 %v4746_v58  ;;  %v3240_v9 = vld [vmem:[%s23178_s0 + $0x194] sm:$0xff] }
 0x331   :  { %6936 = vmatprep.subr.mxu1 %v23202_v33 }
 0x332   :  { %v2445_v40 = vpop.f32.mrf.mxu1  ;;  %v2808_v15 = vpop.f32.mrf.mxu0 }
 0x333   :  { %v17948_v27 = vadd.f32 %v2445_v40, %v1872_v42  ;;  %v3116_v22 = vadd.f32 %v2808_v15, %v17124_v61  ;;  %v2586_v61 = vld [vmem:[%s23178_s0 + $0x1bb] sm:$0xff] }
 0x334   :  { %v14268_v14 = vpop.f32.mrf.mxu1  ;;  %v14278_v39 = vpop.f32.mrf.mxu0  ;;  %v2636_v40 = vpack.c.bf16 %v2586_v61, %v2585_v56  ;;  %v3242_v56 = vld [vmem:[%s23178_s0 + $0x1a4] sm:$0xff] }
 0x336   :  { %v2450_v62 = vpop.f32.mrf.mxu1  ;;  %v2813_v47 = vpop.f32.mrf.mxu0  ;;  %14376 = vmatmul.mubr.msk.bf16.gmra.mxu0 %vm285_vm2, %v2635_v53  ;;  %14526 = vmatmul.mubr.msk.bf16.gmra.mxu1 %vm285_vm2, %v3292_v11 }
 0x337   :  { %v17957_v28 = vadd.f32 %v2450_v62, %v1873_v4  ;;  %v3117_v42 = vadd.f32 %v2813_v47, %v17129_v51  ;;  %14379 = vmatprep.mubr.msk.bf16.mxu0 %vm15827_vm1, %v23202_v33  ;;  %14529 = vmatprep.mubr.msk.bf16.mxu1 %vm15827_vm1, %v23202_v33  ;;  %v3241_v4 = vld [vmem:[%s23178_s0 + $0x19c] sm:$0xff] }
 0x338   :  { %v14271_v48 = vpop.f32.mrf.mxu1  ;;  %v14281_v51 = vpop.f32.mrf.mxu0  ;;  %v3293_v15 = vpack.c.bf16 %v3241_v4, %v3240_v9  ;;  %v2587_v62 = vld [vmem:[%s23178_s0 + $0x1c3] sm:$0xff] }
 0x33a   :  { %v2453_v63 = vpop.f32.mrf.mxu1  ;;  %v2816_v46 = vpop.f32.mrf.mxu0 }
 0x33b   :  { %v3118_v53 = vadd.f32 %v2816_v46, %v17142_v20  ;;  %v2588_v20 = vld [vmem:[%s23178_s0 + $0x1cb] sm:$0xff] }
 0x33c   :  { %v14272_v11 = vpop.f32.mrf.mxu1  ;;  %v14282_v58 = vpop.f32.mrf.mxu0  ;;  %v2637_v51 = vpack.c.bf16 %v2588_v20, %v2587_v62 }
 0x33e   :  { %v2821_v14 = vpop.f32.mrf.mxu0  ;;  %14380 = vmatmul.mubr.msk.bf16.gmra.mxu0 %vm285_vm2, %v2636_v40  ;;  %v3464_v39 = vpop.f32.mrf.mxu1  ;;  %14530 = vmatmul.mubr.msk.bf16.gmra.mxu1 %vm285_vm2, %v3293_v15 }
 0x33f   :  { %v3119_v47 = vadd.f32 %v2821_v14, %v17147_v13  ;;  %v17980_v48 = vadd.f32 %v3464_v39, %v3115_v2  ;;  %14383 = vmatprep.mubr.msk.bf16.mxu0 %vm15827_vm1, %v23202_v33  ;;  %14533 = vmatprep.mubr.msk.bf16.mxu1 %vm15827_vm1, %v23202_v33  ;;  %v3243_v13 = vld [vmem:[%s23178_s0 + $0x1ac] sm:$0xff] }
 0x340   :  { %v14285_v2 = vpop.f32.mrf.mxu0  ;;  %v14435_v61 = vpop.f32.mrf.mxu1  ;;  %v3294_v63 = vpack.c.bf16 %v3243_v13, %v3242_v56  ;;  %v2589_v39 = vld [vmem:[%s23178_s0 + $0x1d3] sm:$0xff] }
 0x342   :  { %v2824_v9 = vpop.f32.mrf.mxu0  ;;  %v3467_v4 = vpop.f32.mrf.mxu1 }
 0x343   :  { %v3120_v46 = vadd.f32 %v2824_v9, %v17160_v50  ;;  %v17996_v40 = vadd.f32 %v3467_v4, %v3116_v22  ;;  %v2590_v50 = vld [vmem:[%s23178_s0 + $0x1db] sm:$0xff] }
 0x344   :  { %v14286_v15 = vpop.f32.mrf.mxu0  ;;  %v14436_v11 = vpop.f32.mrf.mxu1  ;;  %v3244_v22 = vld [vmem:[%s23178_s0 + $0x1b4] sm:$0xff]  ;;  %v2638_v61 = vpack.c.bf16 %v2590_v50, %v2589_v39 }
 0x346   :  { %v2829_v58 = vpop.f32.mrf.mxu0  ;;  %14384 = vmatmul.mubr.msk.bf16.gmra.mxu0 %vm285_vm2, %v2637_v51  ;;  %v3472_v14 = vpop.f32.mrf.mxu1  ;;  %14534 = vmatmul.mubr.msk.bf16.gmra.mxu1 %vm285_vm2, %v3294_v63 }
 0x347   :  { %v3121_v2 = vadd.f32 %v2829_v58, %v17165_v8  ;;  %v18004_v62 = vadd.f32 %v3472_v14, %v3117_v42  ;;  %14387 = vmatprep.mubr.msk.bf16.mxu0 %vm15827_vm1, %v23202_v33  ;;  %14537 = vmatprep.mubr.msk.bf16.mxu1 %vm15827_vm1, %v23202_v33  ;;  %v3245_v8 = vld [vmem:[%s23178_s0 + $0x1bc] sm:$0xff] }
 0x348   :  { %v14289_v42 = vpop.f32.mrf.mxu0  ;;  %v14439_v20 = vpop.f32.mrf.mxu1  ;;  %v3295_v9 = vpack.c.bf16 %v3245_v8, %v3244_v22  ;;  %v2591_v14 = vld [vmem:[%s23178_s0 + $0x1e3] sm:$0xff] }
 0x34a   :  { %v2832_v56 = vpop.f32.mrf.mxu0  ;;  %v3475_v13 = vpop.f32.mrf.mxu1 }
 0x34b   :  { %v3122_v4 = vadd.f32 %v2832_v56, %v17178_v5  ;;  %v18020_v51 = vadd.f32 %v3475_v13, %v3118_v53  ;;  %v2592_v5 = vld [vmem:[%s23178_s0 + $0x1eb] sm:$0xff] }
 0x34c   :  { %v14290_v63 = vpop.f32.mrf.mxu0  ;;  %v14440_v15 = vpop.f32.mrf.mxu1  ;;  %v3246_v53 = vld [vmem:[%s23178_s0 + $0x1c4] sm:$0xff]  ;;  %v2639_v20 = vpack.c.bf16 %v2592_v5, %v2591_v14 }
 0x34e   :  { %v2837_v11 = vpop.f32.mrf.mxu0  ;;  %14388 = vmatmul.mubr.msk.bf16.gmra.mxu0 %vm285_vm2, %v2638_v61  ;;  %v3480_v58 = vpop.f32.mrf.mxu1  ;;  %14538 = vmatmul.mubr.msk.bf16.gmra.mxu1 %vm285_vm2, %v3295_v9 }
 0x34f   :  { %v3123_v42 = vadd.f32 %v2837_v11, %v17183_v18  ;;  %v18028_v39 = vadd.f32 %v3480_v58, %v3119_v47  ;;  %14391 = vmatprep.mubr.msk.bf16.mxu0 %vm15827_vm1, %v23202_v33  ;;  %14541 = vmatprep.mubr.msk.bf16.mxu1 %vm15827_vm1, %v23202_v33  ;;  %v3247_v18 = vld [vmem:[%s23178_s0 + $0x1cc] sm:$0xff] }
 0x350   :  { %v14293_v47 = vpop.f32.mrf.mxu0  ;;  %v14443_v50 = vpop.f32.mrf.mxu1  ;;  %v3296_v56 = vpack.c.bf16 %v3247_v18, %v3246_v53  ;;  %v2593_v58 = vld [vmem:[%s23178_s0 + $0x1f3] sm:$0xff] }
 0x352   :  { %v2840_v22 = vpop.f32.mrf.mxu0  ;;  %v3483_v8 = vpop.f32.mrf.mxu1 }
 0x353   :  { %v3124_v13 = vadd.f32 %v2840_v22, %v17196_v29  ;;  %v18044_v61 = vadd.f32 %v3483_v8, %v3120_v46  ;;  %v2594_v29 = vld [vmem:[%s23178_s0 + $0x1fb] sm:$0xff] }
 0x354   :  { %v14294_v9 = vpop.f32.mrf.mxu0  ;;  %v14444_v63 = vpop.f32.mrf.mxu1  ;;  %v3248_v46 = vld [vmem:[%s23178_s0 + $0x1d4] sm:$0xff]  ;;  %v2640_v50 = vpack.c.bf16 %v2594_v29, %v2593_v58 }
 0x356   :  { %v2845_v15 = vpop.f32.mrf.mxu0  ;;  %14392 = vmatmul.mubr.msk.bf16.gmra.mxu0 %vm285_vm2, %v2639_v20  ;;  %v3488_v11 = vpop.f32.mrf.mxu1  ;;  %14542 = vmatmul.mubr.msk.bf16.gmra.mxu1 %vm285_vm2, %v3296_v56 }
 0x357   :  { %v3125_v47 = vadd.f32 %v2845_v15, %v17201_v35  ;;  %v18052_v14 = vadd.f32 %v3488_v11, %v3121_v2  ;;  %14395 = vmatprep.mubr.msk.bf16.mxu0 %vm15827_vm1, %v23202_v33  ;;  %14545 = vmatprep.mubr.msk.bf16.mxu1 %vm15827_vm1, %v23202_v33  ;;  %v3249_v35 = vld [vmem:[%s23178_s0 + $0x1dc] sm:$0xff] }
 0x358   :  { %v14297_v2 = vpop.f32.mrf.mxu0  ;;  %v14447_v5 = vpop.f32.mrf.mxu1  ;;  %v3297_v22 = vpack.c.bf16 %v3249_v35, %v3248_v46  ;;  %v2595_v11 = vld [vmem:[%s23178_s0 + $0x203] sm:$0xff] }
 0x35a   :  { %v2848_v53 = vpop.f32.mrf.mxu0  ;;  %v3491_v18 = vpop.f32.mrf.mxu1 }
 0x35b   :  { %v3126_v8 = vadd.f32 %v2848_v53, %v17214_v41  ;;  %v18068_v20 = vadd.f32 %v3491_v18, %v3122_v4  ;;  %v2596_v41 = vld [vmem:[%s23178_s0 + $0x20b] sm:$0xff] }
 0x35c   :  { %v14298_v56 = vpop.f32.mrf.mxu0  ;;  %v14448_v9 = vpop.f32.mrf.mxu1  ;;  %v3250_v4 = vld [vmem:[%s23178_s0 + $0x1e4] sm:$0xff]  ;;  %v2641_v5 = vpack.c.bf16 %v2596_v41, %v2595_v11 }
 0x35e   :  { %v2853_v63 = vpop.f32.mrf.mxu0  ;;  %14396 = vmatmul.mubr.msk.bf16.gmra.mxu0 %vm285_vm2, %v2640_v50  ;;  %v3496_v15 = vpop.f32.mrf.mxu1  ;;  %14546 = vmatmul.mubr.msk.bf16.gmra.mxu1 %vm285_vm2, %v3297_v22 }
 0x35f   :  { %v3127_v2 = vadd.f32 %v2853_v63, %v17219_v52  ;;  %v18076_v58 = vadd.f32 %v3496_v15, %v3123_v42  ;;  %14399 = vmatprep.mubr.msk.bf16.mxu0 %vm15827_vm1, %v23202_v33  ;;  %14549 = vmatprep.mubr.msk.bf16.mxu1 %vm15827_vm1, %v23202_v33  ;;  %v3251_v52 = vld [vmem:[%s23178_s0 + $0x1ec] sm:$0xff] }
 0x360   :  { %v14301_v42 = vpop.f32.mrf.mxu0  ;;  %v14451_v29 = vpop.f32.mrf.mxu1  ;;  %v3298_v53 = vpack.c.bf16 %v3251_v52, %v3250_v4  ;;  %v2597_v15 = vld [vmem:[%s23178_s0 + $0x213] sm:$0xff] }
 0x362   :  { %v2856_v46 = vpop.f32.mrf.mxu0  ;;  %v3499_v35 = vpop.f32.mrf.mxu1 }
 0x363   :  { %v3128_v18 = vadd.f32 %v2856_v46, %v17232_v0  ;;  %v18092_v50 = vadd.f32 %v3499_v35, %v3124_v13  ;;  %v2598_v0 = vld [vmem:[%s23178_s0 + $0x21b] sm:$0xff] }
 0x364   :  { %v14302_v22 = vpop.f32.mrf.mxu0  ;;  %v14452_v56 = vpop.f32.mrf.mxu1  ;;  %v3252_v13 = vld [vmem:[%s23178_s0 + $0x1f4] sm:$0xff]  ;;  %v2642_v29 = vpack.c.bf16 %v2598_v0, %v2597_v15 }
 0x366   :  { %v2861_v9 = vpop.f32.mrf.mxu0  ;;  %14400 = vmatmul.mubr.msk.bf16.gmra.mxu0 %vm285_vm2, %v2641_v5  ;;  %v3504_v63 = vpop.f32.mrf.mxu1  ;;  %14550 = vmatmul.mubr.msk.bf16.gmra.mxu1 %vm285_vm2, %v3298_v53 }
 0x367   :  { %v3129_v42 = vadd.f32 %v2861_v9, %v17237_v7  ;;  %v18100_v11 = vadd.f32 %v3504_v63, %v3125_v47  ;;  %14403 = vmatprep.mubr.msk.bf16.mxu0 %vm15827_vm1, %v23202_v33  ;;  %14553 = vmatprep.mubr.msk.bf16.mxu1 %vm15827_vm1, %v23202_v33  ;;  %v3253_v7 = vld [vmem:[%s23178_s0 + $0x1fc] sm:$0xff] }
 0x368   :  { %v14305_v47 = vpop.f32.mrf.mxu0  ;;  %v14455_v41 = vpop.f32.mrf.mxu1  ;;  %v3299_v46 = vpack.c.bf16 %v3253_v7, %v3252_v13  ;;  %v2599_v63 = vld [vmem:[%s23178_s0 + $0x223] sm:$0xff] }
 0x36a   :  { %v2864_v4 = vpop.f32.mrf.mxu0  ;;  %v3507_v52 = vpop.f32.mrf.mxu1 }
 0x36b   :  { %v3130_v35 = vadd.f32 %v2864_v4, %v17250_v32  ;;  %v18116_v5 = vadd.f32 %v3507_v52, %v3126_v8  ;;  %v2600_v32 = vld [vmem:[%s23178_s0 + $0x22b] sm:$0xff] }
 0x36c   :  { %v14306_v53 = vpop.f32.mrf.mxu0  ;;  %v14456_v22 = vpop.f32.mrf.mxu1  ;;  %v3254_v8 = vld [vmem:[%s23178_s0 + $0x204] sm:$0xff]  ;;  %v2643_v41 = vpack.c.bf16 %v2600_v32, %v2599_v63 }
 0x36e   :  { %v2869_v56 = vpop.f32.mrf.mxu0  ;;  %14404 = vmatmul.mubr.msk.bf16.gmra.mxu0 %vm285_vm2, %v2642_v29  ;;  %v3512_v9 = vpop.f32.mrf.mxu1  ;;  %14554 = vmatmul.mubr.msk.bf16.gmra.mxu1 %vm285_vm2, %v3299_v46 }
 0x36f   :  { %v3131_v47 = vadd.f32 %v2869_v56, %v17255_v25  ;;  %v18124_v15 = vadd.f32 %v3512_v9, %v3127_v2  ;;  %14407 = vmatprep.mubr.msk.bf16.mxu0 %vm15827_vm1, %v23202_v33  ;;  %14557 = vmatprep.mubr.msk.bf16.mxu1 %vm15827_vm1, %v23202_v33  ;;  %v3255_v25 = vld [vmem:[%s23178_s0 + $0x20c] sm:$0xff] }
 0x370   :  { %v14309_v2 = vpop.f32.mrf.mxu0  ;;  %v14459_v0 = vpop.f32.mrf.mxu1  ;;  %v3300_v4 = vpack.c.bf16 %v3255_v25, %v3254_v8  ;;  %v2601_v9 = vld [vmem:[%s23178_s0 + $0x233] sm:$0xff] }
 0x372   :  { %v2872_v13 = vpop.f32.mrf.mxu0  ;;  %v3515_v7 = vpop.f32.mrf.mxu1 }
 0x373   :  { %v3132_v52 = vadd.f32 %v2872_v13, %v17268_v34  ;;  %v18140_v29 = vadd.f32 %v3515_v7, %v3128_v18  ;;  %v2602_v34 = vld [vmem:[%s23178_s0 + $0x23b] sm:$0xff] }
 0x374   :  { %v14310_v46 = vpop.f32.mrf.mxu0  ;;  %v14460_v53 = vpop.f32.mrf.mxu1  ;;  %v3256_v18 = vld [vmem:[%s23178_s0 + $0x214] sm:$0xff]  ;;  %v2644_v0 = vpack.c.bf16 %v2602_v34, %v2601_v9 }
 0x376   :  { %v2877_v22 = vpop.f32.mrf.mxu0  ;;  %14408 = vmatmul.mubr.msk.bf16.gmra.mxu0 %vm285_vm2, %v2643_v41  ;;  %v3520_v56 = vpop.f32.mrf.mxu1  ;;  %14558 = vmatmul.mubr.msk.bf16.gmra.mxu1 %vm285_vm2, %v3300_v4 }
 0x377   :  { %v3133_v2 = vadd.f32 %v2877_v22, %v17273_v44  ;;  %v18148_v63 = vadd.f32 %v3520_v56, %v3129_v42  ;;  %14411 = vmatprep.mubr.msk.bf16.mxu0 %vm15827_vm1, %v23202_v33  ;;  %14561 = vmatprep.mubr.msk.bf16.mxu1 %vm15827_vm1, %v23202_v33  ;;  %v3257_v44 = vld [vmem:[%s23178_s0 + $0x21c] sm:$0xff] }
 0x378   :  { %v14313_v42 = vpop.f32.mrf.mxu0  ;;  %v14463_v32 = vpop.f32.mrf.mxu1  ;;  %v3301_v13 = vpack.c.bf16 %v3257_v44, %v3256_v18  ;;  %v2603_v56 = vld [vmem:[%s23178_s0 + $0x243] sm:$0xff] }
 0x37a   :  { %v2880_v8 = vpop.f32.mrf.mxu0  ;;  %v3523_v25 = vpop.f32.mrf.mxu1 }
 0x37b   :  { %v3134_v7 = vadd.f32 %v2880_v8, %v17286_v36  ;;  %v18164_v41 = vadd.f32 %v3523_v25, %v3130_v35  ;;  %v2604_v36 = vld [vmem:[%s23178_s0 + $0x24b] sm:$0xff] }
 0x37c   :  { %v14314_v4 = vpop.f32.mrf.mxu0  ;;  %v14464_v46 = vpop.f32.mrf.mxu1  ;;  %v3258_v35 = vld [vmem:[%s23178_s0 + $0x224] sm:$0xff]  ;;  %v2645_v32 = vpack.c.bf16 %v2604_v36, %v2603_v56 }
 0x37e   :  { %v2885_v53 = vpop.f32.mrf.mxu0  ;;  %14412 = vmatmul.mubr.msk.bf16.gmra.mxu0 %vm285_vm2, %v2644_v0  ;;  %v3528_v22 = vpop.f32.mrf.mxu1  ;;  %14562 = vmatmul.mubr.msk.bf16.gmra.mxu1 %vm285_vm2, %v3301_v13 }
 0x37f   :  { %v3135_v42 = vadd.f32 %v2885_v53, %v17291_v3  ;;  %v18172_v9 = vadd.f32 %v3528_v22, %v3131_v47  ;;  %14415 = vmatprep.mubr.msk.bf16.mxu0 %vm15827_vm1, %v23202_v33  ;;  %14565 = vmatprep.mubr.msk.bf16.mxu1 %vm15827_vm1, %v23202_v33  ;;  %v3259_v3 = vld [vmem:[%s23178_s0 + $0x22c] sm:$0xff] }
 0x380   :  { %v14317_v47 = vpop.f32.mrf.mxu0  ;;  %v14467_v34 = vpop.f32.mrf.mxu1  ;;  %v3302_v8 = vpack.c.bf16 %v3259_v3, %v3258_v35  ;;  %v2605_v22 = vld [vmem:[%s23178_s0 + $0x253] sm:$0xff] }
 0x382   :  { %v2888_v18 = vpop.f32.mrf.mxu0  ;;  %v3531_v44 = vpop.f32.mrf.mxu1 }
 0x383   :  { %v3136_v25 = vadd.f32 %v2888_v18, %v17304_v59  ;;  %v18188_v0 = vadd.f32 %v3531_v44, %v3132_v52  ;;  %v2606_v59 = vld [vmem:[%s23178_s0 + $0x25b] sm:$0xff] }
 0x384   :  { %v14318_v13 = vpop.f32.mrf.mxu0  ;;  %v14468_v4 = vpop.f32.mrf.mxu1  ;;  %v3260_v52 = vld [vmem:[%s23178_s0 + $0x234] sm:$0xff]  ;;  %v2646_v34 = vpack.c.bf16 %v2606_v59, %v2605_v22  ;;  %v3263_v59 = vld [vmem:[%s23178_s0 + $0x24c] sm:$0xff] }
 0x386   :  { %v2893_v46 = vpop.f32.mrf.mxu0  ;;  %14416 = vmatmul.mubr.msk.bf16.gmra.mxu0 %vm285_vm2, %v2645_v32  ;;  %v3536_v53 = vpop.f32.mrf.mxu1  ;;  %14566 = vmatmul.mubr.msk.bf16.gmra.mxu1 %vm285_vm2, %v3302_v8 }
 0x387   :  { %v3137_v47 = vadd.f32 %v2893_v46, %v17309_v23  ;;  %v18196_v56 = vadd.f32 %v3536_v53, %v3133_v2  ;;  %14419 = vmatprep.mubr.msk.bf16.mxu0 %vm15827_vm1, %v23202_v33  ;;  %14569 = vmatprep.mubr.msk.bf16.mxu1 %vm15827_vm1, %v23202_v33  ;;  %v3261_v23 = vld [vmem:[%s23178_s0 + $0x23c] sm:$0xff] }
 0x388   :  { %v14321_v2 = vpop.f32.mrf.mxu0  ;;  %v14471_v36 = vpop.f32.mrf.mxu1  ;;  %v3303_v18 = vpack.c.bf16 %v3261_v23, %v3260_v52  ;;  %v2607_v53 = vld [vmem:[%s23178_s0 + $0x263] sm:$0xff] }
 0x389   :  { %v23292_v2 = vld [vmem:[#allocation36_spill] sm:$0xff] }
 0x38a   :  { %v2896_v35 = vpop.f32.mrf.mxu0  ;;  %v3539_v3 = vpop.f32.mrf.mxu1 }
 0x38b   :  { %v3138_v44 = vadd.f32 %v2896_v35, %v17319_v54  ;;  %v18212_v32 = vadd.f32 %v3539_v3, %v3134_v7  ;;  %v2608_v54 = vld [vmem:[%s23178_s0 + $0x26b] sm:$0xff] }
 0x38c   :  { %v14322_v8 = vpop.f32.mrf.mxu0  ;;  %v14472_v13 = vpop.f32.mrf.mxu1  ;;  %v3262_v7 = vld [vmem:[%s23178_s0 + $0x244] sm:$0xff]  ;;  %v2647_v3 = vpack.c.bf16 %v2608_v54, %v2607_v53 }
 0x38e   :  { %v2901_v4 = vpop.f32.mrf.mxu0  ;;  %14420 = vmatmul.mubr.msk.bf16.gmra.mxu0 %vm285_vm2, %v2646_v34  ;;  %v3544_v46 = vpop.f32.mrf.mxu1  ;;  %14570 = vmatmul.mubr.msk.bf16.gmra.mxu1 %vm285_vm2, %v3303_v18  ;;  %v3304_v34 = vpack.c.bf16 %v3263_v59, %v3262_v7 }
 0x38f   :  { %v3139_v36 = vadd.f32 %v2901_v4, %v23292_v2  ;;  %v18220_v22 = vadd.f32 %v3544_v46, %v3135_v42  ;;  %14423 = vmatprep.mubr.msk.bf16.mxu0 %vm15827_vm1, %v23202_v33  ;;  %14573 = vmatprep.mubr.msk.bf16.mxu1 %vm15827_vm1, %v23202_v33 }
 0x390   :  { %v14325_v42 = vpop.f32.mrf.mxu0  ;;  %v14475_v52 = vpop.f32.mrf.mxu1 }
 0x391   :  { %23293 = vst [vmem:[#allocation33_spill] sm:$0xff] %v18220_v22 }
 0x392   :  { %v2904_v23 = vpop.f32.mrf.mxu0  ;;  %v3547_v35 = vpop.f32.mrf.mxu1 }
 0x393   :  { %v3140_v18 = vadd.f32 %v2904_v23, %v17343_v10  ;;  %v18236_v8 = vadd.f32 %v3547_v35, %v3136_v25  ;;  %v2609_v10 = vld [vmem:[%s23178_s0 + $0x273] sm:$0x3] }
 0x394   :  { %v14326_v13 = vpop.f32.mrf.mxu0  ;;  %v14476_v4 = vpop.f32.mrf.mxu1  ;;  %v3264_v25 = vld [vmem:[%s23178_s0 + $0x254] sm:$0xff]  ;;  %v2648_v59 = vpack.c.bf16 %v2609_v10, %v2609_v10 }
 0x396   :  { %v2909_v46 = vpop.f32.mrf.mxu0  ;;  %14424 = vmatmul.mubr.msk.bf16.gmra.mxu0 %vm285_vm2, %v2647_v3  ;;  %v3552_v2 = vpop.f32.mrf.mxu1  ;;  %14574 = vmatmul.mubr.msk.bf16.gmra.mxu1 %vm285_vm2, %v3304_v34 }
 0x397   :  { %v3141_v22 = vadd.f32 %v2909_v46, %v17348_v12  ;;  %v18241_v42 = vadd.f32 %v3552_v2, %v3137_v47  ;;  %14427 = vmatprep.mubr.msk.bf16.mxu0 %vm15827_vm1, %v23202_v33  ;;  %14577 = vmatprep.mubr.msk.bf16.mxu1 %vm15827_vm1, %v23202_v33  ;;  %v3265_v12 = vld [vmem:[%s23178_s0 + $0x25c] sm:$0xff]  ;;  %v3266_v46 = vld [vmem:[%s23178_s0 + $0x264] sm:$0xff] }
 0x398   :  { %v14329_v47 = vpop.f32.mrf.mxu0  ;;  %v14479_v53 = vpop.f32.mrf.mxu1  ;;  %v3305_v52 = vpack.c.bf16 %v3265_v12, %v3264_v25 }
 0x39a   :  { %v2912_v54 = vpop.f32.mrf.mxu0  ;;  %v3555_v7 = vpop.f32.mrf.mxu1 }
 0x39b   :  { %v3142_v23 = vadd.f32 %v2912_v54, %v17364_v57  ;;  %v18257_v35 = vadd.f32 %v3555_v7, %v3138_v44  ;;  %v3267_v57 = vld [vmem:[%s23178_s0 + $0x26c] sm:$0xff]  ;;  %v3851_v44 = vld [vmem:[%s23178_s0 + $0x24] sm:$0xff] }
 0x39c   :  { %v14330_v3 = vpop.f32.mrf.mxu0  ;;  %v14480_v34 = vpop.f32.mrf.mxu1  ;;  %v3306_v53 = vpack.c.bf16 %v3267_v57, %v3266_v46 }
 0x39e   :  { %v2917_v13 = vpop.f32.mrf.mxu0  ;;  %14428 = vmatmul.mubr.msk.bf16.gmra.mxu0 %vm285_vm2, %v2648_v59  ;;  %v3560_v4 = vpop.f32.mrf.mxu1  ;;  %14578 = vmatmul.mubr.msk.bf16.gmra.mxu1 %vm285_vm2, %v3305_v52 }
 0x39f   :  { %v3143_v2 = vadd.f32 %v2917_v13, %v17372_v31  ;;  %v18265_v10 = vadd.f32 %v3560_v4, %v3139_v36  ;;  %14581 = vmatprep.mubr.msk.bf16.mxu1 %vm15827_vm1, %v23202_v33  ;;  %14591 = vmatprep.mubr.msk.bf16.mxu0 %vm15827_vm1, %v23202_v33  ;;  %v3852_v31 = vld [vmem:[%s23178_s0 + $0x2c] sm:$0xff] }
 0x3a0   :  { %v14333_v36 = vpop.f32.mrf.mxu0  ;;  %v14483_v25 = vpop.f32.mrf.mxu1  ;;  %v3928_v54 = vpack.c.bf16 %v3852_v31, %v3851_v44 }
 0x3a2   :  { %v2920_v12 = vpop.f32.mrf.mxu0  ;;  %v3563_v47 = vpop.f32.mrf.mxu1 }
 0x3a3   :  { %v3144_v7 = vadd.f32 %v2920_v12, %v17388_v16  ;;  %v18281_v59 = vadd.f32 %v3563_v47, %v3140_v18  ;;  %v3268_v16 = vld [vmem:[%s23178_s0 + $0x274] sm:$0x3] }
 0x3a4   :  { %v14334_v52 = vpop.f32.mrf.mxu0  ;;  %v14484_v3 = vpop.f32.mrf.mxu1  ;;  %v3853_v18 = vld [vmem:[%s23178_s0 + $0x34] sm:$0xff]  ;;  %v3307_v31 = vpack.c.bf16 %v3268_v16, %v3268_v16 }
 0x3a6   :  { %v2925_v34 = vpop.f32.mrf.mxu0  ;;  %v3568_v13 = vpop.f32.mrf.mxu1  ;;  %14582 = vmatmul.mubr.msk.bf16.gmra.mxu1 %vm285_vm2, %v3306_v53  ;;  %14592 = vmatmul.mubr.msk.bf16.vlgmr.msra.gmra.mxu0 %vm285_vm2, %v3928_v54 }
 0x3a7   :  { %v3145_v4 = vadd.f32 %v2925_v34, %v17396_v30  ;;  %v18286_v36 = vadd.f32 %v3568_v13, %v3141_v22  ;;  %14585 = vmatprep.mubr.msk.bf16.mxu1 %vm15827_vm1, %v23202_v33  ;;  %14595 = vmatprep.mubr.msk.bf16.mxu0 %vm15827_vm1, %v23202_v33  ;;  %v3854_v30 = vld [vmem:[%s23178_s0 + $0x3c] sm:$0xff]  ;;  %v3855_v34 = vld [vmem:[%s23178_s0 + $0x44] sm:$0xff] }
 0x3a8   :  { %v14337_v22 = vpop.f32.mrf.mxu0  ;;  %v14487_v46 = vpop.f32.mrf.mxu1  ;;  %v3929_v25 = vpack.c.bf16 %v3854_v30, %v3853_v18 }
 0x3aa   :  { %v2928_v57 = vpop.f32.mrf.mxu0  ;;  %v3571_v44 = vpop.f32.mrf.mxu1 }
 0x3ab   :  { %v3146_v12 = vadd.f32 %v2928_v57, %v17412_v6  ;;  %v18302_v47 = vadd.f32 %v3571_v44, %v3142_v23  ;;  %v3856_v6 = vld [vmem:[%s23178_s0 + $0x4c] sm:$0xff] }
 0x3ac   :  { %v14338_v53 = vpop.f32.mrf.mxu0  ;;  %v14488_v54 = vpop.f32.mrf.mxu1  ;;  %v4510_v23 = vld [vmem:[%s23178_s0 + $0x25] sm:$0xff]  ;;  %v3930_v46 = vpack.c.bf16 %v3856_v6, %v3855_v34 }
 0x3ae   :  { %v2933_v52 = vpop.f32.mrf.mxu0  ;;  %v3576_v3 = vpop.f32.mrf.mxu1  ;;  %14586 = vmatmul.mubr.msk.bf16.gmra.mxu1 %vm285_vm2, %v3307_v31  ;;  %14596 = vmatmul.mubr.msk.bf16.gmra.mxu0 %vm285_vm2, %v3929_v25 }
 0x3af   :  { %v3147_v13 = vadd.f32 %v2933_v52, %v17420_v19  ;;  %v18310_v16 = vadd.f32 %v3576_v3, %v3143_v2  ;;  %14599 = vmatprep.mubr.msk.bf16.mxu0 %vm15827_vm1, %v23202_v33  ;;  %14749 = vmatprep.mubr.msk.bf16.mxu1 %vm15827_vm1, %v23202_v33  ;;  %v4511_v19 = vld [vmem:[%s23178_s0 + $0x2d] sm:$0xff] }
 0x3b0   :  { %v14341_v2 = vpop.f32.mrf.mxu0  ;;  %v14491_v18 = vpop.f32.mrf.mxu1  ;;  %v4587_v57 = vpack.c.bf16 %v4511_v19, %v4510_v23  ;;  %v3857_v3 = vld [vmem:[%s23178_s0 + $0x54] sm:$0xff] }
 0x3b2   :  { %v2936_v30 = vpop.f32.mrf.mxu0  ;;  %v3579_v22 = vpop.f32.mrf.mxu1 }
 0x3b3   :  { %v3148_v44 = vadd.f32 %v2936_v30, %v17436_v37  ;;  %v18326_v31 = vadd.f32 %v3579_v22, %v3144_v7  ;;  %v3858_v37 = vld [vmem:[%s23178_s0 + $0x5c] sm:$0xff] }
 0x3b4   :  { %v14342_v25 = vpop.f32.mrf.mxu0  ;;  %v14492_v53 = vpop.f32.mrf.mxu1  ;;  %v4512_v7 = vld [vmem:[%s23178_s0 + $0x35] sm:$0xff]  ;;  %v3931_v18 = vpack.c.bf16 %v3858_v37, %v3857_v3 }
 0x3b6   :  { %v2941_v54 = vpop.f32.mrf.mxu0  ;;  %v3584_v52 = vpop.f32.mrf.mxu1  ;;  %14600 = vmatmul.mubr.msk.bf16.gmra.mxu0 %vm285_vm2, %v3930_v46  ;;  %14750 = vmatmul.mubr.msk.bf16.vlgmr.msra.gmra.mxu1 %vm285_vm2, %v4587_v57 }
 0x3b7   :  { %v3149_v2 = vadd.f32 %v2941_v54, %v17444_v26  ;;  %v18334_v34 = vadd.f32 %v3584_v52, %v3145_v4  ;;  %14603 = vmatprep.mubr.msk.bf16.mxu0 %vm15827_vm1, %v23202_v33  ;;  %14753 = vmatprep.mubr.msk.bf16.mxu1 %vm15827_vm1, %v23202_v33  ;;  %v4513_v26 = vld [vmem:[%s23178_s0 + $0x3d] sm:$0xff] }
 0x3b8   :  { %v14345_v4 = vpop.f32.mrf.mxu0  ;;  %v14495_v6 = vpop.f32.mrf.mxu1  ;;  %v4588_v30 = vpack.c.bf16 %v4513_v26, %v4512_v7  ;;  %v3859_v52 = vld [vmem:[%s23178_s0 + $0x64] sm:$0xff] }
 0x3ba   :  { %v2944_v23 = vpop.f32.mrf.mxu0  ;;  %v3587_v19 = vpop.f32.mrf.mxu1 }
 0x3bb   :  { %v3150_v22 = vadd.f32 %v2944_v23, %v17460_v55  ;;  %v18350_v46 = vadd.f32 %v3587_v19, %v3146_v12  ;;  %v3860_v55 = vld [vmem:[%s23178_s0 + $0x6c] sm:$0xff] }
 0x3bc   :  { %v14346_v57 = vpop.f32.mrf.mxu0  ;;  %v14496_v25 = vpop.f32.mrf.mxu1  ;;  %v4514_v12 = vld [vmem:[%s23178_s0 + $0x45] sm:$0xff]  ;;  %v3932_v6 = vpack.c.bf16 %v3860_v55, %v3859_v52 }
 0x3be   :  { %v2949_v53 = vpop.f32.mrf.mxu0  ;;  %v3592_v54 = vpop.f32.mrf.mxu1  ;;  %14604 = vmatmul.mubr.msk.bf16.gmra.mxu0 %vm285_vm2, %v3931_v18  ;;  %14754 = vmatmul.mubr.msk.bf16.gmra.mxu1 %vm285_vm2, %v4588_v30 }
 0x3bf   :  { %v3151_v4 = vadd.f32 %v2949_v53, %v17468_v38  ;;  %v18358_v3 = vadd.f32 %v3592_v54, %v3147_v13  ;;  %14607 = vmatprep.mubr.msk.bf16.mxu0 %vm15827_vm1, %v23202_v33  ;;  %14757 = vmatprep.mubr.msk.bf16.mxu1 %vm15827_vm1, %v23202_v33  ;;  %v4515_v38 = vld [vmem:[%s23178_s0 + $0x4d] sm:$0xff] }
 0x3c0   :  { %v14349_v13 = vpop.f32.mrf.mxu0  ;;  %v14499_v37 = vpop.f32.mrf.mxu1  ;;  %v4589_v23 = vpack.c.bf16 %v4515_v38, %v4514_v12  ;;  %v3861_v54 = vld [vmem:[%s23178_s0 + $0x74] sm:$0xff] }
 0x3c2   :  { %v2952_v7 = vpop.f32.mrf.mxu0  ;;  %v3595_v26 = vpop.f32.mrf.mxu1 }
 0x3c3   :  { %v3152_v19 = vadd.f32 %v2952_v7, %v17484_v17  ;;  %v18374_v18 = vadd.f32 %v3595_v26, %v3148_v44  ;;  %v3862_v17 = vld [vmem:[%s23178_s0 + $0x7c] sm:$0xff] }
 0x3c4   :  { %v14350_v30 = vpop.f32.mrf.mxu0  ;;  %v14500_v57 = vpop.f32.mrf.mxu1  ;;  %v4516_v44 = vld [vmem:[%s23178_s0 + $0x55] sm:$0xff]  ;;  %v3933_v37 = vpack.c.bf16 %v3862_v17, %v3861_v54 }
 0x3c6   :  { %v2957_v25 = vpop.f32.mrf.mxu0  ;;  %v3600_v53 = vpop.f32.mrf.mxu1  ;;  %14608 = vmatmul.mubr.msk.bf16.gmra.mxu0 %vm285_vm2, %v3932_v6  ;;  %14758 = vmatmul.mubr.msk.bf16.gmra.mxu1 %vm285_vm2, %v4589_v23 }
 0x3c7   :  { %v3153_v13 = vadd.f32 %v2957_v25, %v17492_v21  ;;  %v18382_v52 = vadd.f32 %v3600_v53, %v3149_v2  ;;  %14611 = vmatprep.mubr.msk.bf16.mxu0 %vm15827_vm1, %v23202_v33  ;;  %14761 = vmatprep.mubr.msk.bf16.mxu1 %vm15827_vm1, %v23202_v33  ;;  %v4517_v21 = vld [vmem:[%s23178_s0 + $0x5d] sm:$0xff] }
 0x3c8   :  { %v14353_v2 = vpop.f32.mrf.mxu0  ;;  %v14503_v55 = vpop.f32.mrf.mxu1  ;;  %v4590_v7 = vpack.c.bf16 %v4517_v21, %v4516_v44  ;;  %v3863_v53 = vld [vmem:[%s23178_s0 + $0x84] sm:$0xff] }
 0x3ca   :  { %v2960_v12 = vpop.f32.mrf.mxu0  ;;  %v3603_v38 = vpop.f32.mrf.mxu1 }
 0x3cb   :  { %v3154_v26 = vadd.f32 %v2960_v12, %v17508_v43  ;;  %v18398_v6 = vadd.f32 %v3603_v38, %v3150_v22  ;;  %v3864_v43 = vld [vmem:[%s23178_s0 + $0x8c] sm:$0xff] }
 0x3cc   :  { %v14354_v23 = vpop.f32.mrf.mxu0  ;;  %v14504_v30 = vpop.f32.mrf.mxu1  ;;  %v4518_v22 = vld [vmem:[%s23178_s0 + $0x65] sm:$0xff]  ;;  %v3934_v55 = vpack.c.bf16 %v3864_v43, %v3863_v53  ;;  %v23295_v38 = vld [vmem:[#allocation37_spill] sm:$0xff] }
 0x3cd   :  { %v4520_v43 = vld [vmem:[%s23178_s0 + $0x75] sm:$0xff] }
 0x3ce   :  { %v2965_v57 = vpop.f32.mrf.mxu0  ;;  %v3608_v25 = vpop.f32.mrf.mxu1  ;;  %14612 = vmatmul.mubr.msk.bf16.gmra.mxu0 %vm285_vm2, %v3933_v37  ;;  %14762 = vmatmul.mubr.msk.bf16.gmra.mxu1 %vm285_vm2, %v4590_v7 }
 0x3cf   :  { %v3155_v2 = vadd.f32 %v2965_v57, %v17516_v49  ;;  %v18406_v54 = vadd.f32 %v3608_v25, %v3151_v4  ;;  %14615 = vmatprep.mubr.msk.bf16.mxu0 %vm15827_vm1, %v23202_v33  ;;  %14765 = vmatprep.mubr.msk.bf16.mxu1 %vm15827_vm1, %v23202_v33  ;;  %v4519_v49 = vld [vmem:[%s23178_s0 + $0x6d] sm:$0xff] }
 0x3d0   :  { %v14357_v4 = vpop.f32.mrf.mxu0  ;;  %v14507_v17 = vpop.f32.mrf.mxu1  ;;  %v4591_v12 = vpack.c.bf16 %v4519_v49, %v4518_v22  ;;  %v4521_v22 = vld [vmem:[%s23178_s0 + $0x7d] sm:$0xff] }
 0x3d1   :  { %23294 = vst [vmem:[#allocation5_spill] sm:$0xff] %v18406_v54  ;;  %v3865_v4 = vld [vmem:[%s23178_s0 + $0x94] sm:$0xff] }
 0x3d2   :  { %v2968_v44 = vpop.f32.mrf.mxu0  ;;  %v3611_v21 = vpop.f32.mrf.mxu1  ;;  %v23297_v17 = vld [vmem:[#allocation6_spill] sm:$0xff] }
 0x3d3   :  { %v3156_v37 = vadd.f32 %v2968_v44, %v23295_v38  ;;  %v18422_v7 = vadd.f32 %v3611_v21, %v3152_v19  ;;  %v3866_v19 = vld [vmem:[%s23178_s0 + $0x9c] sm:$0xff] }
 0x3d4   :  { %v14358_v23 = vpop.f32.mrf.mxu0  ;;  %v14508_v30 = vpop.f32.mrf.mxu1  ;;  %v23299_v38 = vld [vmem:[#allocation7_spill] sm:$0xff] }
 0x3d5   :  { %23296 = vst [vmem:[#allocation34_spill] sm:$0xff] %v18422_v7 }
 0x3d6   :  { %v2973_v57 = vpop.f32.mrf.mxu0  ;;  %v3616_v25 = vpop.f32.mrf.mxu1  ;;  %14616 = vmatmul.mubr.msk.bf16.gmra.mxu0 %vm285_vm2, %v3934_v55  ;;  %14766 = vmatmul.mubr.msk.bf16.gmra.mxu1 %vm285_vm2, %v4591_v12  ;;  %v3935_v55 = vpack.c.bf16 %v3866_v19, %v3865_v4  ;;  %v4592_v12 = vpack.c.bf16 %v4521_v22, %v4520_v43  ;;  %v4522_v19 = vld [vmem:[%s23178_s0 + $0x85] sm:$0xff]  ;;  %v4523_v43 = vld [vmem:[%s23178_s0 + $0x8d] sm:$0xff] }
 0x3d7   :  { %v3157_v54 = vadd.f32 %v2973_v57, %v23297_v17  ;;  %v18430_v53 = vadd.f32 %v3616_v25, %v3153_v13  ;;  %14619 = vmatprep.mubr.msk.bf16.mxu0 %vm15827_vm1, %v23202_v33  ;;  %14769 = vmatprep.mubr.msk.bf16.mxu1 %vm15827_vm1, %v23202_v33 }
 0x3d8   :  { %v14361_v13 = vpop.f32.mrf.mxu0  ;;  %v14511_v49 = vpop.f32.mrf.mxu1 }
 0x3d9   :  { %23298 = vst [vmem:[#allocation35_spill] sm:$0xff] %v18430_v53  ;;  %v3867_v13 = vld [vmem:[%s23178_s0 + $0xa4] sm:$0xff] }
 0x3da   :  { %v2976_v44 = vpop.f32.mrf.mxu0  ;;  %v3619_v21 = vpop.f32.mrf.mxu1  ;;  %v23301_v49 = vld [vmem:[#allocation8_spill] sm:$0xff] }
 0x3db   :  { %v3158_v23 = vadd.f32 %v2976_v44, %v23299_v38  ;;  %v18446_v30 = vadd.f32 %v3619_v21, %v3154_v26  ;;  %v3868_v26 = vld [vmem:[%s23178_s0 + $0xac] sm:$0xff] }
 0x3dc   :  { %v14362_v57 = vpop.f32.mrf.mxu0  ;;  %v14512_v25 = vpop.f32.mrf.mxu1  ;;  %v3936_v21 = vpack.c.bf16 %v3868_v26, %v3867_v13  ;;  %v23305_v13 = vld [vmem:[#allocation10_spill] sm:$0xff] }
 0x3dd   :  { %23300 = vst [vmem:[#allocation36_spill] sm:$0xff] %v18446_v30  ;;  %v12497_v25 = vld [vmem:[%s23177_s1 + $0x20] sm:$0xf] }
 0x3de   :  { %v2981_v17 = vpop.f32.mrf.mxu0  ;;  %v3624_v53 = vpop.f32.mrf.mxu1  ;;  %14620 = vmatmul.mubr.msk.bf16.gmra.mxu0 %vm285_vm2, %v3935_v55  ;;  %14770 = vmatmul.mubr.msk.bf16.gmra.mxu1 %vm285_vm2, %v4592_v12  ;;  %v4593_v55 = vpack.c.bf16 %v4523_v43, %v4522_v19  ;;  %v23303_v12 = vld [vmem:[#allocation9_spill] sm:$0xff] }
 0x3df   :  { %v3159_v7 = vadd.f32 %v2981_v17, %v23301_v49  ;;  %v18454_v4 = vadd.f32 %v3624_v53, %v3155_v2  ;;  %14623 = vmatprep.mubr.msk.bf16.mxu0 %vm15827_vm1, %v23202_v33  ;;  %14773 = vmatprep.mubr.msk.bf16.mxu1 %vm15827_vm1, %v23202_v33  ;;  %v4524_v43 = vld [vmem:[%s23178_s0 + $0x95] sm:$0xff] }
 0x3e0   :  { %v14365_v2 = vpop.f32.mrf.mxu0  ;;  %v14515_v53 = vpop.f32.mrf.mxu1 }
 0x3e1   :  { %23302 = vst [vmem:[#allocation37_spill] sm:$0xff] %v18454_v4  ;;  %v5405_v4 = vsel %vm403_vm0, %v12497_v25, 0 }
 0x3e2   :  { %v2984_v22 = vpop.f32.mrf.mxu0  ;;  %v3627_v44 = vpop.f32.mrf.mxu1  ;;  %14906 = vmatpush3.bf16.msra.mxu0 %v5405_v4  ;;  %v3870_v4 = vld [vmem:[%s23178_s0 + $0xbc] sm:$0xff] }
 0x3e3   :  { %v3160_v38 = vadd.f32 %v2984_v22, %v23303_v12  ;;  %v18470_v57 = vadd.f32 %v3627_v44, %v3156_v37  ;;  %v3869_v37 = vld [vmem:[%s23178_s0 + $0xb4] sm:$0xff]  ;;  %v23307_v12 = vld [vmem:[#allocation11_spill] sm:$0xff] }
 0x3e4   :  { %v14366_v17 = vpop.f32.mrf.mxu0  ;;  %v14516_v49 = vpop.f32.mrf.mxu1 }
 0x3e5   :  { %23304 = vst [vmem:[#allocation6_spill] sm:$0xff] %v18470_v57 }
 0x3e6   :  { %v2989_v30 = vpop.f32.mrf.mxu0  ;;  %v3632_v2 = vpop.f32.mrf.mxu1  ;;  %14624 = vmatmul.mubr.msk.bf16.gmra.mxu0 %vm285_vm2, %v3936_v21  ;;  %14774 = vmatmul.mubr.msk.bf16.gmra.mxu1 %vm285_vm2, %v4593_v55  ;;  %v3937_v21 = vpack.c.bf16 %v3870_v4, %v3869_v37  ;;  %v4526_v4 = vld [vmem:[%s23178_s0 + $0xa5] sm:$0xff] }
 0x3e7   :  { %v3161_v26 = vadd.f32 %v2989_v30, %v23305_v13  ;;  %v18482_v19 = vadd.f32 %v3632_v2, %v3157_v54  ;;  %14627 = vmatprep.mubr.msk.bf16.mxu0 %vm15827_vm1, %v23202_v33  ;;  %14777 = vmatprep.mubr.msk.bf16.mxu1 %vm15827_vm1, %v23202_v33  ;;  %v4525_v30 = vld [vmem:[%s23178_s0 + $0x9d] sm:$0xff] }
 0x3e8   :  { %v14369_v54 = vpop.f32.mrf.mxu0  ;;  %v14519_v53 = vpop.f32.mrf.mxu1  ;;  %v4594_v55 = vpack.c.bf16 %v4525_v30, %v4524_v43  ;;  %v4527_v43 = vld [vmem:[%s23178_s0 + $0xad] sm:$0xff] }
 0x3e9   :  { %23306 = vst [vmem:[#allocation7_spill] sm:$0xff] %v18482_v19  ;;  %v3871_v54 = vld [vmem:[%s23178_s0 + $0xc4] sm:$0xff] }
 0x3ea   :  { %v2992_v22 = vpop.f32.mrf.mxu0  ;;  %v3635_v44 = vpop.f32.mrf.mxu1  ;;  %v23309_v53 = vld [vmem:[#allocation12_spill] sm:$0xff] }
 0x3eb   :  { %v3162_v25 = vadd.f32 %v2992_v22, %v23307_v12  ;;  %v18498_v17 = vadd.f32 %v3635_v44, %v3158_v23  ;;  %v3872_v23 = vld [vmem:[%s23178_s0 + $0xcc] sm:$0xff] }
 0x3ec   :  { %v14370_v49 = vpop.f32.mrf.mxu0  ;;  %v14520_v2 = vpop.f32.mrf.mxu1  ;;  %v3938_v44 = vpack.c.bf16 %v3872_v23, %v3871_v54  ;;  %v4528_v23 = vld [vmem:[%s23178_s0 + $0xb5] sm:$0xff] }
 0x3ed   :  { %23308 = vst [vmem:[#allocation8_spill] sm:$0xff] %v18498_v17 }
 0x3ee   :  { %v2997_v13 = vpop.f32.mrf.mxu0  ;;  %v3640_v19 = vpop.f32.mrf.mxu1  ;;  %14628 = vmatmul.mubr.msk.bf16.gmra.mxu0 %vm285_vm2, %v3937_v21  ;;  %14778 = vmatmul.mubr.msk.bf16.gmra.mxu1 %vm285_vm2, %v4594_v55  ;;  %v4595_v21 = vpack.c.bf16 %v4527_v43, %v4526_v4  ;;  %v23311_v55 = vld [vmem:[#allocation13_spill] sm:$0xff]  ;;  %v4529_v4 = vld [vmem:[%s23178_s0 + $0xbd] sm:$0xff] }
 0x3ef   :  { %v3163_v57 = vadd.f32 %v2997_v13, %v23309_v53  ;;  %v18506_v37 = vadd.f32 %v3640_v19, %v3159_v7  ;;  %14631 = vmatprep.mubr.msk.bf16.mxu0 %vm15827_vm1, %v23202_v33  ;;  %14781 = vmatprep.mubr.msk.bf16.mxu1 %vm15827_vm1, %v23202_v33 }
 0x3f0   :  { %v14373_v7 = vpop.f32.mrf.mxu0  ;;  %v14523_v19 = vpop.f32.mrf.mxu1 }
 0x3f1   :  { %23310 = vst [vmem:[#allocation9_spill] sm:$0xff] %v18506_v37  ;;  %v3873_v7 = vld [vmem:[%s23178_s0 + $0xd4] sm:$0xff] }
 0x3f2   :  { %v3000_v30 = vpop.f32.mrf.mxu0  ;;  %v3643_v22 = vpop.f32.mrf.mxu1  ;;  %v23313_v19 = vld [vmem:[#allocation14_spill] sm:$0xff] }
 0x3f3   :  { %v3164_v12 = vadd.f32 %v3000_v30, %v23311_v55  ;;  %v18522_v49 = vadd.f32 %v3643_v22, %v3160_v38  ;;  %v3874_v38 = vld [vmem:[%s23178_s0 + $0xdc] sm:$0xff] }
 0x3f4   :  { %v14374_v2 = vpop.f32.mrf.mxu0  ;;  %v14524_v13 = vpop.f32.mrf.mxu1  ;;  %v3939_v22 = vpack.c.bf16 %v3874_v38, %v3873_v7  ;;  %v4530_v38 = vld [vmem:[%s23178_s0 + $0xc5] sm:$0xff] }
 0x3f5   :  { %23312 = vst [vmem:[#allocation10_spill] sm:$0xff] %v18522_v49 }
 0x3f6   :  { %v3005_v53 = vpop.f32.mrf.mxu0  ;;  %v3648_v37 = vpop.f32.mrf.mxu1  ;;  %14632 = vmatmul.mubr.msk.bf16.gmra.mxu0 %vm285_vm2, %v3938_v44  ;;  %14782 = vmatmul.mubr.msk.bf16.gmra.mxu1 %vm285_vm2, %v4595_v21  ;;  %v4596_v44 = vpack.c.bf16 %v4529_v4, %v4528_v23  ;;  %v23315_v21 = vld [vmem:[#allocation15_spill] sm:$0xff]  ;;  %v4531_v23 = vld [vmem:[%s23178_s0 + $0xcd] sm:$0xff] }
 0x3f7   :  { %v3165_v17 = vadd.f32 %v3005_v53, %v23313_v19  ;;  %v18530_v54 = vadd.f32 %v3648_v37, %v3161_v26  ;;  %14635 = vmatprep.mubr.msk.bf16.mxu0 %vm15827_vm1, %v23202_v33  ;;  %14785 = vmatprep.mubr.msk.bf16.mxu1 %vm15827_vm1, %v23202_v33 }
 0x3f8   :  { %v14377_v26 = vpop.f32.mrf.mxu0  ;;  %v14527_v37 = vpop.f32.mrf.mxu1 }
 0x3f9   :  { %23314 = vst [vmem:[#allocation11_spill] sm:$0xff] %v18530_v54  ;;  %v3875_v26 = vld [vmem:[%s23178_s0 + $0xe4] sm:$0xff] }
 0x3fa   :  { %v3008_v43 = vpop.f32.mrf.mxu0  ;;  %v3651_v30 = vpop.f32.mrf.mxu1  ;;  %v23317_v37 = vld [vmem:[#allocation16_spill] sm:$0xff] }
 0x3fb   :  { %v3166_v55 = vadd.f32 %v3008_v43, %v23315_v21  ;;  %v18546_v2 = vadd.f32 %v3651_v30, %v3162_v25  ;;  %v3876_v25 = vld [vmem:[%s23178_s0 + $0xec] sm:$0xff] }
 0x3fc   :  { %v14378_v13 = vpop.f32.mrf.mxu0  ;;  %v14528_v53 = vpop.f32.mrf.mxu1  ;;  %v3940_v30 = vpack.c.bf16 %v3876_v25, %v3875_v26  ;;  %v4532_v25 = vld [vmem:[%s23178_s0 + $0xd5] sm:$0xff] }
 0x3fd   :  { %23316 = vst [vmem:[#allocation12_spill] sm:$0xff] %v18546_v2 }
 0x3fe   :  { %v3013_v19 = vpop.f32.mrf.mxu0  ;;  %v3656_v54 = vpop.f32.mrf.mxu1  ;;  %14636 = vmatmul.mubr.msk.bf16.gmra.mxu0 %vm285_vm2, %v3939_v22  ;;  %14786 = vmatmul.mubr.msk.bf16.gmra.mxu1 %vm285_vm2, %v4596_v44  ;;  %v4597_v22 = vpack.c.bf16 %v4531_v23, %v4530_v38  ;;  %v23319_v44 = vld [vmem:[#allocation17_spill] sm:$0xff]  ;;  %v4533_v38 = vld [vmem:[%s23178_s0 + $0xdd] sm:$0xff] }
 0x3ff   :  { %v3167_v49 = vadd.f32 %v3013_v19, %v23317_v37  ;;  %v18554_v7 = vadd.f32 %v3656_v54, %v3163_v57  ;;  %14639 = vmatprep.mubr.msk.bf16.mxu0 %vm15827_vm1, %v23202_v33  ;;  %14789 = vmatprep.mubr.msk.bf16.mxu1 %vm15827_vm1, %v23202_v33 }
 0x400   :  { %v14381_v57 = vpop.f32.mrf.mxu0  ;;  %v14531_v54 = vpop.f32.mrf.mxu1 }
 0x401   :  { %23318 = vst [vmem:[#allocation13_spill] sm:$0xff] %v18554_v7  ;;  %v3877_v57 = vld [vmem:[%s23178_s0 + $0xf4] sm:$0xff] }
 0x402   :  { %v3016_v4 = vpop.f32.mrf.mxu0  ;;  %v3659_v43 = vpop.f32.mrf.mxu1  ;;  %v23321_v54 = vld [vmem:[#allocation18_spill] sm:$0xff] }
 0x403   :  { %v3168_v21 = vadd.f32 %v3016_v4, %v23319_v44  ;;  %v18570_v13 = vadd.f32 %v3659_v43, %v3164_v12  ;;  %v3878_v12 = vld [vmem:[%s23178_s0 + $0xfc] sm:$0xff] }
 0x404   :  { %v14382_v53 = vpop.f32.mrf.mxu0  ;;  %v14532_v19 = vpop.f32.mrf.mxu1  ;;  %v3941_v43 = vpack.c.bf16 %v3878_v12, %v3877_v57  ;;  %v4534_v12 = vld [vmem:[%s23178_s0 + $0xe5] sm:$0xff] }
 0x405   :  { %23320 = vst [vmem:[#allocation14_spill] sm:$0xff] %v18570_v13 }
 0x406   :  { %v3021_v37 = vpop.f32.mrf.mxu0  ;;  %v3664_v7 = vpop.f32.mrf.mxu1  ;;  %14640 = vmatmul.mubr.msk.bf16.gmra.mxu0 %vm285_vm2, %v3940_v30  ;;  %14790 = vmatmul.mubr.msk.bf16.gmra.mxu1 %vm285_vm2, %v4597_v22  ;;  %v4598_v30 = vpack.c.bf16 %v4533_v38, %v4532_v25  ;;  %v23323_v22 = vld [vmem:[#allocation19_spill] sm:$0xff]  ;;  %v4535_v25 = vld [vmem:[%s23178_s0 + $0xed] sm:$0xff] }
 0x407   :  { %v3169_v2 = vadd.f32 %v3021_v37, %v23321_v54  ;;  %v18578_v26 = vadd.f32 %v3664_v7, %v3165_v17  ;;  %14643 = vmatprep.mubr.msk.bf16.mxu0 %vm15827_vm1, %v23202_v33  ;;  %14793 = vmatprep.mubr.msk.bf16.mxu1 %vm15827_vm1, %v23202_v33 }
 0x408   :  { %v14385_v17 = vpop.f32.mrf.mxu0  ;;  %v14535_v7 = vpop.f32.mrf.mxu1 }
 0x409   :  { %23322 = vst [vmem:[#allocation15_spill] sm:$0xff] %v18578_v26  ;;  %v3879_v17 = vld [vmem:[%s23178_s0 + $0x104] sm:$0xff] }
 0x40a   :  { %v3024_v23 = vpop.f32.mrf.mxu0  ;;  %v3667_v4 = vpop.f32.mrf.mxu1  ;;  %v23325_v7 = vld [vmem:[#allocation20_spill] sm:$0xff] }
 0x40b   :  { %v3170_v44 = vadd.f32 %v3024_v23, %v23323_v22  ;;  %v18594_v53 = vadd.f32 %v3667_v4, %v3166_v55  ;;  %v3880_v55 = vld [vmem:[%s23178_s0 + $0x10c] sm:$0xff] }
 0x40c   :  { %v14386_v19 = vpop.f32.mrf.mxu0  ;;  %v14536_v37 = vpop.f32.mrf.mxu1  ;;  %v3942_v4 = vpack.c.bf16 %v3880_v55, %v3879_v17  ;;  %v4536_v55 = vld [vmem:[%s23178_s0 + $0xf5] sm:$0xff] }
 0x40d   :  { %23324 = vst [vmem:[#allocation16_spill] sm:$0xff] %v18594_v53 }
 0x40e   :  { %v3029_v54 = vpop.f32.mrf.mxu0  ;;  %v3672_v26 = vpop.f32.mrf.mxu1  ;;  %14644 = vmatmul.mubr.msk.bf16.gmra.mxu0 %vm285_vm2, %v3941_v43  ;;  %14794 = vmatmul.mubr.msk.bf16.gmra.mxu1 %vm285_vm2, %v4598_v30  ;;  %v4599_v43 = vpack.c.bf16 %v4535_v25, %v4534_v12  ;;  %v23327_v30 = vld [vmem:[#allocation21_spill] sm:$0xff]  ;;  %v4537_v12 = vld [vmem:[%s23178_s0 + $0xfd] sm:$0xff] }
 0x40f   :  { %v3171_v13 = vadd.f32 %v3029_v54, %v23325_v7  ;;  %v18602_v57 = vadd.f32 %v3672_v26, %v3167_v49  ;;  %14647 = vmatprep.mubr.msk.bf16.mxu0 %vm15827_vm1, %v23202_v33  ;;  %14797 = vmatprep.mubr.msk.bf16.mxu1 %vm15827_vm1, %v23202_v33 }
 0x410   :  { %v14389_v49 = vpop.f32.mrf.mxu0  ;;  %v14539_v26 = vpop.f32.mrf.mxu1 }
 0x411   :  { %23326 = vst [vmem:[#allocation17_spill] sm:$0xff] %v18602_v57  ;;  %v3881_v49 = vld [vmem:[%s23178_s0 + $0x114] sm:$0xff] }
 0x412   :  { %v3032_v38 = vpop.f32.mrf.mxu0  ;;  %v3675_v23 = vpop.f32.mrf.mxu1  ;;  %v23329_v26 = vld [vmem:[#allocation22_spill] sm:$0xff] }
 0x413   :  { %v3172_v22 = vadd.f32 %v3032_v38, %v23327_v30  ;;  %v18618_v19 = vadd.f32 %v3675_v23, %v3168_v21  ;;  %v3882_v21 = vld [vmem:[%s23178_s0 + $0x11c] sm:$0xff] }
 0x414   :  { %v14390_v37 = vpop.f32.mrf.mxu0  ;;  %v14540_v54 = vpop.f32.mrf.mxu1  ;;  %v3943_v23 = vpack.c.bf16 %v3882_v21, %v3881_v49  ;;  %v4538_v21 = vld [vmem:[%s23178_s0 + $0x105] sm:$0xff] }
 0x415   :  { %23328 = vst [vmem:[#allocation18_spill] sm:$0xff] %v18618_v19 }
 0x416   :  { %v3037_v7 = vpop.f32.mrf.mxu0  ;;  %v3680_v57 = vpop.f32.mrf.mxu1  ;;  %14648 = vmatmul.mubr.msk.bf16.gmra.mxu0 %vm285_vm2, %v3942_v4  ;;  %14798 = vmatmul.mubr.msk.bf16.gmra.mxu1 %vm285_vm2, %v4599_v43  ;;  %v4600_v4 = vpack.c.bf16 %v4537_v12, %v4536_v55  ;;  %v23331_v43 = vld [vmem:[#allocation23_spill] sm:$0xff]  ;;  %v4539_v55 = vld [vmem:[%s23178_s0 + $0x10d] sm:$0xff] }
 0x417   :  { %v3173_v53 = vadd.f32 %v3037_v7, %v23329_v26  ;;  %v18626_v17 = vadd.f32 %v3680_v57, %v3169_v2  ;;  %14651 = vmatprep.mubr.msk.bf16.mxu0 %vm15827_vm1, %v23202_v33  ;;  %14801 = vmatprep.mubr.msk.bf16.mxu1 %vm15827_vm1, %v23202_v33 }
 0x418   :  { %v14393_v2 = vpop.f32.mrf.mxu0  ;;  %v14543_v57 = vpop.f32.mrf.mxu1 }
 0x419   :  { %23330 = vst [vmem:[#allocation19_spill] sm:$0xff] %v18626_v17  ;;  %v3883_v2 = vld [vmem:[%s23178_s0 + $0x124] sm:$0xff] }
 0x41a   :  { %v3040_v25 = vpop.f32.mrf.mxu0  ;;  %v3683_v38 = vpop.f32.mrf.mxu1  ;;  %v23333_v57 = vld [vmem:[#allocation24_spill] sm:$0xff] }
 0x41b   :  { %v3174_v30 = vadd.f32 %v3040_v25, %v23331_v43  ;;  %v18642_v37 = vadd.f32 %v3683_v38, %v3170_v44  ;;  %v3884_v44 = vld [vmem:[%s23178_s0 + $0x12c] sm:$0xff] }
 0x41c   :  { %v14394_v54 = vpop.f32.mrf.mxu0  ;;  %v14544_v7 = vpop.f32.mrf.mxu1  ;;  %v3944_v38 = vpack.c.bf16 %v3884_v44, %v3883_v2  ;;  %v4540_v44 = vld [vmem:[%s23178_s0 + $0x115] sm:$0xff] }
 0x41d   :  { %23332 = vst [vmem:[#allocation20_spill] sm:$0xff] %v18642_v37 }
 0x41e   :  { %v3045_v26 = vpop.f32.mrf.mxu0  ;;  %v3688_v17 = vpop.f32.mrf.mxu1  ;;  %14652 = vmatmul.mubr.msk.bf16.gmra.mxu0 %vm285_vm2, %v3943_v23  ;;  %14802 = vmatmul.mubr.msk.bf16.gmra.mxu1 %vm285_vm2, %v4600_v4  ;;  %v4601_v23 = vpack.c.bf16 %v4539_v55, %v4538_v21  ;;  %v23335_v4 = vld [vmem:[#allocation25_spill] sm:$0xff]  ;;  %v4541_v21 = vld [vmem:[%s23178_s0 + $0x11d] sm:$0xff] }
 0x41f   :  { %v3175_v19 = vadd.f32 %v3045_v26, %v23333_v57  ;;  %v18650_v49 = vadd.f32 %v3688_v17, %v3171_v13  ;;  %14655 = vmatprep.mubr.msk.bf16.mxu0 %vm15827_vm1, %v23202_v33  ;;  %14805 = vmatprep.mubr.msk.bf16.mxu1 %vm15827_vm1, %v23202_v33 }
 0x420   :  { %v14397_v13 = vpop.f32.mrf.mxu0  ;;  %v14547_v17 = vpop.f32.mrf.mxu1 }
 0x421   :  { %23334 = vst [vmem:[#allocation21_spill] sm:$0xff] %v18650_v49  ;;  %v3885_v13 = vld [vmem:[%s23178_s0 + $0x134] sm:$0xff] }
 0x422   :  { %v3048_v12 = vpop.f32.mrf.mxu0  ;;  %v3691_v25 = vpop.f32.mrf.mxu1  ;;  %v23337_v17 = vld [vmem:[#allocation26_spill] sm:$0xff] }
 0x423   :  { %v3176_v43 = vadd.f32 %v3048_v12, %v23335_v4  ;;  %v18666_v54 = vadd.f32 %v3691_v25, %v3172_v22  ;;  %v3886_v22 = vld [vmem:[%s23178_s0 + $0x13c] sm:$0xff] }
 0x424   :  { %v14398_v7 = vpop.f32.mrf.mxu0  ;;  %v14548_v26 = vpop.f32.mrf.mxu1  ;;  %v3945_v25 = vpack.c.bf16 %v3886_v22, %v3885_v13  ;;  %v4542_v22 = vld [vmem:[%s23178_s0 + $0x125] sm:$0xff] }
 0x425   :  { %23336 = vst [vmem:[#allocation22_spill] sm:$0xff] %v18666_v54 }
 0x426   :  { %v3053_v57 = vpop.f32.mrf.mxu0  ;;  %v3696_v49 = vpop.f32.mrf.mxu1  ;;  %14656 = vmatmul.mubr.msk.bf16.gmra.mxu0 %vm285_vm2, %v3944_v38  ;;  %14806 = vmatmul.mubr.msk.bf16.gmra.mxu1 %vm285_vm2, %v4601_v23  ;;  %v4602_v38 = vpack.c.bf16 %v4541_v21, %v4540_v44  ;;  %v23339_v23 = vld [vmem:[#allocation27_spill] sm:$0xff]  ;;  %v4543_v44 = vld [vmem:[%s23178_s0 + $0x12d] sm:$0xff] }
 0x427   :  { %v3177_v37 = vadd.f32 %v3053_v57, %v23337_v17  ;;  %v18674_v2 = vadd.f32 %v3696_v49, %v3173_v53  ;;  %14659 = vmatprep.mubr.msk.bf16.mxu0 %vm15827_vm1, %v23202_v33  ;;  %14809 = vmatprep.mubr.msk.bf16.mxu1 %vm15827_vm1, %v23202_v33 }
 0x428   :  { %v14401_v53 = vpop.f32.mrf.mxu0  ;;  %v14551_v49 = vpop.f32.mrf.mxu1 }
 0x429   :  { %23338 = vst [vmem:[#allocation23_spill] sm:$0xff] %v18674_v2  ;;  %v3887_v53 = vld [vmem:[%s23178_s0 + $0x144] sm:$0xff] }
 0x42a   :  { %v3056_v55 = vpop.f32.mrf.mxu0  ;;  %v3699_v12 = vpop.f32.mrf.mxu1  ;;  %v23341_v49 = vld [vmem:[#allocation28_spill] sm:$0xff] }
 0x42b   :  { %v3178_v4 = vadd.f32 %v3056_v55, %v23339_v23  ;;  %v18690_v7 = vadd.f32 %v3699_v12, %v3174_v30  ;;  %v3888_v30 = vld [vmem:[%s23178_s0 + $0x14c] sm:$0xff] }
 0x42c   :  { %v14402_v26 = vpop.f32.mrf.mxu0  ;;  %v14552_v57 = vpop.f32.mrf.mxu1  ;;  %v3946_v12 = vpack.c.bf16 %v3888_v30, %v3887_v53  ;;  %v4544_v30 = vld [vmem:[%s23178_s0 + $0x135] sm:$0xff] }
 0x42d   :  { %23340 = vst [vmem:[#allocation24_spill] sm:$0xff] %v18690_v7 }
 0x42e   :  { %v3061_v17 = vpop.f32.mrf.mxu0  ;;  %v3704_v2 = vpop.f32.mrf.mxu1  ;;  %14660 = vmatmul.mubr.msk.bf16.gmra.mxu0 %vm285_vm2, %v3945_v25  ;;  %14810 = vmatmul.mubr.msk.bf16.gmra.mxu1 %vm285_vm2, %v4602_v38  ;;  %v4603_v25 = vpack.c.bf16 %v4543_v44, %v4542_v22  ;;  %v23343_v38 = vld [vmem:[#allocation29_spill] sm:$0xff]  ;;  %v4545_v22 = vld [vmem:[%s23178_s0 + $0x13d] sm:$0xff] }
 0x42f   :  { %v3179_v54 = vadd.f32 %v3061_v17, %v23341_v49  ;;  %v18698_v13 = vadd.f32 %v3704_v2, %v3175_v19  ;;  %14663 = vmatprep.mubr.msk.bf16.mxu0 %vm15827_vm1, %v23202_v33  ;;  %14813 = vmatprep.mubr.msk.bf16.mxu1 %vm15827_vm1, %v23202_v33 }
 0x430   :  { %v14405_v19 = vpop.f32.mrf.mxu0  ;;  %v14555_v2 = vpop.f32.mrf.mxu1 }
 0x431   :  { %23342 = vst [vmem:[#allocation25_spill] sm:$0xff] %v18698_v13  ;;  %v3889_v19 = vld [vmem:[%s23178_s0 + $0x154] sm:$0xff] }
 0x432   :  { %v3064_v21 = vpop.f32.mrf.mxu0  ;;  %v3707_v55 = vpop.f32.mrf.mxu1  ;;  %v23345_v2 = vld [vmem:[#allocation30_spill] sm:$0xff] }
 0x433   :  { %v3180_v23 = vadd.f32 %v3064_v21, %v23343_v38  ;;  %v18714_v26 = vadd.f32 %v3707_v55, %v3176_v43  ;;  %v3890_v43 = vld [vmem:[%s23178_s0 + $0x15c] sm:$0xff] }
 0x434   :  { %v14406_v57 = vpop.f32.mrf.mxu0  ;;  %v14556_v17 = vpop.f32.mrf.mxu1  ;;  %v3947_v55 = vpack.c.bf16 %v3890_v43, %v3889_v19  ;;  %v4546_v43 = vld [vmem:[%s23178_s0 + $0x145] sm:$0xff] }
 0x435   :  { %23344 = vst [vmem:[#allocation26_spill] sm:$0xff] %v18714_v26 }
 0x436   :  { %v3069_v49 = vpop.f32.mrf.mxu0  ;;  %v3712_v13 = vpop.f32.mrf.mxu1  ;;  %14664 = vmatmul.mubr.msk.bf16.gmra.mxu0 %vm285_vm2, %v3946_v12  ;;  %14814 = vmatmul.mubr.msk.bf16.gmra.mxu1 %vm285_vm2, %v4603_v25  ;;  %v4604_v12 = vpack.c.bf16 %v4545_v22, %v4544_v30  ;;  %v23347_v25 = vld [vmem:[#allocation31_spill] sm:$0xff]  ;;  %v4547_v30 = vld [vmem:[%s23178_s0 + $0x14d] sm:$0xff] }
 0x437   :  { %v3181_v7 = vadd.f32 %v3069_v49, %v23345_v2  ;;  %v18722_v53 = vadd.f32 %v3712_v13, %v3177_v37  ;;  %14667 = vmatprep.mubr.msk.bf16.mxu0 %vm15827_vm1, %v23202_v33  ;;  %14817 = vmatprep.mubr.msk.bf16.mxu1 %vm15827_vm1, %v23202_v33 }
 0x438   :  { %v14409_v37 = vpop.f32.mrf.mxu0  ;;  %v14559_v13 = vpop.f32.mrf.mxu1 }
 0x439   :  { %23346 = vst [vmem:[#allocation27_spill] sm:$0xff] %v18722_v53  ;;  %v3891_v37 = vld [vmem:[%s23178_s0 + $0x164] sm:$0xff] }
 0x43a   :  { %v3072_v44 = vpop.f32.mrf.mxu0  ;;  %v3715_v21 = vpop.f32.mrf.mxu1  ;;  %v23349_v13 = vld [vmem:[#allocation32_spill] sm:$0xff] }
 0x43b   :  { %v3182_v38 = vadd.f32 %v3072_v44, %v23347_v25  ;;  %v18738_v57 = vadd.f32 %v3715_v21, %v3178_v4  ;;  %v3892_v4 = vld [vmem:[%s23178_s0 + $0x16c] sm:$0xff] }
 0x43c   :  { %v14410_v17 = vpop.f32.mrf.mxu0  ;;  %v14560_v49 = vpop.f32.mrf.mxu1  ;;  %v3948_v21 = vpack.c.bf16 %v3892_v4, %v3891_v37  ;;  %v4548_v4 = vld [vmem:[%s23178_s0 + $0x155] sm:$0xff] }
 0x43d   :  { %23348 = vst [vmem:[#allocation28_spill] sm:$0xff] %v18738_v57 }
 0x43e   :  { %v3077_v2 = vpop.f32.mrf.mxu0  ;;  %v3720_v53 = vpop.f32.mrf.mxu1  ;;  %14668 = vmatmul.mubr.msk.bf16.gmra.mxu0 %vm285_vm2, %v3947_v55  ;;  %14818 = vmatmul.mubr.msk.bf16.gmra.mxu1 %vm285_vm2, %v4604_v12  ;;  %v4605_v55 = vpack.c.bf16 %v4547_v30, %v4546_v43  ;;  %v23351_v12 = vld [vmem:[#allocation38_spill] sm:$0xff] }
 0x43f   :  { %v3183_v26 = vadd.f32 %v3077_v2, %v23349_v13  ;;  %v18746_v19 = vadd.f32 %v3720_v53, %v3179_v54  ;;  %14671 = vmatprep.mubr.msk.bf16.mxu0 %vm15827_vm1, %v23202_v33  ;;  %14821 = vmatprep.mubr.msk.bf16.mxu1 %vm15827_vm1, %v23202_v33  ;;  %v4549_v43 = vld [vmem:[%s23178_s0 + $0x15d] sm:$0xff] }
 0x440   :  { %v14413_v54 = vpop.f32.mrf.mxu0  ;;  %v14563_v53 = vpop.f32.mrf.mxu1 }
 0x441   :  { %23350 = vst [vmem:[#allocation29_spill] sm:$0xff] %v18746_v19  ;;  %v3893_v54 = vld [vmem:[%s23178_s0 + $0x174] sm:$0xff]  ;;  %v23352_v53 = vld [vmem:[#allocation39_spill] sm:$0xff] }
 0x442   :  { %v3080_v22 = vpop.f32.mrf.mxu0  ;;  %v3723_v44 = vpop.f32.mrf.mxu1 }
 0x443   :  { %v3184_v25 = vadd.f32 %v3080_v22, %v23351_v12  ;;  %v18762_v17 = vadd.f32 %v3723_v44, %v3180_v23  ;;  %v3894_v23 = vld [vmem:[%s23178_s0 + $0x17c] sm:$0xff] }
 0x444   :  { %v14414_v49 = vpop.f32.mrf.mxu0  ;;  %v14564_v2 = vpop.f32.mrf.mxu1  ;;  %v3949_v44 = vpack.c.bf16 %v3894_v23, %v3893_v54 }
 0x446   :  { %v3085_v13 = vpop.f32.mrf.mxu0  ;;  %v3728_v19 = vpop.f32.mrf.mxu1  ;;  %14672 = vmatmul.mubr.msk.bf16.gmra.mxu0 %vm285_vm2, %v3948_v21  ;;  %14822 = vmatmul.mubr.msk.bf16.gmra.mxu1 %vm285_vm2, %v4605_v55  ;;  %v4606_v21 = vpack.c.bf16 %v4549_v43, %v4548_v4 }
 0x447   :  { %v3185_v57 = vadd.f32 %v3085_v13, %v23352_v53  ;;  %v18770_v37 = vadd.f32 %v3728_v19, %v3181_v7  ;;  %14675 = vmatprep.mubr.msk.bf16.mxu0 %vm15827_vm1, %v23202_v33  ;;  %14825 = vmatprep.mubr.msk.bf16.mxu1 %vm15827_vm1, %v23202_v33 }
 0x448   :  { %v14417_v7 = vpop.f32.mrf.mxu0  ;;  %v14567_v19 = vpop.f32.mrf.mxu1 }
 0x449   :  { %v3895_v7 = vld [vmem:[%s23178_s0 + $0x184] sm:$0xff] }
 0x44a   :  { %v3088_v30 = vpop.f32.mrf.mxu0  ;;  %v3731_v22 = vpop.f32.mrf.mxu1 }
 0x44b   :  { %v3186_v55 = vadd.f32 %v3088_v30, %v17897_v45  ;;  %v18786_v12 = vadd.f32 %v3731_v22, %v3182_v38  ;;  %v3896_v45 = vld [vmem:[%s23178_s0 + $0x18c] sm:$0xff] }
 0x44c   :  { %v14418_v49 = vpop.f32.mrf.mxu0  ;;  %v14568_v2 = vpop.f32.mrf.mxu1  ;;  %v4550_v38 = vld [vmem:[%s23178_s0 + $0x165] sm:$0xff]  ;;  %v3950_v30 = vpack.c.bf16 %v3896_v45, %v3895_v7 }
 0x44e   :  { %v3093_v13 = vpop.f32.mrf.mxu0  ;;  %v3736_v53 = vpop.f32.mrf.mxu1  ;;  %14676 = vmatmul.mubr.msk.bf16.gmra.mxu0 %vm285_vm2, %v3949_v44  ;;  %14826 = vmatmul.mubr.msk.bf16.gmra.mxu1 %vm285_vm2, %v4606_v21 }
 0x44f   :  { %v3187_v19 = vadd.f32 %v3093_v13, %v17906_v60  ;;  %v18794_v54 = vadd.f32 %v3736_v53, %v3183_v26  ;;  %14679 = vmatprep.mubr.msk.bf16.mxu0 %vm15827_vm1, %v23202_v33  ;;  %14829 = vmatprep.mubr.msk.bf16.mxu1 %vm15827_vm1, %v23202_v33  ;;  %v4551_v60 = vld [vmem:[%s23178_s0 + $0x16d] sm:$0xff] }
 0x450   :  { %v14421_v26 = vpop.f32.mrf.mxu0  ;;  %v14571_v23 = vpop.f32.mrf.mxu1  ;;  %v4607_v22 = vpack.c.bf16 %v4551_v60, %v4550_v38 }
 0x451   :  { %v3897_v26 = vld [vmem:[%s23178_s0 + $0x194] sm:$0xff] }
 0x452   :  { %v3096_v4 = vpop.f32.mrf.mxu0  ;;  %v3739_v43 = vpop.f32.mrf.mxu1 }
 0x453   :  { %v3188_v44 = vadd.f32 %v3096_v4, %v17921_v24  ;;  %v18810_v21 = vadd.f32 %v3739_v43, %v3184_v25  ;;  %v3898_v24 = vld [vmem:[%s23178_s0 + $0x19c] sm:$0xff] }
 0x454   :  { %v14422_v49 = vpop.f32.mrf.mxu0  ;;  %v14572_v2 = vpop.f32.mrf.mxu1  ;;  %v4552_v25 = vld [vmem:[%s23178_s0 + $0x175] sm:$0xff]  ;;  %v3951_v4 = vpack.c.bf16 %v3898_v24, %v3897_v26 }
 0x456   :  { %v3101_v13 = vpop.f32.mrf.mxu0  ;;  %v3744_v53 = vpop.f32.mrf.mxu1  ;;  %14680 = vmatmul.mubr.msk.bf16.gmra.mxu0 %vm285_vm2, %v3950_v30  ;;  %14830 = vmatmul.mubr.msk.bf16.gmra.mxu1 %vm285_vm2, %v4607_v22 }
 0x457   :  { %v3189_v23 = vadd.f32 %v3101_v13, %v17928_v1  ;;  %v18818_v7 = vadd.f32 %v3744_v53, %v3185_v57  ;;  %14683 = vmatprep.mubr.msk.bf16.mxu0 %vm15827_vm1, %v23202_v33  ;;  %14833 = vmatprep.mubr.msk.bf16.mxu1 %vm15827_vm1, %v23202_v33  ;;  %v4553_v1 = vld [vmem:[%s23178_s0 + $0x17d] sm:$0xff] }
 0x458   :  { %v14425_v57 = vpop.f32.mrf.mxu0  ;;  %v14575_v45 = vpop.f32.mrf.mxu1  ;;  %v4608_v43 = vpack.c.bf16 %v4553_v1, %v4552_v25 }
 0x459   :  { %v3899_v57 = vld [vmem:[%s23178_s0 + $0x1a4] sm:$0xff] }
 0x45a   :  { %v3104_v38 = vpop.f32.mrf.mxu0  ;;  %v3747_v60 = vpop.f32.mrf.mxu1 }
 0x45b   :  { %v3190_v30 = vadd.f32 %v3104_v38, %v17948_v27  ;;  %v18834_v22 = vadd.f32 %v3747_v60, %v3186_v55  ;;  %v3900_v27 = vld [vmem:[%s23178_s0 + $0x1ac] sm:$0xff] }
 0x45c   :  { %v14426_v49 = vpop.f32.mrf.mxu0  ;;  %v14576_v2 = vpop.f32.mrf.mxu1  ;;  %v4554_v55 = vld [vmem:[%s23178_s0 + $0x185] sm:$0xff]  ;;  %v3952_v38 = vpack.c.bf16 %v3900_v27, %v3899_v57  ;;  %v4556_v57 = vld [vmem:[%s23178_s0 + $0x195] sm:$0xff] }
 0x45e   :  { %v3109_v13 = vpop.f32.mrf.mxu0  ;;  %v3752_v53 = vpop.f32.mrf.mxu1  ;;  %14684 = vmatmul.mubr.msk.bf16.gmra.mxu0 %vm285_vm2, %v3951_v4  ;;  %14834 = vmatmul.mubr.msk.bf16.gmra.mxu1 %vm285_vm2, %v4608_v43 }
 0x45f   :  { %v3191_v45 = vadd.f32 %v3109_v13, %v17957_v28  ;;  %v18842_v26 = vadd.f32 %v3752_v53, %v3187_v19  ;;  %14687 = vmatprep.mubr.msk.bf16.mxu0 %vm15827_vm1, %v23202_v33  ;;  %14837 = vmatprep.mubr.msk.bf16.mxu1 %vm15827_vm1, %v23202_v33  ;;  %v4555_v28 = vld [vmem:[%s23178_s0 + $0x18d] sm:$0xff] }
 0x460   :  { %v14429_v19 = vpop.f32.mrf.mxu0  ;;  %v14579_v24 = vpop.f32.mrf.mxu1  ;;  %v4609_v60 = vpack.c.bf16 %v4555_v28, %v4554_v55  ;;  %v3901_v53 = vld [vmem:[%s23178_s0 + $0x1b4] sm:$0xff] }
 0x462   :  { %v3112_v25 = vpop.f32.mrf.mxu0  ;;  %v3755_v1 = vpop.f32.mrf.mxu1 }
 0x463   :  { %v18857_v4 = vadd.f32 %v3755_v1, %v3188_v44  ;;  %v3902_v44 = vld [vmem:[%s23178_s0 + $0x1bc] sm:$0xff] }
 0x464   :  { %v14430_v43 = vpop.f32.mrf.mxu0  ;;  %v14580_v49 = vpop.f32.mrf.mxu1  ;;  %v3953_v25 = vpack.c.bf16 %v3902_v44, %v3901_v53 }
 0x466   :  { %v3760_v2 = vpop.f32.mrf.mxu1  ;;  %v4123_v13 = vpop.f32.mrf.mxu0  ;;  %14688 = vmatmul.mubr.msk.bf16.gmra.mxu0 %vm285_vm2, %v3952_v38  ;;  %14838 = vmatmul.mubr.msk.bf16.gmra.mxu1 %vm285_vm2, %v4609_v60 }
 0x467   :  { %v18864_v19 = vadd.f32 %v3760_v2, %v3189_v23  ;;  %v4433_v24 = vadd.f32 %v4123_v13, %v17980_v48  ;;  %14691 = vmatprep.mubr.msk.bf16.mxu0 %vm15827_vm1, %v23202_v33  ;;  %14841 = vmatprep.mubr.msk.bf16.mxu1 %vm15827_vm1, %v23202_v33  ;;  %v4557_v23 = vld [vmem:[%s23178_s0 + $0x19d] sm:$0xff] }
 0x468   :  { %v14583_v27 = vpop.f32.mrf.mxu1  ;;  %v14593_v48 = vpop.f32.mrf.mxu0  ;;  %v4610_v1 = vpack.c.bf16 %v4557_v23, %v4556_v57 }
 0x469   :  { %v3903_v27 = vld [vmem:[%s23178_s0 + $0x1c4] sm:$0xff] }
 0x46a   :  { %v3763_v55 = vpop.f32.mrf.mxu1  ;;  %v4126_v28 = vpop.f32.mrf.mxu0 }
 0x46b   :  { %v18880_v38 = vadd.f32 %v3763_v55, %v3190_v30  ;;  %v4434_v60 = vadd.f32 %v4126_v28, %v17996_v40  ;;  %v3904_v40 = vld [vmem:[%s23178_s0 + $0x1cc] sm:$0xff] }
 0x46c   :  { %v14584_v43 = vpop.f32.mrf.mxu1  ;;  %v14594_v49 = vpop.f32.mrf.mxu0  ;;  %v4558_v30 = vld [vmem:[%s23178_s0 + $0x1a5] sm:$0xff]  ;;  %v3954_v55 = vpack.c.bf16 %v3904_v40, %v3903_v27  ;;  %v4560_v27 = vld [vmem:[%s23178_s0 + $0x1b5] sm:$0xff] }
 0x46e   :  { %v3768_v2 = vpop.f32.mrf.mxu1  ;;  %v4131_v13 = vpop.f32.mrf.mxu0  ;;  %14692 = vmatmul.mubr.msk.bf16.gmra.mxu0 %vm285_vm2, %v3953_v25  ;;  %14842 = vmatmul.mubr.msk.bf16.gmra.mxu1 %vm285_vm2, %v4610_v1 }
 0x46f   :  { %v18888_v48 = vadd.f32 %v3768_v2, %v3191_v45  ;;  %v4435_v53 = vadd.f32 %v4131_v13, %v18004_v62  ;;  %14695 = vmatprep.mubr.msk.bf16.mxu0 %vm15827_vm1, %v23202_v33  ;;  %14845 = vmatprep.mubr.msk.bf16.mxu1 %vm15827_vm1, %v23202_v33  ;;  %v4559_v45 = vld [vmem:[%s23178_s0 + $0x1ad] sm:$0xff] }
 0x470   :  { %v14587_v44 = vpop.f32.mrf.mxu1  ;;  %v14597_v62 = vpop.f32.mrf.mxu0  ;;  %v4611_v28 = vpack.c.bf16 %v4559_v45, %v4558_v30  ;;  %v3905_v13 = vld [vmem:[%s23178_s0 + $0x1d4] sm:$0xff] }
 0x472   :  { %v3771_v57 = vpop.f32.mrf.mxu1  ;;  %v4134_v23 = vpop.f32.mrf.mxu0 }
 0x473   :  { %v4436_v25 = vadd.f32 %v4134_v23, %v18020_v51  ;;  %v3906_v51 = vld [vmem:[%s23178_s0 + $0x1dc] sm:$0xff] }
 0x474   :  { %v14588_v1 = vpop.f32.mrf.mxu1  ;;  %v14598_v43 = vpop.f32.mrf.mxu0  ;;  %v3955_v57 = vpack.c.bf16 %v3906_v51, %v3905_v13 }
 0x476   :  { %v4139_v49 = vpop.f32.mrf.mxu0  ;;  %14696 = vmatmul.mubr.msk.bf16.gmra.mxu0 %vm285_vm2, %v3954_v55  ;;  %v4782_v2 = vpop.f32.mrf.mxu1  ;;  %14846 = vmatmul.mubr.msk.bf16.gmra.mxu1 %vm285_vm2, %v4611_v28 }
 0x477   :  { %v4437_v44 = vadd.f32 %v4139_v49, %v18028_v39  ;;  %v18911_v62 = vadd.f32 %v4782_v2, %v4433_v24  ;;  %14699 = vmatprep.mubr.msk.bf16.mxu0 %vm15827_vm1, %v23202_v33  ;;  %14849 = vmatprep.mubr.msk.bf16.mxu1 %vm15827_vm1, %v23202_v33  ;;  %v4561_v39 = vld [vmem:[%s23178_s0 + $0x1bd] sm:$0xff] }
 0x478   :  { %v14601_v24 = vpop.f32.mrf.mxu0  ;;  %v14751_v40 = vpop.f32.mrf.mxu1  ;;  %v4612_v23 = vpack.c.bf16 %v4561_v39, %v4560_v27 }
 0x479   :  { %v3907_v24 = vld [vmem:[%s23178_s0 + $0x1e4] sm:$0xff] }
 0x47a   :  { %v4142_v30 = vpop.f32.mrf.mxu0  ;;  %v4785_v45 = vpop.f32.mrf.mxu1 }
 0x47b   :  { %v4438_v55 = vadd.f32 %v4142_v30, %v18044_v61  ;;  %v18927_v28 = vadd.f32 %v4785_v45, %v4434_v60  ;;  %v3908_v61 = vld [vmem:[%s23178_s0 + $0x1ec] sm:$0xff] }
 0x47c   :  { %v14602_v1 = vpop.f32.mrf.mxu0  ;;  %v14752_v43 = vpop.f32.mrf.mxu1  ;;  %v4562_v60 = vld [vmem:[%s23178_s0 + $0x1c5] sm:$0xff]  ;;  %v3956_v30 = vpack.c.bf16 %v3908_v61, %v3907_v24 }
 0x47e   :  { %v4147_v49 = vpop.f32.mrf.mxu0  ;;  %14700 = vmatmul.mubr.msk.bf16.gmra.mxu0 %vm285_vm2, %v3955_v57  ;;  %v4790_v2 = vpop.f32.mrf.mxu1  ;;  %14850 = vmatmul.mubr.msk.bf16.gmra.mxu1 %vm285_vm2, %v4612_v23 }
 0x47f   :  { %v4439_v40 = vadd.f32 %v4147_v49, %v18052_v14  ;;  %v18935_v13 = vadd.f32 %v4790_v2, %v4435_v53  ;;  %14703 = vmatprep.mubr.msk.bf16.mxu0 %vm15827_vm1, %v23202_v33  ;;  %14853 = vmatprep.mubr.msk.bf16.mxu1 %vm15827_vm1, %v23202_v33  ;;  %v4563_v14 = vld [vmem:[%s23178_s0 + $0x1cd] sm:$0xff] }
 0x480   :  { %v14605_v53 = vpop.f32.mrf.mxu0  ;;  %v14755_v51 = vpop.f32.mrf.mxu1  ;;  %v4613_v45 = vpack.c.bf16 %v4563_v14, %v4562_v60 }
 0x481   :  { %v3909_v53 = vld [vmem:[%s23178_s0 + $0x1f4] sm:$0xff] }
 0x482   :  { %v4150_v27 = vpop.f32.mrf.mxu0  ;;  %v4793_v39 = vpop.f32.mrf.mxu1 }
 0x483   :  { %v4440_v57 = vadd.f32 %v4150_v27, %v18068_v20  ;;  %v18951_v23 = vadd.f32 %v4793_v39, %v4436_v25  ;;  %v3910_v20 = vld [vmem:[%s23178_s0 + $0x1fc] sm:$0xff] }
 0x484   :  { %v14606_v1 = vpop.f32.mrf.mxu0  ;;  %v14756_v43 = vpop.f32.mrf.mxu1  ;;  %v4564_v25 = vld [vmem:[%s23178_s0 + $0x1d5] sm:$0xff]  ;;  %v3957_v27 = vpack.c.bf16 %v3910_v20, %v3909_v53 }
 0x486   :  { %v4155_v49 = vpop.f32.mrf.mxu0  ;;  %14704 = vmatmul.mubr.msk.bf16.gmra.mxu0 %vm285_vm2, %v3956_v30  ;;  %v4798_v2 = vpop.f32.mrf.mxu1  ;;  %14854 = vmatmul.mubr.msk.bf16.gmra.mxu1 %vm285_vm2, %v4613_v45 }
 0x487   :  { %v4441_v51 = vadd.f32 %v4155_v49, %v18076_v58  ;;  %v18959_v24 = vadd.f32 %v4798_v2, %v4437_v44  ;;  %14707 = vmatprep.mubr.msk.bf16.mxu0 %vm15827_vm1, %v23202_v33  ;;  %14857 = vmatprep.mubr.msk.bf16.mxu1 %vm15827_vm1, %v23202_v33  ;;  %v4565_v58 = vld [vmem:[%s23178_s0 + $0x1dd] sm:$0xff] }
 0x488   :  { %v14609_v44 = vpop.f32.mrf.mxu0  ;;  %v14759_v61 = vpop.f32.mrf.mxu1  ;;  %v4614_v39 = vpack.c.bf16 %v4565_v58, %v4564_v25 }
 0x489   :  { %v3911_v44 = vld [vmem:[%s23178_s0 + $0x204] sm:$0xff] }
 0x48a   :  { %v4158_v60 = vpop.f32.mrf.mxu0  ;;  %v4801_v14 = vpop.f32.mrf.mxu1 }
 0x48b   :  { %v4442_v30 = vadd.f32 %v4158_v60, %v18092_v50  ;;  %v18975_v45 = vadd.f32 %v4801_v14, %v4438_v55  ;;  %v3912_v50 = vld [vmem:[%s23178_s0 + $0x20c] sm:$0xff] }
 0x48c   :  { %v14610_v1 = vpop.f32.mrf.mxu0  ;;  %v14760_v43 = vpop.f32.mrf.mxu1  ;;  %v4566_v55 = vld [vmem:[%s23178_s0 + $0x1e5] sm:$0xff]  ;;  %v3958_v60 = vpack.c.bf16 %v3912_v50, %v3911_v44 }
 0x48e   :  { %v4163_v49 = vpop.f32.mrf.mxu0  ;;  %14708 = vmatmul.mubr.msk.bf16.gmra.mxu0 %vm285_vm2, %v3957_v27  ;;  %v4806_v2 = vpop.f32.mrf.mxu1  ;;  %14858 = vmatmul.mubr.msk.bf16.gmra.mxu1 %vm285_vm2, %v4614_v39 }
 0x48f   :  { %v4443_v61 = vadd.f32 %v4163_v49, %v18100_v11  ;;  %v18983_v53 = vadd.f32 %v4806_v2, %v4439_v40  ;;  %14711 = vmatprep.mubr.msk.bf16.mxu0 %vm15827_vm1, %v23202_v33  ;;  %14861 = vmatprep.mubr.msk.bf16.mxu1 %vm15827_vm1, %v23202_v33  ;;  %v4567_v11 = vld [vmem:[%s23178_s0 + $0x1ed] sm:$0xff] }
 0x490   :  { %v14613_v40 = vpop.f32.mrf.mxu0  ;;  %v14763_v20 = vpop.f32.mrf.mxu1  ;;  %v4615_v14 = vpack.c.bf16 %v4567_v11, %v4566_v55 }
 0x491   :  { %v3913_v40 = vld [vmem:[%s23178_s0 + $0x214] sm:$0xff] }
 0x492   :  { %v4166_v25 = vpop.f32.mrf.mxu0  ;;  %v4809_v58 = vpop.f32.mrf.mxu1 }
 0x493   :  { %v4444_v27 = vadd.f32 %v4166_v25, %v18116_v5  ;;  %v18999_v39 = vadd.f32 %v4809_v58, %v4440_v57  ;;  %v3914_v5 = vld [vmem:[%s23178_s0 + $0x21c] sm:$0xff] }
 0x494   :  { %v14614_v1 = vpop.f32.mrf.mxu0  ;;  %v14764_v43 = vpop.f32.mrf.mxu1  ;;  %v4568_v57 = vld [vmem:[%s23178_s0 + $0x1f5] sm:$0xff]  ;;  %v3959_v25 = vpack.c.bf16 %v3914_v5, %v3913_v40 }
 0x496   :  { %v4171_v49 = vpop.f32.mrf.mxu0  ;;  %14712 = vmatmul.mubr.msk.bf16.gmra.mxu0 %vm285_vm2, %v3958_v60  ;;  %v4814_v2 = vpop.f32.mrf.mxu1  ;;  %14862 = vmatmul.mubr.msk.bf16.gmra.mxu1 %vm285_vm2, %v4615_v14 }
 0x497   :  { %v4445_v20 = vadd.f32 %v4171_v49, %v18124_v15  ;;  %v19007_v44 = vadd.f32 %v4814_v2, %v4441_v51  ;;  %14715 = vmatprep.mubr.msk.bf16.mxu0 %vm15827_vm1, %v23202_v33  ;;  %14865 = vmatprep.mubr.msk.bf16.mxu1 %vm15827_vm1, %v23202_v33  ;;  %v4569_v15 = vld [vmem:[%s23178_s0 + $0x1fd] sm:$0xff] }
 0x498   :  { %v14617_v51 = vpop.f32.mrf.mxu0  ;;  %v14767_v50 = vpop.f32.mrf.mxu1  ;;  %v4616_v58 = vpack.c.bf16 %v4569_v15, %v4568_v57 }
 0x499   :  { %v3915_v51 = vld [vmem:[%s23178_s0 + $0x224] sm:$0xff] }
 0x49a   :  { %v4174_v55 = vpop.f32.mrf.mxu0  ;;  %v4817_v11 = vpop.f32.mrf.mxu1 }
 0x49b   :  { %v4446_v60 = vadd.f32 %v4174_v55, %v18140_v29  ;;  %v19023_v14 = vadd.f32 %v4817_v11, %v4442_v30  ;;  %v3916_v29 = vld [vmem:[%s23178_s0 + $0x22c] sm:$0xff] }
 0x49c   :  { %v14618_v1 = vpop.f32.mrf.mxu0  ;;  %v14768_v43 = vpop.f32.mrf.mxu1  ;;  %v4570_v30 = vld [vmem:[%s23178_s0 + $0x205] sm:$0xff]  ;;  %v3960_v55 = vpack.c.bf16 %v3916_v29, %v3915_v51 }
 0x49e   :  { %v4179_v49 = vpop.f32.mrf.mxu0  ;;  %14716 = vmatmul.mubr.msk.bf16.gmra.mxu0 %vm285_vm2, %v3959_v25  ;;  %v4822_v2 = vpop.f32.mrf.mxu1  ;;  %14866 = vmatmul.mubr.msk.bf16.gmra.mxu1 %vm285_vm2, %v4616_v58 }
 0x49f   :  { %v4447_v50 = vadd.f32 %v4179_v49, %v18148_v63  ;;  %v19031_v40 = vadd.f32 %v4822_v2, %v4443_v61  ;;  %14719 = vmatprep.mubr.msk.bf16.mxu0 %vm15827_vm1, %v23202_v33  ;;  %14869 = vmatprep.mubr.msk.bf16.mxu1 %vm15827_vm1, %v23202_v33  ;;  %v4571_v63 = vld [vmem:[%s23178_s0 + $0x20d] sm:$0xff] }
 0x4a0   :  { %v14621_v61 = vpop.f32.mrf.mxu0  ;;  %v14771_v5 = vpop.f32.mrf.mxu1  ;;  %v4617_v11 = vpack.c.bf16 %v4571_v63, %v4570_v30 }
 0x4a1   :  { %v3917_v61 = vld [vmem:[%s23178_s0 + $0x234] sm:$0xff] }
 0x4a2   :  { %v4182_v57 = vpop.f32.mrf.mxu0  ;;  %v4825_v15 = vpop.f32.mrf.mxu1 }
 0x4a3   :  { %v4448_v25 = vadd.f32 %v4182_v57, %v18164_v41  ;;  %v19047_v58 = vadd.f32 %v4825_v15, %v4444_v27  ;;  %v3918_v41 = vld [vmem:[%s23178_s0 + $0x23c] sm:$0xff] }
 0x4a4   :  { %v14622_v1 = vpop.f32.mrf.mxu0  ;;  %v14772_v43 = vpop.f32.mrf.mxu1  ;;  %v4572_v27 = vld [vmem:[%s23178_s0 + $0x215] sm:$0xff]  ;;  %v3961_v57 = vpack.c.bf16 %v3918_v41, %v3917_v61 }
 0x4a6   :  { %v4187_v49 = vpop.f32.mrf.mxu0  ;;  %14720 = vmatmul.mubr.msk.bf16.gmra.mxu0 %vm285_vm2, %v3960_v55  ;;  %v4830_v2 = vpop.f32.mrf.mxu1  ;;  %14870 = vmatmul.mubr.msk.bf16.gmra.mxu1 %vm285_vm2, %v4617_v11 }
 0x4a7   :  { %v4449_v5 = vadd.f32 %v4187_v49, %v18172_v9  ;;  %v19055_v51 = vadd.f32 %v4830_v2, %v4445_v20  ;;  %14723 = vmatprep.mubr.msk.bf16.mxu0 %vm15827_vm1, %v23202_v33  ;;  %14873 = vmatprep.mubr.msk.bf16.mxu1 %vm15827_vm1, %v23202_v33  ;;  %v4573_v9 = vld [vmem:[%s23178_s0 + $0x21d] sm:$0xff] }
 0x4a8   :  { %v14625_v20 = vpop.f32.mrf.mxu0  ;;  %v14775_v29 = vpop.f32.mrf.mxu1  ;;  %v4618_v15 = vpack.c.bf16 %v4573_v9, %v4572_v27 }
 0x4a9   :  { %v3919_v20 = vld [vmem:[%s23178_s0 + $0x244] sm:$0xff] }
 0x4aa   :  { %v4190_v30 = vpop.f32.mrf.mxu0  ;;  %v4833_v63 = vpop.f32.mrf.mxu1 }
 0x4ab   :  { %v4450_v55 = vadd.f32 %v4190_v30, %v18188_v0  ;;  %v19071_v11 = vadd.f32 %v4833_v63, %v4446_v60  ;;  %v3920_v0 = vld [vmem:[%s23178_s0 + $0x24c] sm:$0xff] }
 0x4ac   :  { %v14626_v1 = vpop.f32.mrf.mxu0  ;;  %v14776_v43 = vpop.f32.mrf.mxu1  ;;  %v4574_v60 = vld [vmem:[%s23178_s0 + $0x225] sm:$0xff]  ;;  %v3962_v30 = vpack.c.bf16 %v3920_v0, %v3919_v20  ;;  %v4577_v0 = vld [vmem:[%s23178_s0 + $0x23d] sm:$0xff] }
 0x4ae   :  { %v4195_v49 = vpop.f32.mrf.mxu0  ;;  %14724 = vmatmul.mubr.msk.bf16.gmra.mxu0 %vm285_vm2, %v3961_v57  ;;  %v4838_v2 = vpop.f32.mrf.mxu1  ;;  %14874 = vmatmul.mubr.msk.bf16.gmra.mxu1 %vm285_vm2, %v4618_v15 }
 0x4af   :  { %v4451_v29 = vadd.f32 %v4195_v49, %v18196_v56  ;;  %v19079_v61 = vadd.f32 %v4838_v2, %v4447_v50  ;;  %14727 = vmatprep.mubr.msk.bf16.mxu0 %vm15827_vm1, %v23202_v33  ;;  %14877 = vmatprep.mubr.msk.bf16.mxu1 %vm15827_vm1, %v23202_v33  ;;  %v4575_v56 = vld [vmem:[%s23178_s0 + $0x22d] sm:$0xff] }
 0x4b0   :  { %v14629_v50 = vpop.f32.mrf.mxu0  ;;  %v14779_v41 = vpop.f32.mrf.mxu1  ;;  %v4619_v63 = vpack.c.bf16 %v4575_v56, %v4574_v60 }
 0x4b1   :  { %23353 = vst [vmem:[#allocation30_spill] sm:$0xff] %v19079_v61  ;;  %v3921_v50 = vld [vmem:[%s23178_s0 + $0x254] sm:$0xff] }
 0x4b2   :  { %v4198_v27 = vpop.f32.mrf.mxu0  ;;  %v4841_v9 = vpop.f32.mrf.mxu1  ;;  %v23354_v41 = vld [vmem:[#allocation33_spill] sm:$0xff] }
 0x4b3   :  { %v4452_v57 = vadd.f32 %v4198_v27, %v18212_v32  ;;  %v19095_v15 = vadd.f32 %v4841_v9, %v4448_v25  ;;  %v3922_v32 = vld [vmem:[%s23178_s0 + $0x25c] sm:$0xff] }
 0x4b4   :  { %v14630_v1 = vpop.f32.mrf.mxu0  ;;  %v14780_v43 = vpop.f32.mrf.mxu1  ;;  %v4576_v25 = vld [vmem:[%s23178_s0 + $0x235] sm:$0xff]  ;;  %v3963_v9 = vpack.c.bf16 %v3922_v32, %v3921_v50 }
 0x4b6   :  { %v4203_v49 = vpop.f32.mrf.mxu0  ;;  %14728 = vmatmul.mubr.msk.bf16.gmra.mxu0 %vm285_vm2, %v3962_v30  ;;  %v4846_v2 = vpop.f32.mrf.mxu1  ;;  %14878 = vmatmul.mubr.msk.bf16.gmra.mxu1 %vm285_vm2, %v4619_v63  ;;  %v4620_v30 = vpack.c.bf16 %v4577_v0, %v4576_v25 }
 0x4b7   :  { %v4453_v61 = vadd.f32 %v4203_v49, %v23354_v41  ;;  %v19103_v20 = vadd.f32 %v4846_v2, %v4449_v5  ;;  %14731 = vmatprep.mubr.msk.bf16.mxu0 %vm15827_vm1, %v23202_v33  ;;  %14881 = vmatprep.mubr.msk.bf16.mxu1 %vm15827_vm1, %v23202_v33 }
 0x4b8   :  { %v14633_v5 = vpop.f32.mrf.mxu0  ;;  %v14783_v60 = vpop.f32.mrf.mxu1 }
 0x4b9   :  { %v3923_v5 = vld [vmem:[%s23178_s0 + $0x264] sm:$0xff] }
 0x4ba   :  { %v4206_v56 = vpop.f32.mrf.mxu0  ;;  %v4849_v27 = vpop.f32.mrf.mxu1 }
 0x4bb   :  { %v4454_v63 = vadd.f32 %v4206_v56, %v18236_v8  ;;  %v19119_v1 = vadd.f32 %v4849_v27, %v4450_v55  ;;  %v3924_v8 = vld [vmem:[%s23178_s0 + $0x26c] sm:$0xff] }
 0x4bc   :  { %v14634_v43 = vpop.f32.mrf.mxu0  ;;  %v14784_v49 = vpop.f32.mrf.mxu1  ;;  %v4578_v55 = vld [vmem:[%s23178_s0 + $0x245] sm:$0xff]  ;;  %v3964_v56 = vpack.c.bf16 %v3924_v8, %v3923_v5 }
 0x4be   :  { %v4211_v2 = vpop.f32.mrf.mxu0  ;;  %14732 = vmatmul.mubr.msk.bf16.gmra.mxu0 %vm285_vm2, %v3963_v9  ;;  %v4854_v41 = vpop.f32.mrf.mxu1  ;;  %14882 = vmatmul.mubr.msk.bf16.gmra.mxu1 %vm285_vm2, %v4620_v30 }
 0x4bf   :  { %v4455_v60 = vadd.f32 %v4211_v2, %v18241_v42  ;;  %v19127_v50 = vadd.f32 %v4854_v41, %v4451_v29  ;;  %14735 = vmatprep.mubr.msk.bf16.mxu0 %vm15827_vm1, %v23202_v33  ;;  %14885 = vmatprep.mubr.msk.bf16.mxu1 %vm15827_vm1, %v23202_v33  ;;  %v4579_v42 = vld [vmem:[%s23178_s0 + $0x24d] sm:$0xff] }
 0x4c0   :  { %v14637_v29 = vpop.f32.mrf.mxu0  ;;  %v14787_v32 = vpop.f32.mrf.mxu1  ;;  %v4621_v27 = vpack.c.bf16 %v4579_v42, %v4578_v55 }
 0x4c1   :  { %v3925_v29 = vld [vmem:[%s23178_s0 + $0x274] sm:$0xff] }
 0x4c2   :  { %v4214_v25 = vpop.f32.mrf.mxu0  ;;  %v4857_v0 = vpop.f32.mrf.mxu1 }
 0x4c3   :  { %v4456_v9 = vadd.f32 %v4214_v25, %v18257_v35  ;;  %v19143_v30 = vadd.f32 %v4857_v0, %v4452_v57  ;;  %v3926_v35 = vld [vmem:[%s23178_s0 + $0x27c] sm:$0xff] }
 0x4c4   :  { %v14638_v43 = vpop.f32.mrf.mxu0  ;;  %v14788_v49 = vpop.f32.mrf.mxu1  ;;  %v4580_v57 = vld [vmem:[%s23178_s0 + $0x255] sm:$0xff]  ;;  %v3965_v25 = vpack.c.bf16 %v3926_v35, %v3925_v29 }
 0x4c6   :  { %v4219_v2 = vpop.f32.mrf.mxu0  ;;  %14736 = vmatmul.mubr.msk.bf16.gmra.mxu0 %vm285_vm2, %v3964_v56  ;;  %v4862_v41 = vpop.f32.mrf.mxu1  ;;  %14886 = vmatmul.mubr.msk.bf16.gmra.mxu1 %vm285_vm2, %v4621_v27 }
 0x4c7   :  { %v4457_v32 = vadd.f32 %v4219_v2, %v18265_v10  ;;  %v19151_v5 = vadd.f32 %v4862_v41, %v4453_v61  ;;  %14739 = vmatprep.mubr.msk.bf16.mxu0 %vm15827_vm1, %v23202_v33  ;;  %14889 = vmatprep.mubr.msk.bf16.mxu1 %vm15827_vm1, %v23202_v33  ;;  %v4581_v10 = vld [vmem:[%s23178_s0 + $0x25d] sm:$0xff] }
 0x4c8   :  { %v14641_v61 = vpop.f32.mrf.mxu0  ;;  %v14791_v8 = vpop.f32.mrf.mxu1  ;;  %v4622_v0 = vpack.c.bf16 %v4581_v10, %v4580_v57 }
 0x4c9   :  { %23355 = vst [vmem:[#allocation31_spill] sm:$0xff] %v19151_v5 }
 0x4ca   :  { %v4222_v55 = vpop.f32.mrf.mxu0  ;;  %v4865_v42 = vpop.f32.mrf.mxu1 }
 0x4cb   :  { %v4458_v56 = vadd.f32 %v4222_v55, %v18281_v59  ;;  %v19167_v27 = vadd.f32 %v4865_v42, %v4454_v63  ;;  %v3927_v59 = vld [vmem:[%s23178_s0 + $0x284] sm:$0x3] }
 0x4cc   :  { %v14642_v43 = vpop.f32.mrf.mxu0  ;;  %v14792_v49 = vpop.f32.mrf.mxu1  ;;  %v4582_v63 = vld [vmem:[%s23178_s0 + $0x265] sm:$0xff]  ;;  %v3966_v10 = vpack.c.bf16 %v3927_v59, %v3927_v59 }
 0x4ce   :  { %v4227_v2 = vpop.f32.mrf.mxu0  ;;  %14740 = vmatmul.mubr.msk.bf16.gmra.mxu0 %vm285_vm2, %v3965_v25  ;;  %v4870_v41 = vpop.f32.mrf.mxu1  ;;  %14890 = vmatmul.mubr.msk.bf16.gmra.mxu1 %vm285_vm2, %v4622_v0 }
 0x4cf   :  { %v4459_v5 = vadd.f32 %v4227_v2, %v18286_v36  ;;  %v19172_v61 = vadd.f32 %v4870_v41, %v4455_v60  ;;  %14743 = vmatprep.mubr.msk.bf16.mxu0 %vm15827_vm1, %v23202_v33  ;;  %14893 = vmatprep.mubr.msk.bf16.mxu1 %vm15827_vm1, %v23202_v33  ;;  %v4583_v36 = vld [vmem:[%s23178_s0 + $0x26d] sm:$0xff]  ;;  %v4584_v2 = vld [vmem:[%s23178_s0 + $0x275] sm:$0xff] }
 0x4d0   :  { %v14645_v60 = vpop.f32.mrf.mxu0  ;;  %v14795_v29 = vpop.f32.mrf.mxu1  ;;  %v4623_v8 = vpack.c.bf16 %v4583_v36, %v4582_v63 }
 0x4d2   :  { %v4230_v35 = vpop.f32.mrf.mxu0  ;;  %v4873_v57 = vpop.f32.mrf.mxu1 }
 0x4d3   :  { %v4460_v55 = vadd.f32 %v4230_v35, %v18302_v47  ;;  %v19188_v42 = vadd.f32 %v4873_v57, %v4456_v9  ;;  %v4585_v47 = vld [vmem:[%s23178_s0 + $0x27d] sm:$0xff]  ;;  %v5169_v9 = vld [vmem:[%s23178_s0 + $0x26] sm:$0xff] }
 0x4d4   :  { %v14646_v25 = vpop.f32.mrf.mxu0  ;;  %v14796_v0 = vpop.f32.mrf.mxu1  ;;  %v4624_v29 = vpack.c.bf16 %v4585_v47, %v4584_v2 }
 0x4d6   :  { %v4235_v43 = vpop.f32.mrf.mxu0  ;;  %14744 = vmatmul.mubr.msk.bf16.gmra.mxu0 %vm285_vm2, %v3966_v10  ;;  %v4878_v49 = vpop.f32.mrf.mxu1  ;;  %14894 = vmatmul.mubr.msk.bf16.gmra.mxu1 %vm285_vm2, %v4623_v8 }
 0x4d7   :  { %v4461_v41 = vadd.f32 %v4235_v43, %v18310_v16  ;;  %v19196_v59 = vadd.f32 %v4878_v49, %v4457_v32  ;;  %14897 = vmatprep.mubr.msk.bf16.mxu1 %vm15827_vm1, %v23202_v33  ;;  %14907 = vmatprep.mubr.msk.bf16.mxu0 %vm15827_vm1, %v23202_v33  ;;  %v5170_v16 = vld [vmem:[%s23178_s0 + $0x2e] sm:$0xff] }
 0x4d8   :  { %v14649_v32 = vpop.f32.mrf.mxu0  ;;  %v14799_v63 = vpop.f32.mrf.mxu1  ;;  %v5246_v35 = vpack.c.bf16 %v5170_v16, %v5169_v9 }
 0x4da   :  { %v4238_v36 = vpop.f32.mrf.mxu0  ;;  %v4881_v60 = vpop.f32.mrf.mxu1 }
 0x4db   :  { %v4462_v57 = vadd.f32 %v4238_v36, %v18326_v31  ;;  %v19212_v10 = vadd.f32 %v4881_v60, %v4458_v56  ;;  %v4586_v31 = vld [vmem:[%s23178_s0 + $0x285] sm:$0x3]  ;;  %v5171_v56 = vld [vmem:[%s23178_s0 + $0x36] sm:$0xff] }
 0x4dc   :  { %v14650_v8 = vpop.f32.mrf.mxu0  ;;  %v14800_v25 = vpop.f32.mrf.mxu1  ;;  %v4625_v16 = vpack.c.bf16 %v4586_v31, %v4586_v31 }
 0x4de   :  { %v4243_v0 = vpop.f32.mrf.mxu0  ;;  %v4886_v43 = vpop.f32.mrf.mxu1  ;;  %14898 = vmatmul.mubr.msk.bf16.gmra.mxu1 %vm285_vm2, %v4624_v29  ;;  %14908 = vmatmul.mubr.msk.bf16.vlgmr.msra.gmra.mxu0 %vm285_vm2, %v5246_v35 }
 0x4df   :  { %v4463_v49 = vadd.f32 %v4243_v0, %v18334_v34  ;;  %v19217_v32 = vadd.f32 %v4886_v43, %v4459_v5  ;;  %14901 = vmatprep.mubr.msk.bf16.mxu1 %vm15827_vm1, %v23202_v33  ;;  %14911 = vmatprep.mubr.msk.bf16.mxu0 %vm15827_vm1, %v23202_v33  ;;  %v5172_v34 = vld [vmem:[%s23178_s0 + $0x3e] sm:$0xff] }
 0x4e0   :  { %v14653_v5 = vpop.f32.mrf.mxu0  ;;  %v14803_v2 = vpop.f32.mrf.mxu1  ;;  %v5247_v63 = vpack.c.bf16 %v5172_v34, %v5171_v56 }
 0x4e2   :  { %v4246_v47 = vpop.f32.mrf.mxu0  ;;  %v4889_v9 = vpop.f32.mrf.mxu1 }
 0x4e3   :  { %v4464_v36 = vadd.f32 %v4246_v47, %v18350_v46  ;;  %v19233_v60 = vadd.f32 %v4889_v9, %v4460_v55  ;;  %v5173_v46 = vld [vmem:[%s23178_s0 + $0x46] sm:$0xff]  ;;  %v5174_v55 = vld [vmem:[%s23178_s0 + $0x4e] sm:$0xff] }
 0x4e4   :  { %v14654_v29 = vpop.f32.mrf.mxu0  ;;  %v14804_v35 = vpop.f32.mrf.mxu1  ;;  %v5248_v2 = vpack.c.bf16 %v5174_v55, %v5173_v46 }
 0x4e6   :  { %v4251_v8 = vpop.f32.mrf.mxu0  ;;  %v4894_v25 = vpop.f32.mrf.mxu1  ;;  %14902 = vmatmul.mubr.msk.bf16.gmra.mxu1 %vm285_vm2, %v4625_v16  ;;  %14912 = vmatmul.mubr.msk.bf16.gmra.mxu0 %vm285_vm2, %v5247_v63 }
 0x4e7   :  { %v4465_v0 = vadd.f32 %v4251_v8, %v18358_v3  ;;  %v19238_v43 = vadd.f32 %v4894_v25, %v4461_v41  ;;  %14915 = vmatprep.mubr.msk.bf16.mxu0 %vm15827_vm1, %v23202_v33  ;;  %v5175_v8 = vld [vmem:[%s23178_s0 + $0x56] sm:$0xff] }
 0x4e8   :  { %v14657_v31 = vpop.f32.mrf.mxu0  ;;  %v14807_v56 = vpop.f32.mrf.mxu1 }
 0x4ea   :  { %v4254_v34 = vpop.f32.mrf.mxu0  ;;  %v4897_v5 = vpop.f32.mrf.mxu1 }
 0x4eb   :  { %v4466_v3 = vadd.f32 %v4254_v34, %v18374_v18  ;;  %v19249_v41 = vadd.f32 %v4897_v5, %v4462_v57  ;;  %v5176_v18 = vld [vmem:[%s23178_s0 + $0x5e] sm:$0xff] }
 0x4ec   :  { %v14658_v47 = vpop.f32.mrf.mxu0  ;;  %v14808_v9 = vpop.f32.mrf.mxu1  ;;  %v5249_v31 = vpack.c.bf16 %v5176_v18, %v5175_v8 }
 0x4ed   :  { %v23357_v47 = vld [vmem:[#allocation5_spill] sm:$0xff] }
 0x4ee   :  { %v4259_v16 = vpop.f32.mrf.mxu0  ;;  %v4902_v63 = vpop.f32.mrf.mxu1  ;;  %14916 = vmatmul.mubr.msk.bf16.gmra.mxu0 %vm285_vm2, %v5248_v2 }
 0x4ef   :  { %v4467_v29 = vadd.f32 %v4259_v16, %v18382_v52  ;;  %v19253_v35 = vadd.f32 %v4902_v63, %v4463_v49  ;;  %14919 = vmatprep.mubr.msk.bf16.mxu0 %vm15827_vm1, %v23202_v33  ;;  %v5177_v63 = vld [vmem:[%s23178_s0 + $0x66] sm:$0xff] }
 0x4f0   :  { %v14661_v57 = vpop.f32.mrf.mxu0  ;;  %v14811_v25 = vpop.f32.mrf.mxu1 }
 0x4f2   :  { %v4262_v46 = vpop.f32.mrf.mxu0  ;;  %v4905_v55 = vpop.f32.mrf.mxu1 }
 0x4f3   :  { %v4468_v52 = vadd.f32 %v4262_v46, %v18398_v6  ;;  %v19264_v49 = vadd.f32 %v4905_v55, %v4464_v36  ;;  %v5178_v6 = vld [vmem:[%s23178_s0 + $0x6e] sm:$0xff]  ;;  %v23359_v46 = vld [vmem:[#allocation34_spill] sm:$0xff] }
 0x4f4   :  { %v14662_v56 = vpop.f32.mrf.mxu0  ;;  %v14812_v34 = vpop.f32.mrf.mxu1  ;;  %v5250_v25 = vpack.c.bf16 %v5178_v6, %v5177_v63  ;;  %v5179_v63 = vld [vmem:[%s23178_s0 + $0x76] sm:$0xff] }
 0x4f5   :  { %23356 = vst [vmem:[#allocation32_spill] sm:$0xff] %v19264_v49 }
 0x4f6   :  { %v4267_v5 = vpop.f32.mrf.mxu0  ;;  %v4910_v2 = vpop.f32.mrf.mxu1  ;;  %14920 = vmatmul.mubr.msk.bf16.gmra.mxu0 %vm285_vm2, %v5249_v31 }
 0x4f7   :  { %v4469_v9 = vadd.f32 %v4267_v5, %v23357_v47  ;;  %v19268_v16 = vadd.f32 %v4910_v2, %v4465_v0  ;;  %14923 = vmatprep.mubr.msk.bf16.mxu0 %vm15827_vm1, %v23202_v33  ;;  %v23361_v2 = vld [vmem:[#allocation35_spill] sm:$0xff] }
 0x4f8   :  { %v14665_v36 = vpop.f32.mrf.mxu0  ;;  %v14815_v8 = vpop.f32.mrf.mxu1 }
 0x4f9   :  { %23358 = vst [vmem:[#allocation38_spill] sm:$0xff] %v19268_v16 }
 0x4fa   :  { %v4270_v18 = vpop.f32.mrf.mxu0  ;;  %v4913_v57 = vpop.f32.mrf.mxu1 }
 0x4fb   :  { %v4470_v55 = vadd.f32 %v4270_v18, %v23359_v46  ;;  %v19279_v0 = vadd.f32 %v4913_v57, %v4466_v3  ;;  %v5180_v3 = vld [vmem:[%s23178_s0 + $0x7e] sm:$0xff] }
 0x4fc   :  { %v14666_v31 = vpop.f32.mrf.mxu0  ;;  %v14816_v56 = vpop.f32.mrf.mxu1  ;;  %v5251_v57 = vpack.c.bf16 %v5180_v3, %v5179_v63  ;;  %v5181_v63 = vld [vmem:[%s23178_s0 + $0x86] sm:$0xff] }
 0x4fd   :  { %23360 = vst [vmem:[#allocation39_spill] sm:$0xff] %v19279_v0 }
 0x4fe   :  { %v4275_v34 = vpop.f32.mrf.mxu0  ;;  %v4918_v5 = vpop.f32.mrf.mxu1  ;;  %14924 = vmatmul.mubr.msk.bf16.gmra.mxu0 %vm285_vm2, %v5250_v25  ;;  %v23363_v25 = vld [vmem:[#allocation36_spill] sm:$0xff] }
 0x4ff   :  { %v4471_v47 = vadd.f32 %v4275_v34, %v23361_v2  ;;  %v19283_v16 = vadd.f32 %v4918_v5, %v4467_v29  ;;  %14927 = vmatprep.mubr.msk.bf16.mxu0 %vm15827_vm1, %v23202_v33  ;;  %v23365_v2 = vld [vmem:[#allocation37_spill] sm:$0xff] }
 0x500   :  { %v14669_v6 = vpop.f32.mrf.mxu0  ;;  %v14819_v36 = vpop.f32.mrf.mxu1 }
 0x501   :  { %23362 = vst [vmem:[#allocation33_spill] sm:$0xff] %v19283_v16 }
 0x502   :  { %v4278_v8 = vpop.f32.mrf.mxu0  ;;  %v4921_v18 = vpop.f32.mrf.mxu1 }
 0x503   :  { %v4472_v46 = vadd.f32 %v4278_v8, %v23363_v25  ;;  %v19294_v29 = vadd.f32 %v4921_v18, %v4468_v52  ;;  %v5182_v52 = vld [vmem:[%s23178_s0 + $0x8e] sm:$0xff] }
 0x504   :  { %v14670_v31 = vpop.f32.mrf.mxu0  ;;  %v14820_v56 = vpop.f32.mrf.mxu1  ;;  %v5252_v18 = vpack.c.bf16 %v5182_v52, %v5181_v63  ;;  %v5183_v63 = vld [vmem:[%s23178_s0 + $0x96] sm:$0xff] }
 0x505   :  { %23364 = vst [vmem:[#allocation5_spill] sm:$0xff] %v19294_v29 }
 0x506   :  { %v4283_v34 = vpop.f32.mrf.mxu0  ;;  %v4926_v5 = vpop.f32.mrf.mxu1  ;;  %14928 = vmatmul.mubr.msk.bf16.gmra.mxu0 %vm285_vm2, %v5251_v57  ;;  %v23367_v57 = vld [vmem:[#allocation6_spill] sm:$0xff] }
 0x507   :  { %v4473_v16 = vadd.f32 %v4283_v34, %v23365_v2  ;;  %v19298_v0 = vadd.f32 %v4926_v5, %v4469_v9  ;;  %14931 = vmatprep.mubr.msk.bf16.mxu0 %vm15827_vm1, %v23202_v33  ;;  %v23369_v2 = vld [vmem:[#allocation7_spill] sm:$0xff] }
 0x508   :  { %v14673_v3 = vpop.f32.mrf.mxu0  ;;  %v14823_v6 = vpop.f32.mrf.mxu1 }
 0x509   :  { %23366 = vst [vmem:[#allocation34_spill] sm:$0xff] %v19298_v0 }
 0x50a   :  { %v4286_v36 = vpop.f32.mrf.mxu0  ;;  %v4929_v8 = vpop.f32.mrf.mxu1 }
 0x50b   :  { %v4474_v25 = vadd.f32 %v4286_v36, %v23367_v57  ;;  %v19309_v9 = vadd.f32 %v4929_v8, %v4470_v55  ;;  %v5184_v55 = vld [vmem:[%s23178_s0 + $0x9e] sm:$0xff] }
 0x50c   :  { %v14674_v31 = vpop.f32.mrf.mxu0  ;;  %v14824_v56 = vpop.f32.mrf.mxu1  ;;  %v5253_v8 = vpack.c.bf16 %v5184_v55, %v5183_v63  ;;  %v5185_v63 = vld [vmem:[%s23178_s0 + $0xa6] sm:$0xff] }
 0x50d   :  { %23368 = vst [vmem:[#allocation35_spill] sm:$0xff] %v19309_v9 }
 0x50e   :  { %v4291_v34 = vpop.f32.mrf.mxu0  ;;  %v4934_v5 = vpop.f32.mrf.mxu1  ;;  %14932 = vmatmul.mubr.msk.bf16.gmra.mxu0 %vm285_vm2, %v5252_v18  ;;  %v23371_v18 = vld [vmem:[#allocation8_spill] sm:$0xff] }
 0x50f   :  { %v4475_v0 = vadd.f32 %v4291_v34, %v23369_v2  ;;  %v19313_v29 = vadd.f32 %v4934_v5, %v4471_v47  ;;  %14935 = vmatprep.mubr.msk.bf16.mxu0 %vm15827_vm1, %v23202_v33  ;;  %v23373_v2 = vld [vmem:[#allocation9_spill] sm:$0xff] }
 0x510   :  { %v14677_v52 = vpop.f32.mrf.mxu0  ;;  %v14827_v3 = vpop.f32.mrf.mxu1 }
 0x511   :  { %23370 = vst [vmem:[#allocation36_spill] sm:$0xff] %v19313_v29 }
 0x512   :  { %v4294_v6 = vpop.f32.mrf.mxu0  ;;  %v4937_v36 = vpop.f32.mrf.mxu1 }
 0x513   :  { %v4476_v57 = vadd.f32 %v4294_v6, %v23371_v18  ;;  %v19324_v47 = vadd.f32 %v4937_v36, %v4472_v46  ;;  %v5186_v46 = vld [vmem:[%s23178_s0 + $0xae] sm:$0xff] }
 0x514   :  { %v14678_v31 = vpop.f32.mrf.mxu0  ;;  %v14828_v56 = vpop.f32.mrf.mxu1  ;;  %v5254_v36 = vpack.c.bf16 %v5186_v46, %v5185_v63  ;;  %v5187_v63 = vld [vmem:[%s23178_s0 + $0xb6] sm:$0xff] }
 0x515   :  { %23372 = vst [vmem:[#allocation37_spill] sm:$0xff] %v19324_v47 }
 0x516   :  { %v4299_v34 = vpop.f32.mrf.mxu0  ;;  %v4942_v5 = vpop.f32.mrf.mxu1  ;;  %14936 = vmatmul.mubr.msk.bf16.gmra.mxu0 %vm285_vm2, %v5253_v8  ;;  %v23375_v8 = vld [vmem:[#allocation10_spill] sm:$0xff] }
 0x517   :  { %v4477_v29 = vadd.f32 %v4299_v34, %v23373_v2  ;;  %v19328_v9 = vadd.f32 %v4942_v5, %v4473_v16  ;;  %14939 = vmatprep.mubr.msk.bf16.mxu0 %vm15827_vm1, %v23202_v33  ;;  %v23377_v2 = vld [vmem:[#allocation11_spill] sm:$0xff] }
 0x518   :  { %v14681_v55 = vpop.f32.mrf.mxu0  ;;  %v14831_v52 = vpop.f32.mrf.mxu1 }
 0x519   :  { %23374 = vst [vmem:[#allocation6_spill] sm:$0xff] %v19328_v9 }
 0x51a   :  { %v4302_v3 = vpop.f32.mrf.mxu0  ;;  %v4945_v6 = vpop.f32.mrf.mxu1 }
 0x51b   :  { %v4478_v18 = vadd.f32 %v4302_v3, %v23375_v8  ;;  %v19339_v16 = vadd.f32 %v4945_v6, %v4474_v25  ;;  %v5188_v25 = vld [vmem:[%s23178_s0 + $0xbe] sm:$0xff] }
 0x51c   :  { %v14682_v31 = vpop.f32.mrf.mxu0  ;;  %v14832_v56 = vpop.f32.mrf.mxu1  ;;  %v5255_v6 = vpack.c.bf16 %v5188_v25, %v5187_v63  ;;  %v5189_v63 = vld [vmem:[%s23178_s0 + $0xc6] sm:$0xff] }
 0x51d   :  { %23376 = vst [vmem:[#allocation7_spill] sm:$0xff] %v19339_v16 }
 0x51e   :  { %v4307_v34 = vpop.f32.mrf.mxu0  ;;  %v4950_v5 = vpop.f32.mrf.mxu1  ;;  %14940 = vmatmul.mubr.msk.bf16.gmra.mxu0 %vm285_vm2, %v5254_v36  ;;  %v23379_v36 = vld [vmem:[#allocation12_spill] sm:$0xff] }
 0x51f   :  { %v4479_v9 = vadd.f32 %v4307_v34, %v23377_v2  ;;  %v19343_v47 = vadd.f32 %v4950_v5, %v4475_v0  ;;  %14943 = vmatprep.mubr.msk.bf16.mxu0 %vm15827_vm1, %v23202_v33  ;;  %v23381_v2 = vld [vmem:[#allocation13_spill] sm:$0xff] }
 0x520   :  { %v14685_v46 = vpop.f32.mrf.mxu0  ;;  %v14835_v55 = vpop.f32.mrf.mxu1 }
 0x521   :  { %23378 = vst [vmem:[#allocation8_spill] sm:$0xff] %v19343_v47 }
 0x522   :  { %v4310_v52 = vpop.f32.mrf.mxu0  ;;  %v4953_v3 = vpop.f32.mrf.mxu1 }
 0x523   :  { %v4480_v8 = vadd.f32 %v4310_v52, %v23379_v36  ;;  %v19354_v0 = vadd.f32 %v4953_v3, %v4476_v57  ;;  %v5190_v57 = vld [vmem:[%s23178_s0 + $0xce] sm:$0xff] }
 0x524   :  { %v14686_v31 = vpop.f32.mrf.mxu0  ;;  %v14836_v56 = vpop.f32.mrf.mxu1  ;;  %v5256_v3 = vpack.c.bf16 %v5190_v57, %v5189_v63  ;;  %v5191_v63 = vld [vmem:[%s23178_s0 + $0xd6] sm:$0xff] }
 0x525   :  { %23380 = vst [vmem:[#allocation9_spill] sm:$0xff] %v19354_v0 }
 0x526   :  { %v4315_v34 = vpop.f32.mrf.mxu0  ;;  %v4958_v5 = vpop.f32.mrf.mxu1  ;;  %14944 = vmatmul.mubr.msk.bf16.gmra.mxu0 %vm285_vm2, %v5255_v6  ;;  %v23383_v6 = vld [vmem:[#allocation14_spill] sm:$0xff] }
 0x527   :  { %v4481_v47 = vadd.f32 %v4315_v34, %v23381_v2  ;;  %v19358_v16 = vadd.f32 %v4958_v5, %v4477_v29  ;;  %14947 = vmatprep.mubr.msk.bf16.mxu0 %vm15827_vm1, %v23202_v33  ;;  %v23385_v2 = vld [vmem:[#allocation15_spill] sm:$0xff] }
 0x528   :  { %v14689_v25 = vpop.f32.mrf.mxu0  ;;  %v14839_v46 = vpop.f32.mrf.mxu1 }
 0x529   :  { %23382 = vst [vmem:[#allocation10_spill] sm:$0xff] %v19358_v16 }
 0x52a   :  { %v4318_v55 = vpop.f32.mrf.mxu0  ;;  %v4961_v52 = vpop.f32.mrf.mxu1 }
 0x52b   :  { %v4482_v36 = vadd.f32 %v4318_v55, %v23383_v6  ;;  %v19369_v29 = vadd.f32 %v4961_v52, %v4478_v18  ;;  %v5192_v18 = vld [vmem:[%s23178_s0 + $0xde] sm:$0xff] }
 0x52c   :  { %v14690_v31 = vpop.f32.mrf.mxu0  ;;  %v14840_v56 = vpop.f32.mrf.mxu1  ;;  %v5257_v52 = vpack.c.bf16 %v5192_v18, %v5191_v63  ;;  %v5193_v63 = vld [vmem:[%s23178_s0 + $0xe6] sm:$0xff] }
 0x52d   :  { %23384 = vst [vmem:[#allocation11_spill] sm:$0xff] %v19369_v29 }
 0x52e   :  { %v4323_v34 = vpop.f32.mrf.mxu0  ;;  %v4966_v5 = vpop.f32.mrf.mxu1  ;;  %14948 = vmatmul.mubr.msk.bf16.gmra.mxu0 %vm285_vm2, %v5256_v3  ;;  %v23387_v3 = vld [vmem:[#allocation16_spill] sm:$0xff] }
 0x52f   :  { %v4483_v16 = vadd.f32 %v4323_v34, %v23385_v2  ;;  %v19373_v0 = vadd.f32 %v4966_v5, %v4479_v9  ;;  %14951 = vmatprep.mubr.msk.bf16.mxu0 %vm15827_vm1, %v23202_v33  ;;  %v23389_v2 = vld [vmem:[#allocation17_spill] sm:$0xff] }
 0x530   :  { %v14693_v57 = vpop.f32.mrf.mxu0  ;;  %v14843_v25 = vpop.f32.mrf.mxu1 }
 0x531   :  { %23386 = vst [vmem:[#allocation12_spill] sm:$0xff] %v19373_v0 }
 0x532   :  { %v4326_v46 = vpop.f32.mrf.mxu0  ;;  %v4969_v55 = vpop.f32.mrf.mxu1 }
 0x533   :  { %v4484_v6 = vadd.f32 %v4326_v46, %v23387_v3  ;;  %v19384_v9 = vadd.f32 %v4969_v55, %v4480_v8  ;;  %v5194_v8 = vld [vmem:[%s23178_s0 + $0xee] sm:$0xff] }
 0x534   :  { %v14694_v31 = vpop.f32.mrf.mxu0  ;;  %v14844_v56 = vpop.f32.mrf.mxu1  ;;  %v5258_v55 = vpack.c.bf16 %v5194_v8, %v5193_v63  ;;  %v5195_v63 = vld [vmem:[%s23178_s0 + $0xf6] sm:$0xff] }
 0x535   :  { %23388 = vst [vmem:[#allocation13_spill] sm:$0xff] %v19384_v9 }
 0x536   :  { %v4331_v34 = vpop.f32.mrf.mxu0  ;;  %v4974_v5 = vpop.f32.mrf.mxu1  ;;  %14952 = vmatmul.mubr.msk.bf16.gmra.mxu0 %vm285_vm2, %v5257_v52  ;;  %v23391_v52 = vld [vmem:[#allocation18_spill] sm:$0xff] }
 0x537   :  { %v4485_v0 = vadd.f32 %v4331_v34, %v23389_v2  ;;  %v19388_v29 = vadd.f32 %v4974_v5, %v4481_v47  ;;  %14955 = vmatprep.mubr.msk.bf16.mxu0 %vm15827_vm1, %v23202_v33  ;;  %v23393_v2 = vld [vmem:[#allocation19_spill] sm:$0xff] }
 0x538   :  { %v14697_v18 = vpop.f32.mrf.mxu0  ;;  %v14847_v57 = vpop.f32.mrf.mxu1 }
 0x539   :  { %23390 = vst [vmem:[#allocation14_spill] sm:$0xff] %v19388_v29 }
 0x53a   :  { %v4334_v25 = vpop.f32.mrf.mxu0  ;;  %v4977_v46 = vpop.f32.mrf.mxu1 }
 0x53b   :  { %v4486_v3 = vadd.f32 %v4334_v25, %v23391_v52  ;;  %v19399_v47 = vadd.f32 %v4977_v46, %v4482_v36  ;;  %v5196_v36 = vld [vmem:[%s23178_s0 + $0xfe] sm:$0xff] }
 0x53c   :  { %v14698_v31 = vpop.f32.mrf.mxu0  ;;  %v14848_v56 = vpop.f32.mrf.mxu1  ;;  %v5259_v46 = vpack.c.bf16 %v5196_v36, %v5195_v63  ;;  %v5197_v63 = vld [vmem:[%s23178_s0 + $0x106] sm:$0xff] }
 0x53d   :  { %23392 = vst [vmem:[#allocation15_spill] sm:$0xff] %v19399_v47 }
 0x53e   :  { %v4339_v34 = vpop.f32.mrf.mxu0  ;;  %v4982_v5 = vpop.f32.mrf.mxu1  ;;  %14956 = vmatmul.mubr.msk.bf16.gmra.mxu0 %vm285_vm2, %v5258_v55  ;;  %v23395_v55 = vld [vmem:[#allocation20_spill] sm:$0xff] }
 0x53f   :  { %v4487_v29 = vadd.f32 %v4339_v34, %v23393_v2  ;;  %v19403_v9 = vadd.f32 %v4982_v5, %v4483_v16  ;;  %14959 = vmatprep.mubr.msk.bf16.mxu0 %vm15827_vm1, %v23202_v33  ;;  %v23397_v2 = vld [vmem:[#allocation21_spill] sm:$0xff] }
 0x540   :  { %v14701_v8 = vpop.f32.mrf.mxu0  ;;  %v14851_v18 = vpop.f32.mrf.mxu1 }
 0x541   :  { %23394 = vst [vmem:[#allocation16_spill] sm:$0xff] %v19403_v9 }
 0x542   :  { %v4342_v57 = vpop.f32.mrf.mxu0  ;;  %v4985_v25 = vpop.f32.mrf.mxu1 }
 0x543   :  { %v4488_v52 = vadd.f32 %v4342_v57, %v23395_v55  ;;  %v19414_v16 = vadd.f32 %v4985_v25, %v4484_v6  ;;  %v5198_v6 = vld [vmem:[%s23178_s0 + $0x10e] sm:$0xff] }
 0x544   :  { %v14702_v31 = vpop.f32.mrf.mxu0  ;;  %v14852_v56 = vpop.f32.mrf.mxu1  ;;  %v5260_v25 = vpack.c.bf16 %v5198_v6, %v5197_v63  ;;  %v5199_v63 = vld [vmem:[%s23178_s0 + $0x116] sm:$0xff] }
 0x545   :  { %23396 = vst [vmem:[#allocation17_spill] sm:$0xff] %v19414_v16 }
 0x546   :  { %v4347_v34 = vpop.f32.mrf.mxu0  ;;  %v4990_v5 = vpop.f32.mrf.mxu1  ;;  %14960 = vmatmul.mubr.msk.bf16.gmra.mxu0 %vm285_vm2, %v5259_v46  ;;  %v23399_v46 = vld [vmem:[#allocation22_spill] sm:$0xff] }
 0x547   :  { %v4489_v9 = vadd.f32 %v4347_v34, %v23397_v2  ;;  %v19418_v47 = vadd.f32 %v4990_v5, %v4485_v0  ;;  %14963 = vmatprep.mubr.msk.bf16.mxu0 %vm15827_vm1, %v23202_v33  ;;  %v23401_v2 = vld [vmem:[#allocation23_spill] sm:$0xff] }
 0x548   :  { %v14705_v36 = vpop.f32.mrf.mxu0  ;;  %v14855_v8 = vpop.f32.mrf.mxu1 }
 0x549   :  { %23398 = vst [vmem:[#allocation18_spill] sm:$0xff] %v19418_v47 }
 0x54a   :  { %v4350_v18 = vpop.f32.mrf.mxu0  ;;  %v4993_v57 = vpop.f32.mrf.mxu1 }
 0x54b   :  { %v4490_v55 = vadd.f32 %v4350_v18, %v23399_v46  ;;  %v19429_v0 = vadd.f32 %v4993_v57, %v4486_v3  ;;  %v5200_v3 = vld [vmem:[%s23178_s0 + $0x11e] sm:$0xff] }
 0x54c   :  { %v14706_v31 = vpop.f32.mrf.mxu0  ;;  %v14856_v56 = vpop.f32.mrf.mxu1  ;;  %v5261_v57 = vpack.c.bf16 %v5200_v3, %v5199_v63  ;;  %v5201_v63 = vld [vmem:[%s23178_s0 + $0x126] sm:$0xff] }
 0x54d   :  { %23400 = vst [vmem:[#allocation19_spill] sm:$0xff] %v19429_v0 }
 0x54e   :  { %v4355_v34 = vpop.f32.mrf.mxu0  ;;  %v4998_v5 = vpop.f32.mrf.mxu1  ;;  %14964 = vmatmul.mubr.msk.bf16.gmra.mxu0 %vm285_vm2, %v5260_v25  ;;  %v23403_v25 = vld [vmem:[#allocation24_spill] sm:$0xff] }
 0x54f   :  { %v4491_v47 = vadd.f32 %v4355_v34, %v23401_v2  ;;  %v19433_v16 = vadd.f32 %v4998_v5, %v4487_v29  ;;  %14967 = vmatprep.mubr.msk.bf16.mxu0 %vm15827_vm1, %v23202_v33  ;;  %v23405_v2 = vld [vmem:[#allocation25_spill] sm:$0xff] }
 0x550   :  { %v14709_v6 = vpop.f32.mrf.mxu0  ;;  %v14859_v36 = vpop.f32.mrf.mxu1 }
 0x551   :  { %23402 = vst [vmem:[#allocation20_spill] sm:$0xff] %v19433_v16 }
 0x552   :  { %v4358_v8 = vpop.f32.mrf.mxu0  ;;  %v5001_v18 = vpop.f32.mrf.mxu1 }
 0x553   :  { %v4492_v46 = vadd.f32 %v4358_v8, %v23403_v25  ;;  %v19444_v29 = vadd.f32 %v5001_v18, %v4488_v52  ;;  %v5202_v52 = vld [vmem:[%s23178_s0 + $0x12e] sm:$0xff] }
 0x554   :  { %v14710_v31 = vpop.f32.mrf.mxu0  ;;  %v14860_v56 = vpop.f32.mrf.mxu1  ;;  %v5262_v18 = vpack.c.bf16 %v5202_v52, %v5201_v63  ;;  %v5203_v63 = vld [vmem:[%s23178_s0 + $0x136] sm:$0xff] }
 0x555   :  { %23404 = vst [vmem:[#allocation21_spill] sm:$0xff] %v19444_v29 }
 0x556   :  { %v4363_v34 = vpop.f32.mrf.mxu0  ;;  %v5006_v5 = vpop.f32.mrf.mxu1  ;;  %14968 = vmatmul.mubr.msk.bf16.gmra.mxu0 %vm285_vm2, %v5261_v57  ;;  %v23407_v57 = vld [vmem:[#allocation26_spill] sm:$0xff] }
 0x557   :  { %v4493_v16 = vadd.f32 %v4363_v34, %v23405_v2  ;;  %v19448_v0 = vadd.f32 %v5006_v5, %v4489_v9  ;;  %14971 = vmatprep.mubr.msk.bf16.mxu0 %vm15827_vm1, %v23202_v33  ;;  %v23409_v2 = vld [vmem:[#allocation27_spill] sm:$0xff] }
 0x558   :  { %v14713_v3 = vpop.f32.mrf.mxu0  ;;  %v14863_v6 = vpop.f32.mrf.mxu1 }
 0x559   :  { %23406 = vst [vmem:[#allocation22_spill] sm:$0xff] %v19448_v0 }
 0x55a   :  { %v4366_v36 = vpop.f32.mrf.mxu0  ;;  %v5009_v8 = vpop.f32.mrf.mxu1 }
 0x55b   :  { %v4494_v25 = vadd.f32 %v4366_v36, %v23407_v57  ;;  %v19459_v9 = vadd.f32 %v5009_v8, %v4490_v55  ;;  %v5204_v55 = vld [vmem:[%s23178_s0 + $0x13e] sm:$0xff] }
 0x55c   :  { %v14714_v31 = vpop.f32.mrf.mxu0  ;;  %v14864_v56 = vpop.f32.mrf.mxu1  ;;  %v5263_v8 = vpack.c.bf16 %v5204_v55, %v5203_v63  ;;  %v5205_v63 = vld [vmem:[%s23178_s0 + $0x146] sm:$0xff] }
 0x55d   :  { %23408 = vst [vmem:[#allocation23_spill] sm:$0xff] %v19459_v9 }
 0x55e   :  { %v4371_v34 = vpop.f32.mrf.mxu0  ;;  %v5014_v5 = vpop.f32.mrf.mxu1  ;;  %14972 = vmatmul.mubr.msk.bf16.gmra.mxu0 %vm285_vm2, %v5262_v18  ;;  %v23411_v18 = vld [vmem:[#allocation28_spill] sm:$0xff] }
 0x55f   :  { %v4495_v0 = vadd.f32 %v4371_v34, %v23409_v2  ;;  %v19463_v29 = vadd.f32 %v5014_v5, %v4491_v47  ;;  %14975 = vmatprep.mubr.msk.bf16.mxu0 %vm15827_vm1, %v23202_v33  ;;  %v23413_v2 = vld [vmem:[#allocation29_spill] sm:$0xff] }
 0x560   :  { %v14717_v52 = vpop.f32.mrf.mxu0  ;;  %v14867_v3 = vpop.f32.mrf.mxu1 }
 0x561   :  { %23410 = vst [vmem:[#allocation24_spill] sm:$0xff] %v19463_v29 }
 0x562   :  { %v4374_v6 = vpop.f32.mrf.mxu0  ;;  %v5017_v36 = vpop.f32.mrf.mxu1 }
 0x563   :  { %v4496_v57 = vadd.f32 %v4374_v6, %v23411_v18  ;;  %v19474_v47 = vadd.f32 %v5017_v36, %v4492_v46  ;;  %v5206_v46 = vld [vmem:[%s23178_s0 + $0x14e] sm:$0xff] }
 0x564   :  { %v14718_v31 = vpop.f32.mrf.mxu0  ;;  %v14868_v56 = vpop.f32.mrf.mxu1  ;;  %v5264_v36 = vpack.c.bf16 %v5206_v46, %v5205_v63  ;;  %v5207_v63 = vld [vmem:[%s23178_s0 + $0x156] sm:$0xff] }
 0x565   :  { %23412 = vst [vmem:[#allocation25_spill] sm:$0xff] %v19474_v47  ;;  %v6733_v47 = vld [vmem:[%s23180_s3 + $0x8] sm:$0xff] }
 0x566   :  { %v4379_v34 = vpop.f32.mrf.mxu0  ;;  %v5022_v5 = vpop.f32.mrf.mxu1  ;;  %14976 = vmatmul.mubr.msk.bf16.gmra.mxu0 %vm285_vm2, %v5263_v8  ;;  %7000 = vmatprep.mubr.f32.mxu1 %v6733_v47 }
 0x567   :  { %v4497_v29 = vadd.f32 %v4379_v34, %v23413_v2  ;;  %v19478_v9 = vadd.f32 %v5022_v5, %v4493_v16  ;;  %14979 = vmatprep.mubr.msk.bf16.mxu0 %vm15827_vm1, %v23202_v33 }
 0x568   :  { %v14721_v55 = vpop.f32.mrf.mxu0  ;;  %v14871_v52 = vpop.f32.mrf.mxu1 }
 0x569   :  { %23414 = vst [vmem:[#allocation26_spill] sm:$0xff] %v19478_v9 }
 0x56a   :  { %v4382_v3 = vpop.f32.mrf.mxu0  ;;  %v5025_v6 = vpop.f32.mrf.mxu1 }
 0x56b   :  { %v4498_v8 = vadd.f32 %v4382_v3, %v18762_v17  ;;  %v19489_v16 = vadd.f32 %v5025_v6, %v4494_v25  ;;  %v5208_v17 = vld [vmem:[%s23178_s0 + $0x15e] sm:$0xff] }
 0x56c   :  { %v14722_v18 = vpop.f32.mrf.mxu0  ;;  %v14872_v31 = vpop.f32.mrf.mxu1  ;;  %v5265_v3 = vpack.c.bf16 %v5208_v17, %v5207_v63  ;;  %v5209_v63 = vld [vmem:[%s23178_s0 + $0x166] sm:$0xff] }
 0x56d   :  { %23415 = vst [vmem:[#allocation27_spill] sm:$0xff] %v19489_v16 }
 0x56e   :  { %v4387_v56 = vpop.f32.mrf.mxu0  ;;  %v5030_v34 = vpop.f32.mrf.mxu1  ;;  %14980 = vmatmul.mubr.msk.bf16.gmra.mxu0 %vm285_vm2, %v5264_v36 }
 0x56f   :  { %v4499_v5 = vadd.f32 %v4387_v56, %v18770_v37  ;;  %v19493_v2 = vadd.f32 %v5030_v34, %v4495_v0  ;;  %14983 = vmatprep.mubr.msk.bf16.mxu0 %vm15827_vm1, %v23202_v33 }
 0x570   :  { %v14725_v25 = vpop.f32.mrf.mxu0  ;;  %v14875_v46 = vpop.f32.mrf.mxu1 }
 0x571   :  { %23416 = vst [vmem:[#allocation28_spill] sm:$0xff] %v19493_v2 }
 0x572   :  { %v4390_v55 = vpop.f32.mrf.mxu0  ;;  %v5033_v52 = vpop.f32.mrf.mxu1 }
 0x573   :  { %v4500_v37 = vadd.f32 %v4390_v55, %v18786_v12  ;;  %v19504_v0 = vadd.f32 %v5033_v52, %v4496_v57  ;;  %v5210_v12 = vld [vmem:[%s23178_s0 + $0x16e] sm:$0xff] }
 0x574   :  { %v14726_v6 = vpop.f32.mrf.mxu0  ;;  %v14876_v36 = vpop.f32.mrf.mxu1  ;;  %v5266_v55 = vpack.c.bf16 %v5210_v12, %v5209_v63  ;;  %v5211_v63 = vld [vmem:[%s23178_s0 + $0x176] sm:$0xff] }
 0x575   :  { %23417 = vst [vmem:[#allocation29_spill] sm:$0xff] %v19504_v0 }
 0x576   :  { %v4395_v18 = vpop.f32.mrf.mxu0  ;;  %v5038_v31 = vpop.f32.mrf.mxu1  ;;  %14984 = vmatmul.mubr.msk.bf16.gmra.mxu0 %vm285_vm2, %v5265_v3 }
 0x577   :  { %v4501_v56 = vadd.f32 %v4395_v18, %v18794_v54  ;;  %v19508_v34 = vadd.f32 %v5038_v31, %v4497_v29  ;;  %14987 = vmatprep.mubr.msk.bf16.mxu0 %vm15827_vm1, %v23202_v33 }
 0x578   :  { %v14729_v57 = vpop.f32.mrf.mxu0  ;;  %v14879_v17 = vpop.f32.mrf.mxu1 }
 0x579   :  { %23418 = vst [vmem:[#allocation40_spill] sm:$0xff] %v19508_v34 }
 0x57a   :  { %v4398_v25 = vpop.f32.mrf.mxu0  ;;  %v5041_v46 = vpop.f32.mrf.mxu1 }
 0x57b   :  { %v4502_v54 = vadd.f32 %v4398_v25, %v18810_v21  ;;  %v19519_v29 = vadd.f32 %v5041_v46, %v4498_v8  ;;  %v5212_v21 = vld [vmem:[%s23178_s0 + $0x17e] sm:$0xff] }
 0x57c   :  { %v14730_v52 = vpop.f32.mrf.mxu0  ;;  %v14880_v3 = vpop.f32.mrf.mxu1  ;;  %v5267_v25 = vpack.c.bf16 %v5212_v21, %v5211_v63  ;;  %v5213_v63 = vld [vmem:[%s23178_s0 + $0x186] sm:$0xff] }
 0x57d   :  { %23419 = vst [vmem:[#allocation41_spill] sm:$0xff] %v19519_v29 }
 0x57e   :  { %v4403_v6 = vpop.f32.mrf.mxu0  ;;  %v5046_v36 = vpop.f32.mrf.mxu1  ;;  %14988 = vmatmul.mubr.msk.bf16.gmra.mxu0 %vm285_vm2, %v5266_v55 }
 0x57f   :  { %v4503_v18 = vadd.f32 %v4403_v6, %v18818_v7  ;;  %v19523_v31 = vadd.f32 %v5046_v36, %v4499_v5  ;;  %14991 = vmatprep.mubr.msk.bf16.mxu0 %vm15827_vm1, %v23202_v33 }
 0x580   :  { %v14733_v8 = vpop.f32.mrf.mxu0  ;;  %v14883_v12 = vpop.f32.mrf.mxu1 }
 0x581   :  { %23420 = vst [vmem:[#allocation42_spill] sm:$0xff] %v19523_v31 }
 0x582   :  { %v4406_v57 = vpop.f32.mrf.mxu0  ;;  %v5049_v17 = vpop.f32.mrf.mxu1 }
 0x583   :  { %v4504_v7 = vadd.f32 %v4406_v57, %v18834_v22  ;;  %v19534_v5 = vadd.f32 %v5049_v17, %v4500_v37  ;;  %v5214_v22 = vld [vmem:[%s23178_s0 + $0x18e] sm:$0xff] }
 0x584   :  { %v14734_v46 = vpop.f32.mrf.mxu0  ;;  %v14884_v55 = vpop.f32.mrf.mxu1  ;;  %v5268_v57 = vpack.c.bf16 %v5214_v22, %v5213_v63  ;;  %v5215_v63 = vld [vmem:[%s23178_s0 + $0x196] sm:$0xff] }
 0x585   :  { %23421 = vst [vmem:[#allocation43_spill] sm:$0xff] %v19534_v5 }
 0x586   :  { %v4411_v52 = vpop.f32.mrf.mxu0  ;;  %v5054_v3 = vpop.f32.mrf.mxu1  ;;  %14992 = vmatmul.mubr.msk.bf16.gmra.mxu0 %vm285_vm2, %v5267_v25 }
 0x587   :  { %v4505_v6 = vadd.f32 %v4411_v52, %v18842_v26  ;;  %v19538_v36 = vadd.f32 %v5054_v3, %v4501_v56  ;;  %14995 = vmatprep.mubr.msk.bf16.mxu0 %vm15827_vm1, %v23202_v33 }
 0x588   :  { %v14737_v37 = vpop.f32.mrf.mxu0  ;;  %v14887_v21 = vpop.f32.mrf.mxu1 }
 0x589   :  { %23422 = vst [vmem:[#allocation44_spill] sm:$0xff] %v19538_v36 }
 0x58a   :  { %v4414_v8 = vpop.f32.mrf.mxu0  ;;  %v5057_v12 = vpop.f32.mrf.mxu1 }
 0x58b   :  { %v4506_v26 = vadd.f32 %v4414_v8, %v18857_v4  ;;  %v19549_v56 = vadd.f32 %v5057_v12, %v4502_v54  ;;  %v5216_v4 = vld [vmem:[%s23178_s0 + $0x19e] sm:$0xff] }
 0x58c   :  { %v14738_v17 = vpop.f32.mrf.mxu0  ;;  %v14888_v25 = vpop.f32.mrf.mxu1  ;;  %v5269_v8 = vpack.c.bf16 %v5216_v4, %v5215_v63  ;;  %v5217_v63 = vld [vmem:[%s23178_s0 + $0x1a6] sm:$0xff] }
 0x58d   :  { %23423 = vst [vmem:[#allocation45_spill] sm:$0xff] %v19549_v56 }
 0x58e   :  { %v4419_v46 = vpop.f32.mrf.mxu0  ;;  %v5062_v55 = vpop.f32.mrf.mxu1  ;;  %14996 = vmatmul.mubr.msk.bf16.gmra.mxu0 %vm285_vm2, %v5268_v57 }
 0x58f   :  { %v4507_v52 = vadd.f32 %v4419_v46, %v18864_v19  ;;  %v19553_v3 = vadd.f32 %v5062_v55, %v4503_v18  ;;  %14999 = vmatprep.mubr.msk.bf16.mxu0 %vm15827_vm1, %v23202_v33 }
 0x590   :  { %v14741_v54 = vpop.f32.mrf.mxu0  ;;  %v14891_v22 = vpop.f32.mrf.mxu1 }
 0x591   :  { %23424 = vst [vmem:[#allocation46_spill] sm:$0xff] %v19553_v3 }
 0x592   :  { %v4422_v37 = vpop.f32.mrf.mxu0  ;;  %v5065_v21 = vpop.f32.mrf.mxu1 }
 0x593   :  { %v4508_v19 = vadd.f32 %v4422_v37, %v18880_v38  ;;  %v19564_v18 = vadd.f32 %v5065_v21, %v4504_v7  ;;  %v5218_v38 = vld [vmem:[%s23178_s0 + $0x1ae] sm:$0xff] }
 0x594   :  { %v14742_v12 = vpop.f32.mrf.mxu0  ;;  %v14892_v57 = vpop.f32.mrf.mxu1  ;;  %v5270_v37 = vpack.c.bf16 %v5218_v38, %v5217_v63 }
 0x595   :  { %23425 = vst [vmem:[#allocation47_spill] sm:$0xff] %v19564_v18 }
 0x596   :  { %v4427_v17 = vpop.f32.mrf.mxu0  ;;  %v5070_v25 = vpop.f32.mrf.mxu1  ;;  %15000 = vmatmul.mubr.msk.bf16.gmra.mxu0 %vm285_vm2, %v5269_v8 }
 0x597   :  { %v4509_v46 = vadd.f32 %v4427_v17, %v18888_v48  ;;  %v19568_v55 = vadd.f32 %v5070_v25, %v4505_v6  ;;  %15003 = vmatprep.mubr.msk.bf16.mxu0 %vm15827_vm1, %v23202_v33  ;;  %v5219_v25 = vld [vmem:[%s23178_s0 + $0x1b6] sm:$0xff] }
 0x598   :  { %v14745_v7 = vpop.f32.mrf.mxu0  ;;  %v14895_v4 = vpop.f32.mrf.mxu1 }
 0x599   :  { %23426 = vst [vmem:[#allocation48_spill] sm:$0xff] %v19568_v55 }
 0x59a   :  { %v4430_v54 = vpop.f32.mrf.mxu0  ;;  %v5073_v22 = vpop.f32.mrf.mxu1 }
 0x59b   :  { %v19578_v21 = vadd.f32 %v5073_v22, %v4506_v26  ;;  %v5220_v26 = vld [vmem:[%s23178_s0 + $0x1be] sm:$0xff] }
 0x59c   :  { %v14746_v48 = vpop.f32.mrf.mxu0  ;;  %v14896_v6 = vpop.f32.mrf.mxu1  ;;  %v5271_v54 = vpack.c.bf16 %v5220_v26, %v5219_v25  ;;  %v19610_v25 = vld [vmem:[%s23179_s2] ss:$0 sm:$0xff] }
 0x59d   :  { %23427 = vst [vmem:[#allocation49_spill] sm:$0xff] %v19578_v21 }
 0x59e   :  { %v5078_v8 = vpop.f32.mrf.mxu1  ;;  %v5441_v12 = vpop.f32.mrf.mxu0  ;;  %15004 = vmatmul.mubr.msk.bf16.gmra.mxu0 %vm285_vm2, %v5270_v37 }
 0x59f   :  { %v19581_v57 = vadd.f32 %v5078_v8, %v4507_v52  ;;  %v5751_v17 = vadd.f32 %v5441_v12, %v18911_v62  ;;  %15007 = vmatprep.mubr.msk.bf16.mxu0 %vm15827_vm1, %v23202_v33 }
 0x5a0   :  { %v14899_v63 = vpop.f32.mrf.mxu1  ;;  %v14909_v38 = vpop.f32.mrf.mxu0 }
 0x5a1   :  { %23428 = vst [vmem:[#allocation50_spill] sm:$0xff] %v19581_v57 }
 0x5a2   :  { %v5081_v7 = vpop.f32.mrf.mxu1  ;;  %v5444_v4 = vpop.f32.mrf.mxu0 }
 0x5a3   :  { %v19592_v52 = vadd.f32 %v5081_v7, %v4508_v19  ;;  %v5752_v62 = vadd.f32 %v5444_v4, %v18927_v28  ;;  %v5221_v19 = vld [vmem:[%s23178_s0 + $0x1c6] sm:$0xff]  ;;  %v5222_v28 = vld [vmem:[%s23178_s0 + $0x1ce] sm:$0xff] }
 0x5a4   :  { %v14900_v22 = vpop.f32.mrf.mxu1  ;;  %v14910_v37 = vpop.f32.mrf.mxu0  ;;  %v5272_v38 = vpack.c.bf16 %v5222_v28, %v5221_v19  ;;  %v5224_v19 = vld [vmem:[%s23178_s0 + $0x1de] sm:$0xff] }
 0x5a5   :  { %23429 = vst [vmem:[#allocation51_spill] sm:$0xff] %v19592_v52 }
 0x5a6   :  { %v5086_v48 = vpop.f32.mrf.mxu1  ;;  %v5449_v6 = vpop.f32.mrf.mxu0  ;;  %15008 = vmatmul.mubr.msk.bf16.gmra.mxu0 %vm285_vm2, %v5271_v54 }
 0x5a7   :  { %v19596_v8 = vadd.f32 %v5086_v48, %v4509_v46  ;;  %v5753_v12 = vadd.f32 %v5449_v6, %v18935_v13  ;;  %15011 = vmatprep.mubr.msk.bf16.mxu0 %vm15827_vm1, %v23202_v33  ;;  %v5835_v6 = vadd.f32 %v19610_v25, %v5751_v17 }
 0x5a8   :  { %v14913_v46 = vpop.f32.mrf.mxu0  ;;  %v14903_v26 = vpop.f32.mrf.mxu1 }
 0x5a9   :  { %23430 = vst [vmem:[#allocation52_spill] sm:$0xff] %v19596_v8  ;;  %v5837_v13 = vadd.f32 %v19610_v25, %v5753_v12 }
 0x5aa   :  { %v5452_v63 = vpop.f32.mrf.mxu0  ;;  %v5089_v7 = vpop.f32.mrf.mxu1 }
 0x5ab   :  { %v5754_v4 = vadd.f32 %v5452_v63, %v18951_v23  ;;  %v5914_v37 = vmax.f32 %v5837_v13, 0.0  ;;  %v5223_v23 = vld [vmem:[%s23178_s0 + $0x1d6] sm:$0xff]  ;;  %v5912_v63 = vmax.f32 %v5835_v6, 0.0 }
 0x5ac   :  { %v14914_v54 = vpop.f32.mrf.mxu0  ;;  %v14904_v22 = vpop.f32.mrf.mxu1 }
 0x5ad   :  { %v19615_v48 = vadd.f32 %v19610_v25, %v5754_v4  ;;  %v6065_v28 = vrot.slane %v5914_v37, 2 }
 0x5ae   :  { %v5457_v8 = vpop.f32.mrf.mxu0  ;;  %15012 = vmatmul.mubr.msk.bf16.gmra.mxu0 %vm285_vm2, %v5272_v38  ;;  %v5273_v38 = vpack.c.bf16 %v5224_v19, %v5223_v23  ;;  %v5226_v23 = vld [vmem:[%s23178_s0 + $0x1ee] sm:$0xff] }
 0x5af   :  { %v5915_v46 = vmax.f32 %v19615_v48, 0.0  ;;  %v5755_v12 = vadd.f32 %v5457_v8, %v18959_v24  ;;  %15015 = vmatprep.mubr.msk.bf16.mxu0 %vm15827_vm1, %v23202_v33  ;;  %v5836_v24 = vadd.f32 %v19610_v25, %v5752_v62 }
 0x5b0   :  { %v14917_v17 = vpop.f32.mrf.mxu0 }
 0x5b1   :  { %v6066_v26 = vrot.slane %v5915_v46, 2  ;;  %v5839_v13 = vadd.f32 %v19610_v25, %v5755_v12  ;;  %v5913_v57 = vmax.f32 %v5836_v24, 0.0 }
 0x5b2   :  { %v5460_v8 = vpop.f32.mrf.mxu0 }
 0x5b3   :  { %v6067_v7 = vsel %vm6064_vm3, %v6065_v28, %v6066_v26  ;;  %v5916_v4 = vmax.f32 %v5839_v13, 0.0  ;;  %v5756_v54 = vadd.f32 %v5460_v8, %v18975_v45  ;;  %v5225_v45 = vld [vmem:[%s23178_s0 + $0x1e6] sm:$0xff] }
 0x5b4   :  { %v14918_v22 = vpop.f32.mrf.mxu0  ;;  %v19633_v48 = vmax.f32 %v5912_v63, %v6067_v7 }
 0x5b5   :  { %v6068_v52 = vrot.slane %v5916_v4, 2  ;;  %v19636_v17 = vadd.f32 %v19610_v25, %v5756_v54 }
 0x5b6   :  { %v5465_v21 = vpop.f32.mrf.mxu0  ;;  %15016 = vmatmul.mubr.msk.bf16.gmra.mxu0 %vm285_vm2, %v5273_v38  ;;  %v6437_v24 = vrot.slane %v19633_v48, 1 }
 0x5b7   :  { %v6069_v62 = vsel %vm6064_vm3, %v6066_v26, %v6068_v52  ;;  %v5917_v6 = vmax.f32 %v19636_v17, 0.0  ;;  %v5757_v12 = vadd.f32 %v5465_v21, %v18983_v53  ;;  %15019 = vmatprep.mubr.msk.bf16.mxu0 %vm15827_vm1, %v23202_v33  ;;  %v5274_v21 = vpack.c.bf16 %v5226_v23, %v5225_v45 }
 0x5b8   :  { %v14921_v19 = vpop.f32.mrf.mxu0  ;;  %v19650_v28 = vmax.f32 %v5913_v57, %v6069_v62 }
 0x5b9   :  { %v6070_v13 = vrot.slane %v5917_v6, 2  ;;  %v19653_v26 = vadd.f32 %v19610_v25, %v5757_v12  ;;  %v5227_v19 = vld [vmem:[%s23178_s0 + $0x1f6] sm:$0xff] }
 0x5ba   :  { %v5468_v53 = vpop.f32.mrf.mxu0  ;;  %v6438_v63 = vrot.slane %v19650_v28, 1 }
 0x5bb   :  { %v6071_v8 = vsel %vm6064_vm3, %v6068_v52, %v6070_v13  ;;  %v5918_v38 = vmax.f32 %v19653_v26, 0.0  ;;  %v5758_v7 = vadd.f32 %v5468_v53, %v18999_v39  ;;  %v5228_v26 = vld [vmem:[%s23178_s0 + $0x1fe] sm:$0xff] }
 0x5bc   :  { %v14922_v54 = vpop.f32.mrf.mxu0  ;;  %v19660_v57 = vmax.f32 %v5914_v37, %v6071_v8  ;;  %v19663_v22 = vsel %vm6436_vm4, %v6437_v24, %v6438_v63 }
 0x5bd   :  { %v6072_v17 = vrot.slane %v5918_v38, 2  ;;  %v19666_v62 = vadd.f32 %v19610_v25, %v5758_v7  ;;  %v5275_v54 = vpack.c.bf16 %v5228_v26, %v5227_v19 }
 0x5be   :  { %v5473_v45 = vpop.f32.mrf.mxu0  ;;  %15020 = vmatmul.mubr.msk.bf16.gmra.mxu0 %vm285_vm2, %v5274_v21  ;;  %v6440_v52 = vrot.slane %v19660_v57, 1 }
 0x5bf   :  { %v6073_v39 = vsel %vm6064_vm3, %v6070_v13, %v6072_v17  ;;  %v5919_v37 = vmax.f32 %v19666_v62, 0.0  ;;  %v5759_v23 = vadd.f32 %v5473_v45, %v19007_v44  ;;  %15023 = vmatprep.mubr.msk.bf16.mxu0 %vm15827_vm1, %v23202_v33 }
 0x5c0   :  { %v14925_v53 = vpop.f32.mrf.mxu0  ;;  %v19683_v21 = vmax.f32 %v5915_v46, %v6073_v39  ;;  %v19686_v13 = vsel %vm6436_vm4, %v6438_v63, %v6440_v52 }
 0x5c1   :  { %v6074_v24 = vrot.slane %v5919_v37, 2  ;;  %v19689_v44 = vadd.f32 %v19610_v25, %v5759_v23 }
 0x5c2   :  { %v5476_v7 = vpop.f32.mrf.mxu0  ;;  %v6442_v62 = vrot.slane %v19683_v21, 1 }
 0x5c3   :  { %v6075_v45 = vsel %vm6064_vm3, %v6072_v17, %v6074_v24  ;;  %v5920_v53 = vmax.f32 %v19689_v44, 0.0  ;;  %v5760_v46 = vadd.f32 %v5476_v7, %v19023_v14  ;;  %v5230_v7 = vld [vmem:[%s23178_s0 + $0x20e] sm:$0xff] }
 0x5c4   :  { %v14926_v39 = vpop.f32.mrf.mxu0  ;;  %v19697_v63 = vmax.f32 %v5916_v4, %v6075_v45  ;;  %v19700_v12 = vsel %vm6436_vm4, %v6440_v52, %v6442_v62  ;;  %v5229_v52 = vld [vmem:[%s23178_s0 + $0x206] sm:$0xff] }
 0x5c5   :  { %v6076_v23 = vrot.slane %v5920_v53, 2  ;;  %v19703_v55 = vadd.f32 %v19610_v25, %v5760_v46 }
 0x5c6   :  { %v5481_v26 = vpop.f32.mrf.mxu0  ;;  %15024 = vmatmul.mubr.msk.bf16.gmra.mxu0 %vm285_vm2, %v5275_v54  ;;  %v6444_v17 = vrot.slane %v19697_v63, 1 }
 0x5c7   :  { %v6077_v14 = vsel %vm6064_vm3, %v6074_v24, %v6076_v23  ;;  %v5921_v4 = vmax.f32 %v19703_v55, 0.0  ;;  %v5761_v44 = vadd.f32 %v5481_v26, %v19031_v40  ;;  %15027 = vmatprep.mubr.msk.bf16.mxu0 %vm15827_vm1, %v23202_v33  ;;  %v5276_v26 = vpack.c.bf16 %v5230_v7, %v5229_v52 }
 0x5c8   :  { %v14929_v54 = vpop.f32.mrf.mxu0  ;;  %v19720_v45 = vmax.f32 %v5917_v6, %v6077_v14  ;;  %v19723_v24 = vsel %vm6436_vm4, %v6442_v62, %v6444_v17 }
 0x5c9   :  { %v6078_v55 = vrot.slane %v5921_v4, 2  ;;  %v19726_v40 = vadd.f32 %v19610_v25, %v5761_v44 }
 0x5ca   :  { %v5484_v39 = vpop.f32.mrf.mxu0  ;;  %v6446_v8 = vrot.slane %v19720_v45, 1 }
 0x5cb   :  { %v6079_v19 = vsel %vm6064_vm3, %v6076_v23, %v6078_v55  ;;  %v5922_v54 = vmax.f32 %v19726_v40, 0.0  ;;  %v5762_v6 = vadd.f32 %v5484_v39, %v19047_v58  ;;  %v5232_v40 = vld [vmem:[%s23178_s0 + $0x21e] sm:$0xff] }
 0x5cc   :  { %v14930_v14 = vpop.f32.mrf.mxu0  ;;  %v19734_v62 = vmax.f32 %v5918_v38, %v6079_v19  ;;  %v19737_v18 = vsel %vm6436_vm4, %v6444_v17, %v6446_v8  ;;  %v5231_v17 = vld [vmem:[%s23178_s0 + $0x216] sm:$0xff] }
 0x5cd   :  { %v6080_v44 = vrot.slane %v5922_v54, 2  ;;  %v19740_v3 = vadd.f32 %v19610_v25, %v5762_v6 }
 0x5ce   :  { %v5489_v7 = vpop.f32.mrf.mxu0  ;;  %15028 = vmatmul.mubr.msk.bf16.gmra.mxu0 %vm285_vm2, %v5276_v26  ;;  %v6448_v23 = vrot.slane %v19734_v62, 1 }
 0x5cf   :  { %v6081_v58 = vsel %vm6064_vm3, %v6078_v55, %v6080_v44  ;;  %v5923_v38 = vmax.f32 %v19740_v3, 0.0  ;;  %v5763_v19 = vadd.f32 %v5489_v7, %v19055_v51  ;;  %15031 = vmatprep.mubr.msk.bf16.mxu0 %vm15827_vm1, %v23202_v33  ;;  %v5277_v7 = vpack.c.bf16 %v5232_v40, %v5231_v17 }
 0x5d0   :  { %v14933_v39 = vpop.f32.mrf.mxu0  ;;  %v19757_v26 = vmax.f32 %v5919_v37, %v6081_v58  ;;  %v19760_v55 = vsel %vm6436_vm4, %v6446_v8, %v6448_v23 }
 0x5d1   :  { %v6082_v3 = vrot.slane %v5923_v38, 2  ;;  %v19763_v51 = vadd.f32 %v19610_v25, %v5763_v19 }
 0x5d2   :  { %v5492_v14 = vpop.f32.mrf.mxu0  ;;  %v6450_v46 = vrot.slane %v19757_v26, 1 }
 0x5d3   :  { %v6083_v52 = vsel %vm6064_vm3, %v6080_v44, %v6082_v3  ;;  %v5924_v39 = vmax.f32 %v19763_v51, 0.0  ;;  %v5764_v37 = vadd.f32 %v5492_v14, %v19071_v11  ;;  %v5234_v14 = vld [vmem:[%s23178_s0 + $0x22e] sm:$0xff] }
 0x5d4   :  { %v14934_v58 = vpop.f32.mrf.mxu0  ;;  %v19771_v8 = vmax.f32 %v5920_v53, %v6083_v52  ;;  %v19774_v56 = vsel %vm6436_vm4, %v6448_v23, %v6450_v46  ;;  %v23431_v52 = vld [vmem:[#allocation30_spill] sm:$0xff]  ;;  %v5233_v23 = vld [vmem:[%s23178_s0 + $0x226] sm:$0xff] }
 0x5d5   :  { %v6084_v19 = vrot.slane %v5924_v39, 2  ;;  %v19777_v36 = vadd.f32 %v19610_v25, %v5764_v37  ;;  %v5278_v6 = vpack.c.bf16 %v5234_v14, %v5233_v23 }
 0x5d6   :  { %v5497_v40 = vpop.f32.mrf.mxu0  ;;  %15032 = vmatmul.mubr.msk.bf16.gmra.mxu0 %vm285_vm2, %v5277_v7  ;;  %v6452_v44 = vrot.slane %v19771_v8, 1 }
 0x5d7   :  { %v6085_v11 = vsel %vm6064_vm3, %v6082_v3, %v6084_v19  ;;  %v5925_v53 = vmax.f32 %v19777_v36, 0.0  ;;  %v5765_v51 = vadd.f32 %v5497_v40, %v23431_v52  ;;  %15035 = vmatprep.mubr.msk.bf16.mxu0 %vm15827_vm1, %v23202_v33 }
 0x5d8   :  { %v14937_v7 = vpop.f32.mrf.mxu0  ;;  %v19794_v37 = vmax.f32 %v5921_v4, %v6085_v11  ;;  %v19797_v3 = vsel %vm6436_vm4, %v6450_v46, %v6452_v44 }
 0x5d9   :  { %v6086_v36 = vrot.slane %v5925_v53, 2  ;;  %v19800_v58 = vadd.f32 %v19610_v25, %v5765_v51 }
 0x5da   :  { %v5500_v52 = vpop.f32.mrf.mxu0  ;;  %v6454_v17 = vrot.slane %v19794_v37, 1 }
 0x5db   :  { %v6087_v5 = vsel %vm6064_vm3, %v6084_v19, %v6086_v36  ;;  %v5926_v7 = vmax.f32 %v19800_v58, 0.0  ;;  %v5766_v4 = vadd.f32 %v5500_v52, %v19095_v15  ;;  %v5236_v58 = vld [vmem:[%s23178_s0 + $0x23e] sm:$0xff] }
 0x5dc   :  { %v14938_v11 = vpop.f32.mrf.mxu0  ;;  %v19808_v46 = vmax.f32 %v5922_v54, %v6087_v5  ;;  %v19811_v31 = vsel %vm6436_vm4, %v6452_v44, %v6454_v17  ;;  %v5235_v44 = vld [vmem:[%s23178_s0 + $0x236] sm:$0xff] }
 0x5dd   :  { %v6088_v51 = vrot.slane %v5926_v7, 2  ;;  %v19814_v29 = vadd.f32 %v19610_v25, %v5766_v4 }
 0x5de   :  { %v5505_v14 = vpop.f32.mrf.mxu0  ;;  %15036 = vmatmul.mubr.msk.bf16.gmra.mxu0 %vm285_vm2, %v5278_v6  ;;  %v6456_v19 = vrot.slane %v19808_v46, 1 }
 0x5df   :  { %v6089_v15 = vsel %vm6064_vm3, %v6086_v36, %v6088_v51  ;;  %v5927_v5 = vmax.f32 %v19814_v29, 0.0  ;;  %v5767_v54 = vadd.f32 %v5505_v14, %v19103_v20  ;;  %15039 = vmatprep.mubr.msk.bf16.mxu0 %vm15827_vm1, %v23202_v33  ;;  %v5279_v14 = vpack.c.bf16 %v5236_v58, %v5235_v44 }
 0x5e0   :  { %v14941_v6 = vpop.f32.mrf.mxu0  ;;  %v19831_v52 = vmax.f32 %v5923_v38, %v6089_v15  ;;  %v19834_v36 = vsel %vm6436_vm4, %v6454_v17, %v6456_v19 }
 0x5e1   :  { %v6090_v29 = vrot.slane %v5927_v5, 2  ;;  %v19837_v20 = vadd.f32 %v19610_v25, %v5767_v54 }
 0x5e2   :  { %v5508_v11 = vpop.f32.mrf.mxu0  ;;  %v6458_v40 = vrot.slane %v19831_v52, 1 }
 0x5e3   :  { %v6091_v23 = vsel %vm6064_vm3, %v6088_v51, %v6090_v29  ;;  %v5928_v6 = vmax.f32 %v19837_v20, 0.0  ;;  %v5768_v38 = vadd.f32 %v5508_v11, %v19119_v1  ;;  %v5238_v20 = vld [vmem:[%s23178_s0 + $0x24e] sm:$0xff] }
 0x5e4   :  { %v14942_v15 = vpop.f32.mrf.mxu0  ;;  %v19845_v17 = vmax.f32 %v5924_v39, %v6091_v23  ;;  %v19848_v34 = vsel %vm6436_vm4, %v6456_v19, %v6458_v40  ;;  %v5237_v19 = vld [vmem:[%s23178_s0 + $0x246] sm:$0xff] }
 0x5e5   :  { %v6092_v54 = vrot.slane %v5928_v6, 2  ;;  %v19851_v0 = vadd.f32 %v19610_v25, %v5768_v38  ;;  %v5280_v4 = vpack.c.bf16 %v5238_v20, %v5237_v19 }
 0x5e6   :  { %v5513_v58 = vpop.f32.mrf.mxu0  ;;  %15040 = vmatmul.mubr.msk.bf16.gmra.mxu0 %vm285_vm2, %v5279_v14  ;;  %v6460_v51 = vrot.slane %v19845_v17, 1 }
 0x5e7   :  { %v6093_v1 = vsel %vm6064_vm3, %v6090_v29, %v6092_v54  ;;  %v23194_v39 = vmax.f32 %v19851_v0, 0.0  ;;  %v5769_v23 = vadd.f32 %v5513_v58, %v19127_v50  ;;  %15043 = vmatprep.mubr.msk.bf16.mxu0 %vm15827_vm1, %v23202_v33 }
 0x5e8   :  { %v14945_v11 = vpop.f32.mrf.mxu0  ;;  %v19868_v14 = vmax.f32 %v5925_v53, %v6093_v1  ;;  %v19871_v29 = vsel %vm6436_vm4, %v6458_v40, %v6460_v51 }
 0x5e9   :  { %v6094_v50 = vrot.slane %v23194_v39, 2  ;;  %v19876_v38 = vadd.f32 %v19610_v25, %v5769_v23 }
 0x5ea   :  { %v5516_v58 = vpop.f32.mrf.mxu0  ;;  %v6462_v44 = vrot.slane %v19868_v14, 1 }
 0x5eb   :  { %v6095_v11 = vsel %vm6064_vm3, %v6092_v54, %v6094_v50  ;;  %v5930_v53 = vmax.f32 %v19876_v38, 0.0  ;;  %v5770_v40 = vadd.f32 %v5516_v58, %v19143_v30  ;;  %v23432_v38 = vld [vmem:[#allocation31_spill] sm:$0xff] }
 0x5ec   :  { %v14946_v1 = vpop.f32.mrf.mxu0  ;;  %v19884_v2 = vmax.f32 %v5926_v7, %v6095_v11  ;;  %v19887_v39 = vsel %vm6436_vm4, %v6460_v51, %v6462_v44  ;;  %v5239_v51 = vld [vmem:[%s23178_s0 + $0x256] sm:$0xff]  ;;  %v5240_v11 = vld [vmem:[%s23178_s0 + $0x25e] sm:$0xff] }
 0x5ed   :  { %v6096_v23 = vrot.slane %v5930_v53, 2  ;;  %v19890_v16 = vadd.f32 %v19610_v25, %v5770_v40  ;;  %v5281_v19 = vpack.c.bf16 %v5240_v11, %v5239_v51 }
 0x5ee   :  { %v5521_v20 = vpop.f32.mrf.mxu0  ;;  %15044 = vmatmul.mubr.msk.bf16.gmra.mxu0 %vm285_vm2, %v5280_v4  ;;  %v6464_v54 = vrot.slane %v19884_v2, 1 }
 0x5ef   :  { %v6097_v30 = vsel %vm6064_vm3, %v6094_v50, %v6096_v23  ;;  %v23195_v7 = vmax.f32 %v19890_v16, 0.0  ;;  %v5771_v58 = vadd.f32 %v5521_v20, %v23432_v38  ;;  %15047 = vmatprep.mubr.msk.bf16.mxu0 %vm15827_vm1, %v23202_v33 }
 0x5f0   :  { %v14949_v4 = vpop.f32.mrf.mxu0  ;;  %v6303_v40 = vmax.f32 %v5927_v5, %v6097_v30  ;;  %v6465_v1 = vsel %vm6436_vm4, %v6462_v44, %v6464_v54 }
 0x5f1   :  { %v6098_v50 = vrot.slane %v23195_v7, 2  ;;  %v19911_v20 = vadd.f32 %v19610_v25, %v5771_v58  ;;  %v6671_v38 = vmax.f32 %v19868_v14, %v6465_v1 }
 0x5f2   :  { %v5524_v15 = vpop.f32.mrf.mxu0  ;;  %v6466_v9 = vrot.slane %v6303_v40, 1 }
 0x5f3   :  { %v6099_v4 = vsel %vm6064_vm3, %v6096_v23, %v6098_v50  ;;  %v23196_v5 = vmax.f32 %v19911_v20, 0.0  ;;  %v5772_v44 = vadd.f32 %v5524_v15, %v19167_v27  ;;  %v5241_v15 = vld [vmem:[%s23178_s0 + $0x266] sm:$0xff] }
 0x5f4   :  { %v19920_v30 = vmax.f32 %v5928_v6, %v6099_v4  ;;  %v14950_v58 = vpop.f32.mrf.mxu0  ;;  %v6467_v7 = vsel %vm6436_vm4, %v6464_v54, %v6466_v9 }
 0x5f5   :  { %v6100_v14 = vrot.slane %v23196_v5, 2  ;;  %v19926_v51 = vadd.f32 %v19610_v25, %v5772_v44  ;;  %v6672_v11 = vmax.f32 %v19884_v2, %v6467_v7  ;;  %v5242_v2 = vld [vmem:[%s23178_s0 + $0x26e] sm:$0xff]  ;;  %v23433_v7 = vmax.f32 %v19851_v0, 0.0 }
 0x5f6   :  { %v6468_v23 = vrot.slane %v19920_v30, 1  ;;  %v5529_v1 = vpop.f32.mrf.mxu0  ;;  %15048 = vmatmul.mubr.msk.bf16.gmra.mxu0 %vm285_vm2, %v5281_v19 }
 0x5f7   :  { %v6101_v27 = vsel %vm6064_vm3, %v6098_v50, %v6100_v14  ;;  %v5933_v47 = vmax.f32 %v19926_v51, 0.0  ;;  %v5773_v6 = vadd.f32 %v5529_v1, %v19172_v61  ;;  %15051 = vmatprep.mubr.msk.bf16.mxu0 %vm15827_vm1, %v23202_v33  ;;  %v5282_v1 = vpack.c.bf16 %v5242_v2, %v5241_v15 }
 0x5f8   :  { %v14953_v54 = vpop.f32.mrf.mxu0  ;;  %v6469_v19 = vsel %vm6436_vm4, %v6466_v9, %v6468_v23  ;;  %v19945_v50 = vmax.f32 %v23433_v7, %v6101_v27 }
 0x5f9   :  { %v6102_v61 = vrot.slane %v5933_v47, 2  ;;  %v19950_v4 = vadd.f32 %v19610_v25, %v5773_v6  ;;  %v6673_v44 = vmax.f32 %v6303_v40, %v6469_v19  ;;  %v5244_v19 = vld [vmem:[%s23178_s0 + $0x27e] sm:$0xff] }
 0x5fa   :  { %v5532_v58 = vpop.f32.mrf.mxu0  ;;  %v6470_v5 = vrot.slane %v19945_v50, 1 }
 0x5fb   :  { %v6103_v49 = vsel %vm6064_vm3, %v6100_v14, %v6102_v61  ;;  %v5934_v54 = vmax.f32 %v19950_v4, 0.0  ;;  %v5774_v9 = vadd.f32 %v5532_v58, %v19188_v42  ;;  %6937 = vmatpush1.msra.mxu1 %v6673_v44 }
 0x5fc   :  { %v14954_v0 = vpop.f32.mrf.mxu0  ;;  %6938 = vmatprep.subr.mxu1 %v23202_v33  ;;  %v19957_v27 = vmax.f32 %v5930_v53, %v6103_v49  ;;  %v19960_v6 = vsel %vm6436_vm4, %v6468_v23, %v6470_v5 }
 0x5fd   :  { %v6104_v40 = vrot.slane %v5934_v54, 2  ;;  %v19965_v15 = vadd.f32 %v19610_v25, %v5774_v9  ;;  %6939 = vmatpush1.msra.mxu1 %v6672_v11  ;;  %v5243_v11 = vld [vmem:[%s23178_s0 + $0x276] sm:$0xff] }
 0x5fe   :  { %v5537_v42 = vpop.f32.mrf.mxu0  ;;  %15052 = vmatmul.mubr.msk.bf16.gmra.mxu0 %vm285_vm2, %v5282_v1  ;;  %6940 = vmatprep.subr.mxu1 %v23202_v33  ;;  %v6472_v49 = vrot.slane %v19957_v27, 1  ;;  %v23435_v1 = vmax.f32 %v19845_v17, %v19887_v39  ;;  %v23437_v39 = vmax.f32 %v19911_v20, 0.0 }
 0x5ff   :  { %v6105_v53 = vsel %vm6064_vm3, %v6102_v61, %v6104_v40  ;;  %v5935_v23 = vmax.f32 %v19965_v15, 0.0  ;;  %v5775_v2 = vadd.f32 %v5537_v42, %v19196_v59  ;;  %6941 = vmatpush1.msra.mxu1 %v6671_v38  ;;  %15055 = vmatprep.mubr.msk.bf16.mxu0 %vm15827_vm1, %v23202_v33  ;;  %v23434_v61 = vmax.f32 %v19890_v16, 0.0 }
 0x600   :  { %v14957_v7 = vpop.f32.mrf.mxu0  ;;  %6942 = vmatprep.subr.mxu1 %v23202_v33  ;;  %v19989_v59 = vsel %vm6436_vm4, %v6470_v5, %v6472_v49  ;;  %v5283_v16 = vpack.c.bf16 %v5244_v19, %v5243_v11 }
 0x601   :  { %v19986_v44 = vmax.f32 %v23434_v61, %v6105_v53  ;;  %v6106_v38 = vrot.slane %v5935_v23, 2  ;;  %v19994_v58 = vadd.f32 %v19610_v25, %v5775_v2  ;;  %6943 = vmatpush1.msra.mxu1 %v23435_v1  ;;  %v23436_v7 = vmax.f32 %v19831_v52, %v19871_v29 }
 0x602   :  { %v5540_v0 = vpop.f32.mrf.mxu0  ;;  %6944 = vmatprep.subr.mxu1 %v23202_v33 }
 0x603   :  { %v6474_v5 = vrot.slane %v19986_v44, 1  ;;  %v6107_v42 = vsel %vm6064_vm3, %v6104_v40, %v6106_v38  ;;  %v5936_v53 = vmax.f32 %v19994_v58, 0.0  ;;  %v5776_v2 = vadd.f32 %v5540_v0, %v19212_v10  ;;  %6945 = vmatpush1.msra.mxu1 %v23436_v7 }
 0x604   :  { %v14958_v17 = vpop.f32.mrf.mxu0  ;;  %6946 = vmatprep.subr.mxu1 %v23202_v33  ;;  %v20012_v61 = vmax.f32 %v23437_v39, %v6107_v42  ;;  %v23438_v10 = vmax.f32 %v19808_v46, %v19848_v34  ;;  %v23439_v34 = vmax.f32 %v19794_v37, %v19834_v36  ;;  %v5245_v46 = vld [vmem:[%s23178_s0 + $0x286] sm:$0x3]  ;;  %v23440_v42 = vmax.f32 %v19771_v8, %v19811_v31 }
 0x605   :  { %v20015_v11 = vsel %vm6436_vm4, %v6472_v49, %v6474_v5  ;;  %v6108_v40 = vrot.slane %v5936_v53, 2  ;;  %v20020_v19 = vadd.f32 %v19610_v25, %v5776_v2  ;;  %v5284_v51 = vpack.c.bf16 %v5245_v46, %v5245_v46 }
 0x606   :  { %6947 = vmatpush1.msra.mxu1 %v23438_v10  ;;  %v5545_v29 = vpop.f32.mrf.mxu0  ;;  %15056 = vmatmul.mubr.msk.bf16.gmra.mxu0 %vm285_vm2, %v5283_v16  ;;  %v6476_v20 = vrot.slane %v20012_v61, 1  ;;  %v23441_v10 = vmax.f32 %v19757_v26, %v19797_v3 }
 0x607   :  { %6948 = vmatprep.subr.mxu1 %v23202_v33  ;;  %v6109_v49 = vsel %vm6064_vm3, %v6106_v38, %v6108_v40  ;;  %v5937_v1 = vmax.f32 %v20020_v19, 0.0  ;;  %v5777_v0 = vadd.f32 %v5545_v29, %v19217_v32  ;;  %15059 = vmatprep.mubr.msk.bf16.mxu0 %vm15827_vm1, %v23202_v33 }
 0x608   :  { %6949 = vmatpush1.msra.mxu1 %v23439_v34  ;;  %v14961_v16 = vpop.f32.mrf.mxu0  ;;  %v20044_v38 = vmax.f32 %v5933_v47, %v6109_v49  ;;  %v20047_v32 = vsel %vm6436_vm4, %v6474_v5, %v6476_v20 }
 0x609   :  { %6950 = vmatprep.subr.mxu1 %v23202_v33  ;;  %v6110_v37 = vrot.slane %v5937_v1, 2  ;;  %v20052_v36 = vadd.f32 %v19610_v25, %v5777_v0  ;;  %v6677_v2 = vmax.f32 %v19986_v44, %v20047_v32  ;;  %v23464_v44 = vmax.f32 %v19957_v27, %v20015_v11  ;;  %v6732_v27 = vld [vmem:[%s23180_s3] sm:$0xff]  ;;  %v23476_v32 = vld [vmem:[#allocation21_spill] sm:$0xff] }
 0x60a   :  { %6951 = vmatpush1.msra.mxu1 %v23440_v42  ;;  %v5548_v7 = vpop.f32.mrf.mxu0  ;;  %v6478_v47 = vrot.slane %v20044_v38, 1 }
 0x60b   :  { %6952 = vmatprep.subr.mxu1 %v23202_v33  ;;  %v6111_v5 = vsel %vm6064_vm3, %v6108_v40, %v6110_v37  ;;  %v5938_v17 = vmax.f32 %v20052_v36, 0.0  ;;  %v5778_v39 = vadd.f32 %v5548_v7, %v19233_v60  ;;  %v23442_v60 = vmax.f32 %v19734_v62, %v19774_v56 }
 0x60c   :  { %6953 = vmatpush1.msra.mxu1 %v23441_v10  ;;  %v14962_v31 = vpop.f32.mrf.mxu0  ;;  %v20070_v8 = vmax.f32 %v5934_v54, %v6111_v5  ;;  %v20073_v29 = vsel %vm6436_vm4, %v6476_v20, %v6478_v47  ;;  %v23443_v56 = vmax.f32 %v19720_v45, %v19760_v55 }
 0x60d   :  { %6954 = vmatprep.subr.mxu1 %v23202_v33  ;;  %v6112_v40 = vrot.slane %v5938_v17, 2  ;;  %v20078_v49 = vadd.f32 %v19610_v25, %v5778_v39  ;;  %v6678_v26 = vmax.f32 %v20012_v61, %v20073_v29 }
 0x60e   :  { %6955 = vmatpush1.msra.mxu1 %v23442_v60  ;;  %v5553_v3 = vpop.f32.mrf.mxu0  ;;  %15060 = vmatmul.mubr.msk.bf16.gmra.mxu0 %vm285_vm2, %v5284_v51  ;;  %v6480_v4 = vrot.slane %v20070_v8, 1  ;;  %v23445_v51 = vmax.f32 %v19683_v21, %v19723_v24 }
 0x60f   :  { %6956 = vmatprep.subr.mxu1 %v23202_v33  ;;  %v6113_v54 = vsel %vm6064_vm3, %v6110_v37, %v6112_v40  ;;  %v5939_v20 = vmax.f32 %v20078_v49, 0.0  ;;  %v5779_v0 = vadd.f32 %v5553_v3, %v19238_v43  ;;  %v23444_v43 = vmax.f32 %v19697_v63, %v19737_v18 }
 0x610   :  { %6957 = vmatpush1.msra.mxu1 %v23443_v56  ;;  %v14965_v62 = vpop.f32.mrf.mxu0  ;;  %v20097_v34 = vmax.f32 %v5935_v23, %v6113_v54  ;;  %v20100_v46 = vsel %vm6436_vm4, %v6478_v47, %v6480_v4  ;;  %v23449_v54 = vld [vmem:[#allocation32_spill] sm:$0xff] }
 0x611   :  { %6958 = vmatprep.subr.mxu1 %v23202_v33  ;;  %v6114_v16 = vrot.slane %v5939_v20, 2  ;;  %v20103_v37 = vadd.f32 %v19610_v25, %v5779_v0  ;;  %v6679_v45 = vmax.f32 %v20044_v38, %v20100_v46 }
 0x612   :  { %6959 = vmatpush1.msra.mxu1 %v23444_v43  ;;  %v5556_v55 = vpop.f32.mrf.mxu0  ;;  %v6482_v15 = vrot.slane %v20097_v34, 1 }
 0x613   :  { %6960 = vmatprep.subr.mxu1 %v23202_v33  ;;  %v6115_v23 = vsel %vm6064_vm3, %v6112_v40, %v6114_v16  ;;  %v5940_v42 = vmax.f32 %v20103_v37, 0.0  ;;  %v5780_v7 = vadd.f32 %v5556_v55, %v19249_v41  ;;  %v23446_v41 = vmax.f32 %v19660_v57, %v19700_v12 }
 0x614   :  { %6961 = vmatpush1.msra.mxu1 %v23445_v51  ;;  %v14966_v18 = vpop.f32.mrf.mxu0  ;;  %v20121_v63 = vmax.f32 %v5936_v53, %v6115_v23  ;;  %v20124_v47 = vsel %vm6436_vm4, %v6480_v4, %v6482_v15  ;;  %v23447_v40 = vmax.f32 %v19650_v28, %v19686_v13 }
 0x615   :  { %6962 = vmatprep.subr.mxu1 %v23202_v33  ;;  %v6116_v5 = vrot.slane %v5940_v42, 2  ;;  %v5864_v39 = vadd.f32 %v19610_v25, %v5780_v7  ;;  %v6680_v21 = vmax.f32 %v20070_v8, %v20124_v47  ;;  %v23450_v7 = vld [vmem:[#allocation38_spill] sm:$0xff] }
 0x616   :  { %6963 = vmatpush1.msra.mxu1 %v23446_v41  ;;  %v5561_v24 = vpop.f32.mrf.mxu0  ;;  %v6484_v58 = vrot.slane %v20121_v63, 1 }
 0x617   :  { %6964 = vmatprep.subr.mxu1 %v23202_v33  ;;  %v6117_v53 = vsel %vm6064_vm3, %v6114_v16, %v6116_v5  ;;  %v5941_v10 = vmax.f32 %v5864_v39, 0.0  ;;  %v5781_v31 = vadd.f32 %v5561_v24, %v19253_v35  ;;  %v23448_v35 = vmax.f32 %v19633_v48, %v19663_v22 }
 0x618   :  { %6965 = vmatpush1.msra.mxu1 %v23447_v40  ;;  %v14969_v49 = vpop.f32.mrf.mxu0  ;;  %v20142_v57 = vmax.f32 %v5937_v1, %v6117_v53  ;;  %v20145_v12 = vsel %vm6436_vm4, %v6482_v15, %v6484_v58  ;;  %v23451_v40 = vld [vmem:[#allocation39_spill] sm:$0xff] }
 0x619   :  { %6966 = vmatprep.subr.mxu1 %v23202_v33  ;;  %v6118_v60 = vrot.slane %v5941_v10, 2  ;;  %v5865_v3 = vadd.f32 %v19610_v25, %v5781_v31  ;;  %v6681_v28 = vmax.f32 %v20097_v34, %v20145_v12 }
 0x61a   :  { %6967 = vmatpush1.msra.mxu1 %v23448_v35  ;;  %v5564_v13 = vpop.f32.mrf.mxu0  ;;  %v6486_v19 = vrot.slane %v20142_v57, 1 }
 0x61b   :  { %6968 = vmatprep.subr.mxu1 %v23202_v33  ;;  %v6119_v1 = vsel %vm6064_vm3, %v6116_v5, %v6118_v60  ;;  %v5942_v4 = vmax.f32 %v5865_v3, 0.0  ;;  %v5782_v0 = vadd.f32 %v5564_v13, %v23449_v54 }
 0x61c   :  { %v14970_v56 = vpop.f32.mrf.mxu0  ;;  %v20159_v62 = vmax.f32 %v5938_v17, %v6119_v1  ;;  %v20162_v48 = vsel %vm6436_vm4, %v6484_v58, %v6486_v19 }
 0x61d   :  { %v6120_v22 = vrot.slane %v5942_v4, 2  ;;  %v5866_v16 = vadd.f32 %v19610_v25, %v5782_v0  ;;  %v6682_v37 = vmax.f32 %v20121_v63, %v20162_v48 }
 0x61e   :  { %v5569_v43 = vpop.f32.mrf.mxu0  ;;  %v6488_v55 = vrot.slane %v20159_v62, 1 }
 0x61f   :  { %v6121_v15 = vsel %vm6064_vm3, %v6118_v60, %v6120_v22  ;;  %v5943_v23 = vmax.f32 %v5866_v16, 0.0  ;;  %v5783_v51 = vadd.f32 %v5569_v43, %v23450_v7 }
 0x620   :  { %v14973_v36 = vpop.f32.mrf.mxu0  ;;  %v20170_v17 = vmax.f32 %v5939_v20, %v6121_v15  ;;  %v20173_v18 = vsel %vm6436_vm4, %v6486_v19, %v6488_v55 }
 0x621   :  { %v6122_v5 = vrot.slane %v5943_v23, 2  ;;  %v5867_v39 = vadd.f32 %v19610_v25, %v5783_v51  ;;  %v6683_v41 = vmax.f32 %v20142_v57, %v20173_v18 }
 0x622   :  { %v5572_v24 = vpop.f32.mrf.mxu0  ;;  %v6490_v58 = vrot.slane %v20170_v17, 1 }
 0x623   :  { %v6123_v53 = vsel %vm6064_vm3, %v6120_v22, %v6122_v5  ;;  %v5944_v31 = vmax.f32 %v5867_v39, 0.0  ;;  %v5784_v49 = vadd.f32 %v5572_v24, %v23451_v40  ;;  %v23452_v22 = vld [vmem:[#allocation33_spill] sm:$0xff] }
 0x624   :  { %v14974_v60 = vpop.f32.mrf.mxu0  ;;  %v20181_v20 = vmax.f32 %v5940_v42, %v6123_v53  ;;  %v20184_v3 = vsel %vm6436_vm4, %v6488_v55, %v6490_v58  ;;  %v23453_v53 = vld [vmem:[#allocation5_spill] sm:$0xff] }
 0x625   :  { %v6124_v35 = vrot.slane %v5944_v31, 2  ;;  %v5868_v13 = vadd.f32 %v19610_v25, %v5784_v49  ;;  %v6684_v19 = vmax.f32 %v20159_v62, %v20184_v3 }
 0x626   :  { %v5577_v1 = vpop.f32.mrf.mxu0  ;;  %v6492_v54 = vrot.slane %v20181_v20, 1 }
 0x627   :  { %v6125_v0 = vsel %vm6064_vm3, %v6122_v5, %v6124_v35  ;;  %v5945_v56 = vmax.f32 %v5868_v13, 0.0  ;;  %v5785_v16 = vadd.f32 %v5577_v1, %v23452_v22 }
 0x628   :  { %v14977_v43 = vpop.f32.mrf.mxu0  ;;  %v20192_v42 = vmax.f32 %v5941_v10, %v6125_v0  ;;  %v20195_v55 = vsel %vm6436_vm4, %v6490_v58, %v6492_v54 }
 0x629   :  { %v6126_v15 = vrot.slane %v5945_v56, 2  ;;  %v5869_v7 = vadd.f32 %v19610_v25, %v5785_v16  ;;  %v6685_v51 = vmax.f32 %v20170_v17, %v20195_v55 }
 0x62a   :  { %v5580_v36 = vpop.f32.mrf.mxu0  ;;  %v6494_v39 = vrot.slane %v20192_v42, 1 }
 0x62b   :  { %v6127_v5 = vsel %vm6064_vm3, %v6124_v35, %v6126_v15  ;;  %v5946_v24 = vmax.f32 %v5869_v7, 0.0  ;;  %v5786_v40 = vadd.f32 %v5580_v36, %v23453_v53  ;;  %v23454_v35 = vld [vmem:[#allocation34_spill] sm:$0xff] }
 0x62c   :  { %v14978_v49 = vpop.f32.mrf.mxu0  ;;  %v6318_v10 = vmax.f32 %v5942_v4, %v6127_v5  ;;  %v20204_v60 = vsel %vm6436_vm4, %v6492_v54, %v6494_v39 }
 0x62d   :  { %v6128_v58 = vrot.slane %v5946_v24, 2  ;;  %v5870_v13 = vadd.f32 %v19610_v25, %v5786_v40  ;;  %v6686_v1 = vmax.f32 %v20181_v20, %v20204_v60 }
 0x62e   :  { %v5585_v0 = vpop.f32.mrf.mxu0  ;;  %v6496_v22 = vrot.slane %v6318_v10, 1 }
 0x62f   :  { %v6129_v16 = vsel %vm6064_vm3, %v6126_v15, %v6128_v58  ;;  %v5947_v43 = vmax.f32 %v5870_v13, 0.0  ;;  %v5787_v7 = vadd.f32 %v5585_v0, %v23454_v35  ;;  %v23455_v15 = vld [vmem:[#allocation35_spill] sm:$0xff] }
 0x630   :  { %v14981_v14 = vpop.f32.mrf.mxu0  ;;  %v6319_v36 = vmax.f32 %v5943_v23, %v6129_v16  ;;  %v6497_v4 = vsel %vm6436_vm4, %v6494_v39, %v6496_v22 }
 0x631   :  { %v6130_v5 = vrot.slane %v5947_v43, 2  ;;  %v20213_v54 = vadd.f32 %v19610_v25, %v5787_v7  ;;  %v6687_v53 = vmax.f32 %v20192_v42, %v6497_v4  ;;  %v23456_v4 = vld [vmem:[#allocation36_spill] sm:$0xff] }
 0x632   :  { %v5588_v40 = vpop.f32.mrf.mxu0  ;;  %v6498_v49 = vrot.slane %v6319_v36, 1 }
 0x633   :  { %v6131_v20 = vsel %vm6064_vm3, %v6128_v58, %v6130_v5  ;;  %v5948_v60 = vmax.f32 %v20213_v54, 0.0  ;;  %v5788_v13 = vadd.f32 %v5588_v40, %v23455_v15 }
 0x634   :  { %v20219_v9 = vmax.f32 %v5944_v31, %v6131_v20  ;;  %v14982_v14 = vpop.f32.mrf.mxu0  ;;  %v6499_v23 = vsel %vm6436_vm4, %v6496_v22, %v6498_v49 }
 0x635   :  { %v6132_v39 = vrot.slane %v5948_v60, 2  ;;  %v20223_v0 = vadd.f32 %v19610_v25, %v5788_v13  ;;  %v6688_v16 = vmax.f32 %v6318_v10, %v6499_v23 }
 0x636   :  { %v6500_v42 = vrot.slane %v20219_v9, 1  ;;  %v5593_v35 = vpop.f32.mrf.mxu0 }
 0x637   :  { %v6133_v7 = vsel %vm6064_vm3, %v6130_v5, %v6132_v39  ;;  %v5949_v58 = vmax.f32 %v20223_v0, 0.0  ;;  %v5789_v54 = vadd.f32 %v5593_v35, %v23456_v4  ;;  %v23457_v0 = vld [vmem:[#allocation37_spill] sm:$0xff] }
 0x638   :  { %v14985_v40 = vpop.f32.mrf.mxu0  ;;  %v6501_v31 = vsel %vm6436_vm4, %v6498_v49, %v6500_v42  ;;  %v20230_v20 = vmax.f32 %v5945_v56, %v6133_v7 }
 0x639   :  { %v6134_v22 = vrot.slane %v5949_v58, 2  ;;  %v20233_v15 = vadd.f32 %v19610_v25, %v5789_v54  ;;  %v6689_v13 = vmax.f32 %v6319_v36, %v6501_v31  ;;  %v23458_v40 = vld [vmem:[#allocation6_spill] sm:$0xff] }
 0x63a   :  { %v5596_v10 = vpop.f32.mrf.mxu0  ;;  %v6502_v14 = vrot.slane %v20230_v20, 1 }
 0x63b   :  { %v6135_v23 = vsel %vm6064_vm3, %v6132_v39, %v6134_v22  ;;  %v5950_v5 = vmax.f32 %v20233_v15, 0.0  ;;  %v5790_v52 = vadd.f32 %v5596_v10, %v23457_v0  ;;  %6969 = vmatpush2.msra.mxu1 %v6689_v13  ;;  %v6762_v39 = vld [vmem:[%s23180_s3 + $0xf0] sm:$0xff] }
 0x63c   :  { %v14986_v35 = vpop.f32.mrf.mxu0  ;;  %6970 = vmatprep.subr.mxu1 %v23202_v33  ;;  %v20240_v56 = vmax.f32 %v5946_v24, %v6135_v23  ;;  %v20243_v49 = vsel %vm6436_vm4, %v6500_v42, %v6502_v14 }
 0x63d   :  { %v6136_v36 = vrot.slane %v5950_v5, 2  ;;  %v20248_v7 = vadd.f32 %v19610_v25, %v5790_v52  ;;  %6971 = vmatpush2.msra.mxu1 %v6688_v16  ;;  %v23459_v35 = vld [vmem:[#allocation7_spill] sm:$0xff] }
 0x63e   :  { %v5601_v4 = vpop.f32.mrf.mxu0  ;;  %6972 = vmatprep.subr.mxu1 %v23202_v33  ;;  %v6504_v54 = vrot.slane %v20240_v56, 1 }
 0x63f   :  { %v6137_v24 = vsel %vm6064_vm3, %v6134_v22, %v6136_v36  ;;  %v5951_v42 = vmax.f32 %v20248_v7, 0.0  ;;  %v5791_v31 = vadd.f32 %v5601_v4, %v23458_v40  ;;  %6973 = vmatpush2.msra.mxu1 %v6687_v53  ;;  %v20268_v22 = vld [vmem:[%s23179_s2] ss:$0 sm:$0xff] }
 0x640   :  { %v14989_v13 = vpop.f32.mrf.mxu0  ;;  %6974 = vmatprep.subr.mxu1 %v23202_v33  ;;  %v20258_v25 = vmax.f32 %v5947_v43, %v6137_v24  ;;  %v20261_v52 = vsel %vm6436_vm4, %v6502_v14, %v6504_v54 }
 0x641   :  { %v6138_v16 = vrot.slane %v5951_v42, 2  ;;  %v20271_v10 = vadd.f32 %v20268_v22, %v5791_v31  ;;  %6975 = vmatpush2.msra.mxu1 %v6686_v1  ;;  %v23460_v13 = vld [vmem:[#allocation8_spill] sm:$0xff] }
 0x642   :  { %v5604_v43 = vpop.f32.mrf.mxu0  ;;  %6976 = vmatprep.subr.mxu1 %v23202_v33  ;;  %v6506_v14 = vrot.slane %v20258_v25, 1 }
 0x643   :  { %v6139_v23 = vsel %vm6064_vm3, %v6136_v36, %v6138_v16  ;;  %v5952_v0 = vmax.f32 %v20271_v10, 0.0  ;;  %v5792_v4 = vadd.f32 %v5604_v43, %v23459_v35  ;;  %6977 = vmatpush2.msra.mxu1 %v6685_v51  ;;  %v23461_v35 = vld [vmem:[#allocation9_spill] sm:$0xff] }
 0x644   :  { %v14990_v24 = vpop.f32.mrf.mxu0  ;;  %6978 = vmatprep.subr.mxu1 %v23202_v33  ;;  %v20284_v1 = vmax.f32 %v5948_v60, %v6139_v23  ;;  %v20287_v40 = vsel %vm6436_vm4, %v6504_v54, %v6506_v14 }
 0x645   :  { %v6140_v31 = vrot.slane %v5952_v0, 2  ;;  %v20292_v36 = vadd.f32 %v20268_v22, %v5792_v4  ;;  %6979 = vmatpush2.msra.mxu1 %v6684_v19 }
 0x646   :  { %v5609_v55 = vpop.f32.mrf.mxu0  ;;  %6980 = vmatprep.subr.mxu1 %v23202_v33  ;;  %v6508_v51 = vrot.slane %v20284_v1, 1 }
 0x647   :  { %v6141_v60 = vsel %vm6064_vm3, %v6138_v16, %v6140_v31  ;;  %v5953_v54 = vmax.f32 %v20292_v36, 0.0  ;;  %v5793_v43 = vadd.f32 %v5609_v55, %v23460_v13  ;;  %6981 = vmatpush2.msra.mxu1 %v6683_v41  ;;  %v23462_v55 = vld [vmem:[#allocation10_spill] sm:$0xff] }
 0x648   :  { %v14993_v62 = vpop.f32.mrf.mxu0  ;;  %6982 = vmatprep.subr.mxu1 %v23202_v33  ;;  %v20308_v3 = vmax.f32 %v5949_v58, %v6141_v60  ;;  %v20311_v19 = vsel %vm6436_vm4, %v6506_v14, %v6508_v51 }
 0x649   :  { %v6142_v23 = vrot.slane %v5953_v54, 2  ;;  %v20316_v16 = vadd.f32 %v20268_v22, %v5793_v43  ;;  %6983 = vmatpush2.msra.mxu1 %v6682_v37  ;;  %v23463_v43 = vld [vmem:[#allocation11_spill] sm:$0xff] }
 0x64a   :  { %v5612_v18 = vpop.f32.mrf.mxu0  ;;  %6984 = vmatprep.subr.mxu1 %v23202_v33  ;;  %v6510_v41 = vrot.slane %v20308_v3, 1 }
 0x64b   :  { %v6143_v58 = vsel %vm6064_vm3, %v6140_v31, %v6142_v23  ;;  %v5954_v14 = vmax.f32 %v20316_v16, 0.0  ;;  %v5794_v4 = vadd.f32 %v5612_v18, %v23461_v35  ;;  %6985 = vmatpush2.msra.mxu1 %v6681_v28 }
 0x64c   :  { %v14994_v63 = vpop.f32.mrf.mxu0  ;;  %6986 = vmatprep.subr.mxu1 %v23202_v33  ;;  %v20334_v48 = vmax.f32 %v5950_v5, %v6143_v58  ;;  %v20337_v37 = vsel %vm6436_vm4, %v6508_v51, %v6510_v41  ;;  %v23465_v58 = vld [vmem:[#allocation12_spill] sm:$0xff] }
 0x64d   :  { %v6144_v24 = vrot.slane %v5954_v14, 2  ;;  %v20342_v31 = vadd.f32 %v20268_v22, %v5794_v4  ;;  %6987 = vmatpush2.msra.mxu1 %v6680_v21  ;;  %v23466_v4 = vmax.f32 %v19945_v50, %v19989_v59  ;;  %v6738_v63 = vld [vmem:[%s23180_s3 + $0x30] sm:$0xff] }
 0x64e   :  { %v5617_v12 = vpop.f32.mrf.mxu0  ;;  %6988 = vmatprep.subr.mxu1 %v23202_v33  ;;  %v6512_v28 = vrot.slane %v20334_v48, 1 }
 0x64f   :  { %v6145_v15 = vsel %vm6064_vm3, %v6142_v23, %v6144_v24  ;;  %v5955_v5 = vmax.f32 %v20342_v31, 0.0  ;;  %v5795_v51 = vadd.f32 %v5617_v12, %v23462_v55  ;;  %6989 = vmatpush2.msra.mxu1 %v6679_v45 }
 0x650   :  { %v14997_v8 = vpop.f32.mrf.mxu0  ;;  %6990 = vmatprep.subr.mxu1 %v23202_v33  ;;  %v20360_v47 = vmax.f32 %v5951_v42, %v6145_v15  ;;  %v20363_v21 = vsel %vm6436_vm4, %v6510_v41, %v6512_v28 }
 0x651   :  { %v6146_v60 = vrot.slane %v5955_v5, 2  ;;  %v20368_v13 = vadd.f32 %v20268_v22, %v5795_v51  ;;  %6991 = vmatpush2.msra.mxu1 %v6678_v26  ;;  %v23468_v8 = vld [vmem:[#allocation13_spill] sm:$0xff] }
 0x652   :  { %v5620_v46 = vpop.f32.mrf.mxu0  ;;  %6992 = vmatprep.subr.mxu1 %v23202_v33  ;;  %v6514_v45 = vrot.slane %v20360_v47, 1 }
 0x653   :  { %v6147_v7 = vsel %vm6064_vm3, %v6144_v24, %v6146_v60  ;;  %v5956_v42 = vmax.f32 %v20368_v13, 0.0  ;;  %v5796_v62 = vadd.f32 %v5620_v46, %v23463_v43  ;;  %6993 = vmatpush2.msra.mxu1 %v6677_v2  ;;  %v6743_v46 = vld [vmem:[%s23180_s3 + $0x58] sm:$0xff] }
 0x654   :  { %v14998_v61 = vpop.f32.mrf.mxu0  ;;  %6994 = vmatprep.subr.mxu1 %v23202_v33  ;;  %v20386_v29 = vmax.f32 %v5952_v0, %v6147_v7  ;;  %v20389_v26 = vsel %vm6436_vm4, %v6512_v28, %v6514_v45  ;;  %v23467_v28 = vmax.f32 %v19920_v30, %v19960_v6  ;;  %v6737_v30 = vld [vmem:[%s23180_s3 + $0x28] sm:$0xff] }
 0x655   :  { %v6148_v23 = vrot.slane %v5956_v42, 2  ;;  %v20394_v18 = vadd.f32 %v20268_v22, %v5796_v62  ;;  %6995 = vmatpush2.msra.mxu1 %v23464_v44 }
 0x656   :  { %v5625_v2 = vpop.f32.mrf.mxu0  ;;  %6996 = vmatprep.subr.mxu1 %v23202_v33  ;;  %v6516_v10 = vrot.slane %v20386_v29, 1 }
 0x657   :  { %v6149_v0 = vsel %vm6064_vm3, %v6146_v60, %v6148_v23  ;;  %v5957_v41 = vmax.f32 %v20394_v18, 0.0  ;;  %v5797_v35 = vadd.f32 %v5625_v2, %v23465_v58  ;;  %6997 = vmatpush2.msra.mxu1 %v23466_v4  ;;  %v23469_v2 = vld [vmem:[#allocation14_spill] sm:$0xff] }
 0x658   :  { %v15001_v11 = vpop.f32.mrf.mxu0  ;;  %6998 = vmatprep.subr.mxu1 %v23202_v33  ;;  %v20418_v24 = vmax.f32 %v5953_v54, %v6149_v0  ;;  %v20421_v12 = vsel %vm6436_vm4, %v6514_v45, %v6516_v10  ;;  %v6742_v0 = vld [vmem:[%s23180_s3 + $0x50] sm:$0xff] }
 0x659   :  { %v6150_v50 = vrot.slane %v5957_v41, 2  ;;  %v20426_v59 = vadd.f32 %v20268_v22, %v5797_v35  ;;  %6999 = vmatpush2.msra.mxu1 %v23467_v28  ;;  %v6748_v35 = vld [vmem:[%s23180_s3 + $0x80] sm:$0xff] }
 0x65a   :  { %v5628_v55 = vpop.f32.mrf.mxu0  ;;  %7001 = vmatmul.mubr.f32.vlgmr.msra.gmra.mxu1 %v6732_v27  ;;  %7126 = vmatprep.subr.mxu1 %v23202_v33  ;;  %v6518_v36 = vrot.slane %v20418_v24, 1 }
 0x65b   :  { %v6151_v54 = vsel %vm6064_vm3, %v6148_v23, %v6150_v50  ;;  %v5958_v51 = vmax.f32 %v20426_v59, 0.0  ;;  %v5798_v60 = vadd.f32 %v5628_v55, %v23468_v8  ;;  %7005 = vmatprep.mubr.f32.mxu1 %v6738_v63  ;;  %v6747_v8 = vld [vmem:[%s23180_s3 + $0x78] sm:$0xff] }
 0x65c   :  { %v15002_v6 = vpop.f32.mrf.mxu0  ;;  %v20446_v45 = vmax.f32 %v5954_v14, %v6151_v54  ;;  %v20449_v7 = vsel %vm6436_vm4, %v6516_v10, %v6518_v36  ;;  %v23470_v54 = vld [vmem:[#allocation15_spill] sm:$0xff] }
 0x65d   :  { %v6152_v43 = vrot.slane %v5958_v51, 2  ;;  %v20454_v62 = vadd.f32 %v20268_v22, %v5798_v60  ;;  %v6698_v61 = vmax.f32 %v20386_v29, %v20449_v7  ;;  %v6753_v6 = vld [vmem:[%s23180_s3 + $0xa8] sm:$0xff] }
 0x65e   :  { %v5633_v23 = vpop.f32.mrf.mxu0  ;;  %7006 = vmatmul.mubr.f32.gmra.mxu1 %v6737_v30  ;;  %v6520_v44 = vrot.slane %v20446_v45, 1  ;;  %v6797_v29 = vld [vmem:[%s23180_s3 + $0x208] sm:$0xff] }
 0x65f   :  { %v6153_v16 = vsel %vm6064_vm3, %v6150_v50, %v6152_v43  ;;  %v5959_v14 = vmax.f32 %v20454_v62, 0.0  ;;  %v5799_v10 = vadd.f32 %v5633_v23, %v23469_v2  ;;  %7010 = vmatprep.mubr.f32.mxu1 %v6743_v46 }
 0x660   :  { %v15005_v58 = vpop.f32.mrf.mxu0  ;;  %v20470_v4 = vmax.f32 %v5955_v5, %v6153_v16  ;;  %v20473_v27 = vsel %vm6436_vm4, %v6518_v36, %v6520_v44 }
 0x661   :  { %v6154_v11 = vrot.slane %v5959_v14, 2  ;;  %v20478_v63 = vadd.f32 %v20268_v22, %v5799_v10  ;;  %v6699_v50 = vmax.f32 %v20418_v24, %v20473_v27  ;;  %v6752_v58 = vld [vmem:[%s23180_s3 + $0xa0] sm:$0xff] }
 0x662   :  { %v5636_v28 = vpop.f32.mrf.mxu0  ;;  %7011 = vmatmul.mubr.f32.gmra.mxu1 %v6742_v0  ;;  %v6522_v55 = vrot.slane %v20470_v4, 1  ;;  %v23471_v0 = vld [vmem:[#allocation16_spill] sm:$0xff] }
 0x663   :  { %v6155_v31 = vsel %vm6064_vm3, %v6152_v43, %v6154_v11  ;;  %v5960_v5 = vmax.f32 %v20478_v63, 0.0  ;;  %v5800_v36 = vadd.f32 %v5636_v28, %v23470_v54  ;;  %7015 = vmatprep.mubr.f32.mxu1 %v6748_v35 }
 0x664   :  { %v15006_v60 = vpop.f32.mrf.mxu0  ;;  %v20491_v30 = vmax.f32 %v5956_v42, %v6155_v31  ;;  %v20497_v46 = vsel %vm6436_vm4, %v6520_v44, %v6522_v55 }
 0x665   :  { %v6156_v43 = vrot.slane %v5960_v5, 2  ;;  %v20502_v23 = vadd.f32 %v20268_v22, %v5800_v36  ;;  %v6700_v16 = vmax.f32 %v20446_v45, %v20497_v46  ;;  %v6792_v45 = vld [vmem:[%s23180_s3 + $0x1e0] sm:$0xff] }
 0x666   :  { %v5641_v2 = vpop.f32.mrf.mxu0  ;;  %v6524_v13 = vrot.slane %v20491_v30, 1  ;;  %7016 = vmatmul.mubr.f32.gmra.mxu1 %v6747_v8 }
 0x667   :  { %v6157_v42 = vsel %vm6064_vm3, %v6154_v11, %v6156_v43  ;;  %v5961_v10 = vmax.f32 %v20502_v23, 0.0  ;;  %v5801_v44 = vadd.f32 %v5641_v2, %v23471_v0  ;;  %7020 = vmatprep.mubr.f32.mxu1 %v6753_v6  ;;  %v6758_v11 = vld [vmem:[%s23180_s3 + $0xd0] sm:$0xff]  ;;  %v6777_v23 = vld [vmem:[%s23180_s3 + $0x168] sm:$0xff] }
 0x668   :  { %v15009_v35 = vpop.f32.mrf.mxu0  ;;  %v20515_v28 = vmax.f32 %v5957_v41, %v6157_v42  ;;  %v20518_v31 = vsel %vm6436_vm4, %v6522_v55, %v6524_v13  ;;  %v23472_v6 = vld [vmem:[#allocation17_spill] sm:$0xff]  ;;  %v6757_v42 = vld [vmem:[%s23180_s3 + $0xc8] sm:$0xff] }
 0x669   :  { %v6158_v54 = vrot.slane %v5961_v10, 2  ;;  %v20526_v36 = vadd.f32 %v20268_v22, %v5801_v44  ;;  %v6701_v8 = vmax.f32 %v20470_v4, %v20518_v31 }
 0x66a   :  { %v5644_v60 = vpop.f32.mrf.mxu0  ;;  %v6526_v18 = vrot.slane %v20515_v28, 1  ;;  %7021 = vmatmul.mubr.f32.gmra.mxu1 %v6752_v58 }
 0x66b   :  { %v6159_v41 = vsel %vm6064_vm3, %v6156_v43, %v6158_v54  ;;  %v5962_v55 = vmax.f32 %v20526_v36, 0.0  ;;  %v5802_v2 = vadd.f32 %v5644_v60, %v23472_v6  ;;  %7025 = vmatprep.mubr.f32.mxu1 %v6758_v11  ;;  %v6763_v43 = vld [vmem:[%s23180_s3 + $0xf8] sm:$0xff] }
 0x66c   :  { %v15010_v0 = vpop.f32.mrf.mxu0  ;;  %v20539_v44 = vmax.f32 %v5958_v51, %v6159_v41  ;;  %v20542_v35 = vsel %vm6436_vm4, %v6524_v13, %v6526_v18  ;;  %v23473_v41 = vld [vmem:[#allocation18_spill] sm:$0xff] }
 0x66d   :  { %v6160_v58 = vrot.slane %v5962_v55, 2  ;;  %v20550_v11 = vadd.f32 %v20268_v22, %v5802_v2  ;;  %v6702_v60 = vmax.f32 %v20491_v30, %v20542_v35  ;;  %v6787_v30 = vld [vmem:[%s23180_s3 + $0x1b8] sm:$0xff] }
 0x66e   :  { %v5649_v6 = vpop.f32.mrf.mxu0  ;;  %v6528_v59 = vrot.slane %v20539_v44, 1  ;;  %7026 = vmatmul.mubr.f32.gmra.mxu1 %v6757_v42  ;;  %v6768_v42 = vld [vmem:[%s23180_s3 + $0x120] sm:$0xff] }
 0x66f   :  { %v6161_v51 = vsel %vm6064_vm3, %v6158_v54, %v6160_v58  ;;  %v5963_v13 = vmax.f32 %v20550_v11, 0.0  ;;  %v5803_v0 = vadd.f32 %v5649_v6, %v23473_v41  ;;  %7030 = vmatprep.mubr.f32.mxu1 %v6763_v43 }
 0x670   :  { %v15013_v2 = vpop.f32.mrf.mxu0  ;;  %v6335_v53 = vmax.f32 %v5959_v14, %v6161_v51  ;;  %v6529_v17 = vsel %vm6436_vm4, %v6526_v18, %v6528_v59  ;;  %v23474_v18 = vld [vmem:[#allocation19_spill] sm:$0xff] }
 0x671   :  { %v6162_v54 = vrot.slane %v5963_v13, 2  ;;  %v20570_v6 = vadd.f32 %v20268_v22, %v5803_v0  ;;  %v6703_v43 = vmax.f32 %v20515_v28, %v6529_v17  ;;  %v6767_v2 = vld [vmem:[%s23180_s3 + $0x118] sm:$0xff] }
 0x672   :  { %v5652_v41 = vpop.f32.mrf.mxu0  ;;  %v6530_v57 = vrot.slane %v6335_v53, 1  ;;  %7031 = vmatmul.mubr.f32.gmra.mxu1 %v6762_v39  ;;  %v6773_v39 = vld [vmem:[%s23180_s3 + $0x148] sm:$0xff] }
 0x673   :  { %v6163_v62 = vsel %vm6064_vm3, %v6160_v58, %v6162_v54  ;;  %v5964_v14 = vmax.f32 %v20570_v6, 0.0  ;;  %v5804_v51 = vadd.f32 %v5652_v41, %v23474_v18  ;;  %7035 = vmatprep.mubr.f32.mxu1 %v6768_v42  ;;  %v6772_v18 = vld [vmem:[%s23180_s3 + $0x140] sm:$0xff] }
 0x674   :  { %v20581_v0 = vmax.f32 %v5960_v5, %v6163_v62  ;;  %v15014_v34 = vpop.f32.mrf.mxu0  ;;  %v6531_v17 = vsel %vm6436_vm4, %v6528_v59, %v6530_v57  ;;  %v23475_v59 = vld [vmem:[#allocation20_spill] sm:$0xff] }
 0x675   :  { %v6164_v28 = vrot.slane %v5964_v14, 2  ;;  %v20590_v58 = vadd.f32 %v20268_v22, %v5804_v51  ;;  %v6704_v42 = vmax.f32 %v20539_v44, %v6531_v17  ;;  %v6778_v44 = vld [vmem:[%s23180_s3 + $0x170] sm:$0xff] }
 0x676   :  { %v6532_v41 = vrot.slane %v20581_v0, 1  ;;  %v5657_v63 = vpop.f32.mrf.mxu0  ;;  %7036 = vmatmul.mubr.f32.gmra.mxu1 %v6767_v2 }
 0x677   :  { %v6165_v34 = vsel %vm6064_vm3, %v6162_v54, %v6164_v28  ;;  %v5965_v5 = vmax.f32 %v20590_v58, 0.0  ;;  %v5805_v62 = vadd.f32 %v5657_v63, %v23475_v59  ;;  %7040 = vmatprep.mubr.f32.mxu1 %v6773_v39 }
 0x678   :  { %v15017_v38 = vpop.f32.mrf.mxu0  ;;  %v6533_v51 = vsel %vm6436_vm4, %v6530_v57, %v6532_v41  ;;  %v20606_v2 = vmax.f32 %v5961_v10, %v6165_v34 }
 0x679   :  { %v6166_v54 = vrot.slane %v5965_v5, 2  ;;  %v20611_v17 = vadd.f32 %v20268_v22, %v5805_v62  ;;  %v6705_v39 = vmax.f32 %v6335_v53, %v6533_v51  ;;  %v6783_v53 = vld [vmem:[%s23180_s3 + $0x198] sm:$0xff] }
 0x67a   :  { %v5660_v63 = vpop.f32.mrf.mxu0  ;;  %7041 = vmatmul.mubr.f32.gmra.mxu1 %v6772_v18  ;;  %v6534_v38 = vrot.slane %v20606_v2, 1  ;;  %v6842_v18 = vld [vmem:[%s23180_s3 + $0x370] sm:$0xff] }
 0x67b   :  { %v6167_v57 = vsel %vm6064_vm3, %v6164_v28, %v6166_v54  ;;  %v5966_v59 = vmax.f32 %v20611_v17, 0.0  ;;  %v5806_v15 = vadd.f32 %v5660_v63, %v23476_v32  ;;  %7127 = vmatpush1.msra.mxu1 %v6705_v39  ;;  %7045 = vmatprep.mubr.f32.mxu1 %v6778_v44  ;;  %v23477_v44 = vld [vmem:[#allocation22_spill] sm:$0xff] }
 0x67c   :  { %v15018_v10 = vpop.f32.mrf.mxu0  ;;  %7128 = vmatprep.subr.mxu1 %v23202_v33  ;;  %v20626_v28 = vmax.f32 %v5962_v55, %v6167_v57  ;;  %v20629_v34 = vsel %vm6436_vm4, %v6532_v41, %v6534_v38  ;;  %v6788_v63 = vld [vmem:[%s23180_s3 + $0x1c0] sm:$0xff] }
 0x67d   :  { %v6168_v32 = vrot.slane %v5966_v59, 2  ;;  %v20634_v62 = vadd.f32 %v20268_v22, %v5806_v15  ;;  %7129 = vmatpush1.msra.mxu1 %v6704_v42  ;;  %v6782_v15 = vld [vmem:[%s23180_s3 + $0x190] sm:$0xff] }
 0x67e   :  { %v5665_v51 = vpop.f32.mrf.mxu0  ;;  %7130 = vmatprep.subr.mxu1 %v23202_v33  ;;  %7046 = vmatmul.mubr.f32.gmra.mxu1 %v6777_v23  ;;  %v6536_v36 = vrot.slane %v20626_v28, 1 }
 0x67f   :  { %v6169_v55 = vsel %vm6064_vm3, %v6166_v54, %v6168_v32  ;;  %v5967_v41 = vmax.f32 %v20634_v62, 0.0  ;;  %v5807_v39 = vadd.f32 %v5665_v51, %v23477_v44  ;;  %7131 = vmatpush1.msra.mxu1 %v6703_v43  ;;  %7050 = vmatprep.mubr.f32.mxu1 %v6783_v53  ;;  %v23478_v51 = vld [vmem:[#allocation23_spill] sm:$0xff] }
 0x680   :  { %v15021_v42 = vpop.f32.mrf.mxu0  ;;  %7132 = vmatprep.subr.mxu1 %v23202_v33  ;;  %v20652_v54 = vmax.f32 %v5963_v13, %v6169_v55  ;;  %v20655_v57 = vsel %vm6436_vm4, %v6534_v38, %v6536_v36 }
 0x681   :  { %v6170_v43 = vrot.slane %v5967_v41, 2  ;;  %v20660_v23 = vadd.f32 %v20268_v22, %v5807_v39  ;;  %7133 = vmatpush1.msra.mxu1 %v6702_v60  ;;  %v6793_v60 = vld [vmem:[%s23180_s3 + $0x1e8] sm:$0xff] }
 0x682   :  { %v5668_v53 = vpop.f32.mrf.mxu0  ;;  %7134 = vmatprep.subr.mxu1 %v23202_v33  ;;  %7051 = vmatmul.mubr.f32.gmra.mxu1 %v6782_v15  ;;  %v6538_v11 = vrot.slane %v20652_v54, 1  ;;  %v23479_v15 = vld [vmem:[#allocation24_spill] sm:$0xff] }
 0x683   :  { %v6171_v13 = vsel %vm6064_vm3, %v6168_v32, %v6170_v43  ;;  %v5968_v38 = vmax.f32 %v20660_v23, 0.0  ;;  %v5808_v55 = vadd.f32 %v5668_v53, %v23478_v51  ;;  %7135 = vmatpush1.msra.mxu1 %v6701_v8  ;;  %7055 = vmatprep.mubr.f32.mxu1 %v6788_v63 }
 0x684   :  { %v15022_v35 = vpop.f32.mrf.mxu0  ;;  %7136 = vmatprep.subr.mxu1 %v23202_v33  ;;  %v20684_v32 = vmax.f32 %v5964_v14, %v6171_v13  ;;  %v20687_v44 = vsel %vm6436_vm4, %v6536_v36, %v6538_v11  ;;  %v23480_v13 = vld [vmem:[#allocation25_spill] sm:$0xff] }
 0x685   :  { %v6172_v4 = vrot.slane %v5968_v38, 2  ;;  %v20692_v31 = vadd.f32 %v20268_v22, %v5808_v55  ;;  %7137 = vmatpush1.msra.mxu1 %v6700_v16  ;;  %v6798_v16 = vld [vmem:[%s23180_s3 + $0x210] sm:$0xff]  ;;  %v23481_v55 = vmax.f32 %v20360_v47, %v20421_v12 }
 0x686   :  { %v5673_v39 = vpop.f32.mrf.mxu0  ;;  %7138 = vmatprep.subr.mxu1 %v23202_v33  ;;  %7056 = vmatmul.mubr.f32.gmra.mxu1 %v6787_v30  ;;  %v6540_v6 = vrot.slane %v20684_v32, 1 }
 0x687   :  { %v6173_v14 = vsel %vm6064_vm3, %v6170_v43, %v6172_v4  ;;  %v5969_v36 = vmax.f32 %v20692_v31, 0.0  ;;  %v5809_v42 = vadd.f32 %v5673_v39, %v23479_v15  ;;  %7139 = vmatpush1.msra.mxu1 %v6699_v50  ;;  %7060 = vmatprep.mubr.f32.mxu1 %v6793_v60  ;;  %v23482_v60 = vmax.f32 %v20334_v48, %v20389_v26  ;;  %v6802_v48 = vld [vmem:[%s23180_s3 + $0x230] sm:$0xff] }
 0x688   :  { %v15025_v46 = vpop.f32.mrf.mxu0  ;;  %7140 = vmatprep.subr.mxu1 %v23202_v33  ;;  %v20716_v63 = vmax.f32 %v5965_v5, %v6173_v14  ;;  %v20719_v43 = vsel %vm6436_vm4, %v6538_v11, %v6540_v6  ;;  %v23483_v14 = vld [vmem:[#allocation26_spill] sm:$0xff] }
 0x689   :  { %v6174_v24 = vrot.slane %v5969_v36, 2  ;;  %v20724_v27 = vadd.f32 %v20268_v22, %v5809_v42  ;;  %7141 = vmatpush1.msra.mxu1 %v6698_v61  ;;  %v6803_v61 = vld [vmem:[%s23180_s3 + $0x238] sm:$0xff]  ;;  %v23484_v42 = vmax.f32 %v20308_v3, %v20363_v21 }
 0x68a   :  { %v5676_v53 = vpop.f32.mrf.mxu0  ;;  %7142 = vmatprep.subr.mxu1 %v23202_v33  ;;  %7061 = vmatmul.mubr.f32.gmra.mxu1 %v6792_v45  ;;  %v6542_v58 = vrot.slane %v20716_v63, 1  ;;  %v6808_v45 = vld [vmem:[%s23180_s3 + $0x260] sm:$0xff] }
 0x68b   :  { %v6175_v5 = vsel %vm6064_vm3, %v6172_v4, %v6174_v24  ;;  %v5970_v11 = vmax.f32 %v20724_v27, 0.0  ;;  %v5810_v51 = vadd.f32 %v5676_v53, %v23480_v13  ;;  %7143 = vmatpush1.msra.mxu1 %v23481_v55  ;;  %7065 = vmatprep.mubr.f32.mxu1 %v6798_v16  ;;  %v23486_v13 = vld [vmem:[#allocation27_spill] sm:$0xff]  ;;  %v23487_v55 = vmax.f32 %v20258_v25, %v20311_v19 }
 0x68c   :  { %v15026_v7 = vpop.f32.mrf.mxu0  ;;  %7144 = vmatprep.subr.mxu1 %v23202_v33  ;;  %v20748_v30 = vmax.f32 %v5966_v59, %v6175_v5  ;;  %v20751_v35 = vsel %vm6436_vm4, %v6540_v6, %v6542_v58 }
 0x68d   :  { %v6176_v47 = vrot.slane %v5970_v11, 2  ;;  %v20756_v12 = vadd.f32 %v20268_v22, %v5810_v51  ;;  %7145 = vmatpush1.msra.mxu1 %v23482_v60  ;;  %v23500_v60 = vld [vmem:[#allocation47_spill] sm:$0xff] }
 0x68e   :  { %v5681_v39 = vpop.f32.mrf.mxu0  ;;  %7146 = vmatprep.subr.mxu1 %v23202_v33  ;;  %7066 = vmatmul.mubr.f32.gmra.mxu1 %v6797_v29  ;;  %v6544_v17 = vrot.slane %v20748_v30, 1  ;;  %v6813_v29 = vld [vmem:[%s23180_s3 + $0x288] sm:$0xff] }
 0x68f   :  { %v6177_v59 = vsel %vm6064_vm3, %v6174_v24, %v6176_v47  ;;  %v5971_v6 = vmax.f32 %v20756_v12, 0.0  ;;  %v5811_v15 = vadd.f32 %v5681_v39, %v23483_v14  ;;  %7147 = vmatpush1.msra.mxu1 %v23484_v42  ;;  %7070 = vmatprep.mubr.f32.mxu1 %v6803_v61  ;;  %v23485_v24 = vmax.f32 %v20284_v1, %v20337_v37  ;;  %v6807_v1 = vld [vmem:[%s23180_s3 + $0x258] sm:$0xff]  ;;  %v6818_v42 = vld [vmem:[%s23180_s3 + $0x2b0] sm:$0xff] }
 0x690   :  { %v15029_v26 = vpop.f32.mrf.mxu0  ;;  %7148 = vmatprep.subr.mxu1 %v23202_v33  ;;  %v20780_v46 = vmax.f32 %v5967_v41, %v6177_v59  ;;  %v20783_v16 = vsel %vm6436_vm4, %v6542_v58, %v6544_v17  ;;  %v23489_v59 = vld [vmem:[#allocation28_spill] sm:$0xff] }
 0x691   :  { %v6178_v3 = vrot.slane %v5971_v6, 2  ;;  %v20788_v21 = vadd.f32 %v20268_v22, %v5811_v15  ;;  %7149 = vmatpush1.msra.mxu1 %v23485_v24  ;;  %v23490_v15 = vmax.f32 %v20230_v20, %v20261_v52 }
 0x692   :  { %v5684_v5 = vpop.f32.mrf.mxu0  ;;  %7150 = vmatprep.subr.mxu1 %v23202_v33  ;;  %7071 = vmatmul.mubr.f32.gmra.mxu1 %v6802_v48  ;;  %v6546_v62 = vrot.slane %v20780_v46, 1 }
 0x693   :  { %v6179_v41 = vsel %vm6064_vm3, %v6176_v47, %v6178_v3  ;;  %v5972_v58 = vmax.f32 %v20788_v21, 0.0  ;;  %v5812_v51 = vadd.f32 %v5684_v5, %v23486_v13  ;;  %7151 = vmatpush1.msra.mxu1 %v23487_v55  ;;  %7075 = vmatprep.mubr.f32.mxu1 %v6808_v45  ;;  %v23488_v47 = vmax.f32 %v20240_v56, %v20287_v40  ;;  %v6812_v56 = vld [vmem:[%s23180_s3 + $0x280] sm:$0xff]  ;;  %v6823_v13 = vld [vmem:[%s23180_s3 + $0x2d8] sm:$0xff] }
 0x694   :  { %v15030_v37 = vpop.f32.mrf.mxu0  ;;  %7152 = vmatprep.subr.mxu1 %v23202_v33  ;;  %v20812_v7 = vmax.f32 %v5968_v38, %v6179_v41  ;;  %v20815_v61 = vsel %vm6436_vm4, %v6544_v17, %v6546_v62  ;;  %v23491_v45 = vmax.f32 %v20219_v9, %v20243_v49  ;;  %v6817_v9 = vld [vmem:[%s23180_s3 + $0x2a8] sm:$0xff] }
 0x695   :  { %v6180_v25 = vrot.slane %v5972_v58, 2  ;;  %v20820_v19 = vadd.f32 %v20268_v22, %v5812_v51  ;;  %7153 = vmatpush1.msra.mxu1 %v23488_v47 }
 0x696   :  { %v5689_v39 = vpop.f32.mrf.mxu0  ;;  %7154 = vmatprep.subr.mxu1 %v23202_v33  ;;  %7076 = vmatmul.mubr.f32.gmra.mxu1 %v6807_v1  ;;  %v6548_v23 = vrot.slane %v20812_v7, 1 }
 0x697   :  { %v6181_v38 = vsel %vm6064_vm3, %v6178_v3, %v6180_v25  ;;  %v5973_v17 = vmax.f32 %v20820_v19, 0.0  ;;  %v5813_v14 = vadd.f32 %v5689_v39, %v23489_v59  ;;  %7155 = vmatpush1.msra.mxu1 %v23490_v15  ;;  %7080 = vmatprep.mubr.f32.mxu1 %v6813_v29  ;;  %v23493_v39 = vld [vmem:[#allocation40_spill] sm:$0xff] }
 0x698   :  { %v15033_v40 = vpop.f32.mrf.mxu0  ;;  %7156 = vmatprep.subr.mxu1 %v23202_v33  ;;  %v20844_v48 = vmax.f32 %v5969_v36, %v6181_v38  ;;  %v20847_v26 = vsel %vm6436_vm4, %v6546_v62, %v6548_v23  ;;  %v23492_v62 = vld [vmem:[#allocation29_spill] sm:$0xff] }
 0x699   :  { %v6182_v20 = vrot.slane %v5973_v17, 2  ;;  %v20852_v52 = vadd.f32 %v20268_v22, %v5813_v14  ;;  %7157 = vmatpush1.msra.mxu1 %v23491_v45  ;;  %v6822_v38 = vld [vmem:[%s23180_s3 + $0x2d0] sm:$0xff]  ;;  %v6828_v14 = vld [vmem:[%s23180_s3 + $0x300] sm:$0xff] }
 0x69a   :  { %v5692_v24 = vpop.f32.mrf.mxu0  ;;  %7081 = vmatmul.mubr.f32.gmra.mxu1 %v6812_v56  ;;  %7158 = vmatprep.subr.mxu1 %v23202_v33  ;;  %v6550_v31 = vrot.slane %v20844_v48, 1 }
 0x69b   :  { %v6183_v36 = vsel %vm6064_vm3, %v6180_v25, %v6182_v20  ;;  %v5974_v5 = vmax.f32 %v20852_v52, 0.0  ;;  %v5814_v41 = vadd.f32 %v5692_v24, %v23492_v62  ;;  %7085 = vmatprep.mubr.f32.mxu1 %v6818_v42  ;;  %v6827_v62 = vld [vmem:[%s23180_s3 + $0x2f8] sm:$0xff] }
 0x69c   :  { %v15034_v49 = vpop.f32.mrf.mxu0  ;;  %v20872_v51 = vmax.f32 %v5970_v11, %v6183_v36  ;;  %v20875_v55 = vsel %vm6436_vm4, %v6548_v23, %v6550_v31  ;;  %v23494_v36 = vld [vmem:[#allocation41_spill] sm:$0xff] }
 0x69d   :  { %v6184_v1 = vrot.slane %v5974_v5, 2  ;;  %v20880_v37 = vadd.f32 %v20268_v22, %v5814_v41  ;;  %v6714_v29 = vmax.f32 %v20812_v7, %v20875_v55  ;;  %v6833_v49 = vld [vmem:[%s23180_s3 + $0x328] sm:$0xff] }
 0x69e   :  { %v5697_v25 = vpop.f32.mrf.mxu0  ;;  %7086 = vmatmul.mubr.f32.gmra.mxu1 %v6817_v9  ;;  %v6552_v47 = vrot.slane %v20872_v51, 1 }
 0x69f   :  { %v6185_v27 = vsel %vm6064_vm3, %v6182_v20, %v6184_v1  ;;  %v5975_v11 = vmax.f32 %v20880_v37, 0.0  ;;  %v5815_v23 = vadd.f32 %v5697_v25, %v23493_v39  ;;  %7090 = vmatprep.mubr.f32.mxu1 %v6823_v13 }
 0x6a0   :  { %v15037_v59 = vpop.f32.mrf.mxu0  ;;  %v20896_v15 = vmax.f32 %v5971_v6, %v6185_v27  ;;  %v20899_v56 = vsel %vm6436_vm4, %v6550_v31, %v6552_v47 }
 0x6a1   :  { %v6186_v40 = vrot.slane %v5975_v11, 2  ;;  %v20904_v42 = vadd.f32 %v20268_v22, %v5815_v23  ;;  %v6715_v20 = vmax.f32 %v20844_v48, %v20899_v56  ;;  %v6832_v59 = vld [vmem:[%s23180_s3 + $0x320] sm:$0xff] }
 0x6a2   :  { %v5700_v45 = vpop.f32.mrf.mxu0  ;;  %7091 = vmatmul.mubr.f32.gmra.mxu1 %v6822_v38  ;;  %v6554_v24 = vrot.slane %v20896_v15, 1  ;;  %v23495_v38 = vld [vmem:[#allocation42_spill] sm:$0xff] }
 0x6a3   :  { %v6187_v12 = vsel %vm6064_vm3, %v6184_v1, %v6186_v40  ;;  %v5976_v6 = vmax.f32 %v20904_v42, 0.0  ;;  %v5816_v31 = vadd.f32 %v5700_v45, %v23494_v36  ;;  %7095 = vmatprep.mubr.f32.mxu1 %v6828_v14 }
 0x6a4   :  { %v15038_v41 = vpop.f32.mrf.mxu0  ;;  %v20917_v9 = vmax.f32 %v5972_v58, %v6187_v12  ;;  %v20923_v13 = vsel %vm6436_vm4, %v6552_v47, %v6554_v24 }
 0x6a5   :  { %v6188_v1 = vrot.slane %v5976_v6, 2  ;;  %v20928_v25 = vadd.f32 %v20268_v22, %v5816_v31  ;;  %v6716_v27 = vmax.f32 %v20872_v51, %v20923_v13 }
 0x6a6   :  { %v5705_v39 = vpop.f32.mrf.mxu0  ;;  %v6556_v21 = vrot.slane %v20917_v9, 1  ;;  %7096 = vmatmul.mubr.f32.gmra.mxu1 %v6827_v62 }
 0x6a7   :  { %v6189_v58 = vsel %vm6064_vm3, %v6186_v40, %v6188_v1  ;;  %v5977_v23 = vmax.f32 %v20928_v25, 0.0  ;;  %v5817_v47 = vadd.f32 %v5705_v39, %v23495_v38  ;;  %7100 = vmatprep.mubr.f32.mxu1 %v6833_v49  ;;  %v6838_v40 = vld [vmem:[%s23180_s3 + $0x350] sm:$0xff]  ;;  %v23496_v49 = vld [vmem:[#allocation43_spill] sm:$0xff] }
 0x6a8   :  { %v15041_v14 = vpop.f32.mrf.mxu0  ;;  %v20941_v45 = vmax.f32 %v5973_v17, %v6189_v58  ;;  %v20944_v12 = vsel %vm6436_vm4, %v6554_v24, %v6556_v21  ;;  %v6837_v58 = vld [vmem:[%s23180_s3 + $0x348] sm:$0xff] }
 0x6a9   :  { %v6190_v36 = vrot.slane %v5977_v23, 2  ;;  %v20952_v31 = vadd.f32 %v20268_v22, %v5817_v47  ;;  %v6717_v62 = vmax.f32 %v20896_v15, %v20944_v12 }
 0x6aa   :  { %v5708_v41 = vpop.f32.mrf.mxu0  ;;  %v6558_v19 = vrot.slane %v20941_v45, 1  ;;  %7101 = vmatmul.mubr.f32.gmra.mxu1 %v6832_v59 }
 0x6ab   :  { %v6191_v17 = vsel %vm6064_vm3, %v6188_v1, %v6190_v36  ;;  %v5978_v24 = vmax.f32 %v20952_v31, 0.0  ;;  %v5818_v39 = vadd.f32 %v5708_v41, %v23496_v49  ;;  %7105 = vmatprep.mubr.f32.mxu1 %v6838_v40  ;;  %v6843_v1 = vld [vmem:[%s23180_s3 + $0x378] sm:$0xff] }
 0x6ac   :  { %v15042_v38 = vpop.f32.mrf.mxu0  ;;  %v20965_v47 = vmax.f32 %v5974_v5, %v6191_v17  ;;  %v20968_v14 = vsel %vm6436_vm4, %v6556_v21, %v6558_v19  ;;  %v23497_v17 = vld [vmem:[#allocation44_spill] sm:$0xff] }
 0x6ad   :  { %v6192_v59 = vrot.slane %v5978_v24, 2  ;;  %v20976_v40 = vadd.f32 %v20268_v22, %v5818_v39  ;;  %v6718_v41 = vmax.f32 %v20917_v9, %v20968_v14 }
 0x6ae   :  { %v5713_v49 = vpop.f32.mrf.mxu0  ;;  %v6560_v52 = vrot.slane %v20965_v47, 1  ;;  %7106 = vmatmul.mubr.f32.gmra.mxu1 %v6837_v58  ;;  %v6848_v58 = vld [vmem:[%s23180_s3 + $0x3a0] sm:$0xff] }
 0x6af   :  { %v6193_v5 = vsel %vm6064_vm3, %v6190_v36, %v6192_v59  ;;  %v5979_v21 = vmax.f32 %v20976_v40, 0.0  ;;  %v5819_v38 = vadd.f32 %v5713_v49, %v23497_v17  ;;  %7110 = vmatprep.mubr.f32.mxu1 %v6843_v1 }
 0x6b0   :  { %v15045_v39 = vpop.f32.mrf.mxu0  ;;  %v6351_v10 = vmax.f32 %v5975_v11, %v6193_v5  ;;  %v6561_v8 = vsel %vm6436_vm4, %v6558_v19, %v6560_v52  ;;  %v23498_v19 = vld [vmem:[#allocation45_spill] sm:$0xff] }
 0x6b1   :  { %v6194_v36 = vrot.slane %v5979_v21, 2  ;;  %v20996_v49 = vadd.f32 %v20268_v22, %v5819_v38  ;;  %v6719_v1 = vmax.f32 %v20941_v45, %v6561_v8  ;;  %v6847_v39 = vld [vmem:[%s23180_s3 + $0x398] sm:$0xff] }
 0x6b2   :  { %v5716_v17 = vpop.f32.mrf.mxu0  ;;  %v6562_v50 = vrot.slane %v6351_v10, 1  ;;  %7111 = vmatmul.mubr.f32.gmra.mxu1 %v6842_v18  ;;  %v6853_v18 = vld [vmem:[%s23180_s3 + $0x3c8] sm:$0xff] }
 0x6b3   :  { %v6195_v37 = vsel %vm6064_vm3, %v6192_v59, %v6194_v36  ;;  %v5980_v11 = vmax.f32 %v20996_v49, 0.0  ;;  %v5820_v5 = vadd.f32 %v5716_v17, %v23498_v19  ;;  %7115 = vmatprep.mubr.f32.mxu1 %v6848_v58  ;;  %v6852_v19 = vld [vmem:[%s23180_s3 + $0x3c0] sm:$0xff] }
 0x6b4   :  { %v21007_v38 = vmax.f32 %v5976_v6, %v6195_v37  ;;  %v15046_v4 = vpop.f32.mrf.mxu0  ;;  %v6563_v8 = vsel %vm6436_vm4, %v6560_v52, %v6562_v50  ;;  %v23499_v52 = vld [vmem:[#allocation46_spill] sm:$0xff] }
 0x6b5   :  { %v6196_v45 = vrot.slane %v5980_v11, 2  ;;  %v21016_v59 = vadd.f32 %v20268_v22, %v5820_v5  ;;  %v6720_v58 = vmax.f32 %v20965_v47, %v6563_v8  ;;  %v6735_v47 = vld [vmem:[%s23180_s3 + $0x18] sm:$0xff] }
 0x6b6   :  { %v6564_v17 = vrot.slane %v21007_v38, 1  ;;  %v5721_v42 = vpop.f32.mrf.mxu0  ;;  %7116 = vmatmul.mubr.f32.gmra.mxu1 %v6847_v39 }
 0x6b7   :  { %v6197_v4 = vsel %vm6064_vm3, %v6194_v36, %v6196_v45  ;;  %v5981_v6 = vmax.f32 %v21016_v59, 0.0  ;;  %v5821_v37 = vadd.f32 %v5721_v42, %v23499_v52  ;;  %7120 = vmatprep.mubr.f32.mxu1 %v6853_v18 }
 0x6b8   :  { %v15049_v53 = vpop.f32.mrf.mxu0  ;;  %v6565_v5 = vsel %vm6436_vm4, %v6562_v50, %v6564_v17  ;;  %v21032_v39 = vmax.f32 %v5977_v23, %v6197_v4 }
 0x6b9   :  { %v6198_v36 = vrot.slane %v5981_v6, 2  ;;  %v21037_v8 = vadd.f32 %v20268_v22, %v5821_v37  ;;  %v6721_v18 = vmax.f32 %v6351_v10, %v6565_v5 }
 0x6ba   :  { %v5724_v42 = vpop.f32.mrf.mxu0  ;;  %7121 = vmatmul.mubr.f32.gmra.mxu1 %v6852_v19  ;;  %v6566_v53 = vrot.slane %v21032_v39, 1  ;;  %v23501_v19 = vld [vmem:[#allocation48_spill] sm:$0xff] }
 0x6bb   :  { %v6199_v50 = vsel %vm6064_vm3, %v6196_v45, %v6198_v36  ;;  %v5982_v52 = vmax.f32 %v21037_v8, 0.0  ;;  %v5822_v3 = vadd.f32 %v5724_v42, %v23500_v60  ;;  %7159 = vmatpush2.msra.mxu1 %v6721_v18  ;;  %7190 = vmatprep.mubr.f32.mxu1 %v6735_v47 }
 0x6bc   :  { %v15050_v25 = vpop.f32.mrf.mxu0  ;;  %7160 = vmatprep.subr.mxu1 %v23202_v33  ;;  %v21046_v23 = vmax.f32 %v5978_v24, %v6199_v50  ;;  %v21049_v10 = vsel %vm6436_vm4, %v6564_v17, %v6566_v53  ;;  %v23502_v50 = vld [vmem:[#allocation49_spill] sm:$0xff] }
 0x6bd   :  { %v6200_v4 = vrot.slane %v5982_v52, 2  ;;  %v21054_v45 = vadd.f32 %v20268_v22, %v5822_v3  ;;  %7161 = vmatpush2.msra.mxu1 %v6720_v58  ;;  %v6722_v60 = vmax.f32 %v21007_v38, %v21049_v10  ;;  %v6780_v38 = vld [vmem:[%s23180_s3 + $0x180] sm:$0xff]  ;;  %v6779_v10 = vld [vmem:[%s23180_s3 + $0x178] sm:$0xff] }
 0x6be   :  { %v5729_v37 = vpop.f32.mrf.mxu0  ;;  %7162 = vmatprep.subr.mxu1 %v23202_v33  ;;  %v6568_v31 = vrot.slane %v21046_v23, 1 }
 0x6bf   :  { %v6201_v24 = vsel %vm6064_vm3, %v6198_v36, %v6200_v4  ;;  %v5983_v17 = vmax.f32 %v21054_v45, 0.0  ;;  %v5823_v5 = vadd.f32 %v5729_v37, %v23501_v19  ;;  %7163 = vmatpush2.msra.mxu1 %v6719_v1  ;;  %v15825_v36 = vld [vmem:[%s23179_s2] ss:$0 sm:$0xff] }
 0x6c0   :  { %v15053_v47 = vpop.f32.mrf.mxu0  ;;  %7164 = vmatprep.subr.mxu1 %v23202_v33  ;;  %v21066_v22 = vmax.f32 %v5979_v21, %v6201_v24  ;;  %v21069_v3 = vsel %vm6436_vm4, %v6566_v53, %v6568_v31 }
 0x6c1   :  { %v6202_v58 = vrot.slane %v5983_v17, 2  ;;  %v21076_v18 = vadd.f32 %v15825_v36, %v5823_v5  ;;  %7165 = vmatpush2.msra.mxu1 %v6718_v41  ;;  %v6723_v40 = vmax.f32 %v21032_v39, %v21069_v3  ;;  %v23504_v47 = vld [vmem:[#allocation51_spill] sm:$0xff]  ;;  %v6774_v3 = vld [vmem:[%s23180_s3 + $0x150] sm:$0xff] }
 0x6c2   :  { %v5732_v21 = vpop.f32.mrf.mxu0  ;;  %7166 = vmatprep.subr.mxu1 %v23202_v33  ;;  %v6570_v1 = vrot.slane %v21066_v22, 1  ;;  %v6769_v39 = vld [vmem:[%s23180_s3 + $0x128] sm:$0xff] }
 0x6c3   :  { %v6203_v42 = vsel %vm6064_vm3, %v6200_v4, %v6202_v58  ;;  %v5984_v53 = vmax.f32 %v21076_v18, 0.0  ;;  %v5824_v25 = vadd.f32 %v5732_v21, %v23502_v50  ;;  %7167 = vmatpush2.msra.mxu1 %v6717_v62  ;;  %v23505_v18 = vmax.f32 %v20780_v46, %v20847_v26 }
 0x6c4   :  { %v15054_v9 = vpop.f32.mrf.mxu0  ;;  %7168 = vmatprep.subr.mxu1 %v23202_v33  ;;  %v21094_v14 = vmax.f32 %v5980_v11, %v6203_v42  ;;  %v21097_v41 = vsel %vm6436_vm4, %v6568_v31, %v6570_v1  ;;  %v23503_v31 = vld [vmem:[#allocation50_spill] sm:$0xff]  ;;  %v23506_v42 = vmax.f32 %v20748_v30, %v20815_v61 }
 0x6c5   :  { %v6204_v37 = vrot.slane %v5984_v53, 2  ;;  %v21099_v4 = vadd.f32 %v15825_v36, %v5824_v25  ;;  %7169 = vmatpush2.msra.mxu1 %v6716_v27  ;;  %v6724_v15 = vmax.f32 %v21046_v23, %v21097_v41  ;;  %v23507_v25 = vld [vmem:[#allocation52_spill] sm:$0xff]  ;;  %v6775_v23 = vld [vmem:[%s23180_s3 + $0x158] sm:$0xff] }
 0x6c6   :  { %v5737_v12 = vpop.f32.mrf.mxu0  ;;  %7170 = vmatprep.subr.mxu1 %v23202_v33  ;;  %v6572_v62 = vrot.slane %v21094_v14, 1  ;;  %v6790_v41 = vld [vmem:[%s23180_s3 + $0x1d0] sm:$0xff] }
 0x6c7   :  { %v6205_v49 = vsel %vm6064_vm3, %v6202_v58, %v6204_v37  ;;  %v5985_v11 = vmax.f32 %v21099_v4, 0.0  ;;  %v5825_v24 = vadd.f32 %v5737_v12, %v23503_v31  ;;  %7171 = vmatpush2.msra.mxu1 %v6715_v20 }
 0x6c8   :  { %v15057_v51 = vpop.f32.mrf.mxu0  ;;  %7172 = vmatprep.subr.mxu1 %v23202_v33  ;;  %v21117_v13 = vmax.f32 %v5981_v6, %v6205_v49  ;;  %v21120_v27 = vsel %vm6436_vm4, %v6570_v1, %v6572_v62  ;;  %v23509_v49 = vmax.f32 %v20684_v32, %v20751_v35 }
 0x6c9   :  { %v6206_v19 = vrot.slane %v5985_v11, 2  ;;  %v5909_v5 = vadd.f32 %v15825_v36, %v5825_v24  ;;  %7173 = vmatpush2.msra.mxu1 %v6714_v29  ;;  %v6725_v48 = vmax.f32 %v21066_v22, %v21120_v27  ;;  %v6764_v22 = vld [vmem:[%s23180_s3 + $0x100] sm:$0xff]  ;;  %v6795_v27 = vld [vmem:[%s23180_s3 + $0x1f8] sm:$0xff] }
 0x6ca   :  { %v5740_v56 = vpop.f32.mrf.mxu0  ;;  %7174 = vmatprep.subr.mxu1 %v23202_v33  ;;  %v6574_v20 = vrot.slane %v21117_v13, 1 }
 0x6cb   :  { %v6207_v59 = vsel %vm6064_vm3, %v6204_v37, %v6206_v19  ;;  %v5986_v6 = vmax.f32 %v5909_v5, 0.0  ;;  %v5826_v58 = vadd.f32 %v5740_v56, %v23504_v47  ;;  %7175 = vmatpush2.msra.mxu1 %v23505_v18  ;;  %v23508_v37 = vmax.f32 %v20716_v63, %v20783_v16  ;;  %v6745_v47 = vld [vmem:[%s23180_s3 + $0x68] sm:$0xff] }
 0x6cc   :  { %v15058_v21 = vpop.f32.mrf.mxu0  ;;  %7176 = vmatprep.subr.mxu1 %v23202_v33  ;;  %v21137_v7 = vmax.f32 %v5982_v52, %v6207_v59  ;;  %v21140_v55 = vsel %vm6436_vm4, %v6572_v62, %v6574_v20  ;;  %v6749_v18 = vld [vmem:[%s23180_s3 + $0x88] sm:$0xff] }
 0x6cd   :  { %v6208_v29 = vrot.slane %v5986_v6, 2  ;;  %v5910_v1 = vadd.f32 %v15825_v36, %v5826_v58  ;;  %7177 = vmatpush2.msra.mxu1 %v23506_v42  ;;  %v6726_v46 = vmax.f32 %v21094_v14, %v21140_v55  ;;  %v6755_v21 = vld [vmem:[%s23180_s3 + $0xb8] sm:$0xff]  ;;  %v6765_v42 = vld [vmem:[%s23180_s3 + $0x108] sm:$0xff]  ;;  %v6770_v14 = vld [vmem:[%s23180_s3 + $0x130] sm:$0xff] }
 0x6ce   :  { %v5745_v26 = vpop.f32.mrf.mxu0  ;;  %7178 = vmatprep.subr.mxu1 %v23202_v33  ;;  %v6576_v50 = vrot.slane %v21137_v7, 1  ;;  %v6800_v55 = vld [vmem:[%s23180_s3 + $0x220] sm:$0xff] }
 0x6cf   :  { %v6209_v8 = vsel %vm6064_vm3, %v6206_v19, %v6208_v29  ;;  %v5987_v52 = vmax.f32 %v5910_v1, 0.0  ;;  %v5827_v9 = vadd.f32 %v5745_v26, %v23507_v25  ;;  %7179 = vmatpush2.msra.mxu1 %v23508_v37  ;;  %v6759_v1 = vld [vmem:[%s23180_s3 + $0xd8] sm:$0xff]  ;;  %v6805_v26 = vld [vmem:[%s23180_s3 + $0x248] sm:$0xff]  ;;  %v6820_v37 = vld [vmem:[%s23180_s3 + $0x2c0] sm:$0xff] }
 0x6d0   :  { %v6359_v30 = vmax.f32 %v5983_v17, %v6209_v8  ;;  %7180 = vmatprep.subr.mxu1 %v23202_v33  ;;  %v6577_v61 = vsel %vm6436_vm4, %v6574_v20, %v6576_v50  ;;  %v15061_v4 = vpop.f32.mrf.mxu0  ;;  %v23510_v17 = vmax.f32 %v20652_v54, %v20719_v43  ;;  %v23512_v54 = vmax.f32 %v20606_v2, %v20655_v57  ;;  %v6734_v43 = vld [vmem:[%s23180_s3 + $0x10] sm:$0xff]  ;;  %v6739_v57 = vld [vmem:[%s23180_s3 + $0x38] sm:$0xff] }
 0x6d1   :  { %v6210_v12 = vrot.slane %v5987_v52, 2  ;;  %v5911_v62 = vadd.f32 %v15825_v36, %v5827_v9  ;;  %7181 = vmatpush2.msra.mxu1 %v23509_v49  ;;  %v6727_v31 = vmax.f32 %v21117_v13, %v6577_v61  ;;  %v23511_v13 = vmax.f32 %v20626_v28, %v20687_v44  ;;  %v6740_v28 = vld [vmem:[%s23180_s3 + $0x40] sm:$0xff]  ;;  %v6810_v8 = vld [vmem:[%s23180_s3 + $0x270] sm:$0xff]  ;;  %v6809_v52 = vld [vmem:[%s23180_s3 + $0x268] sm:$0xff] }
 0x6d2   :  { %v6578_v24 = vrot.slane %v6359_v30, 1  ;;  %7182 = vmatprep.subr.mxu1 %v23202_v33  ;;  %v5748_v63 = vpop.f32.mrf.mxu0  ;;  %v23513_v20 = vmax.f32 %v20581_v0, %v20629_v34  ;;  %v6744_v0 = vld [vmem:[%s23180_s3 + $0x60] sm:$0xff]  ;;  %v6750_v34 = vld [vmem:[%s23180_s3 + $0x90] sm:$0xff]  ;;  %v6815_v25 = vld [vmem:[%s23180_s3 + $0x298] sm:$0xff] }
 0x6d3   :  { %v6211_v16 = vsel %vm6064_vm3, %v6208_v29, %v6210_v12  ;;  %v5988_v45 = vmax.f32 %v5911_v62, 0.0  ;;  %7183 = vmatpush2.msra.mxu1 %v23510_v17  ;;  %v6760_v29 = vld [vmem:[%s23180_s3 + $0xe0] sm:$0xff]  ;;  %v6814_v9 = vld [vmem:[%s23180_s3 + $0x290] sm:$0xff]  ;;  %v6819_v61 = vld [vmem:[%s23180_s3 + $0x2b8] sm:$0xff] }
 0x6d4   :  { %v6360_v51 = vmax.f32 %v5984_v53, %v6211_v16  ;;  %7184 = vmatprep.subr.mxu1 %v23202_v33  ;;  %v6579_v36 = vsel %vm6436_vm4, %v6576_v50, %v6578_v24  ;;  %v15062_v32 = vpop.f32.mrf.mxu0  ;;  %v6804_v50 = vld [vmem:[%s23180_s3 + $0x240] sm:$0xff]  ;;  %v6825_v4 = vld [vmem:[%s23180_s3 + $0x2e8] sm:$0xff] }
 0x6d5   :  { %v6212_v35 = vrot.slane %v5988_v45, 2  ;;  %7185 = vmatpush2.msra.mxu1 %v23511_v13  ;;  %v6728_v19 = vmax.f32 %v21137_v7, %v6579_v36  ;;  %v6754_v7 = vld [vmem:[%s23180_s3 + $0xb0] sm:$0xff]  ;;  %v6824_v49 = vld [vmem:[%s23180_s3 + $0x2e0] sm:$0xff]  ;;  %v6829_v16 = vld [vmem:[%s23180_s3 + $0x308] sm:$0xff] }
 0x6d6   :  { %v6580_v5 = vrot.slane %v6360_v51, 1  ;;  %7186 = vmatprep.subr.mxu1 %v23202_v33  ;;  %v6835_v45 = vld [vmem:[%s23180_s3 + $0x338] sm:$0xff]  ;;  %v6834_v36 = vld [vmem:[%s23180_s3 + $0x330] sm:$0xff]  ;;  %v6840_v32 = vld [vmem:[%s23180_s3 + $0x360] sm:$0xff] }
 0x6d7   :  { %v6213_v56 = vsel %vm6064_vm3, %v6210_v12, %v6212_v35  ;;  %7187 = vmatpush2.msra.mxu1 %v23512_v54 }
 0x6d8   :  { %v6361_v53 = vmax.f32 %v5985_v11, %v6213_v56  ;;  %7188 = vmatprep.subr.mxu1 %v23202_v33  ;;  %v6581_v44 = vsel %vm6436_vm4, %v6578_v24, %v6580_v5 }
 0x6d9   :  { %7189 = vmatpush2.msra.mxu1 %v23513_v20  ;;  %v6729_v59 = vmax.f32 %v6359_v30, %v6581_v44  ;;  %v6849_v20 = vld [vmem:[%s23180_s3 + $0x3a8] sm:$0xff] }
 0x6da   :  { %v6582_v2 = vrot.slane %v6361_v53, 1  ;;  %7191 = vmatmul.mubr.f32.vlgmr.msra.gmra.mxu1 %v6734_v43  ;;  %15063 = vmatprep.subr.mxu1 %v23202_v33  ;;  %v6844_v43 = vld [vmem:[%s23180_s3 + $0x380] sm:$0xff] }
 0x6db   :  { %7195 = vmatprep.mubr.f32.mxu1 %v6740_v28 }
 0x6dc   :  { %v6731_v11 = vmax.f32 %v6361_v53, %v6582_v2  ;;  %v6583_v6 = vsel %vm6436_vm4, %v6580_v5, %v6582_v2  ;;  %v6845_v5 = vld [vmem:[%s23180_s3 + $0x388] sm:$0xff]  ;;  %v6850_v53 = vld [vmem:[%s23180_s3 + $0x3b0] sm:$0xff] }
 0x6dd   :  { %v6730_v58 = vmax.f32 %v6360_v51, %v6583_v6 }
 0x6de   :  { %7196 = vmatmul.mubr.f32.gmra.mxu1 %v6739_v57 }
 0x6df   :  { %15064 = vmatpush3.msk.msra.mxu1 %vm6436_vm4, %v6731_v11  ;;  %7200 = vmatprep.mubr.f32.mxu1 %v6745_v47  ;;  %v6854_v11 = vld [vmem:[%s23180_s3 + $0x3d0] sm:$0xff] }
 0x6e0   :  { %15065 = vmatprep.subr.mxu1 %v23202_v33 }
 0x6e1   :  { %15066 = vmatpush3.msra.mxu1 %v6730_v58  ;;  %v6736_v58 = vld [vmem:[%s23180_s3 + $0x20] sm:$0xff] }
 0x6e2   :  { %15067 = vmatprep.subr.mxu1 %v23202_v33  ;;  %7201 = vmatmul.mubr.f32.gmra.mxu1 %v6744_v0 }
 0x6e3   :  { %15068 = vmatpush3.msra.mxu1 %v6729_v59  ;;  %7205 = vmatprep.mubr.f32.mxu1 %v6750_v34  ;;  %v6855_v59 = vld [vmem:[%s23180_s3 + $0x3d8] sm:$0xff] }
 0x6e4   :  { %15069 = vmatprep.subr.mxu1 %v23202_v33 }
 0x6e5   :  { %15070 = vmatpush3.msra.mxu1 %v6728_v19  ;;  %v6839_v19 = vld [vmem:[%s23180_s3 + $0x358] sm:$0xff] }
 0x6e6   :  { %15071 = vmatprep.subr.mxu1 %v23202_v33  ;;  %7206 = vmatmul.mubr.f32.gmra.mxu1 %v6749_v18  ;;  %v6741_v18 = vld [vmem:[%s23180_s3 + $0x48] sm:$0xff] }
 0x6e7   :  { %15072 = vmatpush3.msra.mxu1 %v6727_v31  ;;  %7210 = vmatprep.mubr.f32.mxu1 %v6755_v21  ;;  %v6830_v31 = vld [vmem:[%s23180_s3 + $0x310] sm:$0xff] }
 0x6e8   :  { %15073 = vmatprep.subr.mxu1 %v23202_v33 }
 0x6e9   :  { %15074 = vmatpush3.msra.mxu1 %v6726_v46  ;;  %v6799_v46 = vld [vmem:[%s23180_s3 + $0x218] sm:$0xff] }
 0x6ea   :  { %15075 = vmatprep.subr.mxu1 %v23202_v33  ;;  %7211 = vmatmul.mubr.f32.gmra.mxu1 %v6754_v7 }
 0x6eb   :  { %15076 = vmatpush3.msra.mxu1 %v6725_v48  ;;  %7215 = vmatprep.mubr.f32.mxu1 %v6760_v29  ;;  %v6794_v48 = vld [vmem:[%s23180_s3 + $0x1f0] sm:$0xff] }
 0x6ec   :  { %15077 = vmatprep.subr.mxu1 %v23202_v33  ;;  %v6746_v29 = vld [vmem:[%s23180_s3 + $0x70] sm:$0xff] }
 0x6ed   :  { %15078 = vmatpush3.msra.mxu1 %v6724_v15  ;;  %v6789_v15 = vld [vmem:[%s23180_s3 + $0x1c8] sm:$0xff] }
 0x6ee   :  { %15079 = vmatprep.subr.mxu1 %v23202_v33  ;;  %7216 = vmatmul.mubr.f32.gmra.mxu1 %v6759_v1 }
 0x6ef   :  { %15080 = vmatpush3.msra.mxu1 %v6723_v40  ;;  %7220 = vmatprep.mubr.f32.mxu1 %v6765_v42  ;;  %v6784_v40 = vld [vmem:[%s23180_s3 + $0x1a0] sm:$0xff] }
 0x6f0   :  { %15081 = vmatprep.subr.mxu1 %v23202_v33 }
 0x6f1   :  { %15082 = vmatpush3.msra.mxu1 %v6722_v60  ;;  %v6785_v60 = vld [vmem:[%s23180_s3 + $0x1a8] sm:$0xff] }
 0x6f2   :  { %7221 = vmatmul.mubr.f32.gmra.mxu1 %v6764_v22  ;;  %v6751_v22 = vld [vmem:[%s23180_s3 + $0x98] sm:$0xff] }
 0x6f3   :  { %7225 = vmatprep.mubr.f32.mxu1 %v6770_v14 }
 0x6f6   :  { %7226 = vmatmul.mubr.f32.gmra.mxu1 %v6769_v39 }
 0x6f7   :  { %7230 = vmatprep.mubr.f32.mxu1 %v6775_v23  ;;  %v6756_v23 = vld [vmem:[%s23180_s3 + $0xc0] sm:$0xff] }
 0x6fa   :  { %7231 = vmatmul.mubr.f32.gmra.mxu1 %v6774_v3 }
 0x6fb   :  { %7235 = vmatprep.mubr.f32.mxu1 %v6780_v38 }
 0x6fe   :  { %7236 = vmatmul.mubr.f32.gmra.mxu1 %v6779_v10  ;;  %v6761_v10 = vld [vmem:[%s23180_s3 + $0xe8] sm:$0xff] }
 0x6ff   :  { %7240 = vmatprep.mubr.f32.mxu1 %v6785_v60 }
 0x702   :  { %7241 = vmatmul.mubr.f32.gmra.mxu1 %v6784_v40 }
 0x703   :  { %7245 = vmatprep.mubr.f32.mxu1 %v6790_v41  ;;  %v6766_v41 = vld [vmem:[%s23180_s3 + $0x110] sm:$0xff] }
 0x706   :  { %7246 = vmatmul.mubr.f32.gmra.mxu1 %v6789_v15 }
 0x707   :  { %7250 = vmatprep.mubr.f32.mxu1 %v6795_v27 }
 0x70a   :  { %7251 = vmatmul.mubr.f32.gmra.mxu1 %v6794_v48  ;;  %v6771_v48 = vld [vmem:[%s23180_s3 + $0x138] sm:$0xff] }
 0x70b   :  { %7255 = vmatprep.mubr.f32.mxu1 %v6800_v55 }
 0x70e   :  { %7256 = vmatmul.mubr.f32.gmra.mxu1 %v6799_v46 }
 0x70f   :  { %7260 = vmatprep.mubr.f32.mxu1 %v6805_v26  ;;  %v6776_v26 = vld [vmem:[%s23180_s3 + $0x160] sm:$0xff] }
 0x712   :  { %7261 = vmatmul.mubr.f32.gmra.mxu1 %v6804_v50 }
 0x713   :  { %7265 = vmatprep.mubr.f32.mxu1 %v6810_v8 }
 0x716   :  { %7266 = vmatmul.mubr.f32.gmra.mxu1 %v6809_v52  ;;  %v6781_v52 = vld [vmem:[%s23180_s3 + $0x188] sm:$0xff] }
 0x717   :  { %7270 = vmatprep.mubr.f32.mxu1 %v6815_v25 }
 0x71a   :  { %7271 = vmatmul.mubr.f32.gmra.mxu1 %v6814_v9  ;;  %v21312_v30 = vpop.f32.mrf.mxu1 }
 0x71b   :  { %7275 = vmatprep.mubr.f32.mxu1 %v6820_v37  ;;  %v6786_v37 = vld [vmem:[%s23180_s3 + $0x1b0] sm:$0xff] }
 0x71c   :  { %v7004_v12 = vpop.f32.mrf.mxu1 }
 0x71d   :  { %v6791_v12 = vld [vmem:[%s23180_s3 + $0x1d8] sm:$0xff] }
 0x71e   :  { %7276 = vmatmul.mubr.f32.gmra.mxu1 %v6819_v61  ;;  %v21320_v62 = vpop.f32.mrf.mxu1 }
 0x71f   :  { %7280 = vmatprep.mubr.f32.mxu1 %v6825_v4 }
 0x720   :  { %v7009_v24 = vpop.f32.mrf.mxu1 }
 0x721   :  { %v6796_v24 = vld [vmem:[%s23180_s3 + $0x200] sm:$0xff] }
 0x722   :  { %7281 = vmatmul.mubr.f32.gmra.mxu1 %v6824_v49  ;;  %v21328_v63 = vpop.f32.mrf.mxu1 }
 0x723   :  { %7285 = vmatprep.mubr.f32.mxu1 %v6830_v31 }
 0x724   :  { %v7014_v17 = vpop.f32.mrf.mxu1 }
 0x725   :  { %v6801_v17 = vld [vmem:[%s23180_s3 + $0x228] sm:$0xff] }
 0x726   :  { %7286 = vmatmul.mubr.f32.gmra.mxu1 %v6829_v16  ;;  %v21336_v51 = vpop.f32.mrf.mxu1 }
 0x727   :  { %7290 = vmatprep.mubr.f32.mxu1 %v6835_v45 }
 0x728   :  { %v7019_v35 = vpop.f32.mrf.mxu1 }
 0x729   :  { %v6806_v35 = vld [vmem:[%s23180_s3 + $0x250] sm:$0xff] }
 0x72a   :  { %7291 = vmatmul.mubr.f32.gmra.mxu1 %v6834_v36  ;;  %v21344_v13 = vpop.f32.mrf.mxu1 }
 0x72b   :  { %7295 = vmatprep.mubr.f32.mxu1 %v6840_v32  ;;  %v15726_v32 = vld [vmem:[%s23181_s4 + $0x8] sm:$0xff]  }
 0x72c   :  { %v7024_v56 = vpop.f32.mrf.mxu1  ;;  %15186 = vmatprep.subr.bf16.mxu0 %v15726_v32 }
 0x72d   :  { %15187 = vmatpush3.bf16.msra.mxu0 %v15726_v32  ;;  %v6811_v56 = vld [vmem:[%s23180_s3 + $0x278] sm:$0xff] }
 0x72e   :  { %7296 = vmatmul.mubr.f32.gmra.mxu1 %v6839_v19  ;;  %v21352_v54 = vpop.f32.mrf.mxu1 }
 0x72f   :  { %7300 = vmatprep.mubr.f32.mxu1 %v6845_v5 }
 0x730   :  { %v7029_v28 = vpop.f32.mrf.mxu1 }
 0x731   :  { %v6816_v28 = vld [vmem:[%s23180_s3 + $0x2a0] sm:$0xff] }
 0x732   :  { %7301 = vmatmul.mubr.f32.gmra.mxu1 %v6844_v43  ;;  %v21360_v44 = vpop.f32.mrf.mxu1 }
 0x733   :  { %7305 = vmatprep.mubr.f32.mxu1 %v6850_v53 }
 0x734   :  { %v7034_v2 = vpop.f32.mrf.mxu1 }
 0x735   :  { %v6821_v2 = vld [vmem:[%s23180_s3 + $0x2c8] sm:$0xff] }
 0x736   :  { %7306 = vmatmul.mubr.f32.gmra.mxu1 %v6849_v20  ;;  %v21368_v57 = vpop.f32.mrf.mxu1 }
 0x737   :  { %7310 = vmatprep.mubr.f32.mxu1 %v6855_v59 }
 0x738   :  { %v7039_v6 = vpop.f32.mrf.mxu1 }
 0x739   :  { %v6831_v6 = vld [vmem:[%s23180_s3 + $0x318] sm:$0xff] }
 0x73a   :  { %7311 = vmatmul.mubr.f32.gmra.mxu1 %v6854_v11  ;;  %v21373_v47 = vpop.f32.mrf.mxu1  ;;  %v6826_v11 = vld [vmem:[%s23180_s3 + $0x2f0] sm:$0xff] }
 0x73b   :  { %15083 = vmatprep.mubr.msk.f32.mxu1 %vm15827_vm1, %v23202_v33 }
 0x73c   :  { %v7044_v0 = vpop.f32.mrf.mxu1 }
 0x73d   :  { %v6841_v0 = vld [vmem:[%s23180_s3 + $0x368] sm:$0xff] }
 0x73e   :  { %15084 = vmatmul.mubr.msk.f32.vlgmr.msra.gmra.mxu1 %vm6857_vm5, %v6736_v58  ;;  %v21381_v34 = vpop.f32.mrf.mxu1  ;;  %v6836_v58 = vld [vmem:[%s23180_s3 + $0x340] sm:$0xff] }
 0x73f   :  { %15086 = vmatprep.mubr.msk.f32.mxu1 %vm15827_vm1, %v23202_v33 }
 0x740   :  { %v7049_v21 = vpop.f32.mrf.mxu1 }
 0x741   :  { %v15728_v21 = vld [vmem:[%s23181_s4] sm:$0xff]  }
 0x742   :  { %15087 = vmatmul.mubr.msk.f32.gmra.mxu1 %vm6857_vm5, %v6741_v18  ;;  %v21389_v7 = vpop.f32.mrf.mxu1  ;;  %v15727_v18 = vld [vmem:[%s23181_s4 + $0x18] sm:$0xff]   ;;  %15188 = vmatprep.subr.bf16.mxu0 %v15728_v21 }
 0x743   :  { %15089 = vmatprep.mubr.msk.f32.mxu1 %vm15827_vm1, %v23202_v33  ;;  %15158 = vmatprep.subr.bf16.mxu1 %v15727_v18 }
 0x744   :  { %v7054_v1 = vpop.f32.mrf.mxu1  ;;  %15159 = vmatpush3.bf16.msra.mxu1 %v15727_v18  ;;  %15189 = vmatpush3.bf16.msra.mxu0 %v15728_v21 }
 0x745   :  { %v15729_v1 = vld [vmem:[%s23181_s4 + $0x10] sm:$0xff]  }
 0x746   :  { %15090 = vmatmul.mubr.msk.f32.gmra.mxu1 %vm6857_vm5, %v6746_v29  ;;  %v21397_v42 = vpop.f32.mrf.mxu1  ;;  %v6846_v29 = vld [vmem:[%s23180_s3 + $0x390] sm:$0xff]  ;;  %15160 = vmatprep.subr.bf16.mxu1 %v15729_v1 }
 0x747   :  { %15092 = vmatprep.mubr.msk.f32.mxu1 %vm15827_vm1, %v23202_v33 }
 0x748   :  { %v7059_v14 = vpop.f32.mrf.mxu1  ;;  %15161 = vmatpush3.bf16.msra.mxu1 %v15729_v1 }
 0x74a   :  { %15093 = vmatmul.mubr.msk.f32.gmra.mxu1 %vm6857_vm5, %v6751_v22  ;;  %v21405_v39 = vpop.f32.mrf.mxu1  ;;  %v6851_v22 = vld [vmem:[%s23180_s3 + $0x3b8] sm:$0xff] }
 0x74b   :  { %15095 = vmatprep.mubr.msk.f32.mxu1 %vm15827_vm1, %v23202_v33 }
 0x74c   :  { %v7064_v3 = vpop.f32.mrf.mxu1 }
 0x74e   :  { %15096 = vmatmul.mubr.msk.f32.gmra.mxu1 %vm6857_vm5, %v6756_v23  ;;  %v21413_v38 = vpop.f32.mrf.mxu1  ;;  %v6856_v23 = vld [vmem:[%s23180_s3 + $0x3e0] sm:$0xff] }
 0x74f   :  { %15098 = vmatprep.mubr.msk.f32.mxu1 %vm15827_vm1, %v23202_v33 }
 0x750   :  { %v7069_v60 = vpop.f32.mrf.mxu1 }
 0x752   :  { %15099 = vmatmul.mubr.msk.f32.gmra.mxu1 %vm6857_vm5, %v6761_v10  ;;  %v21421_v40 = vpop.f32.mrf.mxu1 }
 0x753   :  { %15101 = vmatprep.mubr.msk.f32.mxu1 %vm15827_vm1, %v23202_v33 }
 0x754   :  { %v7074_v15 = vpop.f32.mrf.mxu1 }
 0x756   :  { %15102 = vmatmul.mubr.msk.f32.gmra.mxu1 %vm6857_vm5, %v6766_v41  ;;  %v21429_v27 = vpop.f32.mrf.mxu1 }
 0x757   :  { %15104 = vmatprep.mubr.msk.f32.mxu1 %vm15827_vm1, %v23202_v33 }
 0x758   :  { %v7079_v55 = vpop.f32.mrf.mxu1 }
 0x75a   :  { %15105 = vmatmul.mubr.msk.f32.gmra.mxu1 %vm6857_vm5, %v6771_v48  ;;  %v21437_v46 = vpop.f32.mrf.mxu1 }
 0x75b   :  { %15107 = vmatprep.mubr.msk.f32.mxu1 %vm15827_vm1, %v23202_v33 }
 0x75c   :  { %v7084_v50 = vpop.f32.mrf.mxu1 }
 0x75e   :  { %15108 = vmatmul.mubr.msk.f32.gmra.mxu1 %vm6857_vm5, %v6776_v26  ;;  %v21445_v8 = vpop.f32.mrf.mxu1 }
 0x75f   :  { %15110 = vmatprep.mubr.msk.f32.mxu1 %vm15827_vm1, %v23202_v33 }
 0x760   :  { %v7089_v25 = vpop.f32.mrf.mxu1 }
 0x762   :  { %15111 = vmatmul.mubr.msk.f32.gmra.mxu1 %vm6857_vm5, %v6781_v52  ;;  %v21453_v9 = vpop.f32.mrf.mxu1 }
 0x763   :  { %15113 = vmatprep.mubr.msk.f32.mxu1 %vm15827_vm1, %v23202_v33 }
 0x764   :  { %v7094_v61 = vpop.f32.mrf.mxu1 }
 0x766   :  { %15114 = vmatmul.mubr.msk.f32.gmra.mxu1 %vm6857_vm5, %v6786_v37  ;;  %v21461_v4 = vpop.f32.mrf.mxu1 }
 0x767   :  { %15116 = vmatprep.mubr.msk.f32.mxu1 %vm15827_vm1, %v23202_v33 }
 0x768   :  { %v7099_v49 = vpop.f32.mrf.mxu1 }
 0x76a   :  { %15117 = vmatmul.mubr.msk.f32.gmra.mxu1 %vm6857_vm5, %v6791_v12  ;;  %v21469_v31 = vpop.f32.mrf.mxu1 }
 0x76b   :  { %15119 = vmatprep.mubr.msk.f32.mxu1 %vm15827_vm1, %v23202_v33 }
 0x76c   :  { %v7104_v16 = vpop.f32.mrf.mxu1 }
 0x76e   :  { %15120 = vmatmul.mubr.msk.f32.gmra.mxu1 %vm6857_vm5, %v6796_v24  ;;  %v21477_v45 = vpop.f32.mrf.mxu1 }
 0x76f   :  { %15122 = vmatprep.mubr.msk.f32.mxu1 %vm15827_vm1, %v23202_v33 }
 0x770   :  { %v7109_v36 = vpop.f32.mrf.mxu1 }
 0x772   :  { %15123 = vmatmul.mubr.msk.f32.gmra.mxu1 %vm6857_vm5, %v6801_v17  ;;  %v21491_v19 = vpop.f32.mrf.mxu1 }
 0x773   :  { %15125 = vmatprep.mubr.msk.f32.mxu1 %vm15827_vm1, %v23202_v33 }
 0x774   :  { %v7114_v5 = vpop.f32.mrf.mxu1 }
 0x776   :  { %15126 = vmatmul.mubr.msk.f32.gmra.mxu1 %vm6857_vm5, %v6806_v35  ;;  %v21499_v43 = vpop.f32.mrf.mxu1 }
 0x777   :  { %15128 = vmatprep.mubr.msk.f32.mxu1 %vm15827_vm1, %v23202_v33 }
 0x778   :  { %v7119_v53 = vpop.f32.mrf.mxu1 }
 0x77a   :  { %15129 = vmatmul.mubr.msk.f32.gmra.mxu1 %vm6857_vm5, %v6811_v56  ;;  %v21507_v20 = vpop.f32.mrf.mxu1 }
 0x77b   :  { %15131 = vmatprep.mubr.msk.f32.mxu1 %vm15827_vm1, %v23202_v33 }
 0x77c   :  { %v7124_v59 = vpop.f32.mrf.mxu1 }
 0x77e   :  { %15132 = vmatmul.mubr.msk.f32.gmra.mxu1 %vm6857_vm5, %v6816_v28 }
 0x77f   :  { %15134 = vmatprep.mubr.msk.f32.mxu1 %vm15827_vm1, %v23202_v33 }
 0x782   :  { %15135 = vmatmul.mubr.msk.f32.gmra.mxu1 %vm6857_vm5, %v6821_v2 }
 0x783   :  { %15137 = vmatprep.mubr.msk.f32.mxu1 %vm15827_vm1, %v23202_v33 }
 0x786   :  { %15138 = vmatmul.mubr.msk.f32.gmra.mxu1 %vm6857_vm5, %v6826_v11 }
 0x787   :  { %15140 = vmatprep.mubr.msk.f32.mxu1 %vm15827_vm1, %v23202_v33 }
 0x78a   :  { %15141 = vmatmul.mubr.msk.f32.gmra.mxu1 %vm6857_vm5, %v6831_v6 }
 0x78b   :  { %15143 = vmatprep.mubr.msk.f32.mxu1 %vm15827_vm1, %v23202_v33 }
 0x78e   :  { %15144 = vmatmul.mubr.msk.f32.gmra.mxu1 %vm6857_vm5, %v6836_v58 }
 0x78f   :  { %15146 = vmatprep.mubr.msk.f32.mxu1 %vm15827_vm1, %v23202_v33 }
 0x792   :  { %15147 = vmatmul.mubr.msk.f32.gmra.mxu1 %vm6857_vm5, %v6841_v0 }
 0x793   :  { %15149 = vmatprep.mubr.msk.f32.mxu1 %vm15827_vm1, %v23202_v33 }
 0x796   :  { %15150 = vmatmul.mubr.msk.f32.gmra.mxu1 %vm6857_vm5, %v6846_v29 }
 0x797   :  { %15152 = vmatprep.mubr.msk.f32.mxu1 %vm15827_vm1, %v23202_v33 }
 0x79a   :  { %v7192_v14 = vpop.f32.mrf.mxu1  ;;  %15153 = vmatmul.mubr.msk.f32.gmra.mxu1 %vm6857_vm5, %v6851_v22 }
 0x79b   :  { %15155 = vmatprep.mubr.msk.f32.mxu1 %vm15827_vm1, %v23202_v33 }
 0x79c   :  { %v7194_v3 = vpop.f32.mrf.mxu1 }
 0x79d   :  { %v21609_v3 = vld [vmem:[%s23181_s4 + $0x28] sm:$0xff]  }
 0x79e   :  { %v7197_v10 = vpop.f32.mrf.mxu1  ;;  %15156 = vmatmul.mubr.msk.f32.gmra.mxu1 %vm6857_vm5, %v6856_v23  ;;  %v21604_v23 = vld [vmem:[%s23181_s4 + $0x38] sm:$0xff]   ;;  %15214 = vmatprep.subr.bf16.mxu1 %v21609_v3 }
 0x79f   :  { %15242 = vmatprep.subr.bf16.mxu0 %v21604_v23 }
 0x7a0   :  { %v7199_v60 = vpop.f32.mrf.mxu1 }
 0x7a2   :  { %v7202_v41 = vpop.f32.mrf.mxu1 }
 0x7a4   :  { %v7204_v15 = vpop.f32.mrf.mxu1 }
 0x7a6   :  { %v21569_v48 = vpop.f32.mrf.mxu1 }
 0x7a8   :  { %v7209_v55 = vpop.f32.mrf.mxu1 }
 0x7aa   :  { %v21571_v26 = vpop.f32.mrf.mxu1 }
 0x7ac   :  { %v7214_v50 = vpop.f32.mrf.mxu1 }
 0x7ae   :  { %v21573_v52 = vpop.f32.mrf.mxu1 }
 0x7b0   :  { %v7219_v25 = vpop.f32.mrf.mxu1 }
 0x7b2   :  { %v21575_v37 = vpop.f32.mrf.mxu1 }
 0x7b4   :  { %v7224_v61 = vpop.f32.mrf.mxu1 }
 0x7b6   :  { %v21577_v12 = vpop.f32.mrf.mxu1 }
 0x7b8   :  { %v7229_v49 = vpop.f32.mrf.mxu1 }
 0x7ba   :  { %v21579_v24 = vpop.f32.mrf.mxu1 }
 0x7bc   :  { %v7234_v16 = vpop.f32.mrf.mxu1 }
 0x7be   :  { %v21581_v17 = vpop.f32.mrf.mxu1 }
 0x7c0   :  { %v7239_v36 = vpop.f32.mrf.mxu1 }
 0x7c2   :  { %v21583_v32 = vpop.f32.mrf.mxu1 }
 0x7c4   :  { %v7244_v35 = vpop.f32.mrf.mxu1 }
 0x7c6   :  { %v21585_v5 = vpop.f32.mrf.mxu1 }
 0x7c8   :  { %v7249_v56 = vpop.f32.mrf.mxu1 }
 0x7ca   :  { %v21587_v53 = vpop.f32.mrf.mxu1 }
 0x7cc   :  { %v7254_v28 = vpop.f32.mrf.mxu1 }
 0x7ce   :  { %v21589_v59 = vpop.f32.mrf.mxu1 }
 0x7d0   :  { %v7259_v2 = vpop.f32.mrf.mxu1 }
 0x7d2   :  { %v21591_v11 = vpop.f32.mrf.mxu1 }
 0x7d4   :  { %v7264_v6 = vpop.f32.mrf.mxu1 }
 0x7d5   :  { %v7193_v6 = vadd.f32 %v7192_v14, %v21312_v30  ;;  %v7208_v30 = vadd.f32 %v21569_v48, %v21336_v51 }
 0x7d6   :  { %v21593_v58 = vpop.f32.mrf.mxu1 }
 0x7d8   :  { %v7269_v0 = vpop.f32.mrf.mxu1 }
 0x7da   :  { %v21595_v18 = vpop.f32.mrf.mxu1 }
 0x7dc   :  { %v7274_v21 = vpop.f32.mrf.mxu1 }
 0x7de   :  { %v21597_v29 = vpop.f32.mrf.mxu1 }
 0x7e0   :  { %v7279_v1 = vpop.f32.mrf.mxu1 }
 0x7e2   :  { %v21599_v22 = vpop.f32.mrf.mxu1 }
 0x7e4   :  { %v7284_v60 = vpop.f32.mrf.mxu1 }
 0x7e5   :  { %v7198_v60 = vadd.f32 %v7197_v10, %v21320_v62 }
 0x7e6   :  { %v21613_v15 = vpop.f32.mrf.mxu1 }
 0x7e8   :  { %v7289_v55 = vpop.f32.mrf.mxu1 }
 0x7ea   :  { %v21615_v50 = vpop.f32.mrf.mxu1 }
 0x7ec   :  { %v7294_v25 = vpop.f32.mrf.mxu1 }
 0x7ee   :  { %v21617_v61 = vpop.f32.mrf.mxu1 }
 0x7f0   :  { %v7299_v49 = vpop.f32.mrf.mxu1 }
 0x7f2   :  { %v21619_v16 = vpop.f32.mrf.mxu1 }
 0x7f4   :  { %v7304_v36 = vpop.f32.mrf.mxu1 }
 0x7f5   :  { %v7203_v36 = vadd.f32 %v7202_v41, %v21328_v63 }
 0x7f6   :  { %v21621_v35 = vpop.f32.mrf.mxu1 }
 0x7f8   :  { %v7309_v56 = vpop.f32.mrf.mxu1 }
 0x7fa   :  { %v21623_v28 = vpop.f32.mrf.mxu1 }
 0x7fc   :  { %v7314_v2 = vpop.f32.mrf.mxu1 }
 0x7fe   :  { %v7382_v0 = vpop.f32.mrf.mxu1 }
 0x7ff   :  { %v7383_v21 = vadd.f32 %v7382_v0, %v7193_v6 }
 0x800   :  { %v15085_v1 = vpop.f32.mrf.mxu1 }
 0x801   :  { %7507 = vst.msk [vmem:[#allocation2] sm:$0xff] %vm7506_vm6, %v7383_v21  ;;  %v7213_v21 = vadd.f32 %v21571_v26, %v21344_v13 }
 0x802   :  { %v7387_v55 = vpop.f32.mrf.mxu1 }
 0x803   :  { %v7388_v25 = vadd.f32 %v7387_v55, %v7198_v60 }
 0x804   :  { %v15088_v49 = vpop.f32.mrf.mxu1 }
 0x805   :  { %7508 = vst.msk [vmem:[#allocation2 + $0x8] sm:$0xff] %vm7506_vm6, %v7388_v25 }
 0x806   :  { %v7392_v56 = vpop.f32.mrf.mxu1 }
 0x807   :  { %v7393_v33 = vadd.f32 %v7392_v56, %v7203_v36  ;;  %v7223_v56 = vadd.f32 %v21575_v37, %v21360_v44  ;;  %v15733_v37 = vld [vmem:[%s23181_s4 + $0x20] sm:$0xff]  }
 0x808   :  { %v15091_v2 = vpop.f32.mrf.mxu1  ;;  %v7532_v10 = vld [vmem:[#allocation2] sm:$0xff] }
 0x809   :  { %7509 = vst.msk [vmem:[#allocation2 + $0x10] sm:$0xff] %vm7506_vm6, %v7393_v33  ;;  %v7218_v33 = vadd.f32 %v21573_v52, %v21352_v54  ;;  %v15732_v54 = vld [vmem:[%s23181_s4 + $0x30] sm:$0xff]  }
 0x80a   :  { %v7397_v14 = vpop.f32.mrf.mxu1 }
 0x80b   :  { %v7398_v6 = vadd.f32 %v7397_v14, %v7208_v30 }
 0x80c   :  { %v15094_v62 = vpop.f32.mrf.mxu1  ;;  %v7533_v0 = vld [vmem:[#allocation2 + $0x8] sm:$0xff] }
 0x80d   :  { %7510 = vst.msk [vmem:[#allocation2 + $0x18] sm:$0xff] %vm7506_vm6, %v7398_v6  ;;  %v7555_v63 = vpack.c.bf16 %v7533_v0, %v7532_v10  ;;  %v7571_v55 = vld [vmem:[#allocation2 + $0x1] sm:$0xff]  ;;  %v7228_v10 = vadd.f32 %v21577_v12, %v21368_v57  ;;  %v21658_v0 = vld [vmem:[%s23181_s4 + $0x58] sm:$0xff]   ;;  %v7233_v12 = vadd.f32 %v21579_v24, %v21373_v47  ;;  %v7238_v47 = vadd.f32 %v21581_v17, %v21381_v34 }
 0x80e   :  { %v7402_v41 = vpop.f32.mrf.mxu1 }
 0x80f   :  { %v7403_v1 = vadd.f32 %v7402_v41, %v7213_v21  ;;  %15190 = vmatprep.mubr.msk.bf16.mxu0 %vm7506_vm6, %v7555_v63 }
 0x810   :  { %v15097_v60 = vpop.f32.mrf.mxu1  ;;  %v7572_v51 = vld [vmem:[#allocation2 + $0x9] sm:$0xff] }
 0x811   :  { %7511 = vst.msk [vmem:[#allocation2 + $0x20] sm:$0xff] %vm7506_vm6, %v7403_v1  ;;  %v7594_v48 = vpack.c.bf16 %v7572_v51, %v7571_v55  ;;  %v7534_v26 = vld [vmem:[#allocation2 + $0x10] sm:$0xff]  ;;  %v21669_v60 = vld [vmem:[%s23181_s4 + $0x48] sm:$0xff]  }
 0x812   :  { %v7407_v25 = vpop.f32.mrf.mxu1 }
 0x813   :  { %v7408_v49 = vadd.f32 %v7407_v25, %v7218_v33  ;;  %15162 = vmatprep.mubr.msk.bf16.mxu1 %vm7506_vm6, %v7594_v48 }
 0x814   :  { %v15100_v13 = vpop.f32.mrf.mxu1  ;;  %v7535_v36 = vld [vmem:[#allocation2 + $0x18] sm:$0xff] }
 0x815   :  { %7512 = vst.msk [vmem:[#allocation2 + $0x28] sm:$0xff] %vm7506_vm6, %v7408_v49  ;;  %v7556_v2 = vpack.c.bf16 %v7535_v36, %v7534_v26  ;;  %v7573_v6 = vld [vmem:[#allocation2 + $0x11] sm:$0xff] }
 0x816   :  { %v7412_v52 = vpop.f32.mrf.mxu1 }
 0x817   :  { %v7413_v30 = vadd.f32 %v7412_v52, %v7223_v56  ;;  %15191 = vmatmul.mubr.msk.bf16.vlgmr.msra.gmra.mxu0 %vm7506_vm6, %v7556_v2  ;;  %v7243_v56 = vadd.f32 %v21583_v32, %v21389_v7 }
 0x818   :  { %v15103_v14 = vpop.f32.mrf.mxu1  ;;  %v7574_v62 = vld [vmem:[#allocation2 + $0x19] sm:$0xff]  ;;  %15243 = vmatpush3.bf16.msra.mxu0 %v21604_v23 }
 0x819   :  { %7513 = vst.msk [vmem:[#allocation2 + $0x30] sm:$0xff] %vm7506_vm6, %v7413_v30  ;;  %v7595_v44 = vpack.c.bf16 %v7574_v62, %v7573_v6  ;;  %15244 = vmatprep.subr.bf16.mxu0 %v15732_v54  ;;  %v7536_v41 = vld [vmem:[#allocation2 + $0x20] sm:$0xff]  ;;  %v7248_v14 = vadd.f32 %v21585_v5, %v21397_v42 }
 0x81a   :  { %v7417_v21 = vpop.f32.mrf.mxu1 }
 0x81b   :  { %v7418_v63 = vadd.f32 %v7417_v21, %v7228_v10  ;;  %15163 = vmatmul.mubr.msk.bf16.vlgmr.msra.gmra.mxu1 %vm7506_vm6, %v7595_v44 }
 0x81c   :  { %v15106_v23 = vpop.f32.mrf.mxu1  ;;  %v7537_v57 = vld [vmem:[#allocation2 + $0x28] sm:$0xff]  ;;  %15215 = vmatpush3.bf16.msra.mxu1 %v21609_v3  ;;  %15245 = vmatpush3.bf16.msra.mxu0 %v15732_v54 }
 0x81d   :  { %7514 = vst.msk [vmem:[#allocation2 + $0x38] sm:$0xff] %vm7506_vm6, %v7418_v63  ;;  %v7557_v1 = vpack.c.bf16 %v7537_v57, %v7536_v41  ;;  %15216 = vmatprep.subr.bf16.mxu1 %v15733_v37  ;;  %15298 = vmatprep.subr.bf16.mxu0 %v21658_v0  ;;  %v7575_v33 = vld [vmem:[#allocation2 + $0x21] sm:$0xff]  ;;  %v7258_v57 = vadd.f32 %v21589_v59, %v21413_v38 }
 0x81e   :  { %v7422_v55 = vpop.f32.mrf.mxu1 }
 0x81f   :  { %v7423_v51 = vadd.f32 %v7422_v55, %v7233_v12  ;;  %15194 = vmatprep.mubr.msk.bf16.mxu0 %vm7506_vm6, %v7557_v1 }
 0x820   :  { %v15109_v3 = vpop.f32.mrf.mxu1  ;;  %v7576_v48 = vld [vmem:[#allocation2 + $0x29] sm:$0xff]  ;;  %15217 = vmatpush3.bf16.msra.mxu1 %v15733_v37  ;;  %v7253_v37 = vadd.f32 %v21587_v53, %v21405_v39 }
 0x821   :  { %7515 = vst.msk [vmem:[#allocation2 + $0x40] sm:$0xff] %vm7506_vm6, %v7423_v51  ;;  %v7596_v24 = vpack.c.bf16 %v7576_v48, %v7575_v33  ;;  %15270 = vmatprep.subr.bf16.mxu1 %v21669_v60  ;;  %v7538_v26 = vld [vmem:[#allocation2 + $0x30] sm:$0xff]  ;;  %v7263_v3 = vadd.f32 %v21591_v11, %v21421_v40 }
 0x822   :  { %v7427_v25 = vpop.f32.mrf.mxu1 }
 0x823   :  { %v7428_v49 = vadd.f32 %v7427_v25, %v7238_v47  ;;  %15166 = vmatprep.mubr.msk.bf16.mxu1 %vm7506_vm6, %v7596_v24  ;;  %v7268_v25 = vadd.f32 %v21593_v58, %v21429_v27 }
 0x824   :  { %v15112_v13 = vpop.f32.mrf.mxu1  ;;  %v7539_v36 = vld [vmem:[#allocation2 + $0x38] sm:$0xff] }
 0x825   :  { %7516 = vst.msk [vmem:[#allocation2 + $0x48] sm:$0xff] %vm7506_vm6, %v7428_v49  ;;  %v7558_v2 = vpack.c.bf16 %v7539_v36, %v7538_v26  ;;  %v7577_v52 = vld [vmem:[#allocation2 + $0x31] sm:$0xff] }
 0x826   :  { %v7432_v54 = vpop.f32.mrf.mxu1 }
 0x827   :  { %v7433_v34 = vadd.f32 %v7432_v54, %v7243_v56  ;;  %15195 = vmatmul.mubr.msk.bf16.gmra.mxu0 %vm7506_vm6, %v7558_v2  ;;  %v7273_v56 = vadd.f32 %v21595_v18, %v21437_v46 }
 0x828   :  { %v15115_v17 = vpop.f32.mrf.mxu1  ;;  %v7578_v30 = vld [vmem:[#allocation2 + $0x39] sm:$0xff] }
 0x829   :  { %7517 = vst.msk [vmem:[#allocation2 + $0x50] sm:$0xff] %vm7506_vm6, %v7433_v34  ;;  %v7597_v6 = vpack.c.bf16 %v7578_v30, %v7577_v52  ;;  %v7540_v32 = vld [vmem:[#allocation2 + $0x40] sm:$0xff]  ;;  %v7278_v52 = vadd.f32 %v21597_v29, %v21445_v8 }
 0x82a   :  { %v7437_v62 = vpop.f32.mrf.mxu1 }
 0x82b   :  { %v7438_v10 = vadd.f32 %v7437_v62, %v7248_v14  ;;  %15167 = vmatmul.mubr.msk.bf16.gmra.mxu1 %vm7506_vm6, %v7597_v6 }
 0x82c   :  { %v15118_v7 = vpop.f32.mrf.mxu1  ;;  %v7541_v44 = vld [vmem:[#allocation2 + $0x48] sm:$0xff] }
 0x82d   :  { %7518 = vst.msk [vmem:[#allocation2 + $0x58] sm:$0xff] %vm7506_vm6, %v7438_v10  ;;  %v7559_v21 = vpack.c.bf16 %v7541_v44, %v7540_v32  ;;  %v7579_v5 = vld [vmem:[#allocation2 + $0x41] sm:$0xff]  ;;  %v7283_v10 = vadd.f32 %v21599_v22, %v21453_v9 }
 0x82e   :  { %v7442_v63 = vpop.f32.mrf.mxu1 }
 0x82f   :  { %v7443_v23 = vadd.f32 %v7442_v63, %v7253_v37  ;;  %15198 = vmatprep.mubr.msk.bf16.mxu0 %vm7506_vm6, %v7559_v21  ;;  %v7288_v21 = vadd.f32 %v21613_v15, %v21461_v4 }
 0x830   :  { %v15121_v42 = vpop.f32.mrf.mxu1  ;;  %v7580_v41 = vld [vmem:[#allocation2 + $0x49] sm:$0xff] }
 0x831   :  { %7519 = vst.msk [vmem:[#allocation2 + $0x60] sm:$0xff] %vm7506_vm6, %v7443_v23  ;;  %v7598_v12 = vpack.c.bf16 %v7580_v41, %v7579_v5  ;;  %v7542_v53 = vld [vmem:[#allocation2 + $0x50] sm:$0xff]  ;;  %v7293_v41 = vadd.f32 %v21615_v50, %v21469_v31 }
 0x832   :  { %v7447_v1 = vpop.f32.mrf.mxu1 }
 0x833   :  { %v7448_v55 = vadd.f32 %v7447_v1, %v7258_v57  ;;  %15170 = vmatprep.mubr.msk.bf16.mxu1 %vm7506_vm6, %v7598_v12 }
 0x834   :  { %v15124_v39 = vpop.f32.mrf.mxu1  ;;  %v7543_v51 = vld [vmem:[#allocation2 + $0x58] sm:$0xff] }
 0x835   :  { %7520 = vst.msk [vmem:[#allocation2 + $0x68] sm:$0xff] %vm7506_vm6, %v7448_v55  ;;  %v7560_v33 = vpack.c.bf16 %v7543_v51, %v7542_v53  ;;  %v7581_v59 = vld [vmem:[#allocation2 + $0x51] sm:$0xff]  ;;  %v7298_v39 = vadd.f32 %v21617_v61, %v21477_v45 }
 0x836   :  { %v7452_v48 = vpop.f32.mrf.mxu1 }
 0x837   :  { %v7453_v47 = vadd.f32 %v7452_v48, %v7263_v3  ;;  %15199 = vmatmul.mubr.msk.bf16.gmra.mxu0 %vm7506_vm6, %v7560_v33  ;;  %v7303_v48 = vadd.f32 %v21619_v16, %v21491_v19 }
 0x838   :  { %v15127_v38 = vpop.f32.mrf.mxu1  ;;  %v7582_v24 = vld [vmem:[#allocation2 + $0x59] sm:$0xff] }
 0x839   :  { %7521 = vst.msk [vmem:[#allocation2 + $0x70] sm:$0xff] %vm7506_vm6, %v7453_v47  ;;  %v7599_v49 = vpack.c.bf16 %v7582_v24, %v7581_v59  ;;  %v7544_v11 = vld [vmem:[#allocation2 + $0x60] sm:$0xff] }
 0x83a   :  { %v7457_v13 = vpop.f32.mrf.mxu1 }
 0x83b   :  { %v7458_v26 = vadd.f32 %v7457_v13, %v7268_v25  ;;  %15171 = vmatmul.mubr.msk.bf16.gmra.mxu1 %vm7506_vm6, %v7599_v49  ;;  %v7308_v25 = vadd.f32 %v21621_v35, %v21499_v43  ;;  %v8202_v35 = vld [vmem:[#allocation2 + $0xa] sm:$0xff] }
 0x83c   :  { %v15130_v40 = vpop.f32.mrf.mxu1  ;;  %v7545_v36 = vld [vmem:[#allocation2 + $0x68] sm:$0xff] }
 0x83d   :  { %7522 = vst.msk [vmem:[#allocation2 + $0x78] sm:$0xff] %vm7506_vm6, %v7458_v26  ;;  %v7561_v2 = vpack.c.bf16 %v7545_v36, %v7544_v11  ;;  %v7583_v58 = vld [vmem:[#allocation2 + $0x61] sm:$0xff]  ;;  %v7313_v11 = vadd.f32 %v21623_v28, %v21507_v20 }
 0x83e   :  { %v7462_v54 = vpop.f32.mrf.mxu1  ;;  %v7963_v28 = vld [vmem:[#allocation2 + $0x2] sm:$0xff] }
 0x83f   :  { %v7463_v34 = vadd.f32 %v7462_v54, %v7273_v56  ;;  %15202 = vmatprep.mubr.msk.bf16.mxu0 %vm7506_vm6, %v7561_v2  ;;  %v8203_v54 = vld [vmem:[#allocation2 + $0x12] sm:$0xff] }
 0x840   :  { %v15133_v27 = vpop.f32.mrf.mxu1  ;;  %v7584_v17 = vld [vmem:[#allocation2 + $0x69] sm:$0xff]  ;;  %v8225_v20 = vpack.c.bf16 %v8203_v54, %v8202_v35 }
 0x841   :  { %7523 = vst.msk [vmem:[#allocation2 + $0x80] sm:$0xff] %vm7506_vm6, %v7463_v34  ;;  %v7600_v30 = vpack.c.bf16 %v7584_v17, %v7583_v58  ;;  %v7546_v18 = vld [vmem:[#allocation2 + $0x70] sm:$0xff] }
 0x842   :  { %v7467_v14 = vpop.f32.mrf.mxu1 }
 0x843   :  { %v7468_v6 = vadd.f32 %v7467_v14, %v7278_v52  ;;  %15174 = vmatprep.mubr.msk.bf16.mxu1 %vm7506_vm6, %v7600_v30 }
 0x844   :  { %v15136_v46 = vpop.f32.mrf.mxu1  ;;  %v7547_v62 = vld [vmem:[#allocation2 + $0x78] sm:$0xff] }
 0x845   :  { %7524 = vst.msk [vmem:[#allocation2 + $0x88] sm:$0xff] %vm7506_vm6, %v7468_v6  ;;  %v7562_v7 = vpack.c.bf16 %v7547_v62, %v7546_v18  ;;  %v7585_v29 = vld [vmem:[#allocation2 + $0x71] sm:$0xff]  ;;  %v7986_v6 = vpack.c.bf16 %v8202_v35, %v7963_v28  ;;  %v8205_v46 = vld [vmem:[#allocation2 + $0x22] sm:$0xff]  ;;  %v8204_v18 = vld [vmem:[#allocation2 + $0x1a] sm:$0xff] }
 0x846   :  { %v7472_v32 = vpop.f32.mrf.mxu1  ;;  %v8207_v62 = vld [vmem:[#allocation2 + $0x32] sm:$0xff] }
 0x847   :  { %v7473_v44 = vadd.f32 %v7472_v32, %v7283_v10  ;;  %15203 = vmatmul.mubr.msk.bf16.gmra.mxu0 %vm7506_vm6, %v7562_v7  ;;  %v8206_v10 = vld [vmem:[#allocation2 + $0x2a] sm:$0xff]  ;;  %v8226_v7 = vpack.c.bf16 %v8205_v46, %v8204_v18  ;;  %v7987_v32 = vpack.c.bf16 %v8204_v18, %v8203_v54 }
 0x848   :  { %v15139_v8 = vpop.f32.mrf.mxu1  ;;  %v7586_v37 = vld [vmem:[#allocation2 + $0x79] sm:$0xff]  ;;  %v8441_v35 = vld [vmem:[#allocation2 + $0xb] sm:$0xff] }
 0x849   :  { %7525 = vst.msk [vmem:[#allocation2 + $0x90] sm:$0xff] %vm7506_vm6, %v7473_v44  ;;  %v7601_v63 = vpack.c.bf16 %v7586_v37, %v7585_v29  ;;  %v7548_v22 = vld [vmem:[#allocation2 + $0x80] sm:$0xff]  ;;  %v8227_v44 = vpack.c.bf16 %v8207_v62, %v8206_v10  ;;  %v15736_v8 = vld [vmem:[%s23181_s4 + $0x50] sm:$0xff]   ;;  %v7988_v29 = vpack.c.bf16 %v8206_v10, %v8205_v46 }
 0x84a   :  { %v7477_v23 = vpop.f32.mrf.mxu1  ;;  %v15737_v37 = vld [vmem:[%s23181_s4 + $0x40] sm:$0xff]   ;;  %v8445_v46 = vld [vmem:[#allocation2 + $0x2b] sm:$0xff] }
 0x84b   :  { %v7478_v42 = vadd.f32 %v7477_v23, %v7288_v21  ;;  %15175 = vmatmul.mubr.msk.bf16.gmra.mxu1 %vm7506_vm6, %v7601_v63  ;;  %v8209_v21 = vld [vmem:[#allocation2 + $0x42] sm:$0xff]  ;;  %v21758_v63 = vld [vmem:[%s23181_s4 + $0x78] sm:$0xff]   ;;  %v15740_v18 = vld [vmem:[%s23181_s4 + $0x70] sm:$0xff]  }
 0x84c   :  { %v15142_v9 = vpop.f32.mrf.mxu1  ;;  %v7549_v5 = vld [vmem:[#allocation2 + $0x88] sm:$0xff]  ;;  %v8208_v23 = vld [vmem:[#allocation2 + $0x3a] sm:$0xff] }
 0x84d   :  { %7526 = vst.msk [vmem:[#allocation2 + $0x98] sm:$0xff] %vm7506_vm6, %v7478_v42  ;;  %v7563_v57 = vpack.c.bf16 %v7549_v5, %v7548_v22  ;;  %v7587_v15 = vld [vmem:[#allocation2 + $0x81] sm:$0xff]  ;;  %v8211_v42 = vld [vmem:[#allocation2 + $0x52] sm:$0xff]  ;;  %v8210_v22 = vld [vmem:[#allocation2 + $0x4a] sm:$0xff]  ;;  %v8228_v5 = vpack.c.bf16 %v8209_v21, %v8208_v23 }
 0x84e   :  { %v7482_v12 = vpop.f32.mrf.mxu1  ;;  %v21763_v9 = vld [vmem:[%s23181_s4 + $0x68] sm:$0xff]   ;;  %v15741_v10 = vld [vmem:[%s23181_s4 + $0x60] sm:$0xff]  }
 0x84f   :  { %v7483_v1 = vadd.f32 %v7482_v12, %v7293_v41  ;;  %15206 = vmatprep.mubr.msk.bf16.mxu0 %vm7506_vm6, %v7563_v57  ;;  %v8229_v41 = vpack.c.bf16 %v8211_v42, %v8210_v22  ;;  %v8213_v57 = vld [vmem:[#allocation2 + $0x62] sm:$0xff]  ;;  %v8212_v12 = vld [vmem:[#allocation2 + $0x5a] sm:$0xff] }
 0x850   :  { %v15145_v4 = vpop.f32.mrf.mxu1  ;;  %v7588_v55 = vld [vmem:[#allocation2 + $0x89] sm:$0xff] }
 0x851   :  { %7527 = vst.msk [vmem:[#allocation2 + $0xa0] sm:$0xff] %vm7506_vm6, %v7483_v1  ;;  %v7602_v53 = vpack.c.bf16 %v7588_v55, %v7587_v15  ;;  %v7550_v50 = vld [vmem:[#allocation2 + $0x90] sm:$0xff]  ;;  %v8230_v15 = vpack.c.bf16 %v8213_v57, %v8212_v12  ;;  %v7991_v55 = vpack.c.bf16 %v8212_v12, %v8211_v42  ;;  %v21841_v12 = vld [vmem:[#allocation2 + $0x5c] sm:$0xff] }
 0x852   :  { %v7487_v51 = vpop.f32.mrf.mxu1  ;;  %v8215_v1 = vld [vmem:[#allocation2 + $0x72] sm:$0xff]  ;;  %v8214_v4 = vld [vmem:[#allocation2 + $0x6a] sm:$0xff] }
 0x853   :  { %v7488_v3 = vadd.f32 %v7487_v51, %v7298_v39  ;;  %15178 = vmatprep.mubr.msk.bf16.mxu1 %vm7506_vm6, %v7602_v53  ;;  %v8231_v39 = vpack.c.bf16 %v8215_v1, %v8214_v4  ;;  %v7992_v53 = vpack.c.bf16 %v8214_v4, %v8213_v57  ;;  %v8217_v51 = vld [vmem:[#allocation2 + $0x82] sm:$0xff]  ;;  %v21839_v57 = vld [vmem:[#allocation2 + $0x74] sm:$0xff] }
 0x854   :  { %v15148_v31 = vpop.f32.mrf.mxu1  ;;  %v7551_v33 = vld [vmem:[#allocation2 + $0x98] sm:$0xff] }
 0x855   :  { %7528 = vst.msk [vmem:[#allocation2 + $0xa8] sm:$0xff] %vm7506_vm6, %v7488_v3  ;;  %v7564_v47 = vpack.c.bf16 %v7551_v33, %v7550_v50  ;;  %v7589_v61 = vld [vmem:[#allocation2 + $0x91] sm:$0xff]  ;;  %v8216_v3 = vld [vmem:[#allocation2 + $0x7a] sm:$0xff] }
 0x856   :  { %v7492_v38 = vpop.f32.mrf.mxu1  ;;  %v8219_v31 = vld [vmem:[#allocation2 + $0x92] sm:$0xff]  ;;  %v8218_v50 = vld [vmem:[#allocation2 + $0x8a] sm:$0xff]  ;;  %v8232_v33 = vpack.c.bf16 %v8217_v51, %v8216_v3 }
 0x857   :  { %v7493_v59 = vadd.f32 %v7492_v38, %v7303_v48  ;;  %15207 = vmatmul.mubr.msk.bf16.gmra.mxu0 %vm7506_vm6, %v7564_v47  ;;  %v7993_v48 = vpack.c.bf16 %v8216_v3, %v8215_v1  ;;  %v8233_v47 = vpack.c.bf16 %v8219_v31, %v8218_v50  ;;  %v7994_v38 = vpack.c.bf16 %v8218_v50, %v8217_v51  ;;  %v8454_v1 = vld [vmem:[#allocation2 + $0x73] sm:$0xff]  ;;  %v8453_v51 = vld [vmem:[#allocation2 + $0x6b] sm:$0xff]  ;;  %v8456_v50 = vld [vmem:[#allocation2 + $0x83] sm:$0xff] }
 0x858   :  { %v15151_v45 = vpop.f32.mrf.mxu1  ;;  %v7590_v24 = vld [vmem:[#allocation2 + $0x99] sm:$0xff]  ;;  %v8470_v3 = vpack.c.bf16 %v8454_v1, %v8453_v51 }
 0x859   :  { %7529 = vst.msk [vmem:[#allocation2 + $0xb0] sm:$0xff] %vm7506_vm6, %v7493_v59  ;;  %v7603_v49 = vpack.c.bf16 %v7590_v24, %v7589_v61  ;;  %v7552_v16 = vld [vmem:[#allocation2 + $0xa0] sm:$0xff] }
 0x85a   :  { %v7497_v13 = vpop.f32.mrf.mxu1  ;;  %v8220_v45 = vld [vmem:[#allocation2 + $0x9a] sm:$0xff] }
 0x85b   :  { %v7498_v26 = vadd.f32 %v7497_v13, %v7308_v25  ;;  %15179 = vmatmul.mubr.msk.bf16.gmra.mxu1 %vm7506_vm6, %v7603_v49  ;;  %v7995_v49 = vpack.c.bf16 %v8220_v45, %v8219_v31  ;;  %v21853_v31 = vld [vmem:[#allocation2 + $0x84] sm:$0xff] }
 0x85c   :  { %v15154_v19 = vpop.f32.mrf.mxu1  ;;  %v7553_v40 = vld [vmem:[#allocation2 + $0xa8] sm:$0xff] }
 0x85d   :  { %7530 = vst.msk [vmem:[#allocation2 + $0xb8] sm:$0xff] %vm7506_vm6, %v7498_v26  ;;  %v7565_v36 = vpack.c.bf16 %v7553_v40, %v7552_v16  ;;  %v7591_v43 = vld [vmem:[#allocation2 + $0xa1] sm:$0xff]  ;;  %v21783_v40 = vld [vmem:[#allocation2 + $0x14] sm:$0xff] }
 0x85e   :  { %v7502_v56 = vpop.f32.mrf.mxu1  ;;  %v8221_v59 = vld [vmem:[#allocation2 + $0xa2] sm:$0xff] }
 0x85f   :  { %v7503_v2 = vadd.f32 %v7502_v56, %v7313_v11  ;;  %15210 = vmatprep.mubr.msk.bf16.mxu0 %vm7506_vm6, %v7565_v36  ;;  %v8234_v25 = vpack.c.bf16 %v8221_v59, %v8220_v45  ;;  %v8442_v11 = vld [vmem:[#allocation2 + $0x13] sm:$0xff] }
 0x860   :  { %v7592_v34 = vld [vmem:[#allocation2 + $0xa9] sm:$0xff]  ;;  %v7593_v58 = vld [vmem:[#allocation2 + $0xb1] sm:$0x3]  ;;  %v15157_v17 = vpop.f32.mrf.mxu1  ;;  %v8464_v54 = vpack.c.bf16 %v8442_v11, %v8441_v35 }
 0x861   :  { %v7554_v27 = vld [vmem:[#allocation2 + $0xb0] sm:$0x3]  ;;  %7531 = vst.msk [vmem:[#allocation2 + $0xc0] sm:$0xff] %vm7506_vm6, %v7503_v2  ;;  %v7604_v52 = vpack.c.bf16 %v7592_v34, %v7591_v43  ;;  %v7605_v14 = vpack.c.bf16 %v7593_v58, %v7593_v58  ;;  %v7985_v16 = vld [vmem:[#allocation2 + $0xb2] sm:$0x3]  ;;  %v21790_v34 = vld [vmem:[#allocation2 + $0x24] sm:$0xff] }
 0x862   :  { %v7566_v30 = vpack.c.bf16 %v7554_v27, %v7554_v27  ;;  %v8222_v24 = vld [vmem:[#allocation2 + $0xaa] sm:$0xff]  ;;  %v7997_v2 = vpack.c.bf16 %v7985_v16, %v7985_v16  ;;  %v21792_v58 = vld [vmem:[#allocation2 + $0x34] sm:$0xff]  ;;  %v21794_v17 = vld [vmem:[#allocation2 + $0x1c] sm:$0xff] }
 0x863   :  { %15182 = vmatprep.mubr.msk.bf16.mxu1 %vm7506_vm6, %v7604_v52  ;;  %v7996_v26 = vpack.c.bf16 %v8222_v24, %v8221_v59  ;;  %v8680_v56 = vld [vmem:[#allocation2 + $0xc] sm:$0xff]  ;;  %v8444_v27 = vld [vmem:[#allocation2 + $0x23] sm:$0xff]  ;;  %v8455_v59 = vld [vmem:[#allocation2 + $0x7b] sm:$0xff] }
 0x864   :  { %15211 = vmatmul.mubr.msk.bf16.gmra.mxu0 %vm7506_vm6, %v7566_v30  ;;  %15183 = vmatmul.mubr.msk.bf16.gmra.mxu1 %vm7506_vm6, %v7605_v14  ;;  %v8223_v61 = vld [vmem:[#allocation2 + $0xb2] sm:$0xff]  ;;  %v8224_v19 = vld [vmem:[#allocation2 + $0xba] sm:$0x3]  ;;  %v8703_v43 = vpack.c.bf16 %v21783_v40, %v8680_v56  ;;  %v8704_v30 = vpack.c.bf16 %v21790_v34, %v21794_v17  ;;  %v21873_v16 = vld [vmem:[#allocation2 + $0x9c] sm:$0xff] }
 0x865   :  { %15246 = vmatprep.mubr.msk.bf16.mxu0 %vm7506_vm6, %v8225_v20  ;;  %15218 = vmatprep.mubr.msk.bf16.mxu1 %vm7506_vm6, %v7986_v6  ;;  %v8235_v13 = vpack.c.bf16 %v8223_v61, %v8222_v24  ;;  %v8236_v36 = vpack.c.bf16 %v8224_v19, %v8224_v19  ;;  %v8446_v52 = vld [vmem:[#allocation2 + $0x33] sm:$0xff]  ;;  %v8443_v14 = vld [vmem:[#allocation2 + $0x1b] sm:$0xff]  ;;  %v8471_v61 = vpack.c.bf16 %v8456_v50, %v8455_v59 }
 0x866   :  { %v21798_v20 = vld [vmem:[#allocation2 + $0x2c] sm:$0xff]  ;;  %v8465_v28 = vpack.c.bf16 %v8444_v27, %v8443_v14  ;;  %v21871_v19 = vld [vmem:[#allocation2 + $0xb4] sm:$0xff]  ;;  %v9159_v14 = vld [vmem:[#allocation2 + $0x1d] sm:$0xff] }
 0x867   :  { %v8705_v6 = vpack.c.bf16 %v21792_v58, %v21798_v20  ;;  %v21861_v45 = vld [vmem:[#allocation2 + $0x8c] sm:$0xff]  ;;  %v8459_v56 = vld [vmem:[#allocation2 + $0x9b] sm:$0xff] }
 0x868   :  { %v8462_v11 = vld [vmem:[#allocation2 + $0xb3] sm:$0xff] }
 0x869   :  { %v9173_v59 = vld [vmem:[#allocation2 + $0x8d] sm:$0xff] }
 0x86c   :  { %15247 = vmatmul.mubr.msk.bf16.vlgmr.msra.gmra.mxu0 %vm7506_vm6, %v8226_v7  ;;  %15219 = vmatmul.mubr.msk.bf16.vlgmr.msra.gmra.mxu1 %vm7506_vm6, %v7987_v32  ;;  %v21813_v7 = vld [vmem:[#allocation2 + $0x44] sm:$0xff] }
 0x86d   :  { %15250 = vmatprep.mubr.msk.bf16.mxu0 %vm7506_vm6, %v8227_v44  ;;  %15222 = vmatprep.mubr.msk.bf16.mxu1 %vm7506_vm6, %v7988_v29  ;;  %v8448_v32 = vld [vmem:[#allocation2 + $0x43] sm:$0xff]  ;;  %v21816_v44 = vld [vmem:[#allocation2 + $0x54] sm:$0xff] }
 0x86e   :  { %15299 = vmatpush3.bf16.msra.mxu0 %v21658_v0  ;;  %15271 = vmatpush3.bf16.msra.mxu1 %v21669_v60  ;;  %v7989_v0 = vpack.c.bf16 %v8208_v23, %v8207_v62  ;;  %v7990_v60 = vpack.c.bf16 %v8210_v22, %v8209_v21  ;;  %v8466_v62 = vpack.c.bf16 %v8446_v52, %v8445_v46  ;;  %v21823_v29 = vld [vmem:[#allocation2 + $0x3c] sm:$0xff]  ;;  %v21827_v23 = vld [vmem:[#allocation2 + $0x4c] sm:$0xff] }
 0x86f   :  { %15300 = vmatprep.subr.bf16.mxu0 %v15736_v8  ;;  %15272 = vmatprep.subr.bf16.mxu1 %v15737_v37  ;;  %v8706_v21 = vpack.c.bf16 %v21813_v7, %v21823_v29  ;;  %v8449_v22 = vld [vmem:[#allocation2 + $0x4b] sm:$0xff]  ;;  %v8702_v52 = vld [vmem:[#allocation2 + $0xbc] sm:$0x3]  ;;  %v8945_v1 = vpack.c.bf16 %v21827_v23, %v21813_v7 }
 0x870   :  { %v9170_v7 = vld [vmem:[#allocation2 + $0x75] sm:$0xff] }
 0x872   :  { %15301 = vmatpush3.bf16.msra.mxu0 %v15736_v8  ;;  %15273 = vmatpush3.bf16.msra.mxu1 %v15737_v37  ;;  %v21821_v8 = vld [vmem:[%s23181_s4 + $0x88] sm:$0xff]   ;;  %v8450_v37 = vld [vmem:[#allocation2 + $0x53] sm:$0xff] }
 0x873   :  { %15354 = vmatprep.subr.bf16.mxu0 %v21758_v63  ;;  %15326 = vmatprep.subr.bf16.mxu1 %v21763_v9 }
 0x874   :  { %15251 = vmatmul.mubr.msk.bf16.gmra.mxu0 %vm7506_vm6, %v8228_v5  ;;  %15223 = vmatmul.mubr.msk.bf16.gmra.mxu1 %vm7506_vm6, %v7989_v0  ;;  %v23514_v5 = vmov 0.0   ;;  %v8468_v0 = vpack.c.bf16 %v8450_v37, %v8449_v22  ;;  %v9160_v37 = vld [vmem:[#allocation2 + $0x25] sm:$0xff] }
 0x875   :  { %15254 = vmatprep.mubr.msk.bf16.mxu0 %vm7506_vm6, %v8229_v41  ;;  %15226 = vmatprep.mubr.msk.bf16.mxu1 %vm7506_vm6, %v7990_v60  ;;  %v21837_v41 = vld [vmem:[#allocation2 + $0x64] sm:$0xff] }
 0x876   :  { %v8452_v60 = vld [vmem:[#allocation2 + $0x63] sm:$0xff]  ;;  %v8708_v4 = vpack.c.bf16 %v21837_v41, %v21841_v12 }
 0x877   :  { %v15743_v22 = vld [vmem:[%s23181_s4 + $0x80] sm:$0xff]  }
 0x87c   :  { %15255 = vmatmul.mubr.msk.bf16.gmra.mxu0 %vm7506_vm6, %v8230_v15  ;;  %15227 = vmatmul.mubr.msk.bf16.gmra.mxu1 %vm7506_vm6, %v7991_v55  ;;  %v8451_v15 = vld [vmem:[#allocation2 + $0x5b] sm:$0xff]  ;;  %v21845_v55 = vld [vmem:[#allocation2 + $0x6c] sm:$0xff] }
 0x87d   :  { %15258 = vmatprep.mubr.msk.bf16.mxu0 %vm7506_vm6, %v8231_v39  ;;  %15230 = vmatprep.mubr.msk.bf16.mxu1 %vm7506_vm6, %v7992_v53  ;;  %v8469_v39 = vpack.c.bf16 %v8452_v60, %v8451_v15  ;;  %v8709_v53 = vpack.c.bf16 %v21839_v57, %v21845_v55  ;;  %v9166_v60 = vld [vmem:[#allocation2 + $0x55] sm:$0xff]  ;;  %v9171_v15 = vld [vmem:[#allocation2 + $0x7d] sm:$0xff] }
 0x884   :  { %15259 = vmatmul.mubr.msk.bf16.gmra.mxu0 %vm7506_vm6, %v8232_v33  ;;  %15231 = vmatmul.mubr.msk.bf16.gmra.mxu1 %vm7506_vm6, %v7993_v48  ;;  %v21855_v33 = vld [vmem:[#allocation2 + $0x94] sm:$0xff]  ;;  %v21857_v48 = vld [vmem:[#allocation2 + $0x7c] sm:$0xff] }
 0x885   :  { %15262 = vmatprep.mubr.msk.bf16.mxu0 %vm7506_vm6, %v8233_v47  ;;  %15234 = vmatprep.mubr.msk.bf16.mxu1 %vm7506_vm6, %v7994_v38  ;;  %v8458_v47 = vld [vmem:[#allocation2 + $0x93] sm:$0xff]  ;;  %v8710_v38 = vpack.c.bf16 %v21853_v31, %v21857_v48  ;;  %v8711_v24 = vpack.c.bf16 %v21855_v33, %v21861_v45 }
 0x88c   :  { %15263 = vmatmul.mubr.msk.bf16.gmra.mxu0 %vm7506_vm6, %v8234_v25  ;;  %15235 = vmatmul.mubr.msk.bf16.gmra.mxu1 %vm7506_vm6, %v7995_v49  ;;  %v8457_v25 = vld [vmem:[#allocation2 + $0x8b] sm:$0xff] }
 0x88d   :  { %15266 = vmatprep.mubr.msk.bf16.mxu0 %vm7506_vm6, %v8235_v13  ;;  %15238 = vmatprep.mubr.msk.bf16.mxu1 %vm7506_vm6, %v7996_v26  ;;  %v8472_v49 = vpack.c.bf16 %v8458_v47, %v8457_v25  ;;  %v21869_v13 = vld [vmem:[#allocation2 + $0xa4] sm:$0xff] }
 0x88e   :  { %v8460_v26 = vld [vmem:[#allocation2 + $0xa3] sm:$0xff] }
 0x894   :  { %15267 = vmatmul.mubr.msk.bf16.gmra.mxu0 %vm7506_vm6, %v8236_v36  ;;  %15239 = vmatmul.mubr.msk.bf16.gmra.mxu1 %vm7506_vm6, %v7997_v2  ;;  %v8712_v36 = vpack.c.bf16 %v21869_v13, %v21873_v16  ;;  %v21877_v2 = vld [vmem:[#allocation2 + $0xac] sm:$0xff] }
 0x895   :  { %15302 = vmatprep.mubr.msk.bf16.mxu0 %vm7506_vm6, %v8703_v43  ;;  %15274 = vmatprep.mubr.msk.bf16.mxu1 %vm7506_vm6, %v8464_v54  ;;  %v8473_v43 = vpack.c.bf16 %v8460_v26, %v8459_v56  ;;  %v8713_v35 = vpack.c.bf16 %v21871_v19, %v21877_v2  ;;  %v8461_v54 = vld [vmem:[#allocation2 + $0xab] sm:$0xff]  ;;  %v8950_v56 = vpack.c.bf16 %v21873_v16, %v21855_v33 }
 0x896   :  { %v8474_v27 = vpack.c.bf16 %v8462_v11, %v8461_v54  ;;  %v8949_v11 = vpack.c.bf16 %v21861_v45, %v21853_v31  ;;  %v9179_v54 = vld [vmem:[#allocation2 + $0xbd] sm:$0xff]  ;;  %v9178_v45 = vld [vmem:[#allocation2 + $0xb5] sm:$0xff] }
 0x89c   :  { %15303 = vmatmul.mubr.msk.bf16.vlgmr.msra.gmra.mxu0 %vm7506_vm6, %v8704_v30  ;;  %15275 = vmatmul.mubr.msk.bf16.vlgmr.msra.gmra.mxu1 %vm7506_vm6, %v8465_v28  ;;  %v8463_v30 = vld [vmem:[#allocation2 + $0xbb] sm:$0x3]  ;;  %v8714_v28 = vpack.c.bf16 %v8702_v52, %v8702_v52 }
 0x89d   :  { %15306 = vmatprep.mubr.msk.bf16.mxu0 %vm7506_vm6, %v8705_v6  ;;  %15278 = vmatprep.mubr.msk.bf16.mxu1 %vm7506_vm6, %v8466_v62  ;;  %v9158_v6 = vld [vmem:[#allocation2 + $0x15] sm:$0xff]  ;;  %v8475_v46 = vpack.c.bf16 %v8463_v30, %v8463_v30  ;;  %v8942_v62 = vpack.c.bf16 %v21794_v17, %v21783_v40  ;;  %v8944_v40 = vpack.c.bf16 %v21823_v29, %v21792_v58  ;;  %v9165_v17 = vld [vmem:[#allocation2 + $0x4d] sm:$0xff] }
 0x89e   :  { %15355 = vmatpush3.bf16.msra.mxu0 %v21758_v63  ;;  %15327 = vmatpush3.bf16.msra.mxu1 %v21763_v9  ;;  %v8447_v63 = vld [vmem:[#allocation2 + $0x3b] sm:$0xff]  ;;  %v8707_v9 = vpack.c.bf16 %v21816_v44, %v21827_v23  ;;  %v8946_v58 = vpack.c.bf16 %v21841_v12, %v21816_v44  ;;  %v8947_v23 = vpack.c.bf16 %v21845_v55, %v21837_v41 }
 0x89f   :  { %15356 = vmatprep.subr.bf16.mxu0 %v15740_v18  ;;  %15328 = vmatprep.subr.bf16.mxu1 %v15741_v10  ;;  %v8467_v42 = vpack.c.bf16 %v8448_v32, %v8447_v63  ;;  %v9163_v32 = vld [vmem:[#allocation2 + $0x3d] sm:$0xff]  ;;  %v9162_v63 = vld [vmem:[#allocation2 + $0x35] sm:$0xff]  ;;  %v8948_v44 = vpack.c.bf16 %v21857_v48, %v21839_v57 }
 0x8a0   :  { %v9175_v55 = vld [vmem:[#allocation2 + $0x9d] sm:$0xff]  ;;  %v9174_v48 = vld [vmem:[#allocation2 + $0x95] sm:$0xff] }
 0x8a1   :  { %v8940_v52 = vld [vmem:[#allocation2 + $0xbc] sm:$0xff] }
 0x8a2   :  { %15357 = vmatpush3.bf16.msra.mxu0 %v15740_v18  ;;  %15329 = vmatpush3.bf16.msra.mxu1 %v15741_v10  ;;  %v9181_v18 = vpack.c.bf16 %v9159_v14, %v9158_v6  ;;  %v9161_v10 = vld [vmem:[#allocation2 + $0x2d] sm:$0xff]  ;;  %v8951_v14 = vpack.c.bf16 %v21877_v2, %v21869_v13  ;;  %v8952_v16 = vpack.c.bf16 %v8940_v52, %v21871_v19  ;;  %v8941_v13 = vld [vmem:[#allocation2 + $0xc4] sm:$0x3] }
 0x8a3   :  { %9949 = vmatprep.subr.mxu0 %v23514_v5  ;;  %15382 = vmatprep.subr.bf16.mxu1 %v21821_v8  ;;  %v9412_v52 = vld [vmem:[#allocation2 + $0x8e] sm:$0xff] }
 0x8a4   :  { %15307 = vmatmul.mubr.msk.bf16.gmra.mxu0 %vm7506_vm6, %v8706_v21  ;;  %15279 = vmatmul.mubr.msk.bf16.gmra.mxu1 %vm7506_vm6, %v8467_v42  ;;  %v9182_v21 = vpack.c.bf16 %v9161_v10, %v9160_v37  ;;  %v8943_v42 = vpack.c.bf16 %v21798_v20, %v21790_v34  ;;  %v9167_v34 = vld [vmem:[#allocation2 + $0x5d] sm:$0xff]  ;;  %v9164_v20 = vld [vmem:[#allocation2 + $0x45] sm:$0xff] }
 0x8a5   :  { %15310 = vmatprep.mubr.msk.bf16.mxu0 %vm7506_vm6, %v8707_v9  ;;  %15282 = vmatprep.mubr.msk.bf16.mxu1 %vm7506_vm6, %v8468_v0  ;;  %v9183_v9 = vpack.c.bf16 %v9163_v32, %v9162_v63  ;;  %v9184_v0 = vpack.c.bf16 %v9165_v17, %v9164_v20  ;;  %v9398_v32 = vld [vmem:[#allocation2 + $0x1e] sm:$0xff]  ;;  %v9400_v17 = vld [vmem:[#allocation2 + $0x2e] sm:$0xff]  ;;  %v9399_v20 = vld [vmem:[#allocation2 + $0x26] sm:$0xff] }
 0x8ac   :  { %15311 = vmatmul.mubr.msk.bf16.gmra.mxu0 %vm7506_vm6, %v8708_v4  ;;  %15283 = vmatmul.mubr.msk.bf16.gmra.mxu1 %vm7506_vm6, %v8469_v39  ;;  %v9185_v4 = vpack.c.bf16 %v9167_v34, %v9166_v60  ;;  %v9168_v39 = vld [vmem:[#allocation2 + $0x65] sm:$0xff]  ;;  %v9401_v60 = vld [vmem:[#allocation2 + $0x36] sm:$0xff] }
 0x8ad   :  { %15314 = vmatprep.mubr.msk.bf16.mxu0 %vm7506_vm6, %v8709_v53  ;;  %15286 = vmatprep.mubr.msk.bf16.mxu1 %vm7506_vm6, %v8470_v3  ;;  %v9187_v3 = vpack.c.bf16 %v9171_v15, %v9170_v7  ;;  %v9402_v34 = vld [vmem:[#allocation2 + $0x3e] sm:$0xff] }
 0x8b4   :  { %15315 = vmatmul.mubr.msk.bf16.gmra.mxu0 %vm7506_vm6, %v8710_v38  ;;  %15287 = vmatmul.mubr.msk.bf16.gmra.mxu1 %vm7506_vm6, %v8471_v61 }
 0x8b5   :  { %15318 = vmatprep.mubr.msk.bf16.mxu0 %vm7506_vm6, %v8711_v24  ;;  %15290 = vmatprep.mubr.msk.bf16.mxu1 %vm7506_vm6, %v8472_v49  ;;  %v9172_v24 = vld [vmem:[#allocation2 + $0x85] sm:$0xff] }
 0x8b6   :  { %v9188_v57 = vpack.c.bf16 %v9173_v59, %v9172_v24  ;;  %v9410_v24 = vld [vmem:[#allocation2 + $0x7e] sm:$0xff] }
 0x8bc   :  { %15319 = vmatmul.mubr.msk.bf16.gmra.mxu0 %vm7506_vm6, %v8712_v36  ;;  %15291 = vmatmul.mubr.msk.bf16.gmra.mxu1 %vm7506_vm6, %v8473_v43  ;;  %v9189_v36 = vpack.c.bf16 %v9175_v55, %v9174_v48  ;;  %v9177_v43 = vld [vmem:[#allocation2 + $0xad] sm:$0xff]  ;;  %v9409_v48 = vld [vmem:[#allocation2 + $0x76] sm:$0xff] }
 0x8bd   :  { %15322 = vmatprep.mubr.msk.bf16.mxu0 %vm7506_vm6, %v8713_v35  ;;  %15294 = vmatprep.mubr.msk.bf16.mxu1 %vm7506_vm6, %v8474_v27  ;;  %v9176_v27 = vld [vmem:[#allocation2 + $0xa5] sm:$0xff]  ;;  %v9408_v55 = vld [vmem:[#allocation2 + $0x6e] sm:$0xff] }
 0x8be   :  { %v9190_v31 = vpack.c.bf16 %v9177_v43, %v9176_v27 }
 0x8c4   :  { %15323 = vmatmul.mubr.msk.bf16.gmra.mxu0 %vm7506_vm6, %v8714_v28  ;;  %15295 = vmatmul.mubr.msk.bf16.gmra.mxu1 %vm7506_vm6, %v8475_v46  ;;  %v9191_v28 = vpack.c.bf16 %v9179_v54, %v9178_v45  ;;  %v9414_v45 = vld [vmem:[#allocation2 + $0x9e] sm:$0xff] }
 0x8c5   :  { %15358 = vmatprep.mubr.msk.bf16.mxu0 %vm7506_vm6, %v9181_v18  ;;  %15330 = vmatprep.mubr.msk.bf16.mxu1 %vm7506_vm6, %v8942_v62  ;;  %v9180_v62 = vld [vmem:[#allocation2 + $0xc5] sm:$0x3] }
 0x8c6   :  { %v9192_v19 = vpack.c.bf16 %v9180_v62, %v9180_v62 }
 0x8cc   :  { %15359 = vmatmul.mubr.msk.bf16.vlgmr.msra.gmra.mxu0 %vm7506_vm6, %v9182_v21  ;;  %15331 = vmatmul.mubr.msk.bf16.vlgmr.msra.gmra.mxu1 %vm7506_vm6, %v8943_v42  ;;  %v8953_v42 = vpack.c.bf16 %v8941_v13, %v8941_v13  ;;  %v9418_v13 = vld [vmem:[#allocation2 + $0xbe] sm:$0xff] }
 0x8cd   :  { %15362 = vmatprep.mubr.msk.bf16.mxu0 %vm7506_vm6, %v9183_v9  ;;  %15334 = vmatprep.mubr.msk.bf16.mxu1 %vm7506_vm6, %v8944_v40  ;;  %v9397_v9 = vld [vmem:[#allocation2 + $0x16] sm:$0xff] }
 0x8ce   :  { %15383 = vmatpush3.bf16.msra.mxu1 %v21821_v8  ;;  %v9169_v8 = vld [vmem:[#allocation2 + $0x6d] sm:$0xff] }
 0x8cf   :  { %15384 = vmatprep.subr.bf16.mxu1 %v15743_v22  ;;  %v9186_v51 = vpack.c.bf16 %v9169_v8, %v9168_v39 }
 0x8d2   :  { %15385 = vmatpush3.bf16.msra.mxu1 %v15743_v22  ;;  %v9420_v22 = vpack.c.bf16 %v9398_v32, %v9397_v9 }
 0x8d4   :  { %15363 = vmatmul.mubr.msk.bf16.gmra.mxu0 %vm7506_vm6, %v9184_v0  ;;  %15335 = vmatmul.mubr.msk.bf16.gmra.mxu1 %vm7506_vm6, %v8945_v1  ;;  %v9421_v0 = vpack.c.bf16 %v9400_v17, %v9399_v20 }
 0x8d5   :  { %15366 = vmatprep.mubr.msk.bf16.mxu0 %vm7506_vm6, %v9185_v4  ;;  %15338 = vmatprep.mubr.msk.bf16.mxu1 %vm7506_vm6, %v8946_v58  ;;  %v9422_v58 = vpack.c.bf16 %v9402_v34, %v9401_v60 }
 0x8d7   :  { %v15192_v29 = vpop.f32.mrf.mxu0 }
 0x8d9   :  { %v21911_v53 = vpop.f32.mrf.mxu0 }
 0x8db   :  { %v15164_v50 = vpop.f32.mrf.mxu1  ;;  %v15193_v47 = vpop.f32.mrf.mxu0 }
 0x8dc   :  { %15367 = vmatmul.mubr.msk.bf16.gmra.mxu0 %vm7506_vm6, %v9186_v51  ;;  %v21918_v12 = vadd.f32 %v15192_v29, %v15164_v50  ;;  %15339 = vmatmul.mubr.msk.bf16.gmra.mxu1 %vm7506_vm6, %v8947_v23  ;;  %v9404_v51 = vld [vmem:[#allocation2 + $0x4e] sm:$0xff]  ;;  %v9406_v23 = vld [vmem:[#allocation2 + $0x5e] sm:$0xff] }
 0x8dd   :  { %15370 = vmatprep.mubr.msk.bf16.mxu0 %vm7506_vm6, %v9187_v3  ;;  %v21922_v38 = vpop.f32.mrf.mxu1  ;;  %15342 = vmatprep.mubr.msk.bf16.mxu1 %vm7506_vm6, %v8948_v44  ;;  %v7872_v25 = vpop.f32.mrf.mxu0  ;;  %v9403_v3 = vld [vmem:[#allocation2 + $0x46] sm:$0xff]  ;;  %v9405_v44 = vld [vmem:[#allocation2 + $0x56] sm:$0xff] }
 0x8de   :  { %v9423_v50 = vpack.c.bf16 %v9404_v51, %v9403_v3 }
 0x8df   :  { %v15165_v41 = vpop.f32.mrf.mxu1 }
 0x8e0   :  { %v21925_v61 = vadd.f32 %v15193_v47, %v15165_v41  ;;  %v9424_v47 = vpack.c.bf16 %v9406_v23, %v9405_v44 }
 0x8e1   :  { %v7696_v49 = vpop.f32.mrf.mxu1 }
 0x8e2   :  { %v21927_v26 = vadd.f32 %v7872_v25, %v7696_v49  ;;  %v9407_v49 = vld [vmem:[#allocation2 + $0x66] sm:$0xff] }
 0x8e4   :  { %15371 = vmatmul.mubr.msk.bf16.gmra.mxu0 %vm7506_vm6, %v9188_v57  ;;  %15343 = vmatmul.mubr.msk.bf16.gmra.mxu1 %vm7506_vm6, %v8949_v11  ;;  %v9425_v57 = vpack.c.bf16 %v9408_v55, %v9407_v49 }
 0x8e5   :  { %15374 = vmatprep.mubr.msk.bf16.mxu0 %vm7506_vm6, %v9189_v36  ;;  %15346 = vmatprep.mubr.msk.bf16.mxu1 %vm7506_vm6, %v8950_v56  ;;  %v9426_v56 = vpack.c.bf16 %v9410_v24, %v9409_v48 }
 0x8e7   :  { %v15196_v35 = vpop.f32.mrf.mxu0 }
 0x8e9   :  { %v21937_v30 = vpop.f32.mrf.mxu0 }
 0x8eb   :  { %v15168_v33 = vpop.f32.mrf.mxu1  ;;  %v15197_v46 = vpop.f32.mrf.mxu0 }
 0x8ec   :  { %15375 = vmatmul.mubr.msk.bf16.gmra.mxu0 %vm7506_vm6, %v9190_v31  ;;  %v21943_v6 = vadd.f32 %v15196_v35, %v15168_v33  ;;  %15347 = vmatmul.mubr.msk.bf16.gmra.mxu1 %vm7506_vm6, %v8951_v14  ;;  %v9411_v14 = vld [vmem:[#allocation2 + $0x86] sm:$0xff]  ;;  %v9413_v33 = vld [vmem:[#allocation2 + $0x96] sm:$0xff] }
 0x8ed   :  { %15378 = vmatprep.mubr.msk.bf16.mxu0 %vm7506_vm6, %v9191_v28  ;;  %v21947_v18 = vpop.f32.mrf.mxu1  ;;  %15350 = vmatprep.mubr.msk.bf16.mxu1 %vm7506_vm6, %v8952_v16  ;;  %v7888_v37 = vpop.f32.mrf.mxu0  ;;  %v9427_v28 = vpack.c.bf16 %v9412_v52, %v9411_v14  ;;  %v9428_v16 = vpack.c.bf16 %v9414_v45, %v9413_v33 }
 0x8ef   :  { %v15169_v10 = vpop.f32.mrf.mxu1 }
 0x8f0   :  { %v21950_v2 = vadd.f32 %v15197_v46, %v15169_v10  ;;  %v9416_v10 = vld [vmem:[#allocation2 + $0xae] sm:$0xff] }
 0x8f1   :  { %v7712_v21 = vpop.f32.mrf.mxu1 }
 0x8f2   :  { %v21952_v63 = vadd.f32 %v7888_v37, %v7712_v21  ;;  %v9415_v21 = vld [vmem:[#allocation2 + $0xa6] sm:$0xff] }
 0x8f4   :  { %15379 = vmatmul.mubr.msk.bf16.gmra.mxu0 %vm7506_vm6, %v9192_v19  ;;  %15351 = vmatmul.mubr.msk.bf16.gmra.mxu1 %vm7506_vm6, %v8953_v42  ;;  %v9429_v19 = vpack.c.bf16 %v9416_v10, %v9415_v21  ;;  %v9417_v42 = vld [vmem:[#allocation2 + $0xb6] sm:$0xff] }
 0x8f5   :  { %15386 = vmatprep.mubr.msk.bf16.mxu1 %vm7506_vm6, %v9420_v22  ;;  %v9430_v22 = vpack.c.bf16 %v9418_v13, %v9417_v42 }
 0x8f7   :  { %v15200_v40 = vpop.f32.mrf.mxu0 }
 0x8f9   :  { %v21957_v1 = vpop.f32.mrf.mxu0 }
 0x8fb   :  { %v15172_v4 = vpop.f32.mrf.mxu1  ;;  %v15201_v15 = vpop.f32.mrf.mxu0 }
 0x8fc   :  { %v21959_v8 = vadd.f32 %v15200_v40, %v15172_v4  ;;  %15387 = vmatmul.mubr.msk.bf16.vlgmr.msra.gmra.mxu1 %vm7506_vm6, %v9421_v0  ;;  %v9419_v0 = vld [vmem:[#allocation2 + $0xc6] sm:$0x3] }
 0x8fd   :  { %v21962_v29 = vpop.f32.mrf.mxu1  ;;  %15390 = vmatprep.mubr.msk.bf16.mxu1 %vm7506_vm6, %v9422_v58  ;;  %v21968_v59 = vpop.f32.mrf.mxu0 }
 0x8ff   :  { %v15173_v39 = vpop.f32.mrf.mxu1 }
 0x900   :  { %v21965_v7 = vadd.f32 %v15201_v15, %v15173_v39  ;;  %v9431_v15 = vpack.c.bf16 %v9419_v0, %v9419_v0 }
 0x901   :  { %v21971_v25 = vpop.f32.mrf.mxu1 }
 0x904   :  { %15391 = vmatmul.mubr.msk.bf16.gmra.mxu1 %vm7506_vm6, %v9423_v50 }
 0x905   :  { %15394 = vmatprep.mubr.msk.bf16.mxu1 %vm7506_vm6, %v9424_v47 }
 0x907   :  { %v15204_v41 = vpop.f32.mrf.mxu0 }
 0x909   :  { %v21973_v11 = vpop.f32.mrf.mxu0 }
 0x90b   :  { %v15176_v36 = vpop.f32.mrf.mxu1  ;;  %v15205_v54 = vpop.f32.mrf.mxu0 }
 0x90c   :  { %v21975_v43 = vadd.f32 %v15204_v41, %v15176_v36  ;;  %15395 = vmatmul.mubr.msk.bf16.gmra.mxu1 %vm7506_vm6, %v9425_v57  ;;  %v7870_v57 = vadd.f32 %v21911_v53, %v21922_v38 }
 0x90d   :  { %v21978_v35 = vpop.f32.mrf.mxu1  ;;  %15398 = vmatprep.mubr.msk.bf16.mxu1 %vm7506_vm6, %v9426_v56  ;;  %v21984_v46 = vpop.f32.mrf.mxu0 }
 0x90f   :  { %v15177_v27 = vpop.f32.mrf.mxu1 }
 0x910   :  { %v21981_v31 = vadd.f32 %v15205_v54, %v15177_v27 }
 0x911   :  { %v21987_v32 = vpop.f32.mrf.mxu1 }
 0x914   :  { %15399 = vmatmul.mubr.msk.bf16.gmra.mxu1 %vm7506_vm6, %v9427_v28 }
 0x915   :  { %15402 = vmatprep.mubr.msk.bf16.mxu1 %vm7506_vm6, %v9428_v16 }
 0x917   :  { %v15208_v62 = vpop.f32.mrf.mxu0 }
 0x919   :  { %v21989_v37 = vpop.f32.mrf.mxu0 }
 0x91b   :  { %v15180_v9 = vpop.f32.mrf.mxu1  ;;  %v15209_v17 = vpop.f32.mrf.mxu0 }
 0x91c   :  { %v21991_v40 = vadd.f32 %v15208_v62, %v15180_v9  ;;  %15403 = vmatmul.mubr.msk.bf16.gmra.mxu1 %vm7506_vm6, %v9429_v19 }
 0x91d   :  { %v21994_v34 = vpop.f32.mrf.mxu1  ;;  %15406 = vmatprep.mubr.msk.bf16.mxu1 %vm7506_vm6, %v9430_v22  ;;  %v21999_v4 = vpop.f32.mrf.mxu0 }
 0x91f   :  { %v15181_v20 = vpop.f32.mrf.mxu1 }
 0x920   :  { %v21997_v60 = vadd.f32 %v15209_v17, %v15181_v20 }
 0x921   :  { %v22001_v58 = vpop.f32.mrf.mxu1 }
 0x924   :  { %v15212_v39 = vpop.f32.mrf.mxu0  ;;  %v15184_v51 = vpop.f32.mrf.mxu1  ;;  %15407 = vmatmul.mubr.msk.bf16.gmra.mxu1 %vm7506_vm6, %v9431_v15  ;;  %v7902_v15 = vadd.f32 %v21957_v1, %v21962_v29 }
 0x925   :  { %v22004_v23 = vadd.f32 %v15212_v39, %v15184_v51 }
 0x926   :  { %v22006_v3 = vpop.f32.mrf.mxu0  ;;  %v22008_v50 = vpop.f32.mrf.mxu1 }
 0x928   :  { %v15213_v44 = vpop.f32.mrf.mxu0  ;;  %v15185_v47 = vpop.f32.mrf.mxu1 }
 0x92a   :  { %v22010_v41 = vpop.f32.mrf.mxu0  ;;  %v22012_v55 = vpop.f32.mrf.mxu1 }
 0x92c   :  { %v15248_v24 = vpop.f32.mrf.mxu0  ;;  %v15220_v49 = vpop.f32.mrf.mxu1 }
 0x92d   :  { %v8181_v48 = vadd.f32 %v15220_v49, %v21918_v12  ;;  %v7886_v12 = vadd.f32 %v21937_v30, %v21947_v18 }
 0x92e   :  { %v22017_v36 = vpop.f32.mrf.mxu0  ;;  %v8085_v56 = vpop.f32.mrf.mxu1 }
 0x92f   :  { %v22019_v54 = vadd.f32 %v8085_v56, %v7870_v57  ;;  %v22021_v52 = vadd.f32 %v15248_v24, %v8181_v48  ;;  %v7905_v57 = vadd.f32 %v21968_v59, %v21971_v25 }
 0x930   :  { %v15249_v27 = vpop.f32.mrf.mxu0  ;;  %v15221_v45 = vpop.f32.mrf.mxu1 }
 0x931   :  { %v8182_v14 = vadd.f32 %v15221_v45, %v21925_v61 }
 0x932   :  { %v8327_v28 = vpop.f32.mrf.mxu0  ;;  %v8088_v33 = vpop.f32.mrf.mxu1 }
 0x933   :  { %v8180_v16 = vadd.f32 %v8088_v33, %v21927_v26  ;;  %v22025_v10 = vadd.f32 %v15249_v27, %v8182_v14  ;;  %v7918_v14 = vadd.f32 %v21973_v11, %v21978_v35 }
 0x934   :  { %v15252_v62 = vpop.f32.mrf.mxu0  ;;  %v15224_v53 = vpop.f32.mrf.mxu1 }
 0x935   :  { %v8185_v38 = vadd.f32 %v15224_v53, %v21943_v6  ;;  %v22032_v21 = vadd.f32 %v8327_v28, %v8180_v16 }
 0x936   :  { %v22030_v13 = vpop.f32.mrf.mxu0  ;;  %v8101_v19 = vpop.f32.mrf.mxu1 }
 0x937   :  { %v22034_v42 = vadd.f32 %v8101_v19, %v7886_v12  ;;  %v22036_v9 = vadd.f32 %v15252_v62, %v8185_v38  ;;  %v7921_v12 = vadd.f32 %v21984_v46, %v21987_v32 }
 0x938   :  { %v15253_v61 = vpop.f32.mrf.mxu0  ;;  %v15225_v26 = vpop.f32.mrf.mxu1 }
 0x939   :  { %v8186_v22 = vadd.f32 %v15225_v26, %v21950_v2 }
 0x93a   :  { %v8343_v17 = vpop.f32.mrf.mxu0  ;;  %v8104_v20 = vpop.f32.mrf.mxu1 }
 0x93b   :  { %v8184_v0 = vadd.f32 %v8104_v20, %v21952_v63  ;;  %v22040_v18 = vadd.f32 %v15253_v61, %v8186_v22 }
 0x93c   :  { %v15256_v30 = vpop.f32.mrf.mxu0  ;;  %v15228_v6 = vpop.f32.mrf.mxu1 }
 0x93d   :  { %v8189_v39 = vadd.f32 %v15228_v6, %v21959_v8  ;;  %v22047_v44 = vadd.f32 %v8343_v17, %v8184_v0 }
 0x93e   :  { %v22045_v51 = vpop.f32.mrf.mxu0  ;;  %v8117_v47 = vpop.f32.mrf.mxu1 }
 0x93f   :  { %v22049_v24 = vadd.f32 %v8117_v47, %v7902_v15  ;;  %v22051_v49 = vadd.f32 %v15256_v30, %v8189_v39 }
 0x940   :  { %v15257_v2 = vpop.f32.mrf.mxu0  ;;  %v15229_v63 = vpop.f32.mrf.mxu1 }
 0x941   :  { %v8190_v48 = vadd.f32 %v15229_v63, %v21965_v7 }
 0x942   :  { %v8359_v56 = vpop.f32.mrf.mxu0  ;;  %v8120_v1 = vpop.f32.mrf.mxu1 }
 0x943   :  { %v8188_v29 = vadd.f32 %v8120_v1, %v7905_v57  ;;  %v22056_v27 = vadd.f32 %v15257_v2, %v8190_v48  ;;  %v7950_v57 = vadd.f32 %v22006_v3, %v22008_v50 }
 0x944   :  { %v15260_v8 = vpop.f32.mrf.mxu0  ;;  %v15232_v45 = vpop.f32.mrf.mxu1 }
 0x945   :  { %v8193_v28 = vadd.f32 %v15232_v45, %v21975_v43  ;;  %v22063_v16 = vadd.f32 %v8359_v56, %v8188_v29 }
 0x946   :  { %v22061_v33 = vpop.f32.mrf.mxu0  ;;  %v8133_v62 = vpop.f32.mrf.mxu1 }
 0x947   :  { %v22065_v59 = vadd.f32 %v8133_v62, %v7918_v14  ;;  %v22067_v25 = vadd.f32 %v15260_v8, %v8193_v28 }
 0x948   :  { %v15261_v7 = vpop.f32.mrf.mxu0  ;;  %v15233_v53 = vpop.f32.mrf.mxu1 }
 0x949   :  { %v8194_v38 = vadd.f32 %v15233_v53, %v21981_v31  ;;  %v7937_v31 = vadd.f32 %v21999_v4, %v22001_v58 }
 0x94a   :  { %v8375_v19 = vpop.f32.mrf.mxu0  ;;  %v8136_v11 = vpop.f32.mrf.mxu1 }
 0x94b   :  { %v8192_v35 = vadd.f32 %v8136_v11, %v7921_v12  ;;  %v22072_v61 = vadd.f32 %v15261_v7, %v8194_v38 }
 0x94c   :  { %v15264_v43 = vpop.f32.mrf.mxu0  ;;  %v15236_v26 = vpop.f32.mrf.mxu1 }
 0x94d   :  { %v8197_v22 = vadd.f32 %v15236_v26, %v21991_v40  ;;  %v22077_v20 = vadd.f32 %v8375_v19, %v8192_v35 }
 0x94e   :  { %v22075_v17 = vpop.f32.mrf.mxu0  ;;  %v22079_v0 = vpop.f32.mrf.mxu1 }
 0x94f   :  { %v22081_v6 = vadd.f32 %v15264_v43, %v8197_v22 }
 0x950   :  { %v15265_v30 = vpop.f32.mrf.mxu0  ;;  %v15237_v46 = vpop.f32.mrf.mxu1 }
 0x951   :  { %v8198_v32 = vadd.f32 %v15237_v46, %v21997_v60 }
 0x952   :  { %v8391_v15 = vpop.f32.mrf.mxu0  ;;  %v8152_v39 = vpop.f32.mrf.mxu1 }
 0x953   :  { %v8196_v47 = vadd.f32 %v8152_v39, %v7937_v31  ;;  %v22086_v40 = vadd.f32 %v15265_v30, %v8198_v32  ;;  %v8422_v30 = vadd.f32 %v22030_v13, %v22034_v42 }
 0x954   :  { %v15268_v2 = vpop.f32.mrf.mxu0  ;;  %v15240_v63 = vpop.f32.mrf.mxu1 }
 0x955   :  { %v8201_v48 = vadd.f32 %v15240_v63, %v22004_v23  ;;  %v22093_v1 = vadd.f32 %v8391_v15, %v8196_v47  ;;  %v8418_v23 = vadd.f32 %v22017_v36, %v22019_v54 }
 0x956   :  { %v22091_v56 = vpop.f32.mrf.mxu0  ;;  %v8165_v29 = vpop.f32.mrf.mxu1 }
 0x957   :  { %v22095_v4 = vadd.f32 %v8165_v29, %v7950_v57  ;;  %v22097_v58 = vadd.f32 %v15268_v2, %v8201_v48 }
 0x958   :  { %v15269_v60 = vpop.f32.mrf.mxu0  ;;  %v15241_v8 = vpop.f32.mrf.mxu1 }
 0x959   :  { %v8426_v8 = vadd.f32 %v22045_v51, %v22049_v24 }
 0x95a   :  { %v22099_v45 = vpop.f32.mrf.mxu0  ;;  %v22101_v14 = vpop.f32.mrf.mxu1 }
 0x95c   :  { %v15304_v28 = vpop.f32.mrf.mxu0  ;;  %v15276_v62 = vpop.f32.mrf.mxu1 }
 0x95d   :  { %v8659_v3 = vadd.f32 %v15276_v62, %v22021_v52 }
 0x95e   :  { %v8802_v50 = vpop.f32.mrf.mxu0  ;;  %v8563_v7 = vpop.f32.mrf.mxu1 }
 0x95f   :  { %v8657_v53 = vadd.f32 %v8563_v7, %v8418_v23  ;;  %v22106_v38 = vadd.f32 %v15304_v28, %v8659_v3 }
 0x960   :  { %v15305_v12 = vpop.f32.mrf.mxu0  ;;  %v15277_v19 = vpop.f32.mrf.mxu1 }
 0x961   :  { %v8660_v11 = vadd.f32 %v15277_v19, %v22025_v10  ;;  %v22111_v43 = vadd.f32 %v8802_v50, %v8657_v53 }
 0x962   :  { %v22109_v35 = vpop.f32.mrf.mxu0  ;;  %v8566_v26 = vpop.f32.mrf.mxu1 }
 0x963   :  { %v22114_v22 = vadd.f32 %v8566_v26, %v22032_v21  ;;  %v22116_v54 = vadd.f32 %v15305_v12, %v8660_v11  ;;  %v8430_v26 = vadd.f32 %v22061_v33, %v22065_v59 }
 0x964   :  { %v15308_v36 = vpop.f32.mrf.mxu0  ;;  %v15280_v52 = vpop.f32.mrf.mxu1 }
 0x965   :  { %v8663_v46 = vadd.f32 %v15280_v52, %v22036_v9 }
 0x966   :  { %v8818_v31 = vpop.f32.mrf.mxu0  ;;  %v8579_v32 = vpop.f32.mrf.mxu1 }
 0x967   :  { %v8661_v10 = vadd.f32 %v8579_v32, %v8422_v30  ;;  %v22121_v39 = vadd.f32 %v15308_v36, %v8663_v46 }
 0x968   :  { %v15309_v15 = vpop.f32.mrf.mxu0  ;;  %v15281_v47 = vpop.f32.mrf.mxu1 }
 0x969   :  { %v8664_v2 = vadd.f32 %v15281_v47, %v22040_v18  ;;  %v22126_v63 = vadd.f32 %v8818_v31, %v8661_v10 }
 0x96a   :  { %v22124_v21 = vpop.f32.mrf.mxu0  ;;  %v8582_v57 = vpop.f32.mrf.mxu1 }
 0x96b   :  { %v22129_v48 = vadd.f32 %v8582_v57, %v22047_v44  ;;  %v22131_v42 = vadd.f32 %v15309_v15, %v8664_v2 }
 0x96c   :  { %v15312_v13 = vpop.f32.mrf.mxu0  ;;  %v15284_v9 = vpop.f32.mrf.mxu1 }
 0x96d   :  { %v8667_v29 = vadd.f32 %v15284_v9, %v22051_v49 }
 0x96e   :  { %v8834_v60 = vpop.f32.mrf.mxu0  ;;  %v8595_v28 = vpop.f32.mrf.mxu1 }
 0x96f   :  { %v8665_v18 = vadd.f32 %v8595_v28, %v8426_v8  ;;  %v22136_v23 = vadd.f32 %v15312_v13, %v8667_v29 }
 0x970   :  { %v15313_v62 = vpop.f32.mrf.mxu0  ;;  %v15285_v3 = vpop.f32.mrf.mxu1 }
 0x971   :  { %v8668_v50 = vadd.f32 %v15285_v3, %v22056_v27  ;;  %v22139_v7 = vadd.f32 %v8834_v60, %v8665_v18  ;;  %v7934_v27 = vadd.f32 %v21989_v37, %v21994_v34 }
 0x972   :  { %v8837_v44 = vpop.f32.mrf.mxu0  ;;  %v8598_v53 = vpop.f32.mrf.mxu1 }
 0x973   :  { %v8666_v12 = vadd.f32 %v8598_v53, %v22063_v16  ;;  %v22142_v49 = vadd.f32 %v15313_v62, %v8668_v50  ;;  %v8195_v32 = vadd.f32 %v22079_v0, %v7934_v27 }
 0x974   :  { %v15316_v19 = vpop.f32.mrf.mxu0  ;;  %v15288_v11 = vpop.f32.mrf.mxu1 }
 0x975   :  { %v8671_v51 = vadd.f32 %v15288_v11, %v22067_v25  ;;  %v22147_v36 = vadd.f32 %v8837_v44, %v8666_v12  ;;  %v8434_v13 = vadd.f32 %v22075_v17, %v8195_v32 }
 0x976   :  { %v8850_v24 = vpop.f32.mrf.mxu0  ;;  %v8611_v52 = vpop.f32.mrf.mxu1 }
 0x977   :  { %v8669_v30 = vadd.f32 %v8611_v52, %v8430_v26  ;;  %v22151_v31 = vadd.f32 %v15316_v19, %v8671_v51 }
 0x978   :  { %v15317_v46 = vpop.f32.mrf.mxu0  ;;  %v15289_v16 = vpop.f32.mrf.mxu1 }
 0x979   :  { %v8672_v10 = vadd.f32 %v15289_v16, %v22072_v61  ;;  %v22155_v15 = vadd.f32 %v8850_v24, %v8669_v30 }
 0x97a   :  { %v8853_v25 = vpop.f32.mrf.mxu0  ;;  %v8614_v47 = vpop.f32.mrf.mxu1 }
 0x97b   :  { %v8670_v33 = vadd.f32 %v8614_v47, %v22077_v20  ;;  %v22158_v2 = vadd.f32 %v15317_v46, %v8672_v10 }
 0x97c   :  { %v15320_v59 = vpop.f32.mrf.mxu0  ;;  %v15292_v57 = vpop.f32.mrf.mxu1 }
 0x97d   :  { %v8675_v37 = vadd.f32 %v15292_v57, %v22081_v6  ;;  %v22162_v9 = vadd.f32 %v8853_v25, %v8670_v33  ;;  %v7953_v6 = vadd.f32 %v22010_v41, %v22012_v55  ;;  %v8897_v57 = vadd.f32 %v22109_v35, %v22114_v22 }
 0x97e   :  { %v8866_v34 = vpop.f32.mrf.mxu0  ;;  %v8627_v0 = vpop.f32.mrf.mxu1 }
 0x97f   :  { %v8673_v29 = vadd.f32 %v8627_v0, %v8434_v13  ;;  %v22164_v60 = vadd.f32 %v15320_v59, %v8675_v37  ;;  %v8200_v53 = vadd.f32 %v22101_v14, %v7953_v6 }
 0x980   :  { %v15321_v61 = vpop.f32.mrf.mxu0  ;;  %v15293_v8 = vpop.f32.mrf.mxu1 }
 0x981   :  { %v8676_v28 = vadd.f32 %v15293_v8, %v22086_v40  ;;  %v22167_v18 = vadd.f32 %v8866_v34, %v8673_v29  ;;  %v8438_v40 = vadd.f32 %v22091_v56, %v22095_v4  ;;  %v8439_v52 = vadd.f32 %v22099_v45, %v8200_v53 }
 0x982   :  { %v8869_v20 = vpop.f32.mrf.mxu0  ;;  %v8630_v62 = vpop.f32.mrf.mxu1 }
 0x983   :  { %v8674_v3 = vadd.f32 %v8630_v62, %v22093_v1  ;;  %v22172_v50 = vadd.f32 %v15321_v61, %v8676_v28 }
 0x984   :  { %v15324_v17 = vpop.f32.mrf.mxu0  ;;  %v15296_v44 = vpop.f32.mrf.mxu1 }
 0x985   :  { %v8679_v12 = vadd.f32 %v15296_v44, %v22097_v58  ;;  %v22178_v11 = vadd.f32 %v8869_v20, %v8674_v3  ;;  %v8901_v3 = vadd.f32 %v22124_v21, %v22129_v48 }
 0x986   :  { %v8882_v19 = vpop.f32.mrf.mxu0  ;;  %v8643_v51 = vpop.f32.mrf.mxu1 }
 0x987   :  { %v8677_v24 = vadd.f32 %v8643_v51, %v8438_v40  ;;  %v22180_v41 = vadd.f32 %v15324_v17, %v8679_v12 }
 0x988   :  { %v15325_v26 = vpop.f32.mrf.mxu0  ;;  %v15297_v55 = vpop.f32.mrf.mxu1 }
 0x989   :  { %v22183_v27 = vadd.f32 %v8882_v19, %v8677_v24 }
 0x98a   :  { %v8885_v1 = vpop.f32.mrf.mxu0  ;;  %v8646_v14 = vpop.f32.mrf.mxu1 }
 0x98b   :  { %v8678_v30 = vadd.f32 %v8646_v14, %v8439_v52 }
 0x98c   :  { %v15360_v58 = vpop.f32.mrf.mxu0  ;;  %v15332_v46 = vpop.f32.mrf.mxu1 }
 0x98d   :  { %v9137_v16 = vadd.f32 %v15332_v46, %v22106_v38  ;;  %v22186_v4 = vadd.f32 %v8885_v1, %v8678_v30 }
 0x98e   :  { %v9280_v56 = vpop.f32.mrf.mxu0  ;;  %v9041_v32 = vpop.f32.mrf.mxu1 }
 0x98f   :  { %v9135_v10 = vadd.f32 %v9041_v32, %v22111_v43  ;;  %v22189_v47 = vadd.f32 %v15360_v58, %v9137_v16 }
 0x990   :  { %v15361_v25 = vpop.f32.mrf.mxu0  ;;  %v15333_v33 = vpop.f32.mrf.mxu1 }
 0x991   :  { %v9138_v45 = vadd.f32 %v15333_v33, %v22116_v54  ;;  %v22194_v37 = vadd.f32 %v9280_v56, %v9135_v10 }
 0x992   :  { %v9283_v59 = vpop.f32.mrf.mxu0  ;;  %v9044_v34 = vpop.f32.mrf.mxu1 }
 0x993   :  { %v9136_v38 = vadd.f32 %v9044_v34, %v8897_v57  ;;  %v22196_v0 = vadd.f32 %v15361_v25, %v9138_v45 }
 0x994   :  { %v15364_v13 = vpop.f32.mrf.mxu0  ;;  %v15336_v29 = vpop.f32.mrf.mxu1 }
 0x995   :  { %v9141_v43 = vadd.f32 %v15336_v29, %v22121_v39  ;;  %v22199_v8 = vadd.f32 %v9283_v59, %v9136_v38 }
 0x996   :  { %v9296_v61 = vpop.f32.mrf.mxu0  ;;  %v9057_v28 = vpop.f32.mrf.mxu1 }
 0x997   :  { %v9139_v54 = vadd.f32 %v9057_v28, %v22126_v63  ;;  %v22202_v62 = vadd.f32 %v15364_v13, %v9141_v43  ;;  %v9901_v63 = vld [vmem:[%s23182_s6 + $0x8] sm:$0xff] }
 0x998   :  { %v15365_v20 = vpop.f32.mrf.mxu0  ;;  %v15337_v35 = vpop.f32.mrf.mxu1  ;;  %12724 = vmatprep.mubr.msk.f32.mxu0 %vm9918_vm7, %v9901_v63 }
 0x999   :  { %v9142_v22 = vadd.f32 %v15337_v35, %v22131_v42  ;;  %v22207_v17 = vadd.f32 %v9296_v61, %v9139_v54 }
 0x99a   :  { %v9299_v6 = vpop.f32.mrf.mxu0  ;;  %v9060_v44 = vpop.f32.mrf.mxu1 }
 0x99b   :  { %v9140_v39 = vadd.f32 %v9060_v44, %v8901_v3  ;;  %v22209_v12 = vadd.f32 %v15365_v20, %v9142_v22 }
 0x99c   :  { %v15368_v53 = vpop.f32.mrf.mxu0  ;;  %v15340_v19 = vpop.f32.mrf.mxu1 }
 0x99d   :  { %v9145_v40 = vadd.f32 %v15340_v19, %v22136_v23  ;;  %v22215_v51 = vadd.f32 %v9299_v6, %v9140_v39 }
 0x99e   :  { %v9312_v42 = vpop.f32.mrf.mxu0  ;;  %v9073_v21 = vpop.f32.mrf.mxu1 }
 0x99f   :  { %v9143_v48 = vadd.f32 %v9073_v21, %v22139_v7  ;;  %v22219_v26 = vadd.f32 %v15368_v53, %v9145_v40  ;;  %v22258_v21 = vld [vmem:[%s23183_s5] ss:$0 sm:$0xff] }
 0x9a0   :  { %v15369_v24 = vpop.f32.mrf.mxu0  ;;  %v15341_v55 = vpop.f32.mrf.mxu1 }
 0x9a1   :  { %v9146_v1 = vadd.f32 %v15341_v55, %v22142_v49  ;;  %v22222_v14 = vadd.f32 %v9312_v42, %v9143_v48 }
 0x9a2   :  { %v9315_v52 = vpop.f32.mrf.mxu0  ;;  %v9076_v30 = vpop.f32.mrf.mxu1 }
 0x9a3   :  { %v9144_v23 = vadd.f32 %v9076_v30, %v22147_v36  ;;  %v22225_v46 = vadd.f32 %v15369_v24, %v9146_v1 }
 0x9a4   :  { %v15372_v58 = vpop.f32.mrf.mxu0  ;;  %v15344_v16 = vpop.f32.mrf.mxu1 }
 0x9a5   :  { %v9149_v56 = vadd.f32 %v15344_v16, %v22151_v31  ;;  %v22228_v7 = vadd.f32 %v9315_v52, %v9144_v23 }
 0x9a6   :  { %v9328_v32 = vpop.f32.mrf.mxu0  ;;  %v9089_v10 = vpop.f32.mrf.mxu1 }
 0x9a7   :  { %v9147_v25 = vadd.f32 %v9089_v10, %v22155_v15  ;;  %v22231_v49 = vadd.f32 %v15372_v58, %v9149_v56 }
 0x9a8   :  { %v15373_v33 = vpop.f32.mrf.mxu0  ;;  %v15345_v45 = vpop.f32.mrf.mxu1 }
 0x9a9   :  { %v22235_v57 = vadd.f32 %v9328_v32, %v9147_v25  ;;  %v9150_v58 = vadd.f32 %v15345_v45, %v22158_v2 }
 0x9aa   :  { %v22233_v59 = vpop.f32.mrf.mxu0  ;;  %v9092_v36 = vpop.f32.mrf.mxu1 }
 0x9ac   :  { %v22237_v34 = vpop.f32.mrf.mxu0  ;;  %v15348_v38 = vpop.f32.mrf.mxu1 }
 0x9ad   :  { %v9153_v2 = vadd.f32 %v15348_v38, %v22164_v60 }
 0x9ae   :  { %v22239_v13 = vpop.f32.mrf.mxu0  ;;  %v9105_v31 = vpop.f32.mrf.mxu1 }
 0x9b0   :  { %v15377_v29 = vpop.f32.mrf.mxu0  ;;  %v15349_v43 = vpop.f32.mrf.mxu1 }
 0x9b1   :  { %v9154_v61 = vadd.f32 %v15349_v43, %v22172_v50 }
 0x9b2   :  { %v22242_v15 = vpop.f32.mrf.mxu0  ;;  %v9108_v28 = vpop.f32.mrf.mxu1 }
 0x9b3   :  { %v22244_v20 = vadd.f32 %v15377_v29, %v9154_v61 }
 0x9b4   :  { %v15380_v54 = vpop.f32.mrf.mxu0  ;;  %v15352_v35 = vpop.f32.mrf.mxu1 }
 0x9b5   :  { %v9157_v22 = vadd.f32 %v15352_v35, %v22180_v41 }
 0x9b6   :  { %v9360_v6 = vpop.f32.mrf.mxu0  ;;  %v9121_v3 = vpop.f32.mrf.mxu1 }
 0x9b7   :  { %v9155_v44 = vadd.f32 %v9121_v3, %v22183_v27  ;;  %v22248_v53 = vadd.f32 %v15380_v54, %v9157_v22  ;;  %v22281_v54 = vadd.f32 %v15373_v33, %v9150_v58  ;;  %v9152_v22 = vadd.f32 %v9108_v28, %v22178_v11 }
 0x9b8   :  { %v15381_v39 = vpop.f32.mrf.mxu0  ;;  %v15353_v19 = vpop.f32.mrf.mxu1  ;;  %v22300_v28 = vadd.f32 %v22237_v34, %v9153_v2 }
 0x9b9   :  { %v22250_v63 = vadd.f32 %v9360_v6, %v9155_v44 }
 0x9ba   :  { %v9124_v50 = vpop.f32.mrf.mxu1 }
 0x9bb   :  { %v22253_v40 = vadd.f32 %v9124_v50, %v22186_v4 }
 0x9bc   :  { %v15388_v42 = vpop.f32.mrf.mxu1 }
 0x9bd   :  { %v9615_v41 = vadd.f32 %v15388_v42, %v22189_v47 }
 0x9be   :  { %v9519_v48 = vpop.f32.mrf.mxu1 }
 0x9bf   :  { %v9645_v27 = vadd.f32 %v22258_v21, %v9615_v41  ;;  %v9613_v24 = vadd.f32 %v9519_v48, %v22194_v37  ;;  %v9148_v37 = vadd.f32 %v9092_v36, %v22162_v9  ;;  %v9151_v9 = vadd.f32 %v9105_v31, %v22167_v18 }
 0x9c0   :  { %v15389_v55 = vpop.f32.mrf.mxu1 }
 0x9c1   :  { %v9616_v1 = vadd.f32 %v15389_v55, %v22196_v0  ;;  %v9668_v30 = vmax.f32 %v9645_v27, 0.0  ;;  %v9643_v0 = vadd.f32 %v22258_v21, %v9613_v24  ;;  %v22293_v18 = vadd.f32 %v22233_v59, %v9148_v37 }
 0x9c2   :  { %v9522_v52 = vpop.f32.mrf.mxu1  ;;  %v22312_v27 = vadd.f32 %v22242_v15, %v9152_v22 }
 0x9c3   :  { %v22265_v4 = vadd.f32 %v22258_v21, %v9616_v1  ;;  %v9614_v23 = vadd.f32 %v9522_v52, %v22199_v8  ;;  %v9712_v25 = vrot.slane %v9668_v30, 2  ;;  %v9666_v6 = vmax.f32 %v9643_v0, 0.0 }
 0x9c4   :  { %v15392_v16 = vpop.f32.mrf.mxu1 }
 0x9c5   :  { %v9669_v47 = vmax.f32 %v22265_v4, 0.0  ;;  %v9644_v56 = vadd.f32 %v22258_v21, %v9614_v23  ;;  %v9619_v32 = vadd.f32 %v15392_v16, %v22202_v62  ;;  %v9363_v16 = vpop.f32.mrf.mxu0 }
 0x9c6   :  { %v9535_v10 = vpop.f32.mrf.mxu1 }
 0x9c7   :  { %v9714_v29 = vrot.slane %v9669_v47, 2  ;;  %v9667_v43 = vmax.f32 %v9644_v56, 0.0  ;;  %v9617_v8 = vadd.f32 %v9535_v10, %v22207_v17  ;;  %v22279_v45 = vadd.f32 %v22258_v21, %v9619_v32 }
 0x9c8   :  { %v15393_v61 = vpop.f32.mrf.mxu1 }
 0x9c9   :  { %v9711_v62 = vrot.slane %v9667_v43, 2  ;;  %v9715_v36 = vsel %vm6064_vm3, %v9712_v25, %v9714_v29  ;;  %v9647_v35 = vadd.f32 %v22258_v21, %v9617_v8  ;;  %v9620_v60 = vadd.f32 %v15393_v61, %v22209_v12 }
 0x9ca   :  { %v22287_v3 = vmax.f32 %v9667_v43, %v9715_v36  ;;  %v9538_v17 = vpop.f32.mrf.mxu1  ;;  %v9672_v31 = vmax.f32 %v22279_v45, 0.0 }
 0x9cb   :  { %v9713_v38 = vsel %vm6064_vm3, %v9711_v62, %v9712_v25  ;;  %v9670_v44 = vmax.f32 %v9647_v35, 0.0  ;;  %v9618_v33 = vadd.f32 %v9538_v17, %v22215_v51  ;;  %v22297_v39 = vadd.f32 %v22258_v21, %v9620_v60 }
 0x9cc   :  { %v15396_v11 = vpop.f32.mrf.mxu1  ;;  %v22302_v19 = vmax.f32 %v9666_v6, %v9713_v38  ;;  %v22307_v51 = vadd.f32 %v22239_v13, %v9151_v9  ;;  %v9818_v59 = vrot.slane %v22287_v3, 1  ;;  %v9720_v13 = vrot.slane %v9672_v31, 2 }
 0x9cd   :  { %v9716_v12 = vrot.slane %v9670_v44, 2  ;;  %v9648_v50 = vadd.f32 %v22258_v21, %v9618_v33  ;;  %v9623_v42 = vadd.f32 %v15396_v11, %v22219_v26  ;;  %v9673_v41 = vmax.f32 %v22297_v39, 0.0 }
 0x9ce   :  { %v9551_v48 = vpop.f32.mrf.mxu1  ;;  %v9817_v34 = vrot.slane %v22302_v19, 1  ;;  %v22334_v25 = vadd.f32 %v9363_v16, %v22253_v40 }
 0x9cf   :  { %v9717_v24 = vsel %vm6064_vm3, %v9714_v29, %v9716_v12  ;;  %v9671_v55 = vmax.f32 %v9648_v50, 0.0  ;;  %v22317_v1 = vadd.f32 %v22258_v21, %v9623_v42  ;;  %v9621_v26 = vadd.f32 %v9551_v48, %v22222_v14 }
 0x9d0   :  { %v9722_v52 = vrot.slane %v9673_v41, 2  ;;  %v15397_v23 = vpop.f32.mrf.mxu1  ;;  %v22324_v58 = vmax.f32 %v9668_v30, %v9717_v24  ;;  %v22327_v15 = vsel %vm6436_vm4, %v9817_v34, %v9818_v59 }
 0x9d1   :  { %v9718_v56 = vrot.slane %v9671_v55, 2  ;;  %v9676_v32 = vmax.f32 %v22317_v1, 0.0  ;;  %v9651_v37 = vadd.f32 %v22258_v21, %v9621_v26  ;;  %v9624_v14 = vadd.f32 %v15397_v23, %v22225_v46 }
 0x9d2   :  { %v9723_v0 = vsel %vm6064_vm3, %v9720_v13, %v9722_v52  ;;  %v9554_v10 = vpop.f32.mrf.mxu1  ;;  %v9820_v30 = vrot.slane %v22324_v58, 1 }
 0x9d3   :  { %v9719_v43 = vsel %vm6064_vm3, %v9716_v12, %v9718_v56  ;;  %v9721_v8 = vsel %vm6064_vm3, %v9718_v56, %v9720_v13  ;;  %v22341_v2 = vmax.f32 %v9671_v55, %v9723_v0  ;;  %v9728_v46 = vrot.slane %v9676_v32, 2 }
 0x9d4   :  { %v9674_v61 = vmax.f32 %v9651_v37, 0.0  ;;  %v22346_v9 = vadd.f32 %v22258_v21, %v9624_v14  ;;  %v9622_v40 = vadd.f32 %v9554_v10, %v22228_v7  ;;  %v15400_v62 = vpop.f32.mrf.mxu1  ;;  %v22349_v36 = vmax.f32 %v9670_v44, %v9721_v8 }
 0x9d5   :  { %v9826_v35 = vrot.slane %v22341_v2, 1  ;;  %v9627_v22 = vadd.f32 %v15400_v62, %v22231_v49  ;;  %v22355_v6 = vmax.f32 %v9669_v47, %v9719_v43  ;;  %v22360_v60 = vsel %vm6436_vm4, %v9818_v59, %v9820_v30 }
 0x9d6   :  { %v9724_v17 = vrot.slane %v9674_v61, 2  ;;  %v9677_v38 = vmax.f32 %v22346_v9, 0.0  ;;  %v9652_v7 = vadd.f32 %v22258_v21, %v9622_v40  ;;  %v9567_v44 = vpop.f32.mrf.mxu1  ;;  %v9824_v33 = vrot.slane %v22349_v36, 1 }
 0x9d7   :  { %v22366_v11 = vadd.f32 %v22258_v21, %v9627_v22  ;;  %v9625_v49 = vadd.f32 %v9567_v44, %v22235_v57  ;;  %v9822_v4 = vrot.slane %v22355_v6, 1 }
 0x9d8   :  { %v9725_v12 = vsel %vm6064_vm3, %v9722_v52, %v9724_v17  ;;  %v9730_v50 = vrot.slane %v9677_v38, 2  ;;  %v9675_v42 = vmax.f32 %v9652_v7, 0.0  ;;  %v15401_v59 = vpop.f32.mrf.mxu1  ;;  %v22376_v48 = vsel %vm6436_vm4, %v9824_v33, %v9826_v35 }
 0x9d9   :  { %v9680_v34 = vmax.f32 %v22366_v11, 0.0  ;;  %v9655_v24 = vadd.f32 %v22258_v21, %v9625_v49  ;;  %v9628_v57 = vadd.f32 %v15401_v59, %v22281_v54  ;;  %v22383_v55 = vmax.f32 %v9672_v31, %v9725_v12 }
 0x9da   :  { %v9726_v26 = vrot.slane %v9675_v42, 2  ;;  %v9731_v13 = vsel %vm6064_vm3, %v9728_v46, %v9730_v50  ;;  %v9570_v52 = vpop.f32.mrf.mxu1  ;;  %v22391_v16 = vsel %vm6436_vm4, %v9822_v4, %v9824_v33 }
 0x9db   :  { %v22393_v56 = vmax.f32 %v9675_v42, %v9731_v13  ;;  %v9736_v54 = vrot.slane %v9680_v34, 2  ;;  %v9678_v45 = vmax.f32 %v9655_v24, 0.0  ;;  %v22398_v31 = vadd.f32 %v22258_v21, %v9628_v57 }
 0x9dc   :  { %v9727_v37 = vsel %vm6064_vm3, %v9724_v17, %v9726_v26  ;;  %v9729_v14 = vsel %vm6064_vm3, %v9726_v26, %v9728_v46  ;;  %v9626_v0 = vadd.f32 %v9570_v52, %v22293_v18  ;;  %v15404_v10 = vpop.f32.mrf.mxu1  ;;  %v9828_v43 = vrot.slane %v22383_v55, 1 }
 0x9dd   :  { %v9834_v8 = vrot.slane %v22393_v56, 1  ;;  %v9732_v40 = vrot.slane %v9678_v45, 2  ;;  %v9681_v62 = vmax.f32 %v22398_v31, 0.0  ;;  %v9631_v22 = vadd.f32 %v15404_v10, %v22300_v28 }
 0x9de   :  { %v9656_v7 = vadd.f32 %v22258_v21, %v9626_v0  ;;  %v9583_v44 = vpop.f32.mrf.mxu1  ;;  %v22408_v33 = vmax.f32 %v9674_v61, %v9729_v14  ;;  %v22412_v46 = vmax.f32 %v9673_v41, %v9727_v37  ;;  %v22417_v18 = vsel %vm6436_vm4, %v9826_v35, %v9828_v43 }
 0x9df   :  { %v9733_v17 = vsel %vm6064_vm3, %v9730_v50, %v9732_v40  ;;  %v9738_v49 = vrot.slane %v9681_v62, 2  ;;  %v22423_v28 = vadd.f32 %v22258_v21, %v9631_v22  ;;  %v9629_v61 = vadd.f32 %v9583_v44, %v22307_v51 }
 0x9e0   :  { %v9679_v12 = vmax.f32 %v9656_v7, 0.0  ;;  %v15405_v42 = vpop.f32.mrf.mxu1  ;;  %v22428_v39 = vmax.f32 %v9676_v32, %v9733_v17  ;;  %v9832_v41 = vrot.slane %v22408_v33, 1  ;;  %v9830_v35 = vrot.slane %v22412_v46, 1 }
 0x9e1   :  { %v9739_v50 = vsel %vm6064_vm3, %v9736_v54, %v9738_v49  ;;  %v9684_v59 = vmax.f32 %v22423_v28, 0.0  ;;  %v9659_v24 = vadd.f32 %v22258_v21, %v9629_v61  ;;  %v9632_v57 = vadd.f32 %v15405_v42, %v22244_v20 }
 0x9e2   :  { %v9734_v26 = vrot.slane %v9679_v12, 2  ;;  %v22436_v51 = vmax.f32 %v9679_v12, %v9739_v50  ;;  %v9586_v13 = vpop.f32.mrf.mxu1  ;;  %v9836_v1 = vrot.slane %v22428_v39, 1  ;;  %v22440_v32 = vsel %vm6436_vm4, %v9832_v41, %v9834_v8 }
 0x9e3   :  { %v9744_v52 = vrot.slane %v9684_v59, 2  ;;  %v9682_v37 = vmax.f32 %v9659_v24, 0.0  ;;  %v22445_v14 = vadd.f32 %v22258_v21, %v9632_v57  ;;  %v9630_v0 = vadd.f32 %v9586_v13, %v22312_v27 }
 0x9e4   :  { %v9735_v20 = vsel %vm6064_vm3, %v9732_v40, %v9734_v26  ;;  %v9737_v10 = vsel %vm6064_vm3, %v9734_v26, %v9736_v54  ;;  %v9842_v22 = vrot.slane %v22436_v51, 1  ;;  %v15408_v7 = vpop.f32.mrf.mxu1  ;;  %v22452_v44 = vsel %vm6436_vm4, %v9834_v8, %v9836_v1 }
 0x9e5   :  { %v9740_v17 = vrot.slane %v9682_v37, 2  ;;  %v9685_v61 = vmax.f32 %v22445_v14, 0.0  ;;  %v9660_v12 = vadd.f32 %v22258_v21, %v9630_v0  ;;  %v9635_v42 = vadd.f32 %v15408_v7, %v22248_v53 }
 0x9e6   :  { %v9599_v50 = vpop.f32.mrf.mxu1  ;;  %v22457_v24 = vmax.f32 %v9678_v45, %v9737_v10  ;;  %v22461_v27 = vmax.f32 %v9677_v38, %v9735_v20  ;;  %v9888_v54 = vmax.f32 %v22393_v56, %v22452_v44  ;;  %v9887_v8 = vmax.f32 %v22408_v33, %v22440_v32  ;;  %v9906_v32 = vld [vmem:[%s23182_s6 + $0x30] sm:$0xff]  ;;  %v9909_v44 = vld [vmem:[%s23182_s6 + $0x48] sm:$0xff] }
 0x9e7   :  { %v9741_v40 = vsel %vm6064_vm3, %v9738_v49, %v9740_v17  ;;  %v9746_v57 = vrot.slane %v9685_v61, 2  ;;  %v9683_v26 = vmax.f32 %v9660_v12, 0.0  ;;  %v9665_v53 = vadd.f32 %v22258_v21, %v9635_v42 }
 0x9e8   :  { %v9633_v45 = vadd.f32 %v9599_v50, %v22250_v63  ;;  %v15409_v13 = vpop.f32.mrf.mxu1  ;;  %v9789_v9 = vmax.f32 %v9680_v34, %v9741_v40  ;;  %v9840_v38 = vrot.slane %v22457_v24, 1  ;;  %v9838_v0 = vrot.slane %v22461_v27, 1 }
 0x9e9   :  { %v9742_v20 = vrot.slane %v9683_v26, 2  ;;  %v9747_v10 = vsel %vm6064_vm3, %v9744_v52, %v9746_v57  ;;  %v9688_v49 = vmax.f32 %v9665_v53, 0.0  ;;  %v22480_v7 = vsel %vm6436_vm4, %v9830_v35, %v9832_v41 }
 0x9ea   :  { %v22482_v12 = vmax.f32 %v9683_v26, %v9747_v10  ;;  %v9663_v63 = vadd.f32 %v22258_v21, %v9633_v45  ;;  %v9602_v42 = vpop.f32.mrf.mxu1  ;;  %v9844_v11 = vrot.slane %v9789_v9, 1  ;;  %v9843_v34 = vsel %vm6436_vm4, %v9840_v38, %v9842_v22 }
 0x9eb   :  { %v9743_v50 = vsel %vm6064_vm3, %v9740_v17, %v9742_v20  ;;  %v9745_v40 = vsel %vm6064_vm3, %v9742_v20, %v9744_v52  ;;  %v9752_v13 = vrot.slane %v9688_v49, 2  ;;  %v9634_v53 = vadd.f32 %v9602_v42, %v22334_v25 }
 0x9ec   :  { %v22489_v29 = vmax.f32 %v9682_v37, %v9745_v40  ;;  %v9850_v41 = vrot.slane %v22482_v12, 1  ;;  %v9686_v47 = vmax.f32 %v9663_v63, 0.0  ;;  %v9790_v26 = vmax.f32 %v9681_v62, %v9743_v50  ;;  %v9914_v40 = vld [vmem:[%s23182_s6 + $0x70] sm:$0xff] }
 0x9ed   :  { %v9664_v45 = vadd.f32 %v22258_v21, %v9634_v53  ;;  %v9845_v10 = vsel %vm6436_vm4, %v9842_v22, %v9844_v11  ;;  %v9891_v23 = vmax.f32 %v22457_v24, %v9843_v34  ;;  %v9841_v17 = vsel %vm6436_vm4, %v9838_v0, %v9840_v38  ;;  %v9916_v53 = vld [vmem:[%s23182_s6 + $0x80] sm:$0xff] }
 0x9ee   :  { %v9848_v52 = vrot.slane %v22489_v29, 1  ;;  %v9748_v20 = vrot.slane %v9686_v47, 2  ;;  %v9846_v25 = vrot.slane %v9790_v26, 1  ;;  %v9892_v37 = vmax.f32 %v22436_v51, %v9845_v10  ;;  %v15747_v10 = vld [vmem:[%s23184_s7 + $0x20] sm:$0xff]  }
 0x9ef   :  { %v9687_v49 = vmax.f32 %v9664_v45, 0.0  ;;  %v9890_v63 = vmax.f32 %v22461_v27, %v9841_v17  ;;  %v9839_v31 = vsel %vm6436_vm4, %v9836_v1, %v9838_v0  ;;  %v9886_v21 = vmax.f32 %v22412_v46, %v22480_v7  ;;  %v9910_v0 = vld [vmem:[%s23182_s6 + $0x50] sm:$0xff]  ;;  %v9913_v7 = vld [vmem:[%s23182_s6 + $0x68] sm:$0xff]  ;;  %v15748_v17 = vld [vmem:[%s23184_s7 + $0x18] sm:$0xff]  }
 0x9f0   :  { %v9749_v62 = vsel %vm6064_vm3, %v9746_v57, %v9748_v20  ;;  %v9849_v22 = vsel %vm6436_vm4, %v9846_v25, %v9848_v52  ;;  %v9847_v24 = vsel %vm6436_vm4, %v9844_v11, %v9846_v25  ;;  %v9889_v38 = vmax.f32 %v22428_v39, %v9839_v31  ;;  %v9915_v11 = vld [vmem:[%s23182_s6 + $0x78] sm:$0xff]  ;;  %v15746_v45 = vld [vmem:[%s23184_s7 + $0x28] sm:$0xff]   ;;  %15426 = vmatprep.subr.bf16.mxu1 %v15748_v17 }
 0x9f1   :  { %v9750_v42 = vrot.slane %v9687_v49, 2  ;;  %v9894_v34 = vmax.f32 %v9790_v26, %v9849_v22  ;;  %v9893_v50 = vmax.f32 %v9789_v9, %v9847_v24  ;;  %v9831_v51 = vsel %vm6436_vm4, %v9828_v43, %v9830_v35  ;;  %v15745_v26 = vld [vmem:[%s23184_s7 + $0x30] sm:$0xff]   ;;  %15427 = vmatpush3.bf16.msra.mxu1 %v15748_v17  ;;  %v15752_v25 = vld [vmem:[%s23184_s7 + $0x8] sm:$0xff]   ;;  %v15756_v49 = vld [vmem:[%s23184_s7 + $0x78] sm:$0xff]  }
 0x9f2   :  { %v9885_v1 = vmax.f32 %v22383_v55, %v9831_v51  ;;  %v9884_v27 = vmax.f32 %v22341_v2, %v22417_v18  ;;  %v9882_v57 = vmax.f32 %v22355_v6, %v22391_v16  ;;  %v9823_v39 = vsel %vm6436_vm4, %v9820_v30, %v9822_v4 }
 0x9f3   :  { %v9751_v46 = vsel %vm6064_vm3, %v9748_v20, %v9750_v42  ;;  %v9753_v9 = vsel %vm6064_vm3, %v9750_v42, %v9752_v13  ;;  %9950 = vmatpush1.msra.mxu0 %v9894_v34  ;;  %v9881_v43 = vmax.f32 %v22324_v58, %v9823_v39  ;;  %v9793_v55 = vmax.f32 %v9684_v59, %v9749_v62  ;;  %v9917_v13 = vld [vmem:[%s23182_s6 + $0x88] sm:$0xff]  ;;  %v15750_v20 = vld [vmem:[%s23184_s7 + $0x10] sm:$0xff]  }
 0x9f4   :  { %v9794_v2 = vmax.f32 %v9685_v61, %v9751_v46  ;;  %v9795_v16 = vmax.f32 %v9686_v47, %v9753_v9  ;;  %9951 = vmatprep.subr.mxu0 %v23514_v5  ;;  %v9851_v6 = vsel %vm6436_vm4, %v9848_v52, %v9850_v41  ;;  %v23517_v33 = vmax.f32 %v22302_v19, %v22327_v15  ;;  %v9903_v19 = vld [vmem:[%s23182_s6 + $0x18] sm:$0xff]  ;;  %v9902_v15 = vld [vmem:[%s23182_s6 + $0x10] sm:$0xff] }
 0x9f5   :  { %9952 = vmatpush1.msra.mxu0 %v9893_v50  ;;  %v9852_v30 = vrot.slane %v9793_v55, 1  ;;  %v9895_v4 = vmax.f32 %v22489_v29, %v9851_v6  ;;  %v23515_v29 = vmax.f32 %v22349_v36, %v22376_v48  ;;  %v9905_v36 = vld [vmem:[%s23182_s6 + $0x28] sm:$0xff]  ;;  %v9907_v48 = vld [vmem:[%s23182_s6 + $0x38] sm:$0xff]  ;;  %15428 = vmatprep.subr.bf16.mxu1 %v15750_v20 }
 0x9f6   :  { %v9854_v18 = vrot.slane %v9794_v2, 1  ;;  %v9856_v35 = vrot.slane %v9795_v16, 1  ;;  %9953 = vmatprep.subr.mxu0 %v23514_v5  ;;  %v15749_v52 = vld [vmem:[%s23184_s7 + $0x58] sm:$0xff]   ;;  %15429 = vmatpush3.bf16.msra.mxu1 %v15750_v20 }
 0x9f7   :  { %9954 = vmatpush1.msra.mxu0 %v9892_v37  ;;  %v9853_v58 = vsel %vm6436_vm4, %v9850_v41, %v9852_v30  ;;  %v15744_v41 = vld [vmem:[%s23184_s7 + $0x38] sm:$0xff]   ;;  %15430 = vmatprep.subr.bf16.mxu1 %v15752_v25  ;;  %v15754_v37 = vld [vmem:[%s23184_s7] sm:$0xff]  }
 0x9f8   :  { %9955 = vmatprep.subr.mxu0 %v23514_v5  ;;  %v9857_v28 = vsel %vm6436_vm4, %v9854_v18, %v9856_v35  ;;  %v9855_v47 = vsel %vm6436_vm4, %v9852_v30, %v9854_v18  ;;  %v9896_v59 = vmax.f32 %v22482_v12, %v9853_v58  ;;  %v9899_v56 = vmax.f32 %v9795_v16, %v9856_v35  ;;  %v9912_v12 = vld [vmem:[%s23182_s6 + $0x60] sm:$0xff]  ;;  %v15758_v16 = vld [vmem:[%s23184_s7 + $0x70] sm:$0xff]  }
 0x9f9   :  { %9956 = vmatpush1.msra.mxu0 %v9891_v23  ;;  %v9898_v14 = vmax.f32 %v9794_v2, %v9857_v28  ;;  %v9897_v61 = vmax.f32 %v9793_v55, %v9855_v47  ;;  %v23516_v23 = vmax.f32 %v22287_v3, %v22360_v60  ;;  %v9900_v3 = vld [vmem:[%s23182_s6] sm:$0xff]  ;;  %v15751_v58 = vld [vmem:[%s23184_s7 + $0x50] sm:$0xff]   ;;  %v15760_v28 = vld [vmem:[%s23184_s7 + $0x68] sm:$0xff]  }
 0x9fa   :  { %9957 = vmatprep.subr.mxu0 %v23514_v5  ;;  %v9904_v60 = vld [vmem:[%s23182_s6 + $0x20] sm:$0xff]  ;;  %15431 = vmatpush3.bf16.msra.mxu1 %v15752_v25 }
 0x9fb   :  { %9958 = vmatpush1.msra.mxu0 %v9890_v63  ;;  %15432 = vmatprep.subr.bf16.mxu1 %v15754_v37 }
 0x9fc   :  { %9959 = vmatprep.subr.mxu0 %v23514_v5 }
 0x9fd   :  { %9960 = vmatpush1.msra.mxu0 %v9889_v38 }
 0x9fe   :  { %9961 = vmatprep.subr.mxu0 %v23514_v5  ;;  %15433 = vmatpush3.bf16.msra.mxu1 %v15754_v37 }
 0x9ff   :  { %9962 = vmatpush1.msra.mxu0 %v9888_v54  ;;  %v9908_v54 = vld [vmem:[%s23182_s6 + $0x40] sm:$0xff]  ;;  %15458 = vmatprep.subr.bf16.mxu1 %v15756_v49 }
 0xa00   :  { %9963 = vmatprep.subr.mxu0 %v23514_v5 }
 0xa01   :  { %9964 = vmatpush1.msra.mxu0 %v9887_v8  ;;  %v9911_v8 = vld [vmem:[%s23182_s6 + $0x58] sm:$0xff] }
 0xa02   :  { %9965 = vmatprep.subr.mxu0 %v23514_v5 }
 0xa03   :  { %9966 = vmatpush1.msra.mxu0 %v9886_v21 }
 0xa04   :  { %9967 = vmatprep.subr.mxu0 %v23514_v5 }
 0xa05   :  { %9968 = vmatpush1.msra.mxu0 %v9885_v1 }
 0xa06   :  { %9969 = vmatprep.subr.mxu0 %v23514_v5 }
 0xa07   :  { %9970 = vmatpush1.msra.mxu0 %v9884_v27 }
 0xa08   :  { %9971 = vmatprep.subr.mxu0 %v23514_v5 }
 0xa09   :  { %9972 = vmatpush1.msra.mxu0 %v23515_v29  ;;  %v15753_v29 = vld [vmem:[%s23184_s7 + $0x48] sm:$0xff]  }
 0xa0a   :  { %9973 = vmatprep.subr.mxu0 %v23514_v5 }
 0xa0b   :  { %9974 = vmatpush1.msra.mxu0 %v9882_v57 }
 0xa0c   :  { %9975 = vmatprep.subr.mxu0 %v23514_v5 }
 0xa0d   :  { %9976 = vmatpush1.msra.mxu0 %v9881_v43 }
 0xa0e   :  { %9977 = vmatprep.subr.mxu0 %v23514_v5 }
 0xa0f   :  { %9978 = vmatpush1.msra.mxu0 %v23516_v23 }
 0xa10   :  { %9979 = vmatprep.subr.mxu0 %v23514_v5 }
 0xa11   :  { %9980 = vmatpush1.msra.mxu0 %v23517_v33 }
 0xa12   :  { %10003 = vmatprep.subr.mxu0 %v23514_v5 }
 0xa13   :  { %12723 = vmatpush2.msk.msra.mxu0 %vm6436_vm4, %v9899_v56  ;;  %v15762_v56 = vld [vmem:[%s23184_s7 + $0x60] sm:$0xff]  }
 0xa14   :  { %10005 = vmatprep.subr.mxu0 %v23514_v5 }
 0xa15   :  { %10006 = vmatpush2.msra.mxu0 %v9898_v14 }
 0xa16   :  { %10007 = vmatprep.subr.mxu0 %v23514_v5 }
 0xa17   :  { %10008 = vmatpush2.msra.mxu0 %v9897_v61 }
 0xa18   :  { %10009 = vmatprep.subr.mxu0 %v23514_v5 }
 0xa19   :  { %10010 = vmatpush2.msra.mxu0 %v9896_v59 }
 0xa1a   :  { %10011 = vmatprep.subr.mxu0 %v23514_v5 }
 0xa1b   :  { %10012 = vmatpush2.msra.mxu0 %v9895_v4 }
 0xa1c   :  { %10014 = vmatmul.mubr.f32.vlgmr.msra.gmra.mxu0 %v9900_v3  ;;  %15410 = vmatprep.subr.bf16.mxu0 %v15744_v41 }
 0xa1d   :  { %12725 = vmatprep.mubr.msk.f32.mxu0 %vm9918_vm7, %v9903_v19  ;;  %15411 = vmatpush3.bf16.msra.mxu0 %v15744_v41 }
 0xa1e   :  { %15412 = vmatprep.subr.bf16.mxu0 %v15745_v26 }
 0xa20   :  { %10019 = vmatmul.mubr.f32.gmra.mxu0 %v9902_v15 }
 0xa21   :  { %12726 = vmatprep.mubr.msk.f32.mxu0 %vm9918_vm7, %v9905_v36  ;;  %15413 = vmatpush3.bf16.msra.mxu0 %v15745_v26 }
 0xa22   :  { %15414 = vmatprep.subr.bf16.mxu0 %v15746_v45 }
 0xa24   :  { %10024 = vmatmul.mubr.f32.gmra.mxu0 %v9904_v60  ;;  %v15755_v60 = vld [vmem:[%s23184_s7 + $0x40] sm:$0xff]  }
 0xa25   :  { %12727 = vmatprep.mubr.msk.f32.mxu0 %vm9918_vm7, %v9907_v48  ;;  %15415 = vmatpush3.bf16.msra.mxu0 %v15746_v45  ;;  %v15764_v48 = vld [vmem:[%s23184_s7 + $0xb8] sm:$0xff]  }
 0xa26   :  { %15416 = vmatprep.subr.bf16.mxu0 %v15747_v10 }
 0xa28   :  { %10029 = vmatmul.mubr.f32.gmra.mxu0 %v9906_v32 }
 0xa29   :  { %12728 = vmatprep.mubr.msk.f32.mxu0 %vm9918_vm7, %v9909_v44  ;;  %15417 = vmatpush3.bf16.msra.mxu0 %v15747_v10 }
 0xa2a   :  { %15442 = vmatprep.subr.bf16.mxu0 %v15749_v52 }
 0xa2c   :  { %10034 = vmatmul.mubr.f32.gmra.mxu0 %v9908_v54 }
 0xa2d   :  { %12729 = vmatprep.mubr.msk.f32.mxu0 %vm9918_vm7, %v9911_v8 }
 0xa30   :  { %10039 = vmatmul.mubr.f32.gmra.mxu0 %v9910_v0 }
 0xa31   :  { %12730 = vmatprep.mubr.msk.f32.mxu0 %vm9918_vm7, %v9913_v7 }
 0xa34   :  { %10044 = vmatmul.mubr.f32.gmra.mxu0 %v9912_v12 }
 0xa35   :  { %12731 = vmatprep.mubr.msk.f32.mxu0 %vm9918_vm7, %v9915_v11 }
 0xa38   :  { %10049 = vmatmul.mubr.f32.gmra.mxu0 %v9914_v40 }
 0xa39   :  { %12732 = vmatprep.mubr.msk.f32.mxu0 %vm9918_vm7, %v9917_v13  ;;  %v15757_v13 = vld [vmem:[%s23184_s7 + $0x98] sm:$0xff]  }
 0xa3c   :  { %10054 = vmatmul.mubr.f32.gmra.mxu0 %v9916_v53 }
 0xadc   :  { %v10015_v63 = vpop.f32.mrf.mxu0 }
 0xadd   :  { %10060 = vst.msk [vmem:[#allocation3] sm:$0xff] %vm10059_vm8, %v10015_v63 }
 0xade   :  { %v10017_v31 = vpop.f32.mrf.mxu0 }
 0xae0   :  { %v10020_v21 = vpop.f32.mrf.mxu0 }
 0xae1   :  { %10061 = vst.msk [vmem:[#allocation3 + $0x8] sm:$0xff] %vm10059_vm8, %v10020_v21 }
 0xae2   :  { %v10022_v62 = vpop.f32.mrf.mxu0 }
 0xae4   :  { %v10025_v22 = vpop.f32.mrf.mxu0  ;;  %v10069_v42 = vld [vmem:[#allocation3] sm:$0xff] }
 0xae5   :  { %10062 = vst.msk [vmem:[#allocation3 + $0x10] sm:$0xff] %vm10059_vm8, %v10025_v22  ;;  %v15766_v22 = vld [vmem:[%s23184_s7 + $0xb0] sm:$0xff]  }
 0xae6   :  { %v10027_v24 = vpop.f32.mrf.mxu0 }
 0xae8   :  { %v10030_v38 = vpop.f32.mrf.mxu0  ;;  %v22664_v34 = vld [vmem:[#allocation3 + $0x8] sm:$0xff] }
 0xae9   :  { %10063 = vst.msk [vmem:[#allocation3 + $0x18] sm:$0xff] %vm10059_vm8, %v10030_v38  ;;  %v10077_v50 = vpack.c.bf16 %v22664_v34, %v10069_v42  ;;  %v10089_v27 = vld [vmem:[#allocation3 + $0x1] sm:$0xff] }
 0xaea   :  { %v10032_v51 = vpop.f32.mrf.mxu0  ;;  %v10312_v40 = vld [vmem:[#allocation3 + $0x2] sm:$0xff] }
 0xaeb   :  { %15434 = vmatprep.mubr.msk.bf16.mxu1 %vm10059_vm8, %v10077_v50  ;;  %v10442_v26 = vld [vmem:[#allocation3 + $0x6] sm:$0xff] }
 0xaec   :  { %v10035_v1 = vpop.f32.mrf.mxu0  ;;  %v10090_v57 = vld [vmem:[#allocation3 + $0x9] sm:$0xff]  ;;  %v15761_v50 = vld [vmem:[%s23184_s7 + $0x88] sm:$0xff]  }
 0xaed   :  { %10064 = vst.msk [vmem:[#allocation3 + $0x20] sm:$0xff] %vm10059_vm8, %v10035_v1  ;;  %v10097_v39 = vpack.c.bf16 %v10090_v57, %v10089_v27  ;;  %v22671_v43 = vld [vmem:[#allocation3 + $0x10] sm:$0xff]  ;;  %v15768_v51 = vld [vmem:[%s23184_s7 + $0xa8] sm:$0xff]  }
 0xaee   :  { %v10037_v46 = vpop.f32.mrf.mxu0  ;;  %v10313_v44 = vld [vmem:[#allocation3 + $0xa] sm:$0xff] }
 0xaef   :  { %15418 = vmatprep.mubr.msk.bf16.mxu0 %vm10059_vm8, %v10097_v39  ;;  %v22714_v8 = vld [vmem:[#allocation3 + $0xe] sm:$0xff]  ;;  %v10320_v41 = vpack.c.bf16 %v10313_v44, %v10312_v40 }
 0xaf0   :  { %v10040_v9 = vpop.f32.mrf.mxu0  ;;  %v22673_v55 = vld [vmem:[#allocation3 + $0x18] sm:$0xff]  ;;  %v10450_v45 = vpack.c.bf16 %v22714_v8, %v10442_v26  ;;  %v10573_v39 = vld [vmem:[#allocation3 + $0xf] sm:$0xff] }
 0xaf1   :  { %10065 = vst.msk [vmem:[#allocation3 + $0x28] sm:$0xff] %vm10059_vm8, %v10040_v9  ;;  %v10078_v2 = vpack.c.bf16 %v22673_v55, %v22671_v43  ;;  %v10091_v4 = vld [vmem:[#allocation3 + $0x11] sm:$0xff] }
 0xaf2   :  { %v10042_v6 = vpop.f32.mrf.mxu0  ;;  %v10314_v20 = vld [vmem:[#allocation3 + $0x12] sm:$0xff] }
 0xaf3   :  { %15435 = vmatmul.mubr.msk.bf16.vlgmr.msra.gmra.mxu1 %vm10059_vm8, %v10078_v2  ;;  %v22727_v25 = vld [vmem:[#allocation3 + $0x16] sm:$0xff]  ;;  %v10572_v2 = vld [vmem:[#allocation3 + $0x7] sm:$0xff] }
 0xaf4   :  { %v10045_v30 = vpop.f32.mrf.mxu0  ;;  %v10092_v18 = vld [vmem:[#allocation3 + $0x19] sm:$0xff]  ;;  %15459 = vmatpush3.bf16.msra.mxu1 %v15756_v49  ;;  %v15759_v49 = vld [vmem:[%s23184_s7 + $0x90] sm:$0xff]   ;;  %v10580_v6 = vpack.c.bf16 %v10573_v39, %v10572_v2  ;;  %v15773_v40 = vld [vmem:[%s23184_s7 + $0x118] sm:$0xff]   ;;  %v11100_v39 = vpack.c.bf16 %v22727_v25, %v22714_v8 }
 0xaf5   :  { %10066 = vst.msk [vmem:[#allocation3 + $0x30] sm:$0xff] %vm10059_vm8, %v10045_v30  ;;  %v10098_v35 = vpack.c.bf16 %v10092_v18, %v10091_v4  ;;  %15460 = vmatprep.subr.bf16.mxu1 %v15758_v16  ;;  %v22690_v14 = vld [vmem:[#allocation3 + $0x20] sm:$0xff]  ;;  %v15763_v9 = vld [vmem:[%s23184_s7 + $0x80] sm:$0xff]   ;;  %v10710_v4 = vpack.c.bf16 %v22671_v43, %v22664_v34  ;;  %v15765_v18 = vld [vmem:[%s23184_s7 + $0xd8] sm:$0xff]  }
 0xaf6   :  { %v10047_v47 = vpop.f32.mrf.mxu0  ;;  %v10315_v10 = vld [vmem:[#allocation3 + $0x1a] sm:$0xff]  ;;  %v15767_v34 = vld [vmem:[%s23184_s7 + $0xd0] sm:$0xff]  }
 0xaf7   :  { %15419 = vmatmul.mubr.msk.bf16.vlgmr.msra.gmra.mxu0 %vm10059_vm8, %v10098_v35  ;;  %v22725_v17 = vld [vmem:[#allocation3 + $0x1e] sm:$0xff]  ;;  %v10321_v37 = vpack.c.bf16 %v10315_v10, %v10314_v20  ;;  %v15775_v10 = vld [vmem:[%s23184_s7 + $0x110] sm:$0xff]  }
 0xaf8   :  { %v10050_v59 = vpop.f32.mrf.mxu0  ;;  %15443 = vmatpush3.bf16.msra.mxu0 %v15749_v52  ;;  %15461 = vmatpush3.bf16.msra.mxu1 %v15758_v16  ;;  %v22692_v61 = vld [vmem:[#allocation3 + $0x28] sm:$0xff]  ;;  %v10451_v31 = vpack.c.bf16 %v22725_v17, %v22727_v25  ;;  %v15770_v30 = vld [vmem:[%s23184_s7 + $0xa0] sm:$0xff]  }
 0xaf9   :  { %10067 = vst.msk [vmem:[#allocation3 + $0x38] sm:$0xff] %vm10059_vm8, %v10050_v59  ;;  %15444 = vmatprep.subr.bf16.mxu0 %v15751_v58  ;;  %v10079_v23 = vpack.c.bf16 %v22692_v61, %v22690_v14  ;;  %15462 = vmatprep.subr.bf16.mxu1 %v15760_v28  ;;  %v10093_v3 = vld [vmem:[#allocation3 + $0x21] sm:$0xff]  ;;  %v10574_v47 = vld [vmem:[#allocation3 + $0x17] sm:$0xff] }
 0xafa   :  { %v10052_v33 = vpop.f32.mrf.mxu0  ;;  %v10316_v63 = vld [vmem:[#allocation3 + $0x22] sm:$0xff] }
 0xafb   :  { %15438 = vmatprep.mubr.msk.bf16.mxu1 %vm10059_vm8, %v10079_v23  ;;  %v22741_v24 = vld [vmem:[#allocation3 + $0x26] sm:$0xff]  ;;  %v10711_v23 = vpack.c.bf16 %v22690_v14, %v22673_v55  ;;  %v10833_v55 = vld [vmem:[#allocation3 + $0x14] sm:$0xff] }
 0xafc   :  { %15445 = vmatpush3.bf16.msra.mxu0 %v15751_v58  ;;  %v10094_v19 = vld [vmem:[#allocation3 + $0x29] sm:$0xff]  ;;  %15463 = vmatpush3.bf16.msra.mxu1 %v15760_v28  ;;  %v10055_v15 = vpop.f32.mrf.mxu0  ;;  %v10575_v35 = vld [vmem:[#allocation3 + $0x1f] sm:$0xff] }
 0xafd   :  { %v10099_v36 = vpack.c.bf16 %v10094_v19, %v10093_v3  ;;  %15446 = vmatprep.subr.bf16.mxu0 %v15753_v29  ;;  %15464 = vmatprep.subr.bf16.mxu1 %v15762_v56  ;;  %10068 = vst.msk [vmem:[#allocation3 + $0x40] sm:$0xff] %vm10059_vm8, %v10055_v15  ;;  %v22712_v54 = vld [vmem:[#allocation3 + $0x30] sm:$0xff]  ;;  %v10581_v59 = vpack.c.bf16 %v10575_v35, %v10574_v47  ;;  %v10576_v43 = vld [vmem:[#allocation3 + $0x27] sm:$0xff] }
 0xafe   :  { %v10057_v32 = vpop.f32.mrf.mxu0  ;;  %v10317_v52 = vld [vmem:[#allocation3 + $0x2a] sm:$0xff]  ;;  %v10712_v33 = vpack.c.bf16 %v22712_v54, %v22692_v61  ;;  %v15769_v3 = vld [vmem:[%s23184_s7 + $0xc8] sm:$0xff]  }
 0xaff   :  { %15422 = vmatprep.mubr.msk.bf16.mxu0 %vm10059_vm8, %v10099_v36  ;;  %v22734_v21 = vld [vmem:[#allocation3 + $0x2e] sm:$0xff]  ;;  %v10322_v62 = vpack.c.bf16 %v10317_v52, %v10316_v63  ;;  %v15776_v14 = vld [vmem:[%s23184_s7 + $0xe8] sm:$0xff]  }
 0xb00   :  { %v10095_v0 = vld [vmem:[#allocation3 + $0x31] sm:$0xff]  ;;  %v10096_v7 = vld [vmem:[#allocation3 + $0x39] sm:$0x3]  ;;  %15447 = vmatpush3.bf16.msra.mxu0 %v15753_v29  ;;  %15465 = vmatpush3.bf16.msra.mxu1 %v15762_v56  ;;  %v10452_v38 = vpack.c.bf16 %v22734_v21, %v22741_v24  ;;  %v10449_v57 = vld [vmem:[#allocation3 + $0x3e] sm:$0x3] }
 0xb01   :  { %v10076_v12 = vld [vmem:[#allocation3 + $0x38] sm:$0x3]  ;;  %v10100_v11 = vpack.c.bf16 %v10096_v7, %v10095_v0  ;;  %15448 = vmatprep.subr.bf16.mxu0 %v15755_v60  ;;  %15490 = vmatprep.subr.bf16.mxu1 %v15764_v48  ;;  %v10319_v1 = vld [vmem:[#allocation3 + $0x3a] sm:$0x3]  ;;  %v15772_v58 = vld [vmem:[%s23184_s7 + $0xf8] sm:$0xff]  }
 0xb02   :  { %v10080_v53 = vpack.c.bf16 %v10076_v12, %v22712_v54  ;;  %v10318_v42 = vld [vmem:[#allocation3 + $0x32] sm:$0xff]  ;;  %v15774_v56 = vld [vmem:[%s23184_s7 + $0xf0] sm:$0xff]  }
 0xb03   :  { %15423 = vmatmul.mubr.msk.bf16.gmra.mxu0 %vm10059_vm8, %v10100_v11  ;;  %v22753_v27 = vld [vmem:[#allocation3 + $0x36] sm:$0xff]  ;;  %v10323_v46 = vpack.c.bf16 %v10319_v1, %v10318_v42  ;;  %v10962_v12 = vld [vmem:[#allocation3 + $0xd] sm:$0xff]  ;;  %v10965_v26 = vld [vmem:[#allocation3 + $0x25] sm:$0xff] }
 0xb04   :  { %15439 = vmatmul.mubr.msk.bf16.gmra.mxu1 %vm10059_vm8, %v10080_v53  ;;  %15449 = vmatpush3.bf16.msra.mxu0 %v15755_v60  ;;  %v10453_v16 = vpack.c.bf16 %v10449_v57, %v22753_v27  ;;  %v10577_v28 = vld [vmem:[#allocation3 + $0x2f] sm:$0xff]  ;;  %v10579_v19 = vld [vmem:[#allocation3 + $0x3f] sm:$0x3]  ;;  %v10578_v15 = vld [vmem:[#allocation3 + $0x37] sm:$0xff]  ;;  %v11102_v8 = vpack.c.bf16 %v22753_v27, %v22734_v21 }
 0xb05   :  { %15450 = vmatprep.mubr.msk.bf16.mxu0 %vm10059_vm8, %v10320_v41  ;;  %15474 = vmatprep.subr.bf16.mxu0 %v15757_v13  ;;  %v10582_v29 = vpack.c.bf16 %v10577_v28, %v10576_v43  ;;  %v10709_v61 = vld [vmem:[#allocation3 + $0x40] sm:$0x3]  ;;  %v10583_v36 = vpack.c.bf16 %v10579_v19, %v10578_v15  ;;  %v15771_v60 = vld [vmem:[%s23184_s7 + $0xc0] sm:$0xff]   ;;  %v10836_v52 = vld [vmem:[#allocation3 + $0x2c] sm:$0xff] }
 0xb06   :  { %15466 = vmatprep.mubr.msk.bf16.mxu1 %vm10059_vm8, %v10450_v45  ;;  %v10963_v32 = vld [vmem:[#allocation3 + $0x15] sm:$0xff]  ;;  %v10839_v42 = vld [vmem:[#allocation3 + $0x44] sm:$0x3]  ;;  %v11099_v2 = vld [vmem:[#allocation3 + $0x46] sm:$0x3] }
 0xb07   :  { %v10708_v54 = vld [vmem:[#allocation3 + $0x38] sm:$0xff]  ;;  %v10970_v11 = vpack.c.bf16 %v10963_v32, %v10962_v12  ;;  %v15784_v27 = vld [vmem:[%s23185_s10 + $0x78] sm:$0xff]  }
 0xb08   :  { %v10713_v0 = vpack.c.bf16 %v10709_v61, %v10708_v54  ;;  %v15778_v7 = vld [vmem:[%s23184_s7 + $0xe0] sm:$0xff]  }
 0xb09   :  { %v10837_v53 = vld [vmem:[#allocation3 + $0x34] sm:$0xff]  ;;  %v10834_v41 = vld [vmem:[#allocation3 + $0x1c] sm:$0xff] }
 0xb0a   :  { %v10967_v20 = vld [vmem:[#allocation3 + $0x35] sm:$0xff]  ;;  %v11098_v25 = vld [vmem:[#allocation3 + $0x3e] sm:$0xff] }
 0xb0b   :  { %15451 = vmatmul.mubr.msk.bf16.vlgmr.msra.gmra.mxu0 %vm10059_vm8, %v10321_v37  ;;  %v10842_v37 = vpack.c.bf16 %v10837_v53, %v10836_v52  ;;  %v15779_v57 = vld [vmem:[%s23184_s7 + $0x100] sm:$0xff]  }
 0xb0c   :  { %15467 = vmatmul.mubr.msk.bf16.vlgmr.msra.gmra.mxu1 %vm10059_vm8, %v10451_v31  ;;  %15475 = vmatpush3.bf16.msra.mxu0 %v15757_v13  ;;  %v10835_v13 = vld [vmem:[#allocation3 + $0x24] sm:$0xff]  ;;  %v10966_v31 = vld [vmem:[#allocation3 + $0x2d] sm:$0xff]  ;;  %v15790_v15 = vld [vmem:[%s23185_s10 + $0x60] sm:$0xff]  }
 0xb0d   :  { %15454 = vmatprep.mubr.msk.bf16.mxu0 %vm10059_vm8, %v10322_v62  ;;  %15476 = vmatprep.subr.bf16.mxu0 %v15759_v49  ;;  %v10841_v45 = vpack.c.bf16 %v10835_v13, %v10834_v41  ;;  %v10972_v62 = vpack.c.bf16 %v10967_v20, %v10966_v31 }
 0xb0e   :  { %15491 = vmatpush3.bf16.msra.mxu1 %v15764_v48  ;;  %15470 = vmatprep.mubr.msk.bf16.mxu1 %vm10059_vm8, %v10452_v38  ;;  %v10832_v48 = vld [vmem:[#allocation3 + $0xc] sm:$0xff]  ;;  %v10838_v38 = vld [vmem:[#allocation3 + $0x3c] sm:$0xff] }
 0xb0f   :  { %15492 = vmatprep.subr.bf16.mxu1 %v15766_v22  ;;  %v10840_v44 = vpack.c.bf16 %v10833_v55, %v10832_v48  ;;  %v10843_v1 = vpack.c.bf16 %v10839_v42, %v10838_v38 }
 0xb10   :  { %15477 = vmatpush3.bf16.msra.mxu0 %v15759_v49  ;;  %v10964_v49 = vld [vmem:[#allocation3 + $0x1d] sm:$0xff] }
 0xb11   :  { %15478 = vmatprep.subr.bf16.mxu0 %v15761_v50  ;;  %v10971_v63 = vpack.c.bf16 %v10965_v26, %v10964_v49 }
 0xb12   :  { %15493 = vmatpush3.bf16.msra.mxu1 %v15766_v22  ;;  %v15777_v22 = vld [vmem:[%s23184_s7 + $0x108] sm:$0xff]  }
 0xb13   :  { %15494 = vmatprep.subr.bf16.mxu1 %v15768_v51  ;;  %15455 = vmatmul.mubr.msk.bf16.gmra.mxu0 %vm10059_vm8, %v10323_v46 }
 0xb14   :  { %15471 = vmatmul.mubr.msk.bf16.gmra.mxu1 %vm10059_vm8, %v10453_v16  ;;  %15479 = vmatpush3.bf16.msra.mxu0 %v15761_v50  ;;  %v10968_v50 = vld [vmem:[#allocation3 + $0x3d] sm:$0xff]  ;;  %v11103_v16 = vpack.c.bf16 %v11099_v2, %v11098_v25 }
 0xb15   :  { %15482 = vmatprep.mubr.msk.bf16.mxu0 %vm10059_vm8, %v10580_v6  ;;  %15480 = vmatprep.subr.bf16.mxu0 %v15763_v9 }
 0xb16   :  { %15495 = vmatpush3.bf16.msra.mxu1 %v15768_v51  ;;  %15498 = vmatprep.mubr.msk.bf16.mxu1 %vm10059_vm8, %v10710_v4  ;;  %v10969_v51 = vld [vmem:[#allocation3 + $0x45] sm:$0x3] }
 0xb17   :  { %15496 = vmatprep.subr.bf16.mxu1 %v15770_v30  ;;  %v10973_v46 = vpack.c.bf16 %v10969_v51, %v10968_v50 }
 0xb18   :  { %15481 = vmatpush3.bf16.msra.mxu0 %v15763_v9  ;;  %v11101_v9 = vpack.c.bf16 %v22741_v24, %v22725_v17 }
 0xb19   :  { %15506 = vmatprep.subr.bf16.mxu0 %v15765_v18 }
 0xb1a   :  { %15497 = vmatpush3.bf16.msra.mxu1 %v15770_v30 }
 0xb1b   :  { %15522 = vmatprep.subr.bf16.mxu1 %v15772_v58  ;;  %15483 = vmatmul.mubr.msk.bf16.vlgmr.msra.gmra.mxu0 %vm10059_vm8, %v10581_v59 }
 0xb1c   :  { %15507 = vmatpush3.bf16.msra.mxu0 %v15765_v18  ;;  %15486 = vmatprep.mubr.msk.bf16.mxu0 %vm10059_vm8, %v10582_v29 }
 0xb1d   :  { %15508 = vmatprep.subr.bf16.mxu0 %v15767_v34  ;;  %15499 = vmatmul.mubr.msk.bf16.vlgmr.msra.gmra.mxu1 %vm10059_vm8, %v10711_v23 }
 0xb1e   :  { %15523 = vmatpush3.bf16.msra.mxu1 %v15772_v58  ;;  %15502 = vmatprep.mubr.msk.bf16.mxu1 %vm10059_vm8, %v10712_v33  ;;  %v15788_v33 = vld [vmem:[%s23185_s10 + $0x68] sm:$0xff]  }
 0xb1f   :  { %15524 = vmatprep.subr.bf16.mxu1 %v15774_v56 }
 0xb20   :  { %15509 = vmatpush3.bf16.msra.mxu0 %v15767_v34  ;;  %v15786_v34 = vld [vmem:[%s23185_s10 + $0x70] sm:$0xff]  }
 0xb21   :  { %15510 = vmatprep.subr.bf16.mxu0 %v15769_v3 }
 0xb22   :  { %15525 = vmatpush3.bf16.msra.mxu1 %v15774_v56 }
 0xb23   :  { %15487 = vmatmul.mubr.msk.bf16.gmra.mxu0 %vm10059_vm8, %v10583_v36  ;;  %15526 = vmatprep.subr.bf16.mxu1 %v15776_v14 }
 0xb24   :  { %15511 = vmatpush3.bf16.msra.mxu0 %v15769_v3  ;;  %15514 = vmatprep.mubr.msk.bf16.mxu0 %vm10059_vm8, %v10840_v44 }
 0xb25   :  { %15512 = vmatprep.subr.bf16.mxu0 %v15771_v60  ;;  %15503 = vmatmul.mubr.msk.bf16.gmra.mxu1 %vm10059_vm8, %v10713_v0 }
 0xb26   :  { %15527 = vmatpush3.bf16.msra.mxu1 %v15776_v14  ;;  %15530 = vmatprep.mubr.msk.bf16.mxu1 %vm10059_vm8, %v10970_v11 }
 0xb27   :  { %15528 = vmatprep.subr.bf16.mxu1 %v15778_v7 }
 0xb28   :  { %15513 = vmatpush3.bf16.msra.mxu0 %v15771_v60 }
 0xb29   :  { %15538 = vmatprep.subr.bf16.mxu0 %v15773_v40 }
 0xb2a   :  { %15529 = vmatpush3.bf16.msra.mxu1 %v15778_v7 }
 0xb2b   :  { %15515 = vmatmul.mubr.msk.bf16.vlgmr.msra.gmra.mxu0 %vm10059_vm8, %v10841_v45  ;;  %15554 = vmatprep.subr.mxu1 %v23514_v5 }
 0xb2c   :  { %15539 = vmatpush3.bf16.msra.mxu0 %v15773_v40  ;;  %15518 = vmatprep.mubr.msk.bf16.mxu0 %vm10059_vm8, %v10842_v37 }
 0xb2d   :  { %15540 = vmatprep.subr.bf16.mxu0 %v15775_v10  ;;  %15531 = vmatmul.mubr.msk.bf16.vlgmr.msra.gmra.mxu1 %vm10059_vm8, %v10971_v63 }
 0xb2e   :  { %15534 = vmatprep.mubr.msk.bf16.mxu1 %vm10059_vm8, %v10972_v62 }
 0xb30   :  { %15541 = vmatpush3.bf16.msra.mxu0 %v15775_v10 }
 0xb31   :  { %15542 = vmatprep.subr.bf16.mxu0 %v15777_v22 }
 0xb33   :  { %15519 = vmatmul.mubr.msk.bf16.gmra.mxu0 %vm10059_vm8, %v10843_v1 }
 0xb34   :  { %15543 = vmatpush3.bf16.msra.mxu0 %v15777_v22  ;;  %15546 = vmatprep.mubr.msk.bf16.mxu0 %vm10059_vm8, %v11100_v39 }
 0xb35   :  { %15544 = vmatprep.subr.bf16.mxu0 %v15779_v57  ;;  %15535 = vmatmul.mubr.msk.bf16.gmra.mxu1 %vm10059_vm8, %v10973_v46 }
 0xb36   :  { %15568 = vmatprep.mubr.msk.f32.mxu1 %vm15827_vm1, %v23514_v5 }
 0xb38   :  { %15545 = vmatpush3.bf16.msra.mxu0 %v15779_v57 }
 0xb39   :  { %15588 = vmatprep.subr.bf16.mxu0 %v23514_v5 }
 0xb3b   :  { %15547 = vmatmul.mubr.msk.bf16.vlgmr.msra.gmra.mxu0 %vm10059_vm8, %v11101_v9 }
 0xb3c   :  { %15550 = vmatprep.mubr.msk.bf16.mxu0 %vm10059_vm8, %v11102_v8  ;;  %15589 = vmatpush3.bf16.msra.mxu0 %v15784_v27 }
 0xb3d   :  { %15590 = vmatprep.subr.bf16.mxu0 %v23514_v5 }
 0xb40   :  { %15591 = vmatpush3.bf16.msra.mxu0 %v15786_v34 }
 0xb41   :  { %15592 = vmatprep.subr.bf16.mxu0 %v23514_v5 }
 0xb43   :  { %15551 = vmatmul.mubr.msk.bf16.gmra.mxu0 %vm10059_vm8, %v11103_v16 }
 0xb44   :  { %15604 = vmatprep.mubr.msk.bf16.mxu0 %vm15827_vm1, %v23514_v5  ;;  %15593 = vmatpush3.bf16.msra.mxu0 %v15788_v33 }
 0xb45   :  { %15594 = vmatprep.subr.bf16.mxu0 %v23514_v5 }
 0xb48   :  { %15595 = vmatpush3.bf16.msra.mxu0 %v15790_v15 }
 0xb49   :  { %15596 = vmatprep.subr.bf16.mxu0 %v23514_v5 }
 0xbb3   :  { %v15436_v6 = vpop.f32.mrf.mxu1 }
 0xbb5   :  { %v10281_v24 = vpop.f32.mrf.mxu1 }
 0xbb7   :  { %v15420_v30 = vpop.f32.mrf.mxu0  ;;  %v15437_v18 = vpop.f32.mrf.mxu1 }
 0xbb8   :  { %v10290_v22 = vadd.f32 %v15436_v6, %v15420_v30 }
 0xbb9   :  { %v10180_v17 = vpop.f32.mrf.mxu0  ;;  %v10284_v21 = vpop.f32.mrf.mxu1 }
 0xbba   :  { %v10282_v50 = vadd.f32 %v10281_v24, %v10180_v17 }
 0xbbb   :  { %v15421_v4 = vpop.f32.mrf.mxu0 }
 0xbbc   :  { %v10293_v39 = vadd.f32 %v15437_v18, %v15421_v4 }
 0xbbd   :  { %v10183_v35 = vpop.f32.mrf.mxu0 }
 0xbbe   :  { %v10285_v25 = vadd.f32 %v10284_v21, %v10183_v35 }
 0xbc3   :  { %v22841_v58 = vpop.f32.mrf.mxu0 }
 0xbc4   :  { %v15440_v28 = vpop.f32.mrf.mxu1 }
 0xbc5   :  { %v22844_v47 = vpop.f32.mrf.mxu0  ;;  %v10306_v34 = vadd.f32 %v15440_v28, %v22841_v58 }
 0xbc6   :  { %v22846_v59 = vpop.f32.mrf.mxu1 }
 0xbc7   :  { %v22851_v43 = vpop.f32.mrf.mxu0  ;;  %v10298_v17 = vadd.f32 %v22846_v59, %v22844_v47 }
 0xbc8   :  { %v22853_v29 = vpop.f32.mrf.mxu1 }
 0xbc9   :  { %v22856_v23 = vpop.f32.mrf.mxu0  ;;  %v10309_v58 = vadd.f32 %v22853_v29, %v22851_v43 }
 0xbca   :  { %v22858_v56 = vpop.f32.mrf.mxu1 }
 0xbcb   :  { %v15452_v3 = vpop.f32.mrf.mxu0  ;;  %v10301_v47 = vadd.f32 %v22858_v56, %v22856_v23  ;;  %v22893_v23 = vld [vmem:[%s23186_s8] ss:$0 sm:$0xff] }
 0xbcc   :  { %v15468_v19 = vpop.f32.mrf.mxu1  ;;  %v10436_v51 = vadd.f32 %v15452_v3, %v10290_v22 }
 0xbcd   :  { %v10403_v55 = vpop.f32.mrf.mxu0 }
 0xbce   :  { %v10533_v14 = vpop.f32.mrf.mxu1  ;;  %v10434_v46 = vadd.f32 %v10403_v55, %v10282_v50  ;;  %v10566_v16 = vadd.f32 %v15468_v19, %v10436_v51 }
 0xbcf   :  { %v15453_v61 = vpop.f32.mrf.mxu0 }
 0xbd0   :  { %v15469_v36 = vpop.f32.mrf.mxu1  ;;  %v10437_v2 = vadd.f32 %v15453_v61, %v10293_v39  ;;  %v10564_v30 = vadd.f32 %v10533_v14, %v10434_v46 }
 0xbd1   :  { %v10406_v60 = vpop.f32.mrf.mxu0 }
 0xbd2   :  { %v10536_v48 = vpop.f32.mrf.mxu1  ;;  %v10435_v6 = vadd.f32 %v10406_v60, %v10285_v25  ;;  %v10567_v22 = vadd.f32 %v15469_v36, %v10437_v2 }
 0xbd3   :  { %v15456_v32 = vpop.f32.mrf.mxu0 }
 0xbd4   :  { %v15472_v44 = vpop.f32.mrf.mxu1  ;;  %v10440_v3 = vadd.f32 %v15456_v32, %v10306_v34  ;;  %v10565_v50 = vadd.f32 %v10536_v48, %v10435_v6 }
 0xbd5   :  { %v10419_v54 = vpop.f32.mrf.mxu0 }
 0xbd6   :  { %v10549_v0 = vpop.f32.mrf.mxu1  ;;  %v10438_v18 = vadd.f32 %v10419_v54, %v10298_v17  ;;  %v10570_v14 = vadd.f32 %v15472_v44, %v10440_v3 }
 0xbd7   :  { %v15457_v7 = vpop.f32.mrf.mxu0 }
 0xbd8   :  { %v22868_v12 = vpop.f32.mrf.mxu1  ;;  %v10441_v59 = vadd.f32 %v15457_v7, %v10309_v58  ;;  %v10568_v36 = vadd.f32 %v10549_v0, %v10438_v18 }
 0xbd9   :  { %v10422_v11 = vpop.f32.mrf.mxu0 }
 0xbda   :  { %v22870_v40 = vpop.f32.mrf.mxu1  ;;  %v10571_v44 = vadd.f32 %v22868_v12, %v10441_v59 }
 0xbdb   :  { %v15484_v13 = vpop.f32.mrf.mxu0 }
 0xbdc   :  { %v10696_v33 = vadd.f32 %v15484_v13, %v10566_v16 }
 0xbdd   :  { %v10663_v53 = vpop.f32.mrf.mxu0  ;;  %v15500_v41 = vpop.f32.mrf.mxu1 }
 0xbde   :  { %v10694_v4 = vadd.f32 %v10663_v53, %v10564_v30  ;;  %v10826_v21 = vadd.f32 %v15500_v41, %v10696_v33  ;;  %v10439_v41 = vadd.f32 %v10422_v11, %v10301_v47 }
 0xbdf   :  { %v15485_v26 = vpop.f32.mrf.mxu0  ;;  %v10793_v45 = vpop.f32.mrf.mxu1 }
 0xbe0   :  { %v10697_v35 = vadd.f32 %v15485_v26, %v10567_v22  ;;  %v10824_v60 = vadd.f32 %v10793_v45, %v10694_v4  ;;  %v10569_v11 = vadd.f32 %v22870_v40, %v10439_v41 }
 0xbe1   :  { %v10666_v10 = vpop.f32.mrf.mxu0  ;;  %v15501_v52 = vpop.f32.mrf.mxu1 }
 0xbe2   :  { %v10695_v61 = vadd.f32 %v10666_v10, %v10565_v50  ;;  %v10827_v53 = vadd.f32 %v15501_v52, %v10697_v35 }
 0xbe3   :  { %v15488_v20 = vpop.f32.mrf.mxu0  ;;  %v10796_v37 = vpop.f32.mrf.mxu1 }
 0xbe4   :  { %v10700_v54 = vadd.f32 %v15488_v20, %v10570_v14  ;;  %v10825_v46 = vadd.f32 %v10796_v37, %v10695_v61 }
 0xbe5   :  { %v10679_v49 = vpop.f32.mrf.mxu0  ;;  %v15504_v63 = vpop.f32.mrf.mxu1 }
 0xbe6   :  { %v10698_v51 = vadd.f32 %v10679_v49, %v10568_v36  ;;  %v10830_v56 = vadd.f32 %v15504_v63, %v10700_v54 }
 0xbe7   :  { %v22872_v31 = vpop.f32.mrf.mxu0  ;;  %v22874_v62 = vpop.f32.mrf.mxu1 }
 0xbe8   :  { %v10701_v20 = vadd.f32 %v22872_v31, %v10571_v44  ;;  %v10828_v37 = vadd.f32 %v22874_v62, %v10698_v51 }
 0xbe9   :  { %v22876_v38 = vpop.f32.mrf.mxu0  ;;  %v22878_v42 = vpop.f32.mrf.mxu1 }
 0xbea   :  { %v10699_v25 = vadd.f32 %v22876_v38, %v10569_v11  ;;  %v10831_v40 = vadd.f32 %v22878_v42, %v10701_v20 }
 0xbeb   :  { %v15516_v1 = vpop.f32.mrf.mxu0  ;;  %v22880_v57 = vpop.f32.mrf.mxu1 }
 0xbec   :  { %v10956_v13 = vadd.f32 %v15516_v1, %v10826_v21  ;;  %v10829_v17 = vadd.f32 %v22880_v57, %v10699_v25 }
 0xbed   :  { %v10923_v9 = vpop.f32.mrf.mxu0  ;;  %v15532_v8 = vpop.f32.mrf.mxu1 }
 0xbee   :  { %v10954_v48 = vadd.f32 %v10923_v9, %v10824_v60  ;;  %v11086_v29 = vadd.f32 %v15532_v8, %v10956_v13 }
 0xbef   :  { %v15517_v27 = vpop.f32.mrf.mxu0  ;;  %v11053_v15 = vpop.f32.mrf.mxu1 }
 0xbf0   :  { %v10957_v43 = vadd.f32 %v15517_v27, %v10827_v53  ;;  %v11084_v7 = vadd.f32 %v11053_v15, %v10954_v48 }
 0xbf1   :  { %v10926_v24 = vpop.f32.mrf.mxu0  ;;  %v15533_v19 = vpop.f32.mrf.mxu1 }
 0xbf2   :  { %v10955_v0 = vadd.f32 %v10926_v24, %v10825_v46  ;;  %v11087_v9 = vadd.f32 %v15533_v19, %v10957_v43 }
 0xbf3   :  { %v15520_v55 = vpop.f32.mrf.mxu0  ;;  %v11056_v26 = vpop.f32.mrf.mxu1 }
 0xbf4   :  { %v10960_v1 = vadd.f32 %v15520_v55, %v10830_v56  ;;  %v11085_v27 = vadd.f32 %v11056_v26, %v10955_v0 }
 0xbf5   :  { %v10939_v28 = vpop.f32.mrf.mxu0  ;;  %v15536_v52 = vpop.f32.mrf.mxu1 }
 0xbf6   :  { %v10958_v2 = vadd.f32 %v10939_v28, %v10828_v37  ;;  %v11090_v33 = vadd.f32 %v15536_v52, %v10960_v1 }
 0xbf7   :  { %v15521_v32 = vpop.f32.mrf.mxu0  ;;  %v11069_v6 = vpop.f32.mrf.mxu1 }
 0xbf8   :  { %v10961_v24 = vadd.f32 %v15521_v32, %v10831_v40  ;;  %v11088_v3 = vadd.f32 %v11069_v6, %v10958_v2 }
 0xbf9   :  { %v10942_v39 = vpop.f32.mrf.mxu0  ;;  %v15537_v50 = vpop.f32.mrf.mxu1 }
 0xbfa   :  { %v10959_v35 = vadd.f32 %v10942_v39, %v10829_v17  ;;  %v11091_v61 = vadd.f32 %v15537_v50, %v10961_v24  ;;  %v12872_v50 = vld [vmem:[%s23187_s9 + $0x2] sm:$0x3] }
 0xbfb   :  { %v15548_v45 = vpop.f32.mrf.mxu0  ;;  %v11072_v36 = vpop.f32.mrf.mxu1 }
 0xbfc   :  { %v11216_v10 = vadd.f32 %v15548_v45, %v11086_v29  ;;  %v11089_v54 = vadd.f32 %v11072_v36, %v10959_v35  ;;  %v15780_v35 = vld [vmem:[%s23185_s10 + $0x38] sm:$0xff]  }
 0xbfd   :  { %v11183_v49 = vpop.f32.mrf.mxu0 }
 0xbfe   :  { %v11231_v12 = vadd.f32 %v22893_v23, %v11216_v10  ;;  %v11214_v8 = vadd.f32 %v11183_v49, %v11084_v7 }
 0xbff   :  { %v15549_v63 = vpop.f32.mrf.mxu0 }
 0xc00   :  { %v11229_v16 = vadd.f32 %v22893_v23, %v11214_v8  ;;  %v11217_v34 = vadd.f32 %v15549_v63, %v11087_v9  ;;  %v11239_v31 = vmax.f32 %v11231_v12, 0.0 }
 0xc01   :  { %v11186_v30 = vpop.f32.mrf.mxu0 }
 0xc02   :  { %v11232_v62 = vadd.f32 %v22893_v23, %v11217_v34  ;;  %v11215_v15 = vadd.f32 %v11186_v30, %v11085_v27  ;;  %v11237_v22 = vmax.f32 %v11229_v16, 0.0  ;;  %v11257_v21 = vrot.slane %v11239_v31, 6 }
 0xc03   :  { %v15552_v38 = vpop.f32.mrf.mxu0 }
 0xc04   :  { %v11240_v4 = vmax.f32 %v11232_v62, 0.0  ;;  %v11230_v18 = vadd.f32 %v22893_v23, %v11215_v15  ;;  %v11220_v55 = vadd.f32 %v15552_v38, %v11090_v33  ;;  %v11254_v60 = vrot.slane %v11237_v22, 6 }
 0xc05   :  { %v11199_v42 = vpop.f32.mrf.mxu0 }
 0xc06   :  { %v11259_v19 = vrot.slane %v11240_v4, 6  ;;  %v11238_v58 = vmax.f32 %v11230_v18, 0.0  ;;  %v11235_v28 = vadd.f32 %v22893_v23, %v11220_v55  ;;  %v11218_v14 = vadd.f32 %v11199_v42, %v11088_v3  ;;  %v11317_v55 = vld [vmem:[%s23187_s9] sm:$0x3]  ;;  %v15782_v42 = vld [vmem:[%s23185_s10 + $0x28] sm:$0xff]  }
 0xc07   :  { %v15553_v57 = vpop.f32.mrf.mxu0 }
 0xc08   :  { %v11260_v13 = vsel %vm11253_vm9, %v11257_v21, %v11259_v19  ;;  %v11255_v47 = vrot.slane %v11238_v58, 6  ;;  %v11233_v59 = vadd.f32 %v22893_v23, %v11218_v14  ;;  %v11221_v53 = vadd.f32 %v15553_v57, %v11091_v61  ;;  %v15789_v14 = vld [vmem:[%s23185_s10 + $0x8] sm:$0xff]   ;;  %v15791_v61 = vld [vmem:[%s23185_s10] sm:$0xff]   ;;  %v15792_v57 = vld [vmem:[%s23185_s10 + $0x58] sm:$0xff]  }
 0xc09   :  { %v11278_v32 = vmax.f32 %v11239_v31, %v11260_v13  ;;  %v11202_v48 = vpop.f32.mrf.mxu0  ;;  %v11243_v51 = vmax.f32 %v11235_v28, 0.0  ;;  %v15787_v28 = vld [vmem:[%s23185_s10 + $0x10] sm:$0xff]   ;;  %15597 = vmatpush3.bf16.msra.mxu0 %v15792_v57  ;;  %v15794_v13 = vld [vmem:[%s23185_s10 + $0x48] sm:$0xff]  }
 0xc0a   :  { %v11256_v26 = vsel %vm11253_vm9, %v11254_v60, %v11255_v47  ;;  %v11258_v41 = vsel %vm11253_vm9, %v11255_v47, %v11257_v21  ;;  %v11241_v39 = vmax.f32 %v11233_v59, 0.0  ;;  %v11236_v43 = vadd.f32 %v22893_v23, %v11221_v53  ;;  %v15781_v21 = vld [vmem:[%s23185_s10 + $0x30] sm:$0xff]   ;;  %15598 = vmatprep.subr.bf16.mxu0 %v23514_v5  ;;  %v15795_v47 = vld [vmem:[%s23185_s10 + $0x40] sm:$0xff]  }
 0xc0b   :  { %v11277_v46 = vmax.f32 %v11238_v58, %v11258_v41  ;;  %v11219_v29 = vadd.f32 %v11202_v48, %v11089_v54  ;;  %v11276_v45 = vmax.f32 %v11237_v22, %v11256_v26  ;;  %v11293_v0 = vrot.slane %v11278_v32, 1  ;;  %v15785_v58 = vld [vmem:[%s23185_s10 + $0x18] sm:$0xff]   ;;  %v15793_v60 = vld [vmem:[%s23185_s10 + $0x50] sm:$0xff]   ;;  %v12934_v53 = vld [vmem:[%s23187_s9 + $0x6] sm:$0x3] }
 0xc0c   :  { %v11261_v44 = vrot.slane %v11241_v39, 6  ;;  %v11244_v7 = vmax.f32 %v11236_v43, 0.0  ;;  %v11265_v52 = vrot.slane %v11243_v51, 6  ;;  %v15797_v26 = vld [vmem:[%s23185_s10 + $0xf8] sm:$0xff]  }
 0xc0d   :  { %v11291_v56 = vrot.slane %v11277_v46, 1  ;;  %v11234_v10 = vadd.f32 %v22893_v23, %v11219_v29  ;;  %v11290_v20 = vrot.slane %v11276_v45, 1  ;;  %15599 = vmatpush3.bf16.msra.mxu0 %v15793_v60  ;;  %v15796_v43 = vld [vmem:[%s23185_s10 + $0xb8] sm:$0xff]   ;;  %v15803_v29 = vld [vmem:[%s23185_s10 + $0xe0] sm:$0xff]  }
 0xc0e   :  { %v11262_v11 = vsel %vm11253_vm9, %v11259_v19, %v11261_v44  ;;  %v11267_v49 = vrot.slane %v11244_v7, 6  ;;  %v15783_v19 = vld [vmem:[%s23185_s10 + $0x20] sm:$0xff]   ;;  %15600 = vmatprep.subr.bf16.mxu0 %v23514_v5  ;;  %v15804_v7 = vld [vmem:[%s23185_s10 + $0x98] sm:$0xff]  }
 0xc0f   :  { %v11294_v37 = vsel %vm6436_vm4, %v11291_v56, %v11293_v0  ;;  %v11242_v1 = vmax.f32 %v11234_v10, 0.0  ;;  %v11279_v12 = vmax.f32 %v11240_v4, %v11262_v11  ;;  %v11292_v8 = vsel %vm6436_vm4, %v11290_v20, %v11291_v56  ;;  %v15800_v56 = vld [vmem:[%s23185_s10 + $0xa8] sm:$0xff]   ;;  %v15806_v10 = vld [vmem:[%s23185_s10 + $0x90] sm:$0xff]  }
 0xc10   :  { %v22914_v9 = vmax.f32 %v11277_v46, %v11294_v37  ;;  %v11268_v25 = vsel %vm11253_vm9, %v11265_v52, %v11267_v49  ;;  %v22918_v16 = vmax.f32 %v11276_v45, %v11292_v8  ;;  %v12907_v46 = vld [vmem:[%s23187_s9 + $0x4] sm:$0x3]  ;;  %v15805_v45 = vld [vmem:[%s23185_s10 + $0xd8] sm:$0xff]   ;;  %v15808_v11 = vld [vmem:[%s23185_s10 + $0x88] sm:$0xff]  }
 0xc11   :  { %v11263_v2 = vrot.slane %v11242_v1, 6  ;;  %v11295_v63 = vrot.slane %v11279_v12, 1  ;;  %v11282_v23 = vmax.f32 %v11243_v51, %v11268_v25  ;;  %15601 = vmatpush3.bf16.msra.mxu0 %v15794_v13  ;;  %v15799_v51 = vld [vmem:[%s23185_s10 + $0xf0] sm:$0xff]   ;;  %v15809_v20 = vld [vmem:[%s23185_s10 + $0xc8] sm:$0xff]   ;;  %v15810_v37 = vld [vmem:[%s23185_s10 + $0x80] sm:$0xff]  }
 0xc12   :  { %15602 = vmatprep.subr.bf16.mxu0 %v23514_v5  ;;  %v15811_v49 = vld [vmem:[%s23185_s10 + $0xc0] sm:$0xff]  }
 0xc13   :  { %v11264_v27 = vsel %vm11253_vm9, %v11261_v44, %v11263_v2  ;;  %v11266_v34 = vsel %vm11253_vm9, %v11263_v2, %v11265_v52  ;;  %v11296_v6 = vsel %vm6436_vm4, %v11293_v0, %v11295_v63  ;;  %v11301_v40 = vrot.slane %v11282_v23, 1  ;;  %v15798_v44 = vld [vmem:[%s23185_s10 + $0xb0] sm:$0xff]   ;;  %v15802_v0 = vld [vmem:[%s23185_s10 + $0xa0] sm:$0xff]  }
 0xc14   :  { %v11281_v31 = vmax.f32 %v11242_v1, %v11266_v34  ;;  %v11280_v30 = vmax.f32 %v11241_v39, %v11264_v27  ;;  %v22923_v62 = vmax.f32 %v11278_v32, %v11296_v6  ;;  %v15801_v39 = vld [vmem:[%s23185_s10 + $0xe8] sm:$0xff]   ;;  %v15807_v52 = vld [vmem:[%s23185_s10 + $0xd0] sm:$0xff]  }
 0xc15   :  { %v22925_v33 = vmax.f32 %v11282_v23, %v11301_v40  ;;  %15603 = vmatpush3.bf16.msra.mxu0 %v15795_v47 }
 0xc16   :  { %v11299_v15 = vrot.slane %v11281_v31, 1  ;;  %v11297_v17 = vrot.slane %v11280_v30, 1  ;;  %15628 = vmatprep.subr.mxu0 %v23514_v5 }
 0xc17   :  { %15555 = vmatpush3.msk.msra.mxu1 %vm11322_vm10, %v22925_v33 }
 0xc18   :  { %v11302_v24 = vsel %vm6436_vm4, %v11299_v15, %v11301_v40  ;;  %v11300_v3 = vsel %vm6436_vm4, %v11297_v17, %v11299_v15  ;;  %15556 = vmatprep.subr.mxu1 %v23514_v5  ;;  %v11298_v22 = vsel %vm6436_vm4, %v11295_v63, %v11297_v17  ;;  %v15814_v15 = vld [vmem:[%s23188_s12 + $0x28] sm:$0xff]   ;;  %v15815_v17 = vld [vmem:[%s23188_s12 + $0x20] sm:$0xff]  }
 0xc19   :  { %v22931_v38 = vmax.f32 %v11281_v31, %v11302_v24  ;;  %v22936_v4 = vmax.f32 %v11280_v30, %v11300_v3  ;;  %v22940_v18 = vmax.f32 %v11279_v12, %v11298_v22  ;;  %v15812_v31 = vld [vmem:[%s23188_s12 + $0x38] sm:$0xff]   ;;  %v15817_v3 = vld [vmem:[%s23188_s12 + $0x10] sm:$0xff]   ;;  %v15819_v22 = vld [vmem:[%s23188_s12] sm:$0xff]  }
 0xc1a   :  { %v15816_v24 = vld [vmem:[%s23188_s12 + $0x18] sm:$0xff]  }
 0xc1b   :  { %15557 = vmatpush3.msra.mxu1 %v22931_v38 }
 0xc1c   :  { %15558 = vmatprep.subr.mxu1 %v23514_v5 }
 0xc1d   :  { %15559 = vmatpush3.msra.mxu1 %v22936_v4 }
 0xc1e   :  { %15560 = vmatprep.subr.mxu1 %v23514_v5 }
 0xc1f   :  { %15561 = vmatpush3.msra.mxu1 %v22940_v18 }
 0xc20   :  { %15562 = vmatprep.subr.mxu1 %v23514_v5 }
 0xc21   :  { %15563 = vmatpush3.msra.mxu1 %v22923_v62 }
 0xc22   :  { %15564 = vmatprep.subr.mxu1 %v23514_v5 }
 0xc23   :  { %15565 = vmatpush3.msra.mxu1 %v22914_v9 }
 0xc24   :  { %15566 = vmatprep.subr.mxu1 %v23514_v5 }
 0xc25   :  { %15567 = vmatpush3.msra.mxu1 %v22918_v16 }
 0xc26   :  { %15569 = vmatmul.mubr.msk.f32.vlgmr.msra.gmra.mxu1 %vm11318_vm11, %v11317_v55  ;;  %15571 = vmatprep.subr.mxu1 %v23514_v5 }
 0xc27   :  { %15572 = vmatpush3.msk.msra.mxu1 %vm11322_vm10, %v22925_v33  ;;  %15585 = vmatprep.mubr.msk.f32.mxu1 %vm15827_vm1, %v23514_v5 }
 0xc28   :  { %15573 = vmatprep.subr.mxu1 %v23514_v5 }
 0xc29   :  { %15574 = vmatpush3.msra.mxu1 %v22931_v38 }
 0xc2a   :  { %15575 = vmatprep.subr.mxu1 %v23514_v5 }
 0xc2b   :  { %15576 = vmatpush3.msra.mxu1 %v22936_v4 }
 0xc2c   :  { %15577 = vmatprep.subr.mxu1 %v23514_v5 }
 0xc2d   :  { %15578 = vmatpush3.msra.mxu1 %v22940_v18 }
 0xc2e   :  { %15579 = vmatprep.subr.mxu1 %v23514_v5 }
 0xc2f   :  { %15580 = vmatpush3.msra.mxu1 %v22923_v62 }
 0xc30   :  { %15581 = vmatprep.subr.mxu1 %v23514_v5 }
 0xc31   :  { %15582 = vmatpush3.msra.mxu1 %v22914_v9 }
 0xc32   :  { %15583 = vmatprep.subr.mxu1 %v23514_v5 }
 0xc33   :  { %15584 = vmatpush3.msra.mxu1 %v22918_v16 }
 0xc34   :  { %15586 = vmatmul.mubr.msk.f32.vlgmr.msra.gmra.mxu1 %vm11318_vm11, %v12872_v50  ;;  %15608 = vmatprep.subr.bf16.mxu1 %v23514_v5 }
 0xc35   :  { %15609 = vmatpush3.bf16.msra.mxu1 %v15780_v35  ;;  %15624 = vmatprep.mubr.msk.bf16.mxu1 %vm15827_vm1, %v23514_v5 }
 0xc36   :  { %15610 = vmatprep.subr.bf16.mxu1 %v23514_v5 }
 0xc39   :  { %15611 = vmatpush3.bf16.msra.mxu1 %v15781_v21 }
 0xc3a   :  { %15612 = vmatprep.subr.bf16.mxu1 %v23514_v5 }
 0xc3d   :  { %15613 = vmatpush3.bf16.msra.mxu1 %v15782_v42 }
 0xc3e   :  { %15614 = vmatprep.subr.bf16.mxu1 %v23514_v5 }
 0xc41   :  { %15615 = vmatpush3.bf16.msra.mxu1 %v15783_v19  ;;  %v12961_v19 = vld [vmem:[%s23190_s11] ss:$0 sm:$0xff] }
 0xc42   :  { %15616 = vmatprep.subr.bf16.mxu1 %v23514_v5 }
 0xc45   :  { %15617 = vmatpush3.bf16.msra.mxu1 %v15785_v58 }
 0xc46   :  { %15618 = vmatprep.subr.bf16.mxu1 %v23514_v5 }
 0xc49   :  { %15619 = vmatpush3.bf16.msra.mxu1 %v15787_v28 }
 0xc4a   :  { %15620 = vmatprep.subr.bf16.mxu1 %v23514_v5 }
 0xc4d   :  { %15621 = vmatpush3.bf16.msra.mxu1 %v15789_v14 }
 0xc4e   :  { %15622 = vmatprep.subr.bf16.mxu1 %v23514_v5 }
 0xc51   :  { %15623 = vmatpush3.bf16.msra.mxu1 %v15791_v61 }
 0xc52   :  { %15665 = vmatprep.subr.mxu1 %v23514_v5 }
 0xce6   :  { %v11392_v59 = vpop.f32.mrf.mxu1 }
 0xce7   :  { %v11396_v36 = vpack.c.bf16 %v11392_v59, %v11392_v59 }
 0xce8   :  { %v15570_v32 = vpop.f32.mrf.mxu1 }
 0xce9   :  { %15625 = vmatmul.mubr.bf16.vlgmr.msra.gmra.mxu1 %v11396_v36 }
 0xcea   :  { %15666 = vmatpush3.msk.msra.mxu1 %vm11322_vm10, %v22925_v33  ;;  %15679 = vmatprep.mubr.msk.f32.mxu1 %vm15827_vm1, %v23514_v5 }
 0xceb   :  { %15667 = vmatprep.subr.mxu1 %v23514_v5 }
 0xcec   :  { %15668 = vmatpush3.msra.mxu1 %v22931_v38 }
 0xced   :  { %15669 = vmatprep.subr.mxu1 %v23514_v5 }
 0xcee   :  { %15670 = vmatpush3.msra.mxu1 %v22936_v4 }
 0xcef   :  { %15671 = vmatprep.subr.mxu1 %v23514_v5 }
 0xcf0   :  { %15672 = vmatpush3.msra.mxu1 %v22940_v18 }
 0xcf1   :  { %15673 = vmatprep.subr.mxu1 %v23514_v5 }
 0xcf2   :  { %15674 = vmatpush3.msra.mxu1 %v22923_v62 }
 0xcf3   :  { %15675 = vmatprep.subr.mxu1 %v23514_v5 }
 0xcf4   :  { %15676 = vmatpush3.msra.mxu1 %v22914_v9  ;;  %v11484_v54 = vpop.f32.mrf.mxu1 }
 0xcf5   :  { %v11488_v48 = vpack.c.bf16 %v11484_v54, %v11484_v54  ;;  %15677 = vmatprep.subr.mxu1 %v23514_v5 }
 0xcf6   :  { %15678 = vmatpush3.msra.mxu1 %v22918_v16  ;;  %v15587_v41 = vpop.f32.mrf.mxu1 }
 0xcf7   :  { %15605 = vmatmul.mubr.bf16.vlgmr.msra.gmra.mxu0 %v11488_v48  ;;  %15680 = vmatmul.mubr.msk.f32.vlgmr.msra.gmra.mxu1 %vm11318_vm11, %v12934_v53 }
 0xcf8   :  { %15629 = vmatpush3.msk.msra.mxu0 %vm11322_vm10, %v22925_v33  ;;  %15642 = vmatprep.mubr.msk.f32.mxu0 %vm15827_vm1, %v23514_v5  ;;  %v15813_v33 = vld [vmem:[%s23188_s12 + $0x30] sm:$0xff]  }
 0xcf9   :  { %15630 = vmatprep.subr.mxu0 %v23514_v5  ;;  %15682 = vmatprep.subr.bf16.mxu1 %v23514_v5 }
 0xcfa   :  { %15631 = vmatpush3.msra.mxu0 %v22931_v38  ;;  %15683 = vmatpush3.bf16.msra.mxu1 %v15797_v26  ;;  %v15818_v38 = vld [vmem:[%s23188_s12 + $0x8] sm:$0xff]  }
 0xcfb   :  { %15632 = vmatprep.subr.mxu0 %v23514_v5  ;;  %15684 = vmatprep.subr.bf16.mxu1 %v23514_v5 }
 0xcfc   :  { %15633 = vmatpush3.msra.mxu0 %v22936_v4  ;;  %15698 = vmatprep.mubr.msk.bf16.mxu1 %vm15827_vm1, %v23514_v5  ;;  %v19_v4 = vstv %s23189_s13 }
 0xcfd   :  { %15634 = vmatprep.subr.mxu0 %v23514_v5  ;;  %20 = vst [vmem:[#allocation4] sm:$0x1] %v19_v4 }
 0xcfe   :  { %15635 = vmatpush3.msra.mxu0 %v22940_v18  ;;  %15685 = vmatpush3.bf16.msra.mxu1 %v15799_v51 }
 0xcff   :  { %15636 = vmatprep.subr.mxu0 %v23514_v5  ;;  %15686 = vmatprep.subr.bf16.mxu1 %v23514_v5 }
 0xd00   :  { %15637 = vmatpush3.msra.mxu0 %v22923_v62 }
 0xd01   :  { %15638 = vmatprep.subr.mxu0 %v23514_v5 }
 0xd02   :  { %15639 = vmatpush3.msra.mxu0 %v22914_v9  ;;  %15687 = vmatpush3.bf16.msra.mxu1 %v15801_v39 }
 0xd03   :  { %15640 = vmatprep.subr.mxu0 %v23514_v5  ;;  %15688 = vmatprep.subr.bf16.mxu1 %v23514_v5 }
 0xd04   :  { %15641 = vmatpush3.msra.mxu0 %v22918_v16  ;;  %v12962_v13 = vld [vmem:[#allocation4] ss:$0 sm:$0xff] }
 0xd05   :  { %15643 = vmatmul.mubr.msk.f32.vlgmr.msra.gmra.mxu0 %vm11318_vm11, %v12907_v46  ;;  %15645 = vmatprep.subr.bf16.mxu0 %v23514_v5 }
 0xd06   :  { %15646 = vmatpush3.bf16.msra.mxu0 %v15796_v43  ;;  %15689 = vmatpush3.bf16.msra.mxu1 %v15803_v29 }
 0xd07   :  { %15647 = vmatprep.subr.bf16.mxu0 %v23514_v5  ;;  %15690 = vmatprep.subr.bf16.mxu1 %v23514_v5 }
 0xd08   :  { %15661 = vmatprep.mubr.msk.bf16.mxu0 %vm15827_vm1, %v23514_v5 }
 0xd0a   :  { %15648 = vmatpush3.bf16.msra.mxu0 %v15798_v44  ;;  %15691 = vmatpush3.bf16.msra.mxu1 %v15805_v45 }
 0xd0b   :  { %15649 = vmatprep.subr.bf16.mxu0 %v23514_v5  ;;  %15692 = vmatprep.subr.bf16.mxu1 %v23514_v5 }
 0xd0e   :  { %15650 = vmatpush3.bf16.msra.mxu0 %v15800_v56  ;;  %15693 = vmatpush3.bf16.msra.mxu1 %v15807_v52 }
 0xd0f   :  { %15651 = vmatprep.subr.bf16.mxu0 %v23514_v5  ;;  %15694 = vmatprep.subr.bf16.mxu1 %v23514_v5 }
 0xd12   :  { %15652 = vmatpush3.bf16.msra.mxu0 %v15802_v0  ;;  %15695 = vmatpush3.bf16.msra.mxu1 %v15809_v20 }
 0xd13   :  { %15653 = vmatprep.subr.bf16.mxu0 %v23514_v5  ;;  %15696 = vmatprep.subr.bf16.mxu1 %v23514_v5 }
 0xd16   :  { %15654 = vmatpush3.bf16.msra.mxu0 %v15804_v7  ;;  %15697 = vmatpush3.bf16.msra.mxu1 %v15811_v49 }
 0xd17   :  { %15655 = vmatprep.subr.bf16.mxu0 %v23514_v5 }
 0xd1a   :  { %15656 = vmatpush3.bf16.msra.mxu0 %v15806_v10 }
 0xd1b   :  { %15657 = vmatprep.subr.bf16.mxu0 %v23514_v5 }
 0xd1e   :  { %15658 = vmatpush3.bf16.msra.mxu0 %v15808_v11 }
 0xd1f   :  { %15659 = vmatprep.subr.bf16.mxu0 %v23514_v5 }
 0xd22   :  { %15660 = vmatpush3.bf16.msra.mxu0 %v15810_v37 }
 0xd23   :  { %15702 = vmatprep.subr.bf16.mxu0 %v23514_v5 }
 0xda9   :  { %v11676_v1 = vpop.f32.mrf.mxu1 }
 0xdab   :  { %v15626_v12 = vpop.f32.mrf.mxu1 }
 0xdad   :  { %v11679_v9 = vpop.f32.mrf.mxu1 }
 0xdaf   :  { %v15627_v8 = vpop.f32.mrf.mxu1 }
 0xdb7   :  { %v11588_v25 = vpop.f32.mrf.mxu0  ;;  %v11935_v2 = vpop.f32.mrf.mxu1 }
 0xdb8   :  { %v11677_v63 = vadd.f32 %v11676_v1, %v11588_v25  ;;  %v11939_v16 = vpack.c.bf16 %v11935_v2, %v11935_v2 }
 0xdb9   :  { %v15606_v23 = vpop.f32.mrf.mxu0  ;;  %v15681_v27 = vpop.f32.mrf.mxu1 }
 0xdba   :  { %15699 = vmatmul.mubr.bf16.vlgmr.msra.gmra.mxu1 %v11939_v16 }
 0xdbb   :  { %v11591_v34 = vpop.f32.mrf.mxu0 }
 0xdbd   :  { %v15607_v6 = vpop.f32.mrf.mxu0 }
 0xdc5   :  { %v11753_v40 = vpop.f32.mrf.mxu0 }
 0xdc6   :  { %v11757_v30 = vpack.c.bf16 %v11753_v40, %v11753_v40 }
 0xdc7   :  { %v15644_v62 = vpop.f32.mrf.mxu0 }
 0xdc8   :  { %15662 = vmatmul.mubr.bf16.vlgmr.msra.gmra.mxu0 %v11757_v30 }
 0xdc9   :  { %15703 = vmatpush3.bf16.msra.mxu0 %v15812_v31  ;;  %15718 = vmatprep.mubr.msk.bf16.mxu0 %vm15827_vm1, %v23514_v5 }
 0xdca   :  { %15704 = vmatprep.subr.bf16.mxu0 %v23514_v5 }
 0xdcd   :  { %15705 = vmatpush3.bf16.msra.mxu0 %v15813_v33 }
 0xdce   :  { %15706 = vmatprep.subr.bf16.mxu0 %v23514_v5 }
 0xdd1   :  { %15707 = vmatpush3.bf16.msra.mxu0 %v15814_v15 }
 0xdd2   :  { %15708 = vmatprep.subr.bf16.mxu0 %v23514_v5 }
 0xdd5   :  { %15709 = vmatpush3.bf16.msra.mxu0 %v15815_v17 }
 0xdd6   :  { %15710 = vmatprep.subr.bf16.mxu0 %v23514_v5 }
 0xdd9   :  { %15711 = vmatpush3.bf16.msra.mxu0 %v15816_v24 }
 0xdda   :  { %15712 = vmatprep.subr.bf16.mxu0 %v23514_v5 }
 0xddd   :  { %15713 = vmatpush3.bf16.msra.mxu0 %v15817_v3 }
 0xdde   :  { %15714 = vmatprep.subr.bf16.mxu0 %v23514_v5 }
 0xde1   :  { %15715 = vmatpush3.bf16.msra.mxu0 %v15818_v38 }
 0xde2   :  { %15716 = vmatprep.subr.bf16.mxu0 %v23514_v5 }
 0xde5   :  { %15717 = vmatpush3.bf16.msra.mxu0 %v15819_v22 }
 0xe7a   :  { %v12039_v18 = vpop.f32.mrf.mxu1 }
 0xe7c   :  { %v15700_v55 = vpop.f32.mrf.mxu1 }
 0xe7e   :  { %v12042_v50 = vpop.f32.mrf.mxu1 }
 0xe80   :  { %v15701_v35 = vpop.f32.mrf.mxu1 }
 0xe88   :  { %v11857_v21 = vpop.f32.mrf.mxu0 }
 0xe89   :  { %v11863_v42 = vadd.f32 %v11857_v21, %v11677_v63 }
 0xe8a   :  { %v15663_v58 = vpop.f32.mrf.mxu0 }
 0xe8b   :  { %v12045_v28 = vadd.f32 %v12039_v18, %v11863_v42 }
 0xe8c   :  { %v11860_v14 = vpop.f32.mrf.mxu0 }
 0xe8d   :  { %v12053_v5 = vadd.f32 %v12961_v19, %v12045_v28 }
 0xe8e   :  { %v15664_v61 = vpop.f32.mrf.mxu0 }
 0xe8f   :  { %v12054_v57 = vmax.f32 %v12053_v5, 0.0 }
 0xe91   :  { %v12055_v60 = vpack.c.bf16 %v12054_v57, %v12054_v57 }
 0xe93   :  { %15719 = vmatmul.mubr.bf16.vlgmr.msra.gmra.mxu0 %v12055_v60 }
 0xf53   :  { %v12161_v47 = vpop.f32.mrf.mxu0 }
 0xf54   :  { %v12162_v59 = vadd.f32 %v12962_v13, %v12161_v47 }
 0xf55   :  { %v15720_v36 = vpop.f32.mrf.mxu0 }
 0xf56   :  { %v12167_v32 = vsub.f32 0.0, %v12162_v59 }
 0xf57   :  { %v12164_v54 = vpop.f32.mrf.mxu0 }
 0xf58   :  { %v12168_v53 = vmul.f32 1.442695, %v12167_v32 }
 0xf59   :  { %v15721_v48 = vpop.f32.mrf.mxu0 }
 0xf5a   :  { %15820 = vpow2.f32 %v12168_v53 }
 0xf67   :  { %v15821_v26 = vpop.eup %15820 }
 0xf68   :  { %v12170_v41 = vadd.f32 1.0, %v15821_v26 }
 0xf6a   :  { %15822 = vrcp.f32 %v12170_v41 }
 0xf77   :  { %v15823_v51 = vpop.eup %15822 }
 0xf78   :  { %12173 = vst.msk [vmem:[%s23191_s14] sm:$0x3] %vm12172_vm12, %v15823_v51 }

</bundles_post_ra>
